<compile_context>
chip_gen: v7x
topology: tpu7x:2x2x1
jax: 0.10.0
libtpu: 0.0.40
codegen_flags: <defaults>
</compile_context>

<pallas_src>
import math

import jax
import jax.numpy as jnp
import numpy as np
from jax.experimental import pallas as pl
from jax.experimental.pallas import tpu as pltpu

# ---- dimensions / constants fixed by the PyTorch module ---------------------
IN_FEATURES = 500          # axon2 operates on the 500-d coding
HIDDEN = 500               # snn2: 500 -> 500
N_CLASS = 10               # snn3: 500 -> 10
THRESHOLD = 1.0

TAU_M = 4.0
TAU_S = 1.0
A_M = float(math.exp(-1.0 / TAU_M))   # slow synaptic trace & membrane decay
A_S = float(math.exp(-1.0 / TAU_S))   # fast synaptic trace

# ---- TPU-friendly padded sizes ----------------------------------------------
H_PAD = 512                # 500 -> 4 x 128 lanes
OUT_PAD = 128              # 10  -> 128 lanes (lane-dense output stores)
T_CHUNK = 32               # time steps per grid iteration (statically unrolled)


def _snn_kernel(xw2_ref, b2_ref, w3_ref, b3_ref, out_ref,
                w2m_ref, pm3_ref, ps3_ref, w3m_ref, coef_ref):
    """One grid step = one batch tile x T_CHUNK time steps.

    Recurrent state lives in VMEM/SMEM scratch, persists across the sequential
    time-chunk axis, and is re-initialised whenever a new batch tile starts.
      w2m_ref : (bt, H_PAD)  f32   layer-2 fused carry  v2*A_M*(1-spike2)
      pm3_ref : (bt, OUT_PAD) f32  layer-3 slow trace (post-matmul space)
      ps3_ref : (bt, OUT_PAD) f32  layer-3 fast trace (post-matmul space)
      w3m_ref : (bt, OUT_PAD) f32  layer-3 fused carry  v3*A_M*(1-spike3)
      coef_ref: (2,) f32 SMEM      scalar geometric coeffs (cm, cs) for axon2
    """
    chunk = pl.program_id(1)

    @pl.when(chunk == 0)
    def _init():
        w2m_ref[...] = jnp.zeros_like(w2m_ref)
        pm3_ref[...] = jnp.zeros_like(pm3_ref)
        ps3_ref[...] = jnp.zeros_like(ps3_ref)
        w3m_ref[...] = jnp.zeros_like(w3m_ref)
        coef_ref[0] = jnp.float32(0.0)
        coef_ref[1] = jnp.float32(0.0)

    xw2 = xw2_ref[...]                     # (bt, H_PAD) f32, constant over time
    w3 = w3_ref[...]                       # (H_PAD, OUT_PAD) bf16
    bt = xw2.shape[0]
    # Hoist bias broadcasts out of the unrolled loop (no CSE of broadcast_in_dim).
    b2 = jnp.broadcast_to(b2_ref[...], (bt, H_PAD))
    b3 = jnp.broadcast_to(b3_ref[...], (bt, OUT_PAD))

    cm = coef_ref[0]
    cs = coef_ref[1]

    # TODO(synk): neuron_layer reset convention assumed reset-to-zero gated by the
    # previous spike (v * decay * (1 - s_prev)); adjust if the original uses
    # subtract-threshold.  dual_exp_iir assumed pm = a_m*pm + x, ps = a_s*ps + x,
    # out = pm - ps with no extra normalization constant.
    for i in range(T_CHUNK):   # static unroll -> static stores into the chunk block
        # axon2 + snn2 dense hoisted through the linear layer; with a constant
        # input the dual-exp traces collapse to scalar geometric coefficients.
        cm = cm * A_M + 1.0
        cs = cs * A_S + 1.0
        cur2 = xw2 * (cm - cs) + b2

        # LIF layer 2, fused decay/reset carry: w2m == v2*A_M*(1-spike2).
        v2 = w2m_ref[...] + cur2
        sp2 = v2 > THRESHOLD
        w2m_ref[...] = jnp.where(sp2, 0.0, v2 * A_M)

        # snn3 dense first (spikes are exactly 0/1 in bf16), then axon3's dual-exp
        # recurrence carried in post-matmul (128-wide) space by linearity.
        m = jnp.dot(sp2.astype(jnp.bfloat16), w3,
                    preferred_element_type=jnp.float32)
        pm3 = pm3_ref[...] * A_M + m
        ps3 = ps3_ref[...] * A_S + m
        pm3_ref[...] = pm3
        ps3_ref[...] = ps3
        cur3 = pm3 - ps3 + b3

        # LIF layer 3, fused decay/reset carry.
        v3 = w3m_ref[...] + cur3
        sp3 = v3 > THRESHOLD
        w3m_ref[...] = jnp.where(sp3, 0.0, v3 * A_M)

        out_ref[i] = sp3.astype(jnp.bfloat16)    # lane-dense (bt, 128) bf16 store

    coef_ref[0] = cm
    coef_ref[1] = cs


def _batch_tiling(B):
    """Return (padded_batch, batch_tile).

    For B >= 16 produce at least two sublane-aligned tiles so the leading
    "parallel" grid axis lets a megacore part (v7x) split examples across its
    two TensorCores; for tiny batches keep a single full-batch tile."""
    if B < 16:
        return B, B
    bt = min(128, ((B // 2 + 7) // 8) * 8)
    b_pad = ((B + bt - 1) // bt) * bt
    return b_pad, bt


def ann1_snn2_forward(x, params, length):
    """x: [batch, 500] pre-coding activations (input_type='image').
    Returns spikes [batch, n_class, length] (PyTorch convention)."""
    w2, b2, w3, b3 = params
    B = x.shape[0]

    # ---- hoisted preprocessing: sigm + expand_along_time + constant dense ----
    coding = jax.nn.sigmoid(x)
    xw2 = jnp.dot(coding, w2, precision=jax.lax.Precision.HIGHEST)   # (B, 500) f32

    # ---- batch tiling / padding ----------------------------------------------
    B_pad, bt = _batch_tiling(B)
    n_btiles = B_pad // bt

    # ---- pad to lane-friendly shapes -----------------------------------------
    xw2_p = jnp.zeros((B_pad, H_PAD), jnp.float32).at[:B, :HIDDEN].set(xw2)
    b2_p = jnp.zeros((1, H_PAD), jnp.float32).at[:, :HIDDEN].set(b2)
    w3_p = (jnp.zeros((H_PAD, OUT_PAD), jnp.float32)
            .at[:HIDDEN, :N_CLASS].set(w3).astype(jnp.bfloat16))
    b3_p = jnp.zeros((1, OUT_PAD), jnp.float32).at[:, :N_CLASS].set(b3)

    n_chunks = pl.cdiv(length, T_CHUNK)
    padded_len = n_chunks * T_CHUNK

    in_specs = [
        pl.BlockSpec((bt, H_PAD), lambda b, c: (b, 0)),          # xw2 (hoisted)
        pl.BlockSpec((1, H_PAD), lambda b, c: (0, 0)),           # b2
        pl.BlockSpec((H_PAD, OUT_PAD), lambda b, c: (0, 0)),     # w3 (bf16)
        pl.BlockSpec((1, OUT_PAD), lambda b, c: (0, 0)),         # b3
    ]
    out_spec = pl.BlockSpec((T_CHUNK, bt, OUT_PAD), lambda b, c: (c, b, 0))
    scratch = [
        pltpu.VMEM((bt, H_PAD), jnp.float32),    # w2m: layer-2 fused membrane carry
        pltpu.VMEM((bt, OUT_PAD), jnp.float32),  # pm3 (post-matmul slow trace)
        pltpu.VMEM((bt, OUT_PAD), jnp.float32),  # ps3 (post-matmul fast trace)
        pltpu.VMEM((bt, OUT_PAD), jnp.float32),  # w3m: layer-3 fused membrane carry
        pltpu.SMEM((2,), jnp.float32),           # (cm, cs) scalar geometric coeffs
    ]

    spikes = pl.pallas_call(
        _snn_kernel,
        out_shape=jax.ShapeDtypeStruct((padded_len, B_pad, OUT_PAD), jnp.bfloat16),
        grid_spec=pltpu.PrefetchScalarGridSpec(
            num_scalar_prefetch=0,
            grid=(n_btiles, n_chunks),
            in_specs=in_specs,
            out_specs=out_spec,
            scratch_shapes=scratch),
        compiler_params=pltpu.CompilerParams(
            dimension_semantics=("parallel", "arbitrary")),   # time is sequential
    )(xw2_p, b2_p, w3_p, b3_p)

    # un-pad: [T, B_pad, 128] bf16 -> [B, 10, length] f32
    out = spikes[:length, :B, :N_CLASS].astype(jnp.float32)
    return jnp.transpose(out, (1, 2, 0))


def init_params(key):
    def linear(k, fan_in, fan_out):
        kw, kb = jax.random.split(k)
        bound = 1.0 / math.sqrt(fan_in)
        w = jax.random.uniform(kw, (fan_in, fan_out), jnp.float32, -bound, bound)
        b = jax.random.uniform(kb, (1, fan_out), jnp.float32, -bound, bound)
        return w, b

    k2, k3 = jax.random.split(key)
    w2, b2 = linear(k2, HIDDEN, HIDDEN)     # snn2 dense
    w3, b3 = linear(k3, HIDDEN, N_CLASS)    # snn3 dense
    return (w2, b2, w3, b3)


def reference_forward(x, params, length):
    """Pure-JAX step-by-step reference of the module forward.

    For a constant-over-time coding and layer-uniform (a_m, a_s), the dual-exp
    IIR is linear, so (a) axon2 followed by the snn2 linear layer equals carrying
    scalar geometric coefficients on xw2 = sigmoid(x) @ w2, and (b) axon3
    followed by the snn3 linear layer equals carrying the dual-exp recurrence on
    dot(spike2, w3).  The LIF update v*(A_M*(1-s_prev)) + cur is arithmetically
    identical to the fused carry where(s, 0, v*A_M) + cur.  The reference uses
    these identical forms (and the same padded bf16 operands for the snn3 dense)
    so the spike-threshold comparison is not perturbed by float summation-order
    noise; this is a self-consistency check against the hoisted algebra, not an
    end-to-end validation of the original PyTorch op order/precision.
    """
    w2, b2, w3, b3 = params
    B = x.shape[0]
    coding = jax.nn.sigmoid(x)
    xw2 = jnp.dot(coding, w2, precision=jax.lax.Precision.HIGHEST)   # (B, 500)

    xw2_p = jnp.zeros((B, H_PAD), jnp.float32).at[:, :HIDDEN].set(xw2)
    b2_p = jnp.zeros((1, H_PAD), jnp.float32).at[:, :HIDDEN].set(b2)
    w3_p = (jnp.zeros((H_PAD, OUT_PAD), jnp.float32)
            .at[:HIDDEN, :N_CLASS].set(w3).astype(jnp.bfloat16))
    b3_p = jnp.zeros((1, OUT_PAD), jnp.float32).at[:, :N_CLASS].set(b3)

    def step(state, _):
        cm, cs, w2m, pm3, ps3, w3m = state
        cm = cm * A_M + 1.0
        cs = cs * A_S + 1.0
        cur2 = xw2_p * (cm - cs) + b2_p

        v2 = w2m + cur2
        sp2 = v2 > THRESHOLD
        w2m = jnp.where(sp2, 0.0, v2 * A_M)

        m = jnp.dot(sp2.astype(jnp.bfloat16), w3_p,
                    preferred_element_type=jnp.float32)
        pm3 = pm3 * A_M + m
        ps3 = ps3 * A_S + m
        cur3 = pm3 - ps3 + b3_p

        v3 = w3m + cur3
        sp3 = v3 > THRESHOLD
        w3m = jnp.where(sp3, 0.0, v3 * A_M)
        return (cm, cs, w2m, pm3, ps3, w3m), sp3.astype(jnp.float32)

    zH = jnp.zeros((B, H_PAD), jnp.float32)
    zO = jnp.zeros((B, OUT_PAD), jnp.float32)
    init = (jnp.float32(0.0), jnp.float32(0.0), zH, zO, zO, zO)
    _, spikes = jax.lax.scan(step, init, None, length=length)   # (T, B, OUT_PAD)
    return jnp.transpose(spikes[:, :, :N_CLASS], (1, 2, 0))


if __name__ == "__main__":
    batch_size = 2
    length = 40                      # 2 time chunks -> exercises state carry-over
    key = jax.random.PRNGKey(0)
    kx, kp = jax.random.split(key)

    # default input_type='image' path: sigmoid coding + expand along time.
    # TODO(synk): input_type='spike' (time-varying spike-train input) not implemented.
    x = jax.random.uniform(kx, (batch_size, IN_FEATURES), jnp.float32, 0.0, 1.0)
    params = init_params(kp)

    out = jax.block_until_ready(ann1_snn2_forward(x, params, length))
    ref = jax.block_until_ready(reference_forward(x, params, length))

    assert out.shape == (batch_size, N_CLASS, length), out.shape
    assert np.allclose(np.asarray(out), np.asarray(ref), atol=1e-3), "mismatch vs JAX reference"
    print("KERNEL_OK")
</pallas_src>

<mosaic_0001>
module attributes {stable_mosaic.version = 11 : i64} {
  func.func @_snn_kernel(%arg0: i32, %arg1: i32, %arg2: memref<2x512xf32, #tpu.memory_space<vmem>>, %arg3: memref<1x512xf32, #tpu.memory_space<vmem>>, %arg4: memref<512x128xbf16, #tpu.memory_space<vmem>>, %arg5: memref<1x128xf32, #tpu.memory_space<vmem>>, %arg6: memref<32x2x128xbf16, #tpu.memory_space<vmem>>, %arg7: memref<2x512xf32, #tpu.memory_space<vmem>>, %arg8: memref<2x128xf32, #tpu.memory_space<vmem>>, %arg9: memref<2x128xf32, #tpu.memory_space<vmem>>, %arg10: memref<2x128xf32, #tpu.memory_space<vmem>>, %arg11: memref<2xf32, #tpu.memory_space<smem>>) attributes {dimension_semantics = [#tpu.dimension_semantics<parallel>, #tpu.dimension_semantics<arbitrary>], iteration_bounds = array<i64: 1, 2>, scalar_prefetch = 0 : i64, scratch_operands = 5 : i64, tpu.core_type = #tpu.core_type<tc>, window_params = [{transform_indices = @transform_0, window_bounds = array<i64: 2, 512>}, {pipeline_mode = #tpu.pipeline_mode<synchronous>, transform_indices = @transform_1, window_bounds = array<i64: 1, 512>}, {pipeline_mode = #tpu.pipeline_mode<synchronous>, transform_indices = @transform_2, window_bounds = array<i64: 512, 128>}, {pipeline_mode = #tpu.pipeline_mode<synchronous>, transform_indices = @transform_3, window_bounds = array<i64: 1, 128>}, {transform_indices = @transform_4, window_bounds = array<i64: 32, 2, 128>}]} {
    %c0_i32 = arith.constant 0 : i32
    %0 = arith.cmpi eq, %arg1, %c0_i32 : i32
    %1 = arith.extui %0 : i1 to i32
    %c0_i32_0 = arith.constant 0 : i32
    %2 = arith.cmpi ne, %1, %c0_i32_0 : i32
    scf.if %2 {
      %cst_1004 = arith.constant 0.000000e+00 : f32
      %1551 = vector.broadcast %cst_1004 : f32 to vector<2x512xf32>
      %c0_1005 = arith.constant 0 : index
      %c0_1006 = arith.constant 0 : index
      %1552 = vector.load %arg7[%c0_1005, %c0_1006] : memref<2x512xf32, #tpu.memory_space<vmem>>, vector<2x512xf32>
      tpu.vector_store %arg7[%c0_1005, %c0_1006], %1551 {strides = array<i32>} : memref<2x512xf32, #tpu.memory_space<vmem>>, vector<2x512xf32>,
      %cst_1007 = arith.constant 0.000000e+00 : f32
      %1553 = vector.broadcast %cst_1007 : f32 to vector<2x128xf32>
      %c0_1008 = arith.constant 0 : index
      %c0_1009 = arith.constant 0 : index
      %1554 = vector.load %arg8[%c0_1008, %c0_1009] : memref<2x128xf32, #tpu.memory_space<vmem>>, vector<2x128xf32>
      tpu.vector_store %arg8[%c0_1008, %c0_1009], %1553 {strides = array<i32>} : memref<2x128xf32, #tpu.memory_space<vmem>>, vector<2x128xf32>,
      %cst_1010 = arith.constant 0.000000e+00 : f32
      %1555 = vector.broadcast %cst_1010 : f32 to vector<2x128xf32>
      %c0_1011 = arith.constant 0 : index
      %c0_1012 = arith.constant 0 : index
      %1556 = vector.load %arg9[%c0_1011, %c0_1012] : memref<2x128xf32, #tpu.memory_space<vmem>>, vector<2x128xf32>
      tpu.vector_store %arg9[%c0_1011, %c0_1012], %1555 {strides = array<i32>} : memref<2x128xf32, #tpu.memory_space<vmem>>, vector<2x128xf32>,
      %cst_1013 = arith.constant 0.000000e+00 : f32
      %1557 = vector.broadcast %cst_1013 : f32 to vector<2x128xf32>
      %c0_1014 = arith.constant 0 : index
      %c0_1015 = arith.constant 0 : index
      %1558 = vector.load %arg10[%c0_1014, %c0_1015] : memref<2x128xf32, #tpu.memory_space<vmem>>, vector<2x128xf32>
      tpu.vector_store %arg10[%c0_1014, %c0_1015], %1557 {strides = array<i32>} : memref<2x128xf32, #tpu.memory_space<vmem>>, vector<2x128xf32>,
      %cst_1016 = arith.constant 0.000000e+00 : f32
      %c0_1017 = arith.constant 0 : index
      %1559 = memref.load %arg11[%c0_1017] : memref<2xf32, #tpu.memory_space<smem>>
      memref.store %cst_1016, %arg11[%c0_1017] : memref<2xf32, #tpu.memory_space<smem>>
      %cst_1018 = arith.constant 0.000000e+00 : f32
      %c1_1019 = arith.constant 1 : index
      %1560 = memref.load %arg11[%c1_1019] : memref<2xf32, #tpu.memory_space<smem>>
      memref.store %cst_1018, %arg11[%c1_1019] : memref<2xf32, #tpu.memory_space<smem>>
    } else {
    }
    %c0 = arith.constant 0 : index
    %c0_1 = arith.constant 0 : index
    %3 = vector.load %arg2[%c0, %c0_1] : memref<2x512xf32, #tpu.memory_space<vmem>>, vector<2x512xf32>
    %c0_2 = arith.constant 0 : index
    %c0_3 = arith.constant 0 : index
    %4 = vector.load %arg4[%c0_2, %c0_3] : memref<512x128xbf16, #tpu.memory_space<vmem>>, vector<512x128xbf16>
    %c0_4 = arith.constant 0 : index
    %c0_5 = arith.constant 0 : index
    %5 = vector.load %arg3[%c0_4, %c0_5] : memref<1x512xf32, #tpu.memory_space<vmem>>, vector<1x512xf32>
    %6 = vector.shape_cast %5 : vector<1x512xf32> to vector<1x512xf32>
    %7 = vector.broadcast %6 : vector<1x512xf32> to vector<2x512xf32>
    %c0_6 = arith.constant 0 : index
    %c0_7 = arith.constant 0 : index
    %8 = vector.load %arg5[%c0_6, %c0_7] : memref<1x128xf32, #tpu.memory_space<vmem>>, vector<1x128xf32>
    %9 = vector.shape_cast %8 : vector<1x128xf32> to vector<1x128xf32>
    %10 = vector.broadcast %9 : vector<1x128xf32> to vector<2x128xf32>
    %c0_8 = arith.constant 0 : index
    %11 = memref.load %arg11[%c0_8] : memref<2xf32, #tpu.memory_space<smem>>
    %c1 = arith.constant 1 : index
    %12 = memref.load %arg11[%c1] : memref<2xf32, #tpu.memory_space<smem>>
    %cst = arith.constant 0.778800785 : f32
    %13 = arith.mulf %11, %cst : f32
    %cst_9 = arith.constant 1.000000e+00 : f32
    %14 = arith.addf %13, %cst_9 : f32
    %cst_10 = arith.constant 0.36787945 : f32
    %15 = arith.mulf %12, %cst_10 : f32
    %cst_11 = arith.constant 1.000000e+00 : f32
    %16 = arith.addf %15, %cst_11 : f32
    %17 = arith.subf %14, %16 : f32
    %18 = vector.broadcast %17 : f32 to vector<2x512xf32>
    %19 = arith.mulf %3, %18 : vector<2x512xf32>
    %20 = arith.addf %19, %7 : vector<2x512xf32>
    %c0_12 = arith.constant 0 : index
    %c0_13 = arith.constant 0 : index
    %21 = vector.load %arg7[%c0_12, %c0_13] : memref<2x512xf32, #tpu.memory_space<vmem>>, vector<2x512xf32>
    %22 = arith.addf %21, %20 : vector<2x512xf32>
    %cst_14 = arith.constant 1.000000e+00 : f32
    %23 = vector.broadcast %cst_14 : f32 to vector<2x512xf32>
    %24 = arith.cmpf ogt, %22, %23 : vector<2x512xf32>
    %cst_15 = arith.constant 0.778800785 : f32
    %25 = vector.broadcast %cst_15 : f32 to vector<2x512xf32>
    %26 = arith.mulf %22, %25 : vector<2x512xf32>
    %cst_16 = arith.constant 0.000000e+00 : f32
    %27 = vector.broadcast %cst_16 : f32 to vector<2x512xf32>
    %28 = arith.select %24, %27, %26 : vector<2x512xi1>, vector<2x512xf32>
    %c0_17 = arith.constant 0 : index
    %c0_18 = arith.constant 0 : index
    %29 = vector.load %arg7[%c0_17, %c0_18] : memref<2x512xf32, #tpu.memory_space<vmem>>, vector<2x512xf32>
    tpu.vector_store %arg7[%c0_17, %c0_18], %28 {strides = array<i32>} : memref<2x512xf32, #tpu.memory_space<vmem>>, vector<2x512xf32>,
    %30 = arith.extui %24 : vector<2x512xi1> to vector<2x512xi32>
    %31 = arith.sitofp %30 : vector<2x512xi32> to vector<2x512xf32>
    %32 = arith.truncf %31 : vector<2x512xf32> to vector<2x512xbf16>
    %cst_19 = arith.constant dense<0.000000e+00> : vector<2x128xf32>
    %33 = tpu.matmul %32, %4, %cst_19 {dimension_numbers = #tpu.dot_dimension_numbers<[1], [0], [0], [1], [0, 0, 1, 1], [], []>} : vector<2x512xbf16>, vector<512x128xbf16>, vector<2x128xf32> -> vector<2x128xf32>
    %c0_20 = arith.constant 0 : index
    %c0_21 = arith.constant 0 : index
    %34 = vector.load %arg8[%c0_20, %c0_21] : memref<2x128xf32, #tpu.memory_space<vmem>>, vector<2x128xf32>
    %cst_22 = arith.constant 0.778800785 : f32
    %35 = vector.broadcast %cst_22 : f32 to vector<2x128xf32>
    %36 = arith.mulf %34, %35 : vector<2x128xf32>
    %37 = arith.addf %36, %33 : vector<2x128xf32>
    %c0_23 = arith.constant 0 : index
    %c0_24 = arith.constant 0 : index
    %38 = vector.load %arg9[%c0_23, %c0_24] : memref<2x128xf32, #tpu.memory_space<vmem>>, vector<2x128xf32>
    %cst_25 = arith.constant 0.36787945 : f32
    %39 = vector.broadcast %cst_25 : f32 to vector<2x128xf32>
    %40 = arith.mulf %38, %39 : vector<2x128xf32>
    %41 = arith.addf %40, %33 : vector<2x128xf32>
    %c0_26 = arith.constant 0 : index
    %c0_27 = arith.constant 0 : index
    %42 = vector.load %arg8[%c0_26, %c0_27] : memref<2x128xf32, #tpu.memory_space<vmem>>, vector<2x128xf32>
    tpu.vector_store %arg8[%c0_26, %c0_27], %37 {strides = array<i32>} : memref<2x128xf32, #tpu.memory_space<vmem>>, vector<2x128xf32>,
    %c0_28 = arith.constant 0 : index
    %c0_29 = arith.constant 0 : index
    %43 = vector.load %arg9[%c0_28, %c0_29] : memref<2x128xf32, #tpu.memory_space<vmem>>, vector<2x128xf32>
    tpu.vector_store %arg9[%c0_28, %c0_29], %41 {strides = array<i32>} : memref<2x128xf32, #tpu.memory_space<vmem>>, vector<2x128xf32>,
    %44 = arith.subf %37, %41 : vector<2x128xf32>
    %45 = arith.addf %44, %10 : vector<2x128xf32>
    %c0_30 = arith.constant 0 : index
    %c0_31 = arith.constant 0 : index
    %46 = vector.load %arg10[%c0_30, %c0_31] : memref<2x128xf32, #tpu.memory_space<vmem>>, vector<2x128xf32>
    %47 = arith.addf %46, %45 : vector<2x128xf32>
    %cst_32 = arith.constant 1.000000e+00 : f32
    %48 = vector.broadcast %cst_32 : f32 to vector<2x128xf32>
    %49 = arith.cmpf ogt, %47, %48 : vector<2x128xf32>
    %cst_33 = arith.constant 0.778800785 : f32
    %50 = vector.broadcast %cst_33 : f32 to vector<2x128xf32>
    %51 = arith.mulf %47, %50 : vector<2x128xf32>
    %cst_34 = arith.constant 0.000000e+00 : f32
    %52 = vector.broadcast %cst_34 : f32 to vector<2x128xf32>
    %53 = arith.select %49, %52, %51 : vector<2x128xi1>, vector<2x128xf32>
    %c0_35 = arith.constant 0 : index
    %c0_36 = arith.constant 0 : index
    %54 = vector.load %arg10[%c0_35, %c0_36] : memref<2x128xf32, #tpu.memory_space<vmem>>, vector<2x128xf32>
    tpu.vector_store %arg10[%c0_35, %c0_36], %53 {strides = array<i32>} : memref<2x128xf32, #tpu.memory_space<vmem>>, vector<2x128xf32>,
    %55 = arith.extui %49 : vector<2x128xi1> to vector<2x128xi32>
    %56 = arith.sitofp %55 : vector<2x128xi32> to vector<2x128xf32>
    %57 = arith.truncf %56 : vector<2x128xf32> to vector<2x128xbf16>
    %c0_37 = arith.constant 0 : index
    %c0_38 = arith.constant 0 : index
    %c0_39 = arith.constant 0 : index
    %58 = vector.load %arg6[%c0_37, %c0_38, %c0_39] : memref<32x2x128xbf16, #tpu.memory_space<vmem>>, vector<1x2x128xbf16>
    %59 = vector.shape_cast %58 : vector<1x2x128xbf16> to vector<2x128xbf16>
    %60 = vector.shape_cast %57 : vector<2x128xbf16> to vector<1x2x128xbf16>
    tpu.vector_store %arg6[%c0_37, %c0_38, %c0_39], %60 {strides = array<i32>} : memref<32x2x128xbf16, #tpu.memory_space<vmem>>, vector<1x2x128xbf16>,
    %cst_40 = arith.constant 0.778800785 : f32
    %61 = arith.mulf %14, %cst_40 : f32
    %cst_41 = arith.constant 1.000000e+00 : f32
    %62 = arith.addf %61, %cst_41 : f32
    %cst_42 = arith.constant 0.36787945 : f32
    %63 = arith.mulf %16, %cst_42 : f32
    %cst_43 = arith.constant 1.000000e+00 : f32
    %64 = arith.addf %63, %cst_43 : f32
    %65 = arith.subf %62, %64 : f32
    %66 = vector.broadcast %65 : f32 to vector<2x512xf32>
    %67 = arith.mulf %3, %66 : vector<2x512xf32>
    %68 = arith.addf %67, %7 : vector<2x512xf32>
    %c0_44 = arith.constant 0 : index
    %c0_45 = arith.constant 0 : index
    %69 = vector.load %arg7[%c0_44, %c0_45] : memref<2x512xf32, #tpu.memory_space<vmem>>, vector<2x512xf32>
    %70 = arith.addf %69, %68 : vector<2x512xf32>
    %cst_46 = arith.constant 1.000000e+00 : f32
    %71 = vector.broadcast %cst_46 : f32 to vector<2x512xf32>
    %72 = arith.cmpf ogt, %70, %71 : vector<2x512xf32>
    %cst_47 = arith.constant 0.778800785 : f32
    %73 = vector.broadcast %cst_47 : f32 to vector<2x512xf32>
    %74 = arith.mulf %70, %73 : vector<2x512xf32>
    %cst_48 = arith.constant 0.000000e+00 : f32
    %75 = vector.broadcast %cst_48 : f32 to vector<2x512xf32>
    %76 = arith.select %72, %75, %74 : vector<2x512xi1>, vector<2x512xf32>
    %c0_49 = arith.constant 0 : index
    %c0_50 = arith.constant 0 : index
    %77 = vector.load %arg7[%c0_49, %c0_50] : memref<2x512xf32, #tpu.memory_space<vmem>>, vector<2x512xf32>
    tpu.vector_store %arg7[%c0_49, %c0_50], %76 {strides = array<i32>} : memref<2x512xf32, #tpu.memory_space<vmem>>, vector<2x512xf32>,
    %78 = arith.extui %72 : vector<2x512xi1> to vector<2x512xi32>
    %79 = arith.sitofp %78 : vector<2x512xi32> to vector<2x512xf32>
    %80 = arith.truncf %79 : vector<2x512xf32> to vector<2x512xbf16>
    %cst_51 = arith.constant dense<0.000000e+00> : vector<2x128xf32>
    %81 = tpu.matmul %80, %4, %cst_51 {dimension_numbers = #tpu.dot_dimension_numbers<[1], [0], [0], [1], [0, 0, 1, 1], [], []>} : vector<2x512xbf16>, vector<512x128xbf16>, vector<2x128xf32> -> vector<2x128xf32>
    %c0_52 = arith.constant 0 : index
    %c0_53 = arith.constant 0 : index
    %82 = vector.load %arg8[%c0_52, %c0_53] : memref<2x128xf32, #tpu.memory_space<vmem>>, vector<2x128xf32>
    %cst_54 = arith.constant 0.778800785 : f32
    %83 = vector.broadcast %cst_54 : f32 to vector<2x128xf32>
    %84 = arith.mulf %82, %83 : vector<2x128xf32>
    %85 = arith.addf %84, %81 : vector<2x128xf32>
    %c0_55 = arith.constant 0 : index
    %c0_56 = arith.constant 0 : index
    %86 = vector.load %arg9[%c0_55, %c0_56] : memref<2x128xf32, #tpu.memory_space<vmem>>, vector<2x128xf32>
    %cst_57 = arith.constant 0.36787945 : f32
    %87 = vector.broadcast %cst_57 : f32 to vector<2x128xf32>
    %88 = arith.mulf %86, %87 : vector<2x128xf32>
    %89 = arith.addf %88, %81 : vector<2x128xf32>
    %c0_58 = arith.constant 0 : index
    %c0_59 = arith.constant 0 : index
    %90 = vector.load %arg8[%c0_58, %c0_59] : memref<2x128xf32, #tpu.memory_space<vmem>>, vector<2x128xf32>
    tpu.vector_store %arg8[%c0_58, %c0_59], %85 {strides = array<i32>} : memref<2x128xf32, #tpu.memory_space<vmem>>, vector<2x128xf32>,
    %c0_60 = arith.constant 0 : index
    %c0_61 = arith.constant 0 : index
    %91 = vector.load %arg9[%c0_60, %c0_61] : memref<2x128xf32, #tpu.memory_space<vmem>>, vector<2x128xf32>
    tpu.vector_store %arg9[%c0_60, %c0_61], %89 {strides = array<i32>} : memref<2x128xf32, #tpu.memory_space<vmem>>, vector<2x128xf32>,
    %92 = arith.subf %85, %89 : vector<2x128xf32>
    %93 = arith.addf %92, %10 : vector<2x128xf32>
    %c0_62 = arith.constant 0 : index
    %c0_63 = arith.constant 0 : index
    %94 = vector.load %arg10[%c0_62, %c0_63] : memref<2x128xf32, #tpu.memory_space<vmem>>, vector<2x128xf32>
    %95 = arith.addf %94, %93 : vector<2x128xf32>
    %cst_64 = arith.constant 1.000000e+00 : f32
    %96 = vector.broadcast %cst_64 : f32 to vector<2x128xf32>
    %97 = arith.cmpf ogt, %95, %96 : vector<2x128xf32>
    %cst_65 = arith.constant 0.778800785 : f32
    %98 = vector.broadcast %cst_65 : f32 to vector<2x128xf32>
    %99 = arith.mulf %95, %98 : vector<2x128xf32>
    %cst_66 = arith.constant 0.000000e+00 : f32
    %100 = vector.broadcast %cst_66 : f32 to vector<2x128xf32>
    %101 = arith.select %97, %100, %99 : vector<2x128xi1>, vector<2x128xf32>
    %c0_67 = arith.constant 0 : index
    %c0_68 = arith.constant 0 : index
    %102 = vector.load %arg10[%c0_67, %c0_68] : memref<2x128xf32, #tpu.memory_space<vmem>>, vector<2x128xf32>
    tpu.vector_store %arg10[%c0_67, %c0_68], %101 {strides = array<i32>} : memref<2x128xf32, #tpu.memory_space<vmem>>, vector<2x128xf32>,
    %103 = arith.extui %97 : vector<2x128xi1> to vector<2x128xi32>
    %104 = arith.sitofp %103 : vector<2x128xi32> to vector<2x128xf32>
    %105 = arith.truncf %104 : vector<2x128xf32> to vector<2x128xbf16>
    %c1_69 = arith.constant 1 : index
    %c0_70 = arith.constant 0 : index
    %c0_71 = arith.constant 0 : index
    %106 = vector.load %arg6[%c1_69, %c0_70, %c0_71] : memref<32x2x128xbf16, #tpu.memory_space<vmem>>, vector<1x2x128xbf16>
    %107 = vector.shape_cast %106 : vector<1x2x128xbf16> to vector<2x128xbf16>
    %108 = vector.shape_cast %105 : vector<2x128xbf16> to vector<1x2x128xbf16>
    tpu.vector_store %arg6[%c1_69, %c0_70, %c0_71], %108 {strides = array<i32>} : memref<32x2x128xbf16, #tpu.memory_space<vmem>>, vector<1x2x128xbf16>,
    %cst_72 = arith.constant 0.778800785 : f32
    %109 = arith.mulf %62, %cst_72 : f32
    %cst_73 = arith.constant 1.000000e+00 : f32
    %110 = arith.addf %109, %cst_73 : f32
    %cst_74 = arith.constant 0.36787945 : f32
    %111 = arith.mulf %64, %cst_74 : f32
    %cst_75 = arith.constant 1.000000e+00 : f32
    %112 = arith.addf %111, %cst_75 : f32
    %113 = arith.subf %110, %112 : f32
    %114 = vector.broadcast %113 : f32 to vector<2x512xf32>
    %115 = arith.mulf %3, %114 : vector<2x512xf32>
    %116 = arith.addf %115, %7 : vector<2x512xf32>
    %c0_76 = arith.constant 0 : index
    %c0_77 = arith.constant 0 : index
    %117 = vector.load %arg7[%c0_76, %c0_77] : memref<2x512xf32, #tpu.memory_space<vmem>>, vector<2x512xf32>
    %118 = arith.addf %117, %116 : vector<2x512xf32>
    %cst_78 = arith.constant 1.000000e+00 : f32
    %119 = vector.broadcast %cst_78 : f32 to vector<2x512xf32>
    %120 = arith.cmpf ogt, %118, %119 : vector<2x512xf32>
    %cst_79 = arith.constant 0.778800785 : f32
    %121 = vector.broadcast %cst_79 : f32 to vector<2x512xf32>
    %122 = arith.mulf %118, %121 : vector<2x512xf32>
    %cst_80 = arith.constant 0.000000e+00 : f32
    %123 = vector.broadcast %cst_80 : f32 to vector<2x512xf32>
    %124 = arith.select %120, %123, %122 : vector<2x512xi1>, vector<2x512xf32>
    %c0_81 = arith.constant 0 : index
    %c0_82 = arith.constant 0 : index
    %125 = vector.load %arg7[%c0_81, %c0_82] : memref<2x512xf32, #tpu.memory_space<vmem>>, vector<2x512xf32>
    tpu.vector_store %arg7[%c0_81, %c0_82], %124 {strides = array<i32>} : memref<2x512xf32, #tpu.memory_space<vmem>>, vector<2x512xf32>,
    %126 = arith.extui %120 : vector<2x512xi1> to vector<2x512xi32>
    %127 = arith.sitofp %126 : vector<2x512xi32> to vector<2x512xf32>
    %128 = arith.truncf %127 : vector<2x512xf32> to vector<2x512xbf16>
    %cst_83 = arith.constant dense<0.000000e+00> : vector<2x128xf32>
    %129 = tpu.matmul %128, %4, %cst_83 {dimension_numbers = #tpu.dot_dimension_numbers<[1], [0], [0], [1], [0, 0, 1, 1], [], []>} : vector<2x512xbf16>, vector<512x128xbf16>, vector<2x128xf32> -> vector<2x128xf32>
    %c0_84 = arith.constant 0 : index
    %c0_85 = arith.constant 0 : index
    %130 = vector.load %arg8[%c0_84, %c0_85] : memref<2x128xf32, #tpu.memory_space<vmem>>, vector<2x128xf32>
    %cst_86 = arith.constant 0.778800785 : f32
    %131 = vector.broadcast %cst_86 : f32 to vector<2x128xf32>
    %132 = arith.mulf %130, %131 : vector<2x128xf32>
    %133 = arith.addf %132, %129 : vector<2x128xf32>
    %c0_87 = arith.constant 0 : index
    %c0_88 = arith.constant 0 : index
    %134 = vector.load %arg9[%c0_87, %c0_88] : memref<2x128xf32, #tpu.memory_space<vmem>>, vector<2x128xf32>
    %cst_89 = arith.constant 0.36787945 : f32
    %135 = vector.broadcast %cst_89 : f32 to vector<2x128xf32>
    %136 = arith.mulf %134, %135 : vector<2x128xf32>
    %137 = arith.addf %136, %129 : vector<2x128xf32>
    %c0_90 = arith.constant 0 : index
    %c0_91 = arith.constant 0 : index
    %138 = vector.load %arg8[%c0_90, %c0_91] : memref<2x128xf32, #tpu.memory_space<vmem>>, vector<2x128xf32>
    tpu.vector_store %arg8[%c0_90, %c0_91], %133 {strides = array<i32>} : memref<2x128xf32, #tpu.memory_space<vmem>>, vector<2x128xf32>,
    %c0_92 = arith.constant 0 : index
    %c0_93 = arith.constant 0 : index
    %139 = vector.load %arg9[%c0_92, %c0_93] : memref<2x128xf32, #tpu.memory_space<vmem>>, vector<2x128xf32>
    tpu.vector_store %arg9[%c0_92, %c0_93], %137 {strides = array<i32>} : memref<2x128xf32, #tpu.memory_space<vmem>>, vector<2x128xf32>,
    %140 = arith.subf %133, %137 : vector<2x128xf32>
    %141 = arith.addf %140, %10 : vector<2x128xf32>
    %c0_94 = arith.constant 0 : index
    %c0_95 = arith.constant 0 : index
    %142 = vector.load %arg10[%c0_94, %c0_95] : memref<2x128xf32, #tpu.memory_space<vmem>>, vector<2x128xf32>
    %143 = arith.addf %142, %141 : vector<2x128xf32>
    %cst_96 = arith.constant 1.000000e+00 : f32
    %144 = vector.broadcast %cst_96 : f32 to vector<2x128xf32>
    %145 = arith.cmpf ogt, %143, %144 : vector<2x128xf32>
    %cst_97 = arith.constant 0.778800785 : f32
    %146 = vector.broadcast %cst_97 : f32 to vector<2x128xf32>
    %147 = arith.mulf %143, %146 : vector<2x128xf32>
    %cst_98 = arith.constant 0.000000e+00 : f32
    %148 = vector.broadcast %cst_98 : f32 to vector<2x128xf32>
    %149 = arith.select %145, %148, %147 : vector<2x128xi1>, vector<2x128xf32>
    %c0_99 = arith.constant 0 : index
    %c0_100 = arith.constant 0 : index
    %150 = vector.load %arg10[%c0_99, %c0_100] : memref<2x128xf32, #tpu.memory_space<vmem>>, vector<2x128xf32>
    tpu.vector_store %arg10[%c0_99, %c0_100], %149 {strides = array<i32>} : memref<2x128xf32, #tpu.memory_space<vmem>>, vector<2x128xf32>,
    %151 = arith.extui %145 : vector<2x128xi1> to vector<2x128xi32>
    %152 = arith.sitofp %151 : vector<2x128xi32> to vector<2x128xf32>
    %153 = arith.truncf %152 : vector<2x128xf32> to vector<2x128xbf16>
    %c2 = arith.constant 2 : index
    %c0_101 = arith.constant 0 : index
    %c0_102 = arith.constant 0 : index
    %154 = vector.load %arg6[%c2, %c0_101, %c0_102] : memref<32x2x128xbf16, #tpu.memory_space<vmem>>, vector<1x2x128xbf16>
    %155 = vector.shape_cast %154 : vector<1x2x128xbf16> to vector<2x128xbf16>
    %156 = vector.shape_cast %153 : vector<2x128xbf16> to vector<1x2x128xbf16>
    tpu.vector_store %arg6[%c2, %c0_101, %c0_102], %156 {strides = array<i32>} : memref<32x2x128xbf16, #tpu.memory_space<vmem>>, vector<1x2x128xbf16>,
    %cst_103 = arith.constant 0.778800785 : f32
    %157 = arith.mulf %110, %cst_103 : f32
    %cst_104 = arith.constant 1.000000e+00 : f32
    %158 = arith.addf %157, %cst_104 : f32
    %cst_105 = arith.constant 0.36787945 : f32
    %159 = arith.mulf %112, %cst_105 : f32
    %cst_106 = arith.constant 1.000000e+00 : f32
    %160 = arith.addf %159, %cst_106 : f32
    %161 = arith.subf %158, %160 : f32
    %162 = vector.broadcast %161 : f32 to vector<2x512xf32>
    %163 = arith.mulf %3, %162 : vector<2x512xf32>
    %164 = arith.addf %163, %7 : vector<2x512xf32>
    %c0_107 = arith.constant 0 : index
    %c0_108 = arith.constant 0 : index
    %165 = vector.load %arg7[%c0_107, %c0_108] : memref<2x512xf32, #tpu.memory_space<vmem>>, vector<2x512xf32>
    %166 = arith.addf %165, %164 : vector<2x512xf32>
    %cst_109 = arith.constant 1.000000e+00 : f32
    %167 = vector.broadcast %cst_109 : f32 to vector<2x512xf32>
    %168 = arith.cmpf ogt, %166, %167 : vector<2x512xf32>
    %cst_110 = arith.constant 0.778800785 : f32
    %169 = vector.broadcast %cst_110 : f32 to vector<2x512xf32>
    %170 = arith.mulf %166, %169 : vector<2x512xf32>
    %cst_111 = arith.constant 0.000000e+00 : f32
    %171 = vector.broadcast %cst_111 : f32 to vector<2x512xf32>
    %172 = arith.select %168, %171, %170 : vector<2x512xi1>, vector<2x512xf32>
    %c0_112 = arith.constant 0 : index
    %c0_113 = arith.constant 0 : index
    %173 = vector.load %arg7[%c0_112, %c0_113] : memref<2x512xf32, #tpu.memory_space<vmem>>, vector<2x512xf32>
    tpu.vector_store %arg7[%c0_112, %c0_113], %172 {strides = array<i32>} : memref<2x512xf32, #tpu.memory_space<vmem>>, vector<2x512xf32>,
    %174 = arith.extui %168 : vector<2x512xi1> to vector<2x512xi32>
    %175 = arith.sitofp %174 : vector<2x512xi32> to vector<2x512xf32>
    %176 = arith.truncf %175 : vector<2x512xf32> to vector<2x512xbf16>
    %cst_114 = arith.constant dense<0.000000e+00> : vector<2x128xf32>
    %177 = tpu.matmul %176, %4, %cst_114 {dimension_numbers = #tpu.dot_dimension_numbers<[1], [0], [0], [1], [0, 0, 1, 1], [], []>} : vector<2x512xbf16>, vector<512x128xbf16>, vector<2x128xf32> -> vector<2x128xf32>
    %c0_115 = arith.constant 0 : index
    %c0_116 = arith.constant 0 : index
    %178 = vector.load %arg8[%c0_115, %c0_116] : memref<2x128xf32, #tpu.memory_space<vmem>>, vector<2x128xf32>
    %cst_117 = arith.constant 0.778800785 : f32
    %179 = vector.broadcast %cst_117 : f32 to vector<2x128xf32>
    %180 = arith.mulf %178, %179 : vector<2x128xf32>
    %181 = arith.addf %180, %177 : vector<2x128xf32>
    %c0_118 = arith.constant 0 : index
    %c0_119 = arith.constant 0 : index
    %182 = vector.load %arg9[%c0_118, %c0_119] : memref<2x128xf32, #tpu.memory_space<vmem>>, vector<2x128xf32>
    %cst_120 = arith.constant 0.36787945 : f32
    %183 = vector.broadcast %cst_120 : f32 to vector<2x128xf32>
    %184 = arith.mulf %182, %183 : vector<2x128xf32>
    %185 = arith.addf %184, %177 : vector<2x128xf32>
    %c0_121 = arith.constant 0 : index
    %c0_122 = arith.constant 0 : index
    %186 = vector.load %arg8[%c0_121, %c0_122] : memref<2x128xf32, #tpu.memory_space<vmem>>, vector<2x128xf32>
    tpu.vector_store %arg8[%c0_121, %c0_122], %181 {strides = array<i32>} : memref<2x128xf32, #tpu.memory_space<vmem>>, vector<2x128xf32>,
    %c0_123 = arith.constant 0 : index
    %c0_124 = arith.constant 0 : index
    %187 = vector.load %arg9[%c0_123, %c0_124] : memref<2x128xf32, #tpu.memory_space<vmem>>, vector<2x128xf32>
    tpu.vector_store %arg9[%c0_123, %c0_124], %185 {strides = array<i32>} : memref<2x128xf32, #tpu.memory_space<vmem>>, vector<2x128xf32>,
    %188 = arith.subf %181, %185 : vector<2x128xf32>
    %189 = arith.addf %188, %10 : vector<2x128xf32>
    %c0_125 = arith.constant 0 : index
    %c0_126 = arith.constant 0 : index
    %190 = vector.load %arg10[%c0_125, %c0_126] : memref<2x128xf32, #tpu.memory_space<vmem>>, vector<2x128xf32>
    %191 = arith.addf %190, %189 : vector<2x128xf32>
    %cst_127 = arith.constant 1.000000e+00 : f32
    %192 = vector.broadcast %cst_127 : f32 to vector<2x128xf32>
    %193 = arith.cmpf ogt, %191, %192 : vector<2x128xf32>
    %cst_128 = arith.constant 0.778800785 : f32
    %194 = vector.broadcast %cst_128 : f32 to vector<2x128xf32>
    %195 = arith.mulf %191, %194 : vector<2x128xf32>
    %cst_129 = arith.constant 0.000000e+00 : f32
    %196 = vector.broadcast %cst_129 : f32 to vector<2x128xf32>
    %197 = arith.select %193, %196, %195 : vector<2x128xi1>, vector<2x128xf32>
    %c0_130 = arith.constant 0 : index
    %c0_131 = arith.constant 0 : index
    %198 = vector.load %arg10[%c0_130, %c0_131] : memref<2x128xf32, #tpu.memory_space<vmem>>, vector<2x128xf32>
    tpu.vector_store %arg10[%c0_130, %c0_131], %197 {strides = array<i32>} : memref<2x128xf32, #tpu.memory_space<vmem>>, vector<2x128xf32>,
    %199 = arith.extui %193 : vector<2x128xi1> to vector<2x128xi32>
    %200 = arith.sitofp %199 : vector<2x128xi32> to vector<2x128xf32>
    %201 = arith.truncf %200 : vector<2x128xf32> to vector<2x128xbf16>
    %c3 = arith.constant 3 : index
    %c0_132 = arith.constant 0 : index
    %c0_133 = arith.constant 0 : index
    %202 = vector.load %arg6[%c3, %c0_132, %c0_133] : memref<32x2x128xbf16, #tpu.memory_space<vmem>>, vector<1x2x128xbf16>
    %203 = vector.shape_cast %202 : vector<1x2x128xbf16> to vector<2x128xbf16>
    %204 = vector.shape_cast %201 : vector<2x128xbf16> to vector<1x2x128xbf16>
    tpu.vector_store %arg6[%c3, %c0_132, %c0_133], %204 {strides = array<i32>} : memref<32x2x128xbf16, #tpu.memory_space<vmem>>, vector<1x2x128xbf16>,
    %cst_134 = arith.constant 0.778800785 : f32
    %205 = arith.mulf %158, %cst_134 : f32
    %cst_135 = arith.constant 1.000000e+00 : f32
    %206 = arith.addf %205, %cst_135 : f32
    %cst_136 = arith.constant 0.36787945 : f32
    %207 = arith.mulf %160, %cst_136 : f32
    %cst_137 = arith.constant 1.000000e+00 : f32
    %208 = arith.addf %207, %cst_137 : f32
    %209 = arith.subf %206, %208 : f32
    %210 = vector.broadcast %209 : f32 to vector<2x512xf32>
    %211 = arith.mulf %3, %210 : vector<2x512xf32>
    %212 = arith.addf %211, %7 : vector<2x512xf32>
    %c0_138 = arith.constant 0 : index
    %c0_139 = arith.constant 0 : index
    %213 = vector.load %arg7[%c0_138, %c0_139] : memref<2x512xf32, #tpu.memory_space<vmem>>, vector<2x512xf32>
    %214 = arith.addf %213, %212 : vector<2x512xf32>
    %cst_140 = arith.constant 1.000000e+00 : f32
    %215 = vector.broadcast %cst_140 : f32 to vector<2x512xf32>
    %216 = arith.cmpf ogt, %214, %215 : vector<2x512xf32>
    %cst_141 = arith.constant 0.778800785 : f32
    %217 = vector.broadcast %cst_141 : f32 to vector<2x512xf32>
    %218 = arith.mulf %214, %217 : vector<2x512xf32>
    %cst_142 = arith.constant 0.000000e+00 : f32
    %219 = vector.broadcast %cst_142 : f32 to vector<2x512xf32>
    %220 = arith.select %216, %219, %218 : vector<2x512xi1>, vector<2x512xf32>
    %c0_143 = arith.constant 0 : index
    %c0_144 = arith.constant 0 : index
    %221 = vector.load %arg7[%c0_143, %c0_144] : memref<2x512xf32, #tpu.memory_space<vmem>>, vector<2x512xf32>
    tpu.vector_store %arg7[%c0_143, %c0_144], %220 {strides = array<i32>} : memref<2x512xf32, #tpu.memory_space<vmem>>, vector<2x512xf32>,
    %222 = arith.extui %216 : vector<2x512xi1> to vector<2x512xi32>
    %223 = arith.sitofp %222 : vector<2x512xi32> to vector<2x512xf32>
    %224 = arith.truncf %223 : vector<2x512xf32> to vector<2x512xbf16>
    %cst_145 = arith.constant dense<0.000000e+00> : vector<2x128xf32>
    %225 = tpu.matmul %224, %4, %cst_145 {dimension_numbers = #tpu.dot_dimension_numbers<[1], [0], [0], [1], [0, 0, 1, 1], [], []>} : vector<2x512xbf16>, vector<512x128xbf16>, vector<2x128xf32> -> vector<2x128xf32>
    %c0_146 = arith.constant 0 : index
    %c0_147 = arith.constant 0 : index
    %226 = vector.load %arg8[%c0_146, %c0_147] : memref<2x128xf32, #tpu.memory_space<vmem>>, vector<2x128xf32>
    %cst_148 = arith.constant 0.778800785 : f32
    %227 = vector.broadcast %cst_148 : f32 to vector<2x128xf32>
    %228 = arith.mulf %226, %227 : vector<2x128xf32>
    %229 = arith.addf %228, %225 : vector<2x128xf32>
    %c0_149 = arith.constant 0 : index
    %c0_150 = arith.constant 0 : index
    %230 = vector.load %arg9[%c0_149, %c0_150] : memref<2x128xf32, #tpu.memory_space<vmem>>, vector<2x128xf32>
    %cst_151 = arith.constant 0.36787945 : f32
    %231 = vector.broadcast %cst_151 : f32 to vector<2x128xf32>
    %232 = arith.mulf %230, %231 : vector<2x128xf32>
    %233 = arith.addf %232, %225 : vector<2x128xf32>
    %c0_152 = arith.constant 0 : index
    %c0_153 = arith.constant 0 : index
    %234 = vector.load %arg8[%c0_152, %c0_153] : memref<2x128xf32, #tpu.memory_space<vmem>>, vector<2x128xf32>
    tpu.vector_store %arg8[%c0_152, %c0_153], %229 {strides = array<i32>} : memref<2x128xf32, #tpu.memory_space<vmem>>, vector<2x128xf32>,
    %c0_154 = arith.constant 0 : index
    %c0_155 = arith.constant 0 : index
    %235 = vector.load %arg9[%c0_154, %c0_155] : memref<2x128xf32, #tpu.memory_space<vmem>>, vector<2x128xf32>
    tpu.vector_store %arg9[%c0_154, %c0_155], %233 {strides = array<i32>} : memref<2x128xf32, #tpu.memory_space<vmem>>, vector<2x128xf32>,
    %236 = arith.subf %229, %233 : vector<2x128xf32>
    %237 = arith.addf %236, %10 : vector<2x128xf32>
    %c0_156 = arith.constant 0 : index
    %c0_157 = arith.constant 0 : index
    %238 = vector.load %arg10[%c0_156, %c0_157] : memref<2x128xf32, #tpu.memory_space<vmem>>, vector<2x128xf32>
    %239 = arith.addf %238, %237 : vector<2x128xf32>
    %cst_158 = arith.constant 1.000000e+00 : f32
    %240 = vector.broadcast %cst_158 : f32 to vector<2x128xf32>
    %241 = arith.cmpf ogt, %239, %240 : vector<2x128xf32>
    %cst_159 = arith.constant 0.778800785 : f32
    %242 = vector.broadcast %cst_159 : f32 to vector<2x128xf32>
    %243 = arith.mulf %239, %242 : vector<2x128xf32>
    %cst_160 = arith.constant 0.000000e+00 : f32
    %244 = vector.broadcast %cst_160 : f32 to vector<2x128xf32>
    %245 = arith.select %241, %244, %243 : vector<2x128xi1>, vector<2x128xf32>
    %c0_161 = arith.constant 0 : index
    %c0_162 = arith.constant 0 : index
    %246 = vector.load %arg10[%c0_161, %c0_162] : memref<2x128xf32, #tpu.memory_space<vmem>>, vector<2x128xf32>
    tpu.vector_store %arg10[%c0_161, %c0_162], %245 {strides = array<i32>} : memref<2x128xf32, #tpu.memory_space<vmem>>, vector<2x128xf32>,
    %247 = arith.extui %241 : vector<2x128xi1> to vector<2x128xi32>
    %248 = arith.sitofp %247 : vector<2x128xi32> to vector<2x128xf32>
    %249 = arith.truncf %248 : vector<2x128xf32> to vector<2x128xbf16>
    %c4 = arith.constant 4 : index
    %c0_163 = arith.constant 0 : index
    %c0_164 = arith.constant 0 : index
    %250 = vector.load %arg6[%c4, %c0_163, %c0_164] : memref<32x2x128xbf16, #tpu.memory_space<vmem>>, vector<1x2x128xbf16>
    %251 = vector.shape_cast %250 : vector<1x2x128xbf16> to vector<2x128xbf16>
    %252 = vector.shape_cast %249 : vector<2x128xbf16> to vector<1x2x128xbf16>
    tpu.vector_store %arg6[%c4, %c0_163, %c0_164], %252 {strides = array<i32>} : memref<32x2x128xbf16, #tpu.memory_space<vmem>>, vector<1x2x128xbf16>,
    %cst_165 = arith.constant 0.778800785 : f32
    %253 = arith.mulf %206, %cst_165 : f32
    %cst_166 = arith.constant 1.000000e+00 : f32
    %254 = arith.addf %253, %cst_166 : f32
    %cst_167 = arith.constant 0.36787945 : f32
    %255 = arith.mulf %208, %cst_167 : f32
    %cst_168 = arith.constant 1.000000e+00 : f32
    %256 = arith.addf %255, %cst_168 : f32
    %257 = arith.subf %254, %256 : f32
    %258 = vector.broadcast %257 : f32 to vector<2x512xf32>
    %259 = arith.mulf %3, %258 : vector<2x512xf32>
    %260 = arith.addf %259, %7 : vector<2x512xf32>
    %c0_169 = arith.constant 0 : index
    %c0_170 = arith.constant 0 : index
    %261 = vector.load %arg7[%c0_169, %c0_170] : memref<2x512xf32, #tpu.memory_space<vmem>>, vector<2x512xf32>
    %262 = arith.addf %261, %260 : vector<2x512xf32>
    %cst_171 = arith.constant 1.000000e+00 : f32
    %263 = vector.broadcast %cst_171 : f32 to vector<2x512xf32>
    %264 = arith.cmpf ogt, %262, %263 : vector<2x512xf32>
    %cst_172 = arith.constant 0.778800785 : f32
    %265 = vector.broadcast %cst_172 : f32 to vector<2x512xf32>
    %266 = arith.mulf %262, %265 : vector<2x512xf32>
    %cst_173 = arith.constant 0.000000e+00 : f32
    %267 = vector.broadcast %cst_173 : f32 to vector<2x512xf32>
    %268 = arith.select %264, %267, %266 : vector<2x512xi1>, vector<2x512xf32>
    %c0_174 = arith.constant 0 : index
    %c0_175 = arith.constant 0 : index
    %269 = vector.load %arg7[%c0_174, %c0_175] : memref<2x512xf32, #tpu.memory_space<vmem>>, vector<2x512xf32>
    tpu.vector_store %arg7[%c0_174, %c0_175], %268 {strides = array<i32>} : memref<2x512xf32, #tpu.memory_space<vmem>>, vector<2x512xf32>,
    %270 = arith.extui %264 : vector<2x512xi1> to vector<2x512xi32>
    %271 = arith.sitofp %270 : vector<2x512xi32> to vector<2x512xf32>
    %272 = arith.truncf %271 : vector<2x512xf32> to vector<2x512xbf16>
    %cst_176 = arith.constant dense<0.000000e+00> : vector<2x128xf32>
    %273 = tpu.matmul %272, %4, %cst_176 {dimension_numbers = #tpu.dot_dimension_numbers<[1], [0], [0], [1], [0, 0, 1, 1], [], []>} : vector<2x512xbf16>, vector<512x128xbf16>, vector<2x128xf32> -> vector<2x128xf32>
    %c0_177 = arith.constant 0 : index
    %c0_178 = arith.constant 0 : index
    %274 = vector.load %arg8[%c0_177, %c0_178] : memref<2x128xf32, #tpu.memory_space<vmem>>, vector<2x128xf32>
    %cst_179 = arith.constant 0.778800785 : f32
    %275 = vector.broadcast %cst_179 : f32 to vector<2x128xf32>
    %276 = arith.mulf %274, %275 : vector<2x128xf32>
    %277 = arith.addf %276, %273 : vector<2x128xf32>
    %c0_180 = arith.constant 0 : index
    %c0_181 = arith.constant 0 : index
    %278 = vector.load %arg9[%c0_180, %c0_181] : memref<2x128xf32, #tpu.memory_space<vmem>>, vector<2x128xf32>
    %cst_182 = arith.constant 0.36787945 : f32
    %279 = vector.broadcast %cst_182 : f32 to vector<2x128xf32>
    %280 = arith.mulf %278, %279 : vector<2x128xf32>
    %281 = arith.addf %280, %273 : vector<2x128xf32>
    %c0_183 = arith.constant 0 : index
    %c0_184 = arith.constant 0 : index
    %282 = vector.load %arg8[%c0_183, %c0_184] : memref<2x128xf32, #tpu.memory_space<vmem>>, vector<2x128xf32>
    tpu.vector_store %arg8[%c0_183, %c0_184], %277 {strides = array<i32>} : memref<2x128xf32, #tpu.memory_space<vmem>>, vector<2x128xf32>,
    %c0_185 = arith.constant 0 : index
    %c0_186 = arith.constant 0 : index
    %283 = vector.load %arg9[%c0_185, %c0_186] : memref<2x128xf32, #tpu.memory_space<vmem>>, vector<2x128xf32>
    tpu.vector_store %arg9[%c0_185, %c0_186], %281 {strides = array<i32>} : memref<2x128xf32, #tpu.memory_space<vmem>>, vector<2x128xf32>,
    %284 = arith.subf %277, %281 : vector<2x128xf32>
    %285 = arith.addf %284, %10 : vector<2x128xf32>
    %c0_187 = arith.constant 0 : index
    %c0_188 = arith.constant 0 : index
    %286 = vector.load %arg10[%c0_187, %c0_188] : memref<2x128xf32, #tpu.memory_space<vmem>>, vector<2x128xf32>
    %287 = arith.addf %286, %285 : vector<2x128xf32>
    %cst_189 = arith.constant 1.000000e+00 : f32
    %288 = vector.broadcast %cst_189 : f32 to vector<2x128xf32>
    %289 = arith.cmpf ogt, %287, %288 : vector<2x128xf32>
    %cst_190 = arith.constant 0.778800785 : f32
    %290 = vector.broadcast %cst_190 : f32 to vector<2x128xf32>
    %291 = arith.mulf %287, %290 : vector<2x128xf32>
    %cst_191 = arith.constant 0.000000e+00 : f32
    %292 = vector.broadcast %cst_191 : f32 to vector<2x128xf32>
    %293 = arith.select %289, %292, %291 : vector<2x128xi1>, vector<2x128xf32>
    %c0_192 = arith.constant 0 : index
    %c0_193 = arith.constant 0 : index
    %294 = vector.load %arg10[%c0_192, %c0_193] : memref<2x128xf32, #tpu.memory_space<vmem>>, vector<2x128xf32>
    tpu.vector_store %arg10[%c0_192, %c0_193], %293 {strides = array<i32>} : memref<2x128xf32, #tpu.memory_space<vmem>>, vector<2x128xf32>,
    %295 = arith.extui %289 : vector<2x128xi1> to vector<2x128xi32>
    %296 = arith.sitofp %295 : vector<2x128xi32> to vector<2x128xf32>
    %297 = arith.truncf %296 : vector<2x128xf32> to vector<2x128xbf16>
    %c5 = arith.constant 5 : index
    %c0_194 = arith.constant 0 : index
    %c0_195 = arith.constant 0 : index
    %298 = vector.load %arg6[%c5, %c0_194, %c0_195] : memref<32x2x128xbf16, #tpu.memory_space<vmem>>, vector<1x2x128xbf16>
    %299 = vector.shape_cast %298 : vector<1x2x128xbf16> to vector<2x128xbf16>
    %300 = vector.shape_cast %297 : vector<2x128xbf16> to vector<1x2x128xbf16>
    tpu.vector_store %arg6[%c5, %c0_194, %c0_195], %300 {strides = array<i32>} : memref<32x2x128xbf16, #tpu.memory_space<vmem>>, vector<1x2x128xbf16>,
    %cst_196 = arith.constant 0.778800785 : f32
    %301 = arith.mulf %254, %cst_196 : f32
    %cst_197 = arith.constant 1.000000e+00 : f32
    %302 = arith.addf %301, %cst_197 : f32
    %cst_198 = arith.constant 0.36787945 : f32
    %303 = arith.mulf %256, %cst_198 : f32
    %cst_199 = arith.constant 1.000000e+00 : f32
    %304 = arith.addf %303, %cst_199 : f32
    %305 = arith.subf %302, %304 : f32
    %306 = vector.broadcast %305 : f32 to vector<2x512xf32>
    %307 = arith.mulf %3, %306 : vector<2x512xf32>
    %308 = arith.addf %307, %7 : vector<2x512xf32>
    %c0_200 = arith.constant 0 : index
    %c0_201 = arith.constant 0 : index
    %309 = vector.load %arg7[%c0_200, %c0_201] : memref<2x512xf32, #tpu.memory_space<vmem>>, vector<2x512xf32>
    %310 = arith.addf %309, %308 : vector<2x512xf32>
    %cst_202 = arith.constant 1.000000e+00 : f32
    %311 = vector.broadcast %cst_202 : f32 to vector<2x512xf32>
    %312 = arith.cmpf ogt, %310, %311 : vector<2x512xf32>
    %cst_203 = arith.constant 0.778800785 : f32
    %313 = vector.broadcast %cst_203 : f32 to vector<2x512xf32>
    %314 = arith.mulf %310, %313 : vector<2x512xf32>
    %cst_204 = arith.constant 0.000000e+00 : f32
    %315 = vector.broadcast %cst_204 : f32 to vector<2x512xf32>
    %316 = arith.select %312, %315, %314 : vector<2x512xi1>, vector<2x512xf32>
    %c0_205 = arith.constant 0 : index
    %c0_206 = arith.constant 0 : index
    %317 = vector.load %arg7[%c0_205, %c0_206] : memref<2x512xf32, #tpu.memory_space<vmem>>, vector<2x512xf32>
    tpu.vector_store %arg7[%c0_205, %c0_206], %316 {strides = array<i32>} : memref<2x512xf32, #tpu.memory_space<vmem>>, vector<2x512xf32>,
    %318 = arith.extui %312 : vector<2x512xi1> to vector<2x512xi32>
    %319 = arith.sitofp %318 : vector<2x512xi32> to vector<2x512xf32>
    %320 = arith.truncf %319 : vector<2x512xf32> to vector<2x512xbf16>
    %cst_207 = arith.constant dense<0.000000e+00> : vector<2x128xf32>
    %321 = tpu.matmul %320, %4, %cst_207 {dimension_numbers = #tpu.dot_dimension_numbers<[1], [0], [0], [1], [0, 0, 1, 1], [], []>} : vector<2x512xbf16>, vector<512x128xbf16>, vector<2x128xf32> -> vector<2x128xf32>
    %c0_208 = arith.constant 0 : index
    %c0_209 = arith.constant 0 : index
    %322 = vector.load %arg8[%c0_208, %c0_209] : memref<2x128xf32, #tpu.memory_space<vmem>>, vector<2x128xf32>
    %cst_210 = arith.constant 0.778800785 : f32
    %323 = vector.broadcast %cst_210 : f32 to vector<2x128xf32>
    %324 = arith.mulf %322, %323 : vector<2x128xf32>
    %325 = arith.addf %324, %321 : vector<2x128xf32>
    %c0_211 = arith.constant 0 : index
    %c0_212 = arith.constant 0 : index
    %326 = vector.load %arg9[%c0_211, %c0_212] : memref<2x128xf32, #tpu.memory_space<vmem>>, vector<2x128xf32>
    %cst_213 = arith.constant 0.36787945 : f32
    %327 = vector.broadcast %cst_213 : f32 to vector<2x128xf32>
    %328 = arith.mulf %326, %327 : vector<2x128xf32>
    %329 = arith.addf %328, %321 : vector<2x128xf32>
    %c0_214 = arith.constant 0 : index
    %c0_215 = arith.constant 0 : index
    %330 = vector.load %arg8[%c0_214, %c0_215] : memref<2x128xf32, #tpu.memory_space<vmem>>, vector<2x128xf32>
    tpu.vector_store %arg8[%c0_214, %c0_215], %325 {strides = array<i32>} : memref<2x128xf32, #tpu.memory_space<vmem>>, vector<2x128xf32>,
    %c0_216 = arith.constant 0 : index
    %c0_217 = arith.constant 0 : index
    %331 = vector.load %arg9[%c0_216, %c0_217] : memref<2x128xf32, #tpu.memory_space<vmem>>, vector<2x128xf32>
    tpu.vector_store %arg9[%c0_216, %c0_217], %329 {strides = array<i32>} : memref<2x128xf32, #tpu.memory_space<vmem>>, vector<2x128xf32>,
    %332 = arith.subf %325, %329 : vector<2x128xf32>
    %333 = arith.addf %332, %10 : vector<2x128xf32>
    %c0_218 = arith.constant 0 : index
    %c0_219 = arith.constant 0 : index
    %334 = vector.load %arg10[%c0_218, %c0_219] : memref<2x128xf32, #tpu.memory_space<vmem>>, vector<2x128xf32>
    %335 = arith.addf %334, %333 : vector<2x128xf32>
    %cst_220 = arith.constant 1.000000e+00 : f32
    %336 = vector.broadcast %cst_220 : f32 to vector<2x128xf32>
    %337 = arith.cmpf ogt, %335, %336 : vector<2x128xf32>
    %cst_221 = arith.constant 0.778800785 : f32
    %338 = vector.broadcast %cst_221 : f32 to vector<2x128xf32>
    %339 = arith.mulf %335, %338 : vector<2x128xf32>
    %cst_222 = arith.constant 0.000000e+00 : f32
    %340 = vector.broadcast %cst_222 : f32 to vector<2x128xf32>
    %341 = arith.select %337, %340, %339 : vector<2x128xi1>, vector<2x128xf32>
    %c0_223 = arith.constant 0 : index
    %c0_224 = arith.constant 0 : index
    %342 = vector.load %arg10[%c0_223, %c0_224] : memref<2x128xf32, #tpu.memory_space<vmem>>, vector<2x128xf32>
    tpu.vector_store %arg10[%c0_223, %c0_224], %341 {strides = array<i32>} : memref<2x128xf32, #tpu.memory_space<vmem>>, vector<2x128xf32>,
    %343 = arith.extui %337 : vector<2x128xi1> to vector<2x128xi32>
    %344 = arith.sitofp %343 : vector<2x128xi32> to vector<2x128xf32>
    %345 = arith.truncf %344 : vector<2x128xf32> to vector<2x128xbf16>
    %c6 = arith.constant 6 : index
    %c0_225 = arith.constant 0 : index
    %c0_226 = arith.constant 0 : index
    %346 = vector.load %arg6[%c6, %c0_225, %c0_226] : memref<32x2x128xbf16, #tpu.memory_space<vmem>>, vector<1x2x128xbf16>
    %347 = vector.shape_cast %346 : vector<1x2x128xbf16> to vector<2x128xbf16>
    %348 = vector.shape_cast %345 : vector<2x128xbf16> to vector<1x2x128xbf16>
    tpu.vector_store %arg6[%c6, %c0_225, %c0_226], %348 {strides = array<i32>} : memref<32x2x128xbf16, #tpu.memory_space<vmem>>, vector<1x2x128xbf16>,
    %cst_227 = arith.constant 0.778800785 : f32
    %349 = arith.mulf %302, %cst_227 : f32
    %cst_228 = arith.constant 1.000000e+00 : f32
    %350 = arith.addf %349, %cst_228 : f32
    %cst_229 = arith.constant 0.36787945 : f32
    %351 = arith.mulf %304, %cst_229 : f32
    %cst_230 = arith.constant 1.000000e+00 : f32
    %352 = arith.addf %351, %cst_230 : f32
    %353 = arith.subf %350, %352 : f32
    %354 = vector.broadcast %353 : f32 to vector<2x512xf32>
    %355 = arith.mulf %3, %354 : vector<2x512xf32>
    %356 = arith.addf %355, %7 : vector<2x512xf32>
    %c0_231 = arith.constant 0 : index
    %c0_232 = arith.constant 0 : index
    %357 = vector.load %arg7[%c0_231, %c0_232] : memref<2x512xf32, #tpu.memory_space<vmem>>, vector<2x512xf32>
    %358 = arith.addf %357, %356 : vector<2x512xf32>
    %cst_233 = arith.constant 1.000000e+00 : f32
    %359 = vector.broadcast %cst_233 : f32 to vector<2x512xf32>
    %360 = arith.cmpf ogt, %358, %359 : vector<2x512xf32>
    %cst_234 = arith.constant 0.778800785 : f32
    %361 = vector.broadcast %cst_234 : f32 to vector<2x512xf32>
    %362 = arith.mulf %358, %361 : vector<2x512xf32>
    %cst_235 = arith.constant 0.000000e+00 : f32
    %363 = vector.broadcast %cst_235 : f32 to vector<2x512xf32>
    %364 = arith.select %360, %363, %362 : vector<2x512xi1>, vector<2x512xf32>
    %c0_236 = arith.constant 0 : index
    %c0_237 = arith.constant 0 : index
    %365 = vector.load %arg7[%c0_236, %c0_237] : memref<2x512xf32, #tpu.memory_space<vmem>>, vector<2x512xf32>
    tpu.vector_store %arg7[%c0_236, %c0_237], %364 {strides = array<i32>} : memref<2x512xf32, #tpu.memory_space<vmem>>, vector<2x512xf32>,
    %366 = arith.extui %360 : vector<2x512xi1> to vector<2x512xi32>
    %367 = arith.sitofp %366 : vector<2x512xi32> to vector<2x512xf32>
    %368 = arith.truncf %367 : vector<2x512xf32> to vector<2x512xbf16>
    %cst_238 = arith.constant dense<0.000000e+00> : vector<2x128xf32>
    %369 = tpu.matmul %368, %4, %cst_238 {dimension_numbers = #tpu.dot_dimension_numbers<[1], [0], [0], [1], [0, 0, 1, 1], [], []>} : vector<2x512xbf16>, vector<512x128xbf16>, vector<2x128xf32> -> vector<2x128xf32>
    %c0_239 = arith.constant 0 : index
    %c0_240 = arith.constant 0 : index
    %370 = vector.load %arg8[%c0_239, %c0_240] : memref<2x128xf32, #tpu.memory_space<vmem>>, vector<2x128xf32>
    %cst_241 = arith.constant 0.778800785 : f32
    %371 = vector.broadcast %cst_241 : f32 to vector<2x128xf32>
    %372 = arith.mulf %370, %371 : vector<2x128xf32>
    %373 = arith.addf %372, %369 : vector<2x128xf32>
    %c0_242 = arith.constant 0 : index
    %c0_243 = arith.constant 0 : index
    %374 = vector.load %arg9[%c0_242, %c0_243] : memref<2x128xf32, #tpu.memory_space<vmem>>, vector<2x128xf32>
    %cst_244 = arith.constant 0.36787945 : f32
    %375 = vector.broadcast %cst_244 : f32 to vector<2x128xf32>
    %376 = arith.mulf %374, %375 : vector<2x128xf32>
    %377 = arith.addf %376, %369 : vector<2x128xf32>
    %c0_245 = arith.constant 0 : index
    %c0_246 = arith.constant 0 : index
    %378 = vector.load %arg8[%c0_245, %c0_246] : memref<2x128xf32, #tpu.memory_space<vmem>>, vector<2x128xf32>
    tpu.vector_store %arg8[%c0_245, %c0_246], %373 {strides = array<i32>} : memref<2x128xf32, #tpu.memory_space<vmem>>, vector<2x128xf32>,
    %c0_247 = arith.constant 0 : index
    %c0_248 = arith.constant 0 : index
    %379 = vector.load %arg9[%c0_247, %c0_248] : memref<2x128xf32, #tpu.memory_space<vmem>>, vector<2x128xf32>
    tpu.vector_store %arg9[%c0_247, %c0_248], %377 {strides = array<i32>} : memref<2x128xf32, #tpu.memory_space<vmem>>, vector<2x128xf32>,
    %380 = arith.subf %373, %377 : vector<2x128xf32>
    %381 = arith.addf %380, %10 : vector<2x128xf32>
    %c0_249 = arith.constant 0 : index
    %c0_250 = arith.constant 0 : index
    %382 = vector.load %arg10[%c0_249, %c0_250] : memref<2x128xf32, #tpu.memory_space<vmem>>, vector<2x128xf32>
    %383 = arith.addf %382, %381 : vector<2x128xf32>
    %cst_251 = arith.constant 1.000000e+00 : f32
    %384 = vector.broadcast %cst_251 : f32 to vector<2x128xf32>
    %385 = arith.cmpf ogt, %383, %384 : vector<2x128xf32>
    %cst_252 = arith.constant 0.778800785 : f32
    %386 = vector.broadcast %cst_252 : f32 to vector<2x128xf32>
    %387 = arith.mulf %383, %386 : vector<2x128xf32>
    %cst_253 = arith.constant 0.000000e+00 : f32
    %388 = vector.broadcast %cst_253 : f32 to vector<2x128xf32>
    %389 = arith.select %385, %388, %387 : vector<2x128xi1>, vector<2x128xf32>
    %c0_254 = arith.constant 0 : index
    %c0_255 = arith.constant 0 : index
    %390 = vector.load %arg10[%c0_254, %c0_255] : memref<2x128xf32, #tpu.memory_space<vmem>>, vector<2x128xf32>
    tpu.vector_store %arg10[%c0_254, %c0_255], %389 {strides = array<i32>} : memref<2x128xf32, #tpu.memory_space<vmem>>, vector<2x128xf32>,
    %391 = arith.extui %385 : vector<2x128xi1> to vector<2x128xi32>
    %392 = arith.sitofp %391 : vector<2x128xi32> to vector<2x128xf32>
    %393 = arith.truncf %392 : vector<2x128xf32> to vector<2x128xbf16>
    %c7 = arith.constant 7 : index
    %c0_256 = arith.constant 0 : index
    %c0_257 = arith.constant 0 : index
    %394 = vector.load %arg6[%c7, %c0_256, %c0_257] : memref<32x2x128xbf16, #tpu.memory_space<vmem>>, vector<1x2x128xbf16>
    %395 = vector.shape_cast %394 : vector<1x2x128xbf16> to vector<2x128xbf16>
    %396 = vector.shape_cast %393 : vector<2x128xbf16> to vector<1x2x128xbf16>
    tpu.vector_store %arg6[%c7, %c0_256, %c0_257], %396 {strides = array<i32>} : memref<32x2x128xbf16, #tpu.memory_space<vmem>>, vector<1x2x128xbf16>,
    %cst_258 = arith.constant 0.778800785 : f32
    %397 = arith.mulf %350, %cst_258 : f32
    %cst_259 = arith.constant 1.000000e+00 : f32
    %398 = arith.addf %397, %cst_259 : f32
    %cst_260 = arith.constant 0.36787945 : f32
    %399 = arith.mulf %352, %cst_260 : f32
    %cst_261 = arith.constant 1.000000e+00 : f32
    %400 = arith.addf %399, %cst_261 : f32
    %401 = arith.subf %398, %400 : f32
    %402 = vector.broadcast %401 : f32 to vector<2x512xf32>
    %403 = arith.mulf %3, %402 : vector<2x512xf32>
    %404 = arith.addf %403, %7 : vector<2x512xf32>
    %c0_262 = arith.constant 0 : index
    %c0_263 = arith.constant 0 : index
    %405 = vector.load %arg7[%c0_262, %c0_263] : memref<2x512xf32, #tpu.memory_space<vmem>>, vector<2x512xf32>
    %406 = arith.addf %405, %404 : vector<2x512xf32>
    %cst_264 = arith.constant 1.000000e+00 : f32
    %407 = vector.broadcast %cst_264 : f32 to vector<2x512xf32>
    %408 = arith.cmpf ogt, %406, %407 : vector<2x512xf32>
    %cst_265 = arith.constant 0.778800785 : f32
    %409 = vector.broadcast %cst_265 : f32 to vector<2x512xf32>
    %410 = arith.mulf %406, %409 : vector<2x512xf32>
    %cst_266 = arith.constant 0.000000e+00 : f32
    %411 = vector.broadcast %cst_266 : f32 to vector<2x512xf32>
    %412 = arith.select %408, %411, %410 : vector<2x512xi1>, vector<2x512xf32>
    %c0_267 = arith.constant 0 : index
    %c0_268 = arith.constant 0 : index
    %413 = vector.load %arg7[%c0_267, %c0_268] : memref<2x512xf32, #tpu.memory_space<vmem>>, vector<2x512xf32>
    tpu.vector_store %arg7[%c0_267, %c0_268], %412 {strides = array<i32>} : memref<2x512xf32, #tpu.memory_space<vmem>>, vector<2x512xf32>,
    %414 = arith.extui %408 : vector<2x512xi1> to vector<2x512xi32>
    %415 = arith.sitofp %414 : vector<2x512xi32> to vector<2x512xf32>
    %416 = arith.truncf %415 : vector<2x512xf32> to vector<2x512xbf16>
    %cst_269 = arith.constant dense<0.000000e+00> : vector<2x128xf32>
    %417 = tpu.matmul %416, %4, %cst_269 {dimension_numbers = #tpu.dot_dimension_numbers<[1], [0], [0], [1], [0, 0, 1, 1], [], []>} : vector<2x512xbf16>, vector<512x128xbf16>, vector<2x128xf32> -> vector<2x128xf32>
    %c0_270 = arith.constant 0 : index
    %c0_271 = arith.constant 0 : index
    %418 = vector.load %arg8[%c0_270, %c0_271] : memref<2x128xf32, #tpu.memory_space<vmem>>, vector<2x128xf32>
    %cst_272 = arith.constant 0.778800785 : f32
    %419 = vector.broadcast %cst_272 : f32 to vector<2x128xf32>
    %420 = arith.mulf %418, %419 : vector<2x128xf32>
    %421 = arith.addf %420, %417 : vector<2x128xf32>
    %c0_273 = arith.constant 0 : index
    %c0_274 = arith.constant 0 : index
    %422 = vector.load %arg9[%c0_273, %c0_274] : memref<2x128xf32, #tpu.memory_space<vmem>>, vector<2x128xf32>
    %cst_275 = arith.constant 0.36787945 : f32
    %423 = vector.broadcast %cst_275 : f32 to vector<2x128xf32>
    %424 = arith.mulf %422, %423 : vector<2x128xf32>
    %425 = arith.addf %424, %417 : vector<2x128xf32>
    %c0_276 = arith.constant 0 : index
    %c0_277 = arith.constant 0 : index
    %426 = vector.load %arg8[%c0_276, %c0_277] : memref<2x128xf32, #tpu.memory_space<vmem>>, vector<2x128xf32>
    tpu.vector_store %arg8[%c0_276, %c0_277], %421 {strides = array<i32>} : memref<2x128xf32, #tpu.memory_space<vmem>>, vector<2x128xf32>,
    %c0_278 = arith.constant 0 : index
    %c0_279 = arith.constant 0 : index
    %427 = vector.load %arg9[%c0_278, %c0_279] : memref<2x128xf32, #tpu.memory_space<vmem>>, vector<2x128xf32>
    tpu.vector_store %arg9[%c0_278, %c0_279], %425 {strides = array<i32>} : memref<2x128xf32, #tpu.memory_space<vmem>>, vector<2x128xf32>,
    %428 = arith.subf %421, %425 : vector<2x128xf32>
    %429 = arith.addf %428, %10 : vector<2x128xf32>
    %c0_280 = arith.constant 0 : index
    %c0_281 = arith.constant 0 : index
    %430 = vector.load %arg10[%c0_280, %c0_281] : memref<2x128xf32, #tpu.memory_space<vmem>>, vector<2x128xf32>
    %431 = arith.addf %430, %429 : vector<2x128xf32>
    %cst_282 = arith.constant 1.000000e+00 : f32
    %432 = vector.broadcast %cst_282 : f32 to vector<2x128xf32>
    %433 = arith.cmpf ogt, %431, %432 : vector<2x128xf32>
    %cst_283 = arith.constant 0.778800785 : f32
    %434 = vector.broadcast %cst_283 : f32 to vector<2x128xf32>
    %435 = arith.mulf %431, %434 : vector<2x128xf32>
    %cst_284 = arith.constant 0.000000e+00 : f32
    %436 = vector.broadcast %cst_284 : f32 to vector<2x128xf32>
    %437 = arith.select %433, %436, %435 : vector<2x128xi1>, vector<2x128xf32>
    %c0_285 = arith.constant 0 : index
    %c0_286 = arith.constant 0 : index
    %438 = vector.load %arg10[%c0_285, %c0_286] : memref<2x128xf32, #tpu.memory_space<vmem>>, vector<2x128xf32>
    tpu.vector_store %arg10[%c0_285, %c0_286], %437 {strides = array<i32>} : memref<2x128xf32, #tpu.memory_space<vmem>>, vector<2x128xf32>,
    %439 = arith.extui %433 : vector<2x128xi1> to vector<2x128xi32>
    %440 = arith.sitofp %439 : vector<2x128xi32> to vector<2x128xf32>
    %441 = arith.truncf %440 : vector<2x128xf32> to vector<2x128xbf16>
    %c8 = arith.constant 8 : index
    %c0_287 = arith.constant 0 : index
    %c0_288 = arith.constant 0 : index
    %442 = vector.load %arg6[%c8, %c0_287, %c0_288] : memref<32x2x128xbf16, #tpu.memory_space<vmem>>, vector<1x2x128xbf16>
    %443 = vector.shape_cast %442 : vector<1x2x128xbf16> to vector<2x128xbf16>
    %444 = vector.shape_cast %441 : vector<2x128xbf16> to vector<1x2x128xbf16>
    tpu.vector_store %arg6[%c8, %c0_287, %c0_288], %444 {strides = array<i32>} : memref<32x2x128xbf16, #tpu.memory_space<vmem>>, vector<1x2x128xbf16>,
    %cst_289 = arith.constant 0.778800785 : f32
    %445 = arith.mulf %398, %cst_289 : f32
    %cst_290 = arith.constant 1.000000e+00 : f32
    %446 = arith.addf %445, %cst_290 : f32
    %cst_291 = arith.constant 0.36787945 : f32
    %447 = arith.mulf %400, %cst_291 : f32
    %cst_292 = arith.constant 1.000000e+00 : f32
    %448 = arith.addf %447, %cst_292 : f32
    %449 = arith.subf %446, %448 : f32
    %450 = vector.broadcast %449 : f32 to vector<2x512xf32>
    %451 = arith.mulf %3, %450 : vector<2x512xf32>
    %452 = arith.addf %451, %7 : vector<2x512xf32>
    %c0_293 = arith.constant 0 : index
    %c0_294 = arith.constant 0 : index
    %453 = vector.load %arg7[%c0_293, %c0_294] : memref<2x512xf32, #tpu.memory_space<vmem>>, vector<2x512xf32>
    %454 = arith.addf %453, %452 : vector<2x512xf32>
    %cst_295 = arith.constant 1.000000e+00 : f32
    %455 = vector.broadcast %cst_295 : f32 to vector<2x512xf32>
    %456 = arith.cmpf ogt, %454, %455 : vector<2x512xf32>
    %cst_296 = arith.constant 0.778800785 : f32
    %457 = vector.broadcast %cst_296 : f32 to vector<2x512xf32>
    %458 = arith.mulf %454, %457 : vector<2x512xf32>
    %cst_297 = arith.constant 0.000000e+00 : f32
    %459 = vector.broadcast %cst_297 : f32 to vector<2x512xf32>
    %460 = arith.select %456, %459, %458 : vector<2x512xi1>, vector<2x512xf32>
    %c0_298 = arith.constant 0 : index
    %c0_299 = arith.constant 0 : index
    %461 = vector.load %arg7[%c0_298, %c0_299] : memref<2x512xf32, #tpu.memory_space<vmem>>, vector<2x512xf32>
    tpu.vector_store %arg7[%c0_298, %c0_299], %460 {strides = array<i32>} : memref<2x512xf32, #tpu.memory_space<vmem>>, vector<2x512xf32>,
    %462 = arith.extui %456 : vector<2x512xi1> to vector<2x512xi32>
    %463 = arith.sitofp %462 : vector<2x512xi32> to vector<2x512xf32>
    %464 = arith.truncf %463 : vector<2x512xf32> to vector<2x512xbf16>
    %cst_300 = arith.constant dense<0.000000e+00> : vector<2x128xf32>
    %465 = tpu.matmul %464, %4, %cst_300 {dimension_numbers = #tpu.dot_dimension_numbers<[1], [0], [0], [1], [0, 0, 1, 1], [], []>} : vector<2x512xbf16>, vector<512x128xbf16>, vector<2x128xf32> -> vector<2x128xf32>
    %c0_301 = arith.constant 0 : index
    %c0_302 = arith.constant 0 : index
    %466 = vector.load %arg8[%c0_301, %c0_302] : memref<2x128xf32, #tpu.memory_space<vmem>>, vector<2x128xf32>
    %cst_303 = arith.constant 0.778800785 : f32
    %467 = vector.broadcast %cst_303 : f32 to vector<2x128xf32>
    %468 = arith.mulf %466, %467 : vector<2x128xf32>
    %469 = arith.addf %468, %465 : vector<2x128xf32>
    %c0_304 = arith.constant 0 : index
    %c0_305 = arith.constant 0 : index
    %470 = vector.load %arg9[%c0_304, %c0_305] : memref<2x128xf32, #tpu.memory_space<vmem>>, vector<2x128xf32>
    %cst_306 = arith.constant 0.36787945 : f32
    %471 = vector.broadcast %cst_306 : f32 to vector<2x128xf32>
    %472 = arith.mulf %470, %471 : vector<2x128xf32>
    %473 = arith.addf %472, %465 : vector<2x128xf32>
    %c0_307 = arith.constant 0 : index
    %c0_308 = arith.constant 0 : index
    %474 = vector.load %arg8[%c0_307, %c0_308] : memref<2x128xf32, #tpu.memory_space<vmem>>, vector<2x128xf32>
    tpu.vector_store %arg8[%c0_307, %c0_308], %469 {strides = array<i32>} : memref<2x128xf32, #tpu.memory_space<vmem>>, vector<2x128xf32>,
    %c0_309 = arith.constant 0 : index
    %c0_310 = arith.constant 0 : index
    %475 = vector.load %arg9[%c0_309, %c0_310] : memref<2x128xf32, #tpu.memory_space<vmem>>, vector<2x128xf32>
    tpu.vector_store %arg9[%c0_309, %c0_310], %473 {strides = array<i32>} : memref<2x128xf32, #tpu.memory_space<vmem>>, vector<2x128xf32>,
    %476 = arith.subf %469, %473 : vector<2x128xf32>
    %477 = arith.addf %476, %10 : vector<2x128xf32>
    %c0_311 = arith.constant 0 : index
    %c0_312 = arith.constant 0 : index
    %478 = vector.load %arg10[%c0_311, %c0_312] : memref<2x128xf32, #tpu.memory_space<vmem>>, vector<2x128xf32>
    %479 = arith.addf %478, %477 : vector<2x128xf32>
    %cst_313 = arith.constant 1.000000e+00 : f32
    %480 = vector.broadcast %cst_313 : f32 to vector<2x128xf32>
    %481 = arith.cmpf ogt, %479, %480 : vector<2x128xf32>
    %cst_314 = arith.constant 0.778800785 : f32
    %482 = vector.broadcast %cst_314 : f32 to vector<2x128xf32>
    %483 = arith.mulf %479, %482 : vector<2x128xf32>
    %cst_315 = arith.constant 0.000000e+00 : f32
    %484 = vector.broadcast %cst_315 : f32 to vector<2x128xf32>
    %485 = arith.select %481, %484, %483 : vector<2x128xi1>, vector<2x128xf32>
    %c0_316 = arith.constant 0 : index
    %c0_317 = arith.constant 0 : index
    %486 = vector.load %arg10[%c0_316, %c0_317] : memref<2x128xf32, #tpu.memory_space<vmem>>, vector<2x128xf32>
    tpu.vector_store %arg10[%c0_316, %c0_317], %485 {strides = array<i32>} : memref<2x128xf32, #tpu.memory_space<vmem>>, vector<2x128xf32>,
    %487 = arith.extui %481 : vector<2x128xi1> to vector<2x128xi32>
    %488 = arith.sitofp %487 : vector<2x128xi32> to vector<2x128xf32>
    %489 = arith.truncf %488 : vector<2x128xf32> to vector<2x128xbf16>
    %c9 = arith.constant 9 : index
    %c0_318 = arith.constant 0 : index
    %c0_319 = arith.constant 0 : index
    %490 = vector.load %arg6[%c9, %c0_318, %c0_319] : memref<32x2x128xbf16, #tpu.memory_space<vmem>>, vector<1x2x128xbf16>
    %491 = vector.shape_cast %490 : vector<1x2x128xbf16> to vector<2x128xbf16>
    %492 = vector.shape_cast %489 : vector<2x128xbf16> to vector<1x2x128xbf16>
    tpu.vector_store %arg6[%c9, %c0_318, %c0_319], %492 {strides = array<i32>} : memref<32x2x128xbf16, #tpu.memory_space<vmem>>, vector<1x2x128xbf16>,
    %cst_320 = arith.constant 0.778800785 : f32
    %493 = arith.mulf %446, %cst_320 : f32
    %cst_321 = arith.constant 1.000000e+00 : f32
    %494 = arith.addf %493, %cst_321 : f32
    %cst_322 = arith.constant 0.36787945 : f32
    %495 = arith.mulf %448, %cst_322 : f32
    %cst_323 = arith.constant 1.000000e+00 : f32
    %496 = arith.addf %495, %cst_323 : f32
    %497 = arith.subf %494, %496 : f32
    %498 = vector.broadcast %497 : f32 to vector<2x512xf32>
    %499 = arith.mulf %3, %498 : vector<2x512xf32>
    %500 = arith.addf %499, %7 : vector<2x512xf32>
    %c0_324 = arith.constant 0 : index
    %c0_325 = arith.constant 0 : index
    %501 = vector.load %arg7[%c0_324, %c0_325] : memref<2x512xf32, #tpu.memory_space<vmem>>, vector<2x512xf32>
    %502 = arith.addf %501, %500 : vector<2x512xf32>
    %cst_326 = arith.constant 1.000000e+00 : f32
    %503 = vector.broadcast %cst_326 : f32 to vector<2x512xf32>
    %504 = arith.cmpf ogt, %502, %503 : vector<2x512xf32>
    %cst_327 = arith.constant 0.778800785 : f32
    %505 = vector.broadcast %cst_327 : f32 to vector<2x512xf32>
    %506 = arith.mulf %502, %505 : vector<2x512xf32>
    %cst_328 = arith.constant 0.000000e+00 : f32
    %507 = vector.broadcast %cst_328 : f32 to vector<2x512xf32>
    %508 = arith.select %504, %507, %506 : vector<2x512xi1>, vector<2x512xf32>
    %c0_329 = arith.constant 0 : index
    %c0_330 = arith.constant 0 : index
    %509 = vector.load %arg7[%c0_329, %c0_330] : memref<2x512xf32, #tpu.memory_space<vmem>>, vector<2x512xf32>
    tpu.vector_store %arg7[%c0_329, %c0_330], %508 {strides = array<i32>} : memref<2x512xf32, #tpu.memory_space<vmem>>, vector<2x512xf32>,
    %510 = arith.extui %504 : vector<2x512xi1> to vector<2x512xi32>
    %511 = arith.sitofp %510 : vector<2x512xi32> to vector<2x512xf32>
    %512 = arith.truncf %511 : vector<2x512xf32> to vector<2x512xbf16>
    %cst_331 = arith.constant dense<0.000000e+00> : vector<2x128xf32>
    %513 = tpu.matmul %512, %4, %cst_331 {dimension_numbers = #tpu.dot_dimension_numbers<[1], [0], [0], [1], [0, 0, 1, 1], [], []>} : vector<2x512xbf16>, vector<512x128xbf16>, vector<2x128xf32> -> vector<2x128xf32>
    %c0_332 = arith.constant 0 : index
    %c0_333 = arith.constant 0 : index
    %514 = vector.load %arg8[%c0_332, %c0_333] : memref<2x128xf32, #tpu.memory_space<vmem>>, vector<2x128xf32>
    %cst_334 = arith.constant 0.778800785 : f32
    %515 = vector.broadcast %cst_334 : f32 to vector<2x128xf32>
    %516 = arith.mulf %514, %515 : vector<2x128xf32>
    %517 = arith.addf %516, %513 : vector<2x128xf32>
    %c0_335 = arith.constant 0 : index
    %c0_336 = arith.constant 0 : index
    %518 = vector.load %arg9[%c0_335, %c0_336] : memref<2x128xf32, #tpu.memory_space<vmem>>, vector<2x128xf32>
    %cst_337 = arith.constant 0.36787945 : f32
    %519 = vector.broadcast %cst_337 : f32 to vector<2x128xf32>
    %520 = arith.mulf %518, %519 : vector<2x128xf32>
    %521 = arith.addf %520, %513 : vector<2x128xf32>
    %c0_338 = arith.constant 0 : index
    %c0_339 = arith.constant 0 : index
    %522 = vector.load %arg8[%c0_338, %c0_339] : memref<2x128xf32, #tpu.memory_space<vmem>>, vector<2x128xf32>
    tpu.vector_store %arg8[%c0_338, %c0_339], %517 {strides = array<i32>} : memref<2x128xf32, #tpu.memory_space<vmem>>, vector<2x128xf32>,
    %c0_340 = arith.constant 0 : index
    %c0_341 = arith.constant 0 : index
    %523 = vector.load %arg9[%c0_340, %c0_341] : memref<2x128xf32, #tpu.memory_space<vmem>>, vector<2x128xf32>
    tpu.vector_store %arg9[%c0_340, %c0_341], %521 {strides = array<i32>} : memref<2x128xf32, #tpu.memory_space<vmem>>, vector<2x128xf32>,
    %524 = arith.subf %517, %521 : vector<2x128xf32>
    %525 = arith.addf %524, %10 : vector<2x128xf32>
    %c0_342 = arith.constant 0 : index
    %c0_343 = arith.constant 0 : index
    %526 = vector.load %arg10[%c0_342, %c0_343] : memref<2x128xf32, #tpu.memory_space<vmem>>, vector<2x128xf32>
    %527 = arith.addf %526, %525 : vector<2x128xf32>
    %cst_344 = arith.constant 1.000000e+00 : f32
    %528 = vector.broadcast %cst_344 : f32 to vector<2x128xf32>
    %529 = arith.cmpf ogt, %527, %528 : vector<2x128xf32>
    %cst_345 = arith.constant 0.778800785 : f32
    %530 = vector.broadcast %cst_345 : f32 to vector<2x128xf32>
    %531 = arith.mulf %527, %530 : vector<2x128xf32>
    %cst_346 = arith.constant 0.000000e+00 : f32
    %532 = vector.broadcast %cst_346 : f32 to vector<2x128xf32>
    %533 = arith.select %529, %532, %531 : vector<2x128xi1>, vector<2x128xf32>
    %c0_347 = arith.constant 0 : index
    %c0_348 = arith.constant 0 : index
    %534 = vector.load %arg10[%c0_347, %c0_348] : memref<2x128xf32, #tpu.memory_space<vmem>>, vector<2x128xf32>
    tpu.vector_store %arg10[%c0_347, %c0_348], %533 {strides = array<i32>} : memref<2x128xf32, #tpu.memory_space<vmem>>, vector<2x128xf32>,
    %535 = arith.extui %529 : vector<2x128xi1> to vector<2x128xi32>
    %536 = arith.sitofp %535 : vector<2x128xi32> to vector<2x128xf32>
    %537 = arith.truncf %536 : vector<2x128xf32> to vector<2x128xbf16>
    %c10 = arith.constant 10 : index
    %c0_349 = arith.constant 0 : index
    %c0_350 = arith.constant 0 : index
    %538 = vector.load %arg6[%c10, %c0_349, %c0_350] : memref<32x2x128xbf16, #tpu.memory_space<vmem>>, vector<1x2x128xbf16>
    %539 = vector.shape_cast %538 : vector<1x2x128xbf16> to vector<2x128xbf16>
    %540 = vector.shape_cast %537 : vector<2x128xbf16> to vector<1x2x128xbf16>
    tpu.vector_store %arg6[%c10, %c0_349, %c0_350], %540 {strides = array<i32>} : memref<32x2x128xbf16, #tpu.memory_space<vmem>>, vector<1x2x128xbf16>,
    %cst_351 = arith.constant 0.778800785 : f32
    %541 = arith.mulf %494, %cst_351 : f32
    %cst_352 = arith.constant 1.000000e+00 : f32
    %542 = arith.addf %541, %cst_352 : f32
    %cst_353 = arith.constant 0.36787945 : f32
    %543 = arith.mulf %496, %cst_353 : f32
    %cst_354 = arith.constant 1.000000e+00 : f32
    %544 = arith.addf %543, %cst_354 : f32
    %545 = arith.subf %542, %544 : f32
    %546 = vector.broadcast %545 : f32 to vector<2x512xf32>
    %547 = arith.mulf %3, %546 : vector<2x512xf32>
    %548 = arith.addf %547, %7 : vector<2x512xf32>
    %c0_355 = arith.constant 0 : index
    %c0_356 = arith.constant 0 : index
    %549 = vector.load %arg7[%c0_355, %c0_356] : memref<2x512xf32, #tpu.memory_space<vmem>>, vector<2x512xf32>
    %550 = arith.addf %549, %548 : vector<2x512xf32>
    %cst_357 = arith.constant 1.000000e+00 : f32
    %551 = vector.broadcast %cst_357 : f32 to vector<2x512xf32>
    %552 = arith.cmpf ogt, %550, %551 : vector<2x512xf32>
    %cst_358 = arith.constant 0.778800785 : f32
    %553 = vector.broadcast %cst_358 : f32 to vector<2x512xf32>
    %554 = arith.mulf %550, %553 : vector<2x512xf32>
    %cst_359 = arith.constant 0.000000e+00 : f32
    %555 = vector.broadcast %cst_359 : f32 to vector<2x512xf32>
    %556 = arith.select %552, %555, %554 : vector<2x512xi1>, vector<2x512xf32>
    %c0_360 = arith.constant 0 : index
    %c0_361 = arith.constant 0 : index
    %557 = vector.load %arg7[%c0_360, %c0_361] : memref<2x512xf32, #tpu.memory_space<vmem>>, vector<2x512xf32>
    tpu.vector_store %arg7[%c0_360, %c0_361], %556 {strides = array<i32>} : memref<2x512xf32, #tpu.memory_space<vmem>>, vector<2x512xf32>,
    %558 = arith.extui %552 : vector<2x512xi1> to vector<2x512xi32>
    %559 = arith.sitofp %558 : vector<2x512xi32> to vector<2x512xf32>
    %560 = arith.truncf %559 : vector<2x512xf32> to vector<2x512xbf16>
    %cst_362 = arith.constant dense<0.000000e+00> : vector<2x128xf32>
    %561 = tpu.matmul %560, %4, %cst_362 {dimension_numbers = #tpu.dot_dimension_numbers<[1], [0], [0], [1], [0, 0, 1, 1], [], []>} : vector<2x512xbf16>, vector<512x128xbf16>, vector<2x128xf32> -> vector<2x128xf32>
    %c0_363 = arith.constant 0 : index
    %c0_364 = arith.constant 0 : index
    %562 = vector.load %arg8[%c0_363, %c0_364] : memref<2x128xf32, #tpu.memory_space<vmem>>, vector<2x128xf32>
    %cst_365 = arith.constant 0.778800785 : f32
    %563 = vector.broadcast %cst_365 : f32 to vector<2x128xf32>
    %564 = arith.mulf %562, %563 : vector<2x128xf32>
    %565 = arith.addf %564, %561 : vector<2x128xf32>
    %c0_366 = arith.constant 0 : index
    %c0_367 = arith.constant 0 : index
    %566 = vector.load %arg9[%c0_366, %c0_367] : memref<2x128xf32, #tpu.memory_space<vmem>>, vector<2x128xf32>
    %cst_368 = arith.constant 0.36787945 : f32
    %567 = vector.broadcast %cst_368 : f32 to vector<2x128xf32>
    %568 = arith.mulf %566, %567 : vector<2x128xf32>
    %569 = arith.addf %568, %561 : vector<2x128xf32>
    %c0_369 = arith.constant 0 : index
    %c0_370 = arith.constant 0 : index
    %570 = vector.load %arg8[%c0_369, %c0_370] : memref<2x128xf32, #tpu.memory_space<vmem>>, vector<2x128xf32>
    tpu.vector_store %arg8[%c0_369, %c0_370], %565 {strides = array<i32>} : memref<2x128xf32, #tpu.memory_space<vmem>>, vector<2x128xf32>,
    %c0_371 = arith.constant 0 : index
    %c0_372 = arith.constant 0 : index
    %571 = vector.load %arg9[%c0_371, %c0_372] : memref<2x128xf32, #tpu.memory_space<vmem>>, vector<2x128xf32>
    tpu.vector_store %arg9[%c0_371, %c0_372], %569 {strides = array<i32>} : memref<2x128xf32, #tpu.memory_space<vmem>>, vector<2x128xf32>,
    %572 = arith.subf %565, %569 : vector<2x128xf32>
    %573 = arith.addf %572, %10 : vector<2x128xf32>
    %c0_373 = arith.constant 0 : index
    %c0_374 = arith.constant 0 : index
    %574 = vector.load %arg10[%c0_373, %c0_374] : memref<2x128xf32, #tpu.memory_space<vmem>>, vector<2x128xf32>
    %575 = arith.addf %574, %573 : vector<2x128xf32>
    %cst_375 = arith.constant 1.000000e+00 : f32
    %576 = vector.broadcast %cst_375 : f32 to vector<2x128xf32>
    %577 = arith.cmpf ogt, %575, %576 : vector<2x128xf32>
    %cst_376 = arith.constant 0.778800785 : f32
    %578 = vector.broadcast %cst_376 : f32 to vector<2x128xf32>
    %579 = arith.mulf %575, %578 : vector<2x128xf32>
    %cst_377 = arith.constant 0.000000e+00 : f32
    %580 = vector.broadcast %cst_377 : f32 to vector<2x128xf32>
    %581 = arith.select %577, %580, %579 : vector<2x128xi1>, vector<2x128xf32>
    %c0_378 = arith.constant 0 : index
    %c0_379 = arith.constant 0 : index
    %582 = vector.load %arg10[%c0_378, %c0_379] : memref<2x128xf32, #tpu.memory_space<vmem>>, vector<2x128xf32>
    tpu.vector_store %arg10[%c0_378, %c0_379], %581 {strides = array<i32>} : memref<2x128xf32, #tpu.memory_space<vmem>>, vector<2x128xf32>,
    %583 = arith.extui %577 : vector<2x128xi1> to vector<2x128xi32>
    %584 = arith.sitofp %583 : vector<2x128xi32> to vector<2x128xf32>
    %585 = arith.truncf %584 : vector<2x128xf32> to vector<2x128xbf16>
    %c11 = arith.constant 11 : index
    %c0_380 = arith.constant 0 : index
    %c0_381 = arith.constant 0 : index
    %586 = vector.load %arg6[%c11, %c0_380, %c0_381] : memref<32x2x128xbf16, #tpu.memory_space<vmem>>, vector<1x2x128xbf16>
    %587 = vector.shape_cast %586 : vector<1x2x128xbf16> to vector<2x128xbf16>
    %588 = vector.shape_cast %585 : vector<2x128xbf16> to vector<1x2x128xbf16>
    tpu.vector_store %arg6[%c11, %c0_380, %c0_381], %588 {strides = array<i32>} : memref<32x2x128xbf16, #tpu.memory_space<vmem>>, vector<1x2x128xbf16>,
    %cst_382 = arith.constant 0.778800785 : f32
    %589 = arith.mulf %542, %cst_382 : f32
    %cst_383 = arith.constant 1.000000e+00 : f32
    %590 = arith.addf %589, %cst_383 : f32
    %cst_384 = arith.constant 0.36787945 : f32
    %591 = arith.mulf %544, %cst_384 : f32
    %cst_385 = arith.constant 1.000000e+00 : f32
    %592 = arith.addf %591, %cst_385 : f32
    %593 = arith.subf %590, %592 : f32
    %594 = vector.broadcast %593 : f32 to vector<2x512xf32>
    %595 = arith.mulf %3, %594 : vector<2x512xf32>
    %596 = arith.addf %595, %7 : vector<2x512xf32>
    %c0_386 = arith.constant 0 : index
    %c0_387 = arith.constant 0 : index
    %597 = vector.load %arg7[%c0_386, %c0_387] : memref<2x512xf32, #tpu.memory_space<vmem>>, vector<2x512xf32>
    %598 = arith.addf %597, %596 : vector<2x512xf32>
    %cst_388 = arith.constant 1.000000e+00 : f32
    %599 = vector.broadcast %cst_388 : f32 to vector<2x512xf32>
    %600 = arith.cmpf ogt, %598, %599 : vector<2x512xf32>
    %cst_389 = arith.constant 0.778800785 : f32
    %601 = vector.broadcast %cst_389 : f32 to vector<2x512xf32>
    %602 = arith.mulf %598, %601 : vector<2x512xf32>
    %cst_390 = arith.constant 0.000000e+00 : f32
    %603 = vector.broadcast %cst_390 : f32 to vector<2x512xf32>
    %604 = arith.select %600, %603, %602 : vector<2x512xi1>, vector<2x512xf32>
    %c0_391 = arith.constant 0 : index
    %c0_392 = arith.constant 0 : index
    %605 = vector.load %arg7[%c0_391, %c0_392] : memref<2x512xf32, #tpu.memory_space<vmem>>, vector<2x512xf32>
    tpu.vector_store %arg7[%c0_391, %c0_392], %604 {strides = array<i32>} : memref<2x512xf32, #tpu.memory_space<vmem>>, vector<2x512xf32>,
    %606 = arith.extui %600 : vector<2x512xi1> to vector<2x512xi32>
    %607 = arith.sitofp %606 : vector<2x512xi32> to vector<2x512xf32>
    %608 = arith.truncf %607 : vector<2x512xf32> to vector<2x512xbf16>
    %cst_393 = arith.constant dense<0.000000e+00> : vector<2x128xf32>
    %609 = tpu.matmul %608, %4, %cst_393 {dimension_numbers = #tpu.dot_dimension_numbers<[1], [0], [0], [1], [0, 0, 1, 1], [], []>} : vector<2x512xbf16>, vector<512x128xbf16>, vector<2x128xf32> -> vector<2x128xf32>
    %c0_394 = arith.constant 0 : index
    %c0_395 = arith.constant 0 : index
    %610 = vector.load %arg8[%c0_394, %c0_395] : memref<2x128xf32, #tpu.memory_space<vmem>>, vector<2x128xf32>
    %cst_396 = arith.constant 0.778800785 : f32
    %611 = vector.broadcast %cst_396 : f32 to vector<2x128xf32>
    %612 = arith.mulf %610, %611 : vector<2x128xf32>
    %613 = arith.addf %612, %609 : vector<2x128xf32>
    %c0_397 = arith.constant 0 : index
    %c0_398 = arith.constant 0 : index
    %614 = vector.load %arg9[%c0_397, %c0_398] : memref<2x128xf32, #tpu.memory_space<vmem>>, vector<2x128xf32>
    %cst_399 = arith.constant 0.36787945 : f32
    %615 = vector.broadcast %cst_399 : f32 to vector<2x128xf32>
    %616 = arith.mulf %614, %615 : vector<2x128xf32>
    %617 = arith.addf %616, %609 : vector<2x128xf32>
    %c0_400 = arith.constant 0 : index
    %c0_401 = arith.constant 0 : index
    %618 = vector.load %arg8[%c0_400, %c0_401] : memref<2x128xf32, #tpu.memory_space<vmem>>, vector<2x128xf32>
    tpu.vector_store %arg8[%c0_400, %c0_401], %613 {strides = array<i32>} : memref<2x128xf32, #tpu.memory_space<vmem>>, vector<2x128xf32>,
    %c0_402 = arith.constant 0 : index
    %c0_403 = arith.constant 0 : index
    %619 = vector.load %arg9[%c0_402, %c0_403] : memref<2x128xf32, #tpu.memory_space<vmem>>, vector<2x128xf32>
    tpu.vector_store %arg9[%c0_402, %c0_403], %617 {strides = array<i32>} : memref<2x128xf32, #tpu.memory_space<vmem>>, vector<2x128xf32>,
    %620 = arith.subf %613, %617 : vector<2x128xf32>
    %621 = arith.addf %620, %10 : vector<2x128xf32>
    %c0_404 = arith.constant 0 : index
    %c0_405 = arith.constant 0 : index
    %622 = vector.load %arg10[%c0_404, %c0_405] : memref<2x128xf32, #tpu.memory_space<vmem>>, vector<2x128xf32>
    %623 = arith.addf %622, %621 : vector<2x128xf32>
    %cst_406 = arith.constant 1.000000e+00 : f32
    %624 = vector.broadcast %cst_406 : f32 to vector<2x128xf32>
    %625 = arith.cmpf ogt, %623, %624 : vector<2x128xf32>
    %cst_407 = arith.constant 0.778800785 : f32
    %626 = vector.broadcast %cst_407 : f32 to vector<2x128xf32>
    %627 = arith.mulf %623, %626 : vector<2x128xf32>
    %cst_408 = arith.constant 0.000000e+00 : f32
    %628 = vector.broadcast %cst_408 : f32 to vector<2x128xf32>
    %629 = arith.select %625, %628, %627 : vector<2x128xi1>, vector<2x128xf32>
    %c0_409 = arith.constant 0 : index
    %c0_410 = arith.constant 0 : index
    %630 = vector.load %arg10[%c0_409, %c0_410] : memref<2x128xf32, #tpu.memory_space<vmem>>, vector<2x128xf32>
    tpu.vector_store %arg10[%c0_409, %c0_410], %629 {strides = array<i32>} : memref<2x128xf32, #tpu.memory_space<vmem>>, vector<2x128xf32>,
    %631 = arith.extui %625 : vector<2x128xi1> to vector<2x128xi32>
    %632 = arith.sitofp %631 : vector<2x128xi32> to vector<2x128xf32>
    %633 = arith.truncf %632 : vector<2x128xf32> to vector<2x128xbf16>
    %c12 = arith.constant 12 : index
    %c0_411 = arith.constant 0 : index
    %c0_412 = arith.constant 0 : index
    %634 = vector.load %arg6[%c12, %c0_411, %c0_412] : memref<32x2x128xbf16, #tpu.memory_space<vmem>>, vector<1x2x128xbf16>
    %635 = vector.shape_cast %634 : vector<1x2x128xbf16> to vector<2x128xbf16>
    %636 = vector.shape_cast %633 : vector<2x128xbf16> to vector<1x2x128xbf16>
    tpu.vector_store %arg6[%c12, %c0_411, %c0_412], %636 {strides = array<i32>} : memref<32x2x128xbf16, #tpu.memory_space<vmem>>, vector<1x2x128xbf16>,
    %cst_413 = arith.constant 0.778800785 : f32
    %637 = arith.mulf %590, %cst_413 : f32
    %cst_414 = arith.constant 1.000000e+00 : f32
    %638 = arith.addf %637, %cst_414 : f32
    %cst_415 = arith.constant 0.36787945 : f32
    %639 = arith.mulf %592, %cst_415 : f32
    %cst_416 = arith.constant 1.000000e+00 : f32
    %640 = arith.addf %639, %cst_416 : f32
    %641 = arith.subf %638, %640 : f32
    %642 = vector.broadcast %641 : f32 to vector<2x512xf32>
    %643 = arith.mulf %3, %642 : vector<2x512xf32>
    %644 = arith.addf %643, %7 : vector<2x512xf32>
    %c0_417 = arith.constant 0 : index
    %c0_418 = arith.constant 0 : index
    %645 = vector.load %arg7[%c0_417, %c0_418] : memref<2x512xf32, #tpu.memory_space<vmem>>, vector<2x512xf32>
    %646 = arith.addf %645, %644 : vector<2x512xf32>
    %cst_419 = arith.constant 1.000000e+00 : f32
    %647 = vector.broadcast %cst_419 : f32 to vector<2x512xf32>
    %648 = arith.cmpf ogt, %646, %647 : vector<2x512xf32>
    %cst_420 = arith.constant 0.778800785 : f32
    %649 = vector.broadcast %cst_420 : f32 to vector<2x512xf32>
    %650 = arith.mulf %646, %649 : vector<2x512xf32>
    %cst_421 = arith.constant 0.000000e+00 : f32
    %651 = vector.broadcast %cst_421 : f32 to vector<2x512xf32>
    %652 = arith.select %648, %651, %650 : vector<2x512xi1>, vector<2x512xf32>
    %c0_422 = arith.constant 0 : index
    %c0_423 = arith.constant 0 : index
    %653 = vector.load %arg7[%c0_422, %c0_423] : memref<2x512xf32, #tpu.memory_space<vmem>>, vector<2x512xf32>
    tpu.vector_store %arg7[%c0_422, %c0_423], %652 {strides = array<i32>} : memref<2x512xf32, #tpu.memory_space<vmem>>, vector<2x512xf32>,
    %654 = arith.extui %648 : vector<2x512xi1> to vector<2x512xi32>
    %655 = arith.sitofp %654 : vector<2x512xi32> to vector<2x512xf32>
    %656 = arith.truncf %655 : vector<2x512xf32> to vector<2x512xbf16>
    %cst_424 = arith.constant dense<0.000000e+00> : vector<2x128xf32>
    %657 = tpu.matmul %656, %4, %cst_424 {dimension_numbers = #tpu.dot_dimension_numbers<[1], [0], [0], [1], [0, 0, 1, 1], [], []>} : vector<2x512xbf16>, vector<512x128xbf16>, vector<2x128xf32> -> vector<2x128xf32>
    %c0_425 = arith.constant 0 : index
    %c0_426 = arith.constant 0 : index
    %658 = vector.load %arg8[%c0_425, %c0_426] : memref<2x128xf32, #tpu.memory_space<vmem>>, vector<2x128xf32>
    %cst_427 = arith.constant 0.778800785 : f32
    %659 = vector.broadcast %cst_427 : f32 to vector<2x128xf32>
    %660 = arith.mulf %658, %659 : vector<2x128xf32>
    %661 = arith.addf %660, %657 : vector<2x128xf32>
    %c0_428 = arith.constant 0 : index
    %c0_429 = arith.constant 0 : index
    %662 = vector.load %arg9[%c0_428, %c0_429] : memref<2x128xf32, #tpu.memory_space<vmem>>, vector<2x128xf32>
    %cst_430 = arith.constant 0.36787945 : f32
    %663 = vector.broadcast %cst_430 : f32 to vector<2x128xf32>
    %664 = arith.mulf %662, %663 : vector<2x128xf32>
    %665 = arith.addf %664, %657 : vector<2x128xf32>
    %c0_431 = arith.constant 0 : index
    %c0_432 = arith.constant 0 : index
    %666 = vector.load %arg8[%c0_431, %c0_432] : memref<2x128xf32, #tpu.memory_space<vmem>>, vector<2x128xf32>
    tpu.vector_store %arg8[%c0_431, %c0_432], %661 {strides = array<i32>} : memref<2x128xf32, #tpu.memory_space<vmem>>, vector<2x128xf32>,
    %c0_433 = arith.constant 0 : index
    %c0_434 = arith.constant 0 : index
    %667 = vector.load %arg9[%c0_433, %c0_434] : memref<2x128xf32, #tpu.memory_space<vmem>>, vector<2x128xf32>
    tpu.vector_store %arg9[%c0_433, %c0_434], %665 {strides = array<i32>} : memref<2x128xf32, #tpu.memory_space<vmem>>, vector<2x128xf32>,
    %668 = arith.subf %661, %665 : vector<2x128xf32>
    %669 = arith.addf %668, %10 : vector<2x128xf32>
    %c0_435 = arith.constant 0 : index
    %c0_436 = arith.constant 0 : index
    %670 = vector.load %arg10[%c0_435, %c0_436] : memref<2x128xf32, #tpu.memory_space<vmem>>, vector<2x128xf32>
    %671 = arith.addf %670, %669 : vector<2x128xf32>
    %cst_437 = arith.constant 1.000000e+00 : f32
    %672 = vector.broadcast %cst_437 : f32 to vector<2x128xf32>
    %673 = arith.cmpf ogt, %671, %672 : vector<2x128xf32>
    %cst_438 = arith.constant 0.778800785 : f32
    %674 = vector.broadcast %cst_438 : f32 to vector<2x128xf32>
    %675 = arith.mulf %671, %674 : vector<2x128xf32>
    %cst_439 = arith.constant 0.000000e+00 : f32
    %676 = vector.broadcast %cst_439 : f32 to vector<2x128xf32>
    %677 = arith.select %673, %676, %675 : vector<2x128xi1>, vector<2x128xf32>
    %c0_440 = arith.constant 0 : index
    %c0_441 = arith.constant 0 : index
    %678 = vector.load %arg10[%c0_440, %c0_441] : memref<2x128xf32, #tpu.memory_space<vmem>>, vector<2x128xf32>
    tpu.vector_store %arg10[%c0_440, %c0_441], %677 {strides = array<i32>} : memref<2x128xf32, #tpu.memory_space<vmem>>, vector<2x128xf32>,
    %679 = arith.extui %673 : vector<2x128xi1> to vector<2x128xi32>
    %680 = arith.sitofp %679 : vector<2x128xi32> to vector<2x128xf32>
    %681 = arith.truncf %680 : vector<2x128xf32> to vector<2x128xbf16>
    %c13 = arith.constant 13 : index
    %c0_442 = arith.constant 0 : index
    %c0_443 = arith.constant 0 : index
    %682 = vector.load %arg6[%c13, %c0_442, %c0_443] : memref<32x2x128xbf16, #tpu.memory_space<vmem>>, vector<1x2x128xbf16>
    %683 = vector.shape_cast %682 : vector<1x2x128xbf16> to vector<2x128xbf16>
    %684 = vector.shape_cast %681 : vector<2x128xbf16> to vector<1x2x128xbf16>
    tpu.vector_store %arg6[%c13, %c0_442, %c0_443], %684 {strides = array<i32>} : memref<32x2x128xbf16, #tpu.memory_space<vmem>>, vector<1x2x128xbf16>,
    %cst_444 = arith.constant 0.778800785 : f32
    %685 = arith.mulf %638, %cst_444 : f32
    %cst_445 = arith.constant 1.000000e+00 : f32
    %686 = arith.addf %685, %cst_445 : f32
    %cst_446 = arith.constant 0.36787945 : f32
    %687 = arith.mulf %640, %cst_446 : f32
    %cst_447 = arith.constant 1.000000e+00 : f32
    %688 = arith.addf %687, %cst_447 : f32
    %689 = arith.subf %686, %688 : f32
    %690 = vector.broadcast %689 : f32 to vector<2x512xf32>
    %691 = arith.mulf %3, %690 : vector<2x512xf32>
    %692 = arith.addf %691, %7 : vector<2x512xf32>
    %c0_448 = arith.constant 0 : index
    %c0_449 = arith.constant 0 : index
    %693 = vector.load %arg7[%c0_448, %c0_449] : memref<2x512xf32, #tpu.memory_space<vmem>>, vector<2x512xf32>
    %694 = arith.addf %693, %692 : vector<2x512xf32>
    %cst_450 = arith.constant 1.000000e+00 : f32
    %695 = vector.broadcast %cst_450 : f32 to vector<2x512xf32>
    %696 = arith.cmpf ogt, %694, %695 : vector<2x512xf32>
    %cst_451 = arith.constant 0.778800785 : f32
    %697 = vector.broadcast %cst_451 : f32 to vector<2x512xf32>
    %698 = arith.mulf %694, %697 : vector<2x512xf32>
    %cst_452 = arith.constant 0.000000e+00 : f32
    %699 = vector.broadcast %cst_452 : f32 to vector<2x512xf32>
    %700 = arith.select %696, %699, %698 : vector<2x512xi1>, vector<2x512xf32>
    %c0_453 = arith.constant 0 : index
    %c0_454 = arith.constant 0 : index
    %701 = vector.load %arg7[%c0_453, %c0_454] : memref<2x512xf32, #tpu.memory_space<vmem>>, vector<2x512xf32>
    tpu.vector_store %arg7[%c0_453, %c0_454], %700 {strides = array<i32>} : memref<2x512xf32, #tpu.memory_space<vmem>>, vector<2x512xf32>,
    %702 = arith.extui %696 : vector<2x512xi1> to vector<2x512xi32>
    %703 = arith.sitofp %702 : vector<2x512xi32> to vector<2x512xf32>
    %704 = arith.truncf %703 : vector<2x512xf32> to vector<2x512xbf16>
    %cst_455 = arith.constant dense<0.000000e+00> : vector<2x128xf32>
    %705 = tpu.matmul %704, %4, %cst_455 {dimension_numbers = #tpu.dot_dimension_numbers<[1], [0], [0], [1], [0, 0, 1, 1], [], []>} : vector<2x512xbf16>, vector<512x128xbf16>, vector<2x128xf32> -> vector<2x128xf32>
    %c0_456 = arith.constant 0 : index
    %c0_457 = arith.constant 0 : index
    %706 = vector.load %arg8[%c0_456, %c0_457] : memref<2x128xf32, #tpu.memory_space<vmem>>, vector<2x128xf32>
    %cst_458 = arith.constant 0.778800785 : f32
    %707 = vector.broadcast %cst_458 : f32 to vector<2x128xf32>
    %708 = arith.mulf %706, %707 : vector<2x128xf32>
    %709 = arith.addf %708, %705 : vector<2x128xf32>
    %c0_459 = arith.constant 0 : index
    %c0_460 = arith.constant 0 : index
    %710 = vector.load %arg9[%c0_459, %c0_460] : memref<2x128xf32, #tpu.memory_space<vmem>>, vector<2x128xf32>
    %cst_461 = arith.constant 0.36787945 : f32
    %711 = vector.broadcast %cst_461 : f32 to vector<2x128xf32>
    %712 = arith.mulf %710, %711 : vector<2x128xf32>
    %713 = arith.addf %712, %705 : vector<2x128xf32>
    %c0_462 = arith.constant 0 : index
    %c0_463 = arith.constant 0 : index
    %714 = vector.load %arg8[%c0_462, %c0_463] : memref<2x128xf32, #tpu.memory_space<vmem>>, vector<2x128xf32>
    tpu.vector_store %arg8[%c0_462, %c0_463], %709 {strides = array<i32>} : memref<2x128xf32, #tpu.memory_space<vmem>>, vector<2x128xf32>,
    %c0_464 = arith.constant 0 : index
    %c0_465 = arith.constant 0 : index
    %715 = vector.load %arg9[%c0_464, %c0_465] : memref<2x128xf32, #tpu.memory_space<vmem>>, vector<2x128xf32>
    tpu.vector_store %arg9[%c0_464, %c0_465], %713 {strides = array<i32>} : memref<2x128xf32, #tpu.memory_space<vmem>>, vector<2x128xf32>,
    %716 = arith.subf %709, %713 : vector<2x128xf32>
    %717 = arith.addf %716, %10 : vector<2x128xf32>
    %c0_466 = arith.constant 0 : index
    %c0_467 = arith.constant 0 : index
    %718 = vector.load %arg10[%c0_466, %c0_467] : memref<2x128xf32, #tpu.memory_space<vmem>>, vector<2x128xf32>
    %719 = arith.addf %718, %717 : vector<2x128xf32>
    %cst_468 = arith.constant 1.000000e+00 : f32
    %720 = vector.broadcast %cst_468 : f32 to vector<2x128xf32>
    %721 = arith.cmpf ogt, %719, %720 : vector<2x128xf32>
    %cst_469 = arith.constant 0.778800785 : f32
    %722 = vector.broadcast %cst_469 : f32 to vector<2x128xf32>
    %723 = arith.mulf %719, %722 : vector<2x128xf32>
    %cst_470 = arith.constant 0.000000e+00 : f32
    %724 = vector.broadcast %cst_470 : f32 to vector<2x128xf32>
    %725 = arith.select %721, %724, %723 : vector<2x128xi1>, vector<2x128xf32>
    %c0_471 = arith.constant 0 : index
    %c0_472 = arith.constant 0 : index
    %726 = vector.load %arg10[%c0_471, %c0_472] : memref<2x128xf32, #tpu.memory_space<vmem>>, vector<2x128xf32>
    tpu.vector_store %arg10[%c0_471, %c0_472], %725 {strides = array<i32>} : memref<2x128xf32, #tpu.memory_space<vmem>>, vector<2x128xf32>,
    %727 = arith.extui %721 : vector<2x128xi1> to vector<2x128xi32>
    %728 = arith.sitofp %727 : vector<2x128xi32> to vector<2x128xf32>
    %729 = arith.truncf %728 : vector<2x128xf32> to vector<2x128xbf16>
    %c14 = arith.constant 14 : index
    %c0_473 = arith.constant 0 : index
    %c0_474 = arith.constant 0 : index
    %730 = vector.load %arg6[%c14, %c0_473, %c0_474] : memref<32x2x128xbf16, #tpu.memory_space<vmem>>, vector<1x2x128xbf16>
    %731 = vector.shape_cast %730 : vector<1x2x128xbf16> to vector<2x128xbf16>
    %732 = vector.shape_cast %729 : vector<2x128xbf16> to vector<1x2x128xbf16>
    tpu.vector_store %arg6[%c14, %c0_473, %c0_474], %732 {strides = array<i32>} : memref<32x2x128xbf16, #tpu.memory_space<vmem>>, vector<1x2x128xbf16>,
    %cst_475 = arith.constant 0.778800785 : f32
    %733 = arith.mulf %686, %cst_475 : f32
    %cst_476 = arith.constant 1.000000e+00 : f32
    %734 = arith.addf %733, %cst_476 : f32
    %cst_477 = arith.constant 0.36787945 : f32
    %735 = arith.mulf %688, %cst_477 : f32
    %cst_478 = arith.constant 1.000000e+00 : f32
    %736 = arith.addf %735, %cst_478 : f32
    %737 = arith.subf %734, %736 : f32
    %738 = vector.broadcast %737 : f32 to vector<2x512xf32>
    %739 = arith.mulf %3, %738 : vector<2x512xf32>
    %740 = arith.addf %739, %7 : vector<2x512xf32>
    %c0_479 = arith.constant 0 : index
    %c0_480 = arith.constant 0 : index
    %741 = vector.load %arg7[%c0_479, %c0_480] : memref<2x512xf32, #tpu.memory_space<vmem>>, vector<2x512xf32>
    %742 = arith.addf %741, %740 : vector<2x512xf32>
    %cst_481 = arith.constant 1.000000e+00 : f32
    %743 = vector.broadcast %cst_481 : f32 to vector<2x512xf32>
    %744 = arith.cmpf ogt, %742, %743 : vector<2x512xf32>
    %cst_482 = arith.constant 0.778800785 : f32
    %745 = vector.broadcast %cst_482 : f32 to vector<2x512xf32>
    %746 = arith.mulf %742, %745 : vector<2x512xf32>
    %cst_483 = arith.constant 0.000000e+00 : f32
    %747 = vector.broadcast %cst_483 : f32 to vector<2x512xf32>
    %748 = arith.select %744, %747, %746 : vector<2x512xi1>, vector<2x512xf32>
    %c0_484 = arith.constant 0 : index
    %c0_485 = arith.constant 0 : index
    %749 = vector.load %arg7[%c0_484, %c0_485] : memref<2x512xf32, #tpu.memory_space<vmem>>, vector<2x512xf32>
    tpu.vector_store %arg7[%c0_484, %c0_485], %748 {strides = array<i32>} : memref<2x512xf32, #tpu.memory_space<vmem>>, vector<2x512xf32>,
    %750 = arith.extui %744 : vector<2x512xi1> to vector<2x512xi32>
    %751 = arith.sitofp %750 : vector<2x512xi32> to vector<2x512xf32>
    %752 = arith.truncf %751 : vector<2x512xf32> to vector<2x512xbf16>
    %cst_486 = arith.constant dense<0.000000e+00> : vector<2x128xf32>
    %753 = tpu.matmul %752, %4, %cst_486 {dimension_numbers = #tpu.dot_dimension_numbers<[1], [0], [0], [1], [0, 0, 1, 1], [], []>} : vector<2x512xbf16>, vector<512x128xbf16>, vector<2x128xf32> -> vector<2x128xf32>
    %c0_487 = arith.constant 0 : index
    %c0_488 = arith.constant 0 : index
    %754 = vector.load %arg8[%c0_487, %c0_488] : memref<2x128xf32, #tpu.memory_space<vmem>>, vector<2x128xf32>
    %cst_489 = arith.constant 0.778800785 : f32
    %755 = vector.broadcast %cst_489 : f32 to vector<2x128xf32>
    %756 = arith.mulf %754, %755 : vector<2x128xf32>
    %757 = arith.addf %756, %753 : vector<2x128xf32>
    %c0_490 = arith.constant 0 : index
    %c0_491 = arith.constant 0 : index
    %758 = vector.load %arg9[%c0_490, %c0_491] : memref<2x128xf32, #tpu.memory_space<vmem>>, vector<2x128xf32>
    %cst_492 = arith.constant 0.36787945 : f32
    %759 = vector.broadcast %cst_492 : f32 to vector<2x128xf32>
    %760 = arith.mulf %758, %759 : vector<2x128xf32>
    %761 = arith.addf %760, %753 : vector<2x128xf32>
    %c0_493 = arith.constant 0 : index
    %c0_494 = arith.constant 0 : index
    %762 = vector.load %arg8[%c0_493, %c0_494] : memref<2x128xf32, #tpu.memory_space<vmem>>, vector<2x128xf32>
    tpu.vector_store %arg8[%c0_493, %c0_494], %757 {strides = array<i32>} : memref<2x128xf32, #tpu.memory_space<vmem>>, vector<2x128xf32>,
    %c0_495 = arith.constant 0 : index
    %c0_496 = arith.constant 0 : index
    %763 = vector.load %arg9[%c0_495, %c0_496] : memref<2x128xf32, #tpu.memory_space<vmem>>, vector<2x128xf32>
    tpu.vector_store %arg9[%c0_495, %c0_496], %761 {strides = array<i32>} : memref<2x128xf32, #tpu.memory_space<vmem>>, vector<2x128xf32>,
    %764 = arith.subf %757, %761 : vector<2x128xf32>
    %765 = arith.addf %764, %10 : vector<2x128xf32>
    %c0_497 = arith.constant 0 : index
    %c0_498 = arith.constant 0 : index
    %766 = vector.load %arg10[%c0_497, %c0_498] : memref<2x128xf32, #tpu.memory_space<vmem>>, vector<2x128xf32>
    %767 = arith.addf %766, %765 : vector<2x128xf32>
    %cst_499 = arith.constant 1.000000e+00 : f32
    %768 = vector.broadcast %cst_499 : f32 to vector<2x128xf32>
    %769 = arith.cmpf ogt, %767, %768 : vector<2x128xf32>
    %cst_500 = arith.constant 0.778800785 : f32
    %770 = vector.broadcast %cst_500 : f32 to vector<2x128xf32>
    %771 = arith.mulf %767, %770 : vector<2x128xf32>
    %cst_501 = arith.constant 0.000000e+00 : f32
    %772 = vector.broadcast %cst_501 : f32 to vector<2x128xf32>
    %773 = arith.select %769, %772, %771 : vector<2x128xi1>, vector<2x128xf32>
    %c0_502 = arith.constant 0 : index
    %c0_503 = arith.constant 0 : index
    %774 = vector.load %arg10[%c0_502, %c0_503] : memref<2x128xf32, #tpu.memory_space<vmem>>, vector<2x128xf32>
    tpu.vector_store %arg10[%c0_502, %c0_503], %773 {strides = array<i32>} : memref<2x128xf32, #tpu.memory_space<vmem>>, vector<2x128xf32>,
    %775 = arith.extui %769 : vector<2x128xi1> to vector<2x128xi32>
    %776 = arith.sitofp %775 : vector<2x128xi32> to vector<2x128xf32>
    %777 = arith.truncf %776 : vector<2x128xf32> to vector<2x128xbf16>
    %c15 = arith.constant 15 : index
    %c0_504 = arith.constant 0 : index
    %c0_505 = arith.constant 0 : index
    %778 = vector.load %arg6[%c15, %c0_504, %c0_505] : memref<32x2x128xbf16, #tpu.memory_space<vmem>>, vector<1x2x128xbf16>
    %779 = vector.shape_cast %778 : vector<1x2x128xbf16> to vector<2x128xbf16>
    %780 = vector.shape_cast %777 : vector<2x128xbf16> to vector<1x2x128xbf16>
    tpu.vector_store %arg6[%c15, %c0_504, %c0_505], %780 {strides = array<i32>} : memref<32x2x128xbf16, #tpu.memory_space<vmem>>, vector<1x2x128xbf16>,
    %cst_506 = arith.constant 0.778800785 : f32
    %781 = arith.mulf %734, %cst_506 : f32
    %cst_507 = arith.constant 1.000000e+00 : f32
    %782 = arith.addf %781, %cst_507 : f32
    %cst_508 = arith.constant 0.36787945 : f32
    %783 = arith.mulf %736, %cst_508 : f32
    %cst_509 = arith.constant 1.000000e+00 : f32
    %784 = arith.addf %783, %cst_509 : f32
    %785 = arith.subf %782, %784 : f32
    %786 = vector.broadcast %785 : f32 to vector<2x512xf32>
    %787 = arith.mulf %3, %786 : vector<2x512xf32>
    %788 = arith.addf %787, %7 : vector<2x512xf32>
    %c0_510 = arith.constant 0 : index
    %c0_511 = arith.constant 0 : index
    %789 = vector.load %arg7[%c0_510, %c0_511] : memref<2x512xf32, #tpu.memory_space<vmem>>, vector<2x512xf32>
    %790 = arith.addf %789, %788 : vector<2x512xf32>
    %cst_512 = arith.constant 1.000000e+00 : f32
    %791 = vector.broadcast %cst_512 : f32 to vector<2x512xf32>
    %792 = arith.cmpf ogt, %790, %791 : vector<2x512xf32>
    %cst_513 = arith.constant 0.778800785 : f32
    %793 = vector.broadcast %cst_513 : f32 to vector<2x512xf32>
    %794 = arith.mulf %790, %793 : vector<2x512xf32>
    %cst_514 = arith.constant 0.000000e+00 : f32
    %795 = vector.broadcast %cst_514 : f32 to vector<2x512xf32>
    %796 = arith.select %792, %795, %794 : vector<2x512xi1>, vector<2x512xf32>
    %c0_515 = arith.constant 0 : index
    %c0_516 = arith.constant 0 : index
    %797 = vector.load %arg7[%c0_515, %c0_516] : memref<2x512xf32, #tpu.memory_space<vmem>>, vector<2x512xf32>
    tpu.vector_store %arg7[%c0_515, %c0_516], %796 {strides = array<i32>} : memref<2x512xf32, #tpu.memory_space<vmem>>, vector<2x512xf32>,
    %798 = arith.extui %792 : vector<2x512xi1> to vector<2x512xi32>
    %799 = arith.sitofp %798 : vector<2x512xi32> to vector<2x512xf32>
    %800 = arith.truncf %799 : vector<2x512xf32> to vector<2x512xbf16>
    %cst_517 = arith.constant dense<0.000000e+00> : vector<2x128xf32>
    %801 = tpu.matmul %800, %4, %cst_517 {dimension_numbers = #tpu.dot_dimension_numbers<[1], [0], [0], [1], [0, 0, 1, 1], [], []>} : vector<2x512xbf16>, vector<512x128xbf16>, vector<2x128xf32> -> vector<2x128xf32>
    %c0_518 = arith.constant 0 : index
    %c0_519 = arith.constant 0 : index
    %802 = vector.load %arg8[%c0_518, %c0_519] : memref<2x128xf32, #tpu.memory_space<vmem>>, vector<2x128xf32>
    %cst_520 = arith.constant 0.778800785 : f32
    %803 = vector.broadcast %cst_520 : f32 to vector<2x128xf32>
    %804 = arith.mulf %802, %803 : vector<2x128xf32>
    %805 = arith.addf %804, %801 : vector<2x128xf32>
    %c0_521 = arith.constant 0 : index
    %c0_522 = arith.constant 0 : index
    %806 = vector.load %arg9[%c0_521, %c0_522] : memref<2x128xf32, #tpu.memory_space<vmem>>, vector<2x128xf32>
    %cst_523 = arith.constant 0.36787945 : f32
    %807 = vector.broadcast %cst_523 : f32 to vector<2x128xf32>
    %808 = arith.mulf %806, %807 : vector<2x128xf32>
    %809 = arith.addf %808, %801 : vector<2x128xf32>
    %c0_524 = arith.constant 0 : index
    %c0_525 = arith.constant 0 : index
    %810 = vector.load %arg8[%c0_524, %c0_525] : memref<2x128xf32, #tpu.memory_space<vmem>>, vector<2x128xf32>
    tpu.vector_store %arg8[%c0_524, %c0_525], %805 {strides = array<i32>} : memref<2x128xf32, #tpu.memory_space<vmem>>, vector<2x128xf32>,
    %c0_526 = arith.constant 0 : index
    %c0_527 = arith.constant 0 : index
    %811 = vector.load %arg9[%c0_526, %c0_527] : memref<2x128xf32, #tpu.memory_space<vmem>>, vector<2x128xf32>
    tpu.vector_store %arg9[%c0_526, %c0_527], %809 {strides = array<i32>} : memref<2x128xf32, #tpu.memory_space<vmem>>, vector<2x128xf32>,
    %812 = arith.subf %805, %809 : vector<2x128xf32>
    %813 = arith.addf %812, %10 : vector<2x128xf32>
    %c0_528 = arith.constant 0 : index
    %c0_529 = arith.constant 0 : index
    %814 = vector.load %arg10[%c0_528, %c0_529] : memref<2x128xf32, #tpu.memory_space<vmem>>, vector<2x128xf32>
    %815 = arith.addf %814, %813 : vector<2x128xf32>
    %cst_530 = arith.constant 1.000000e+00 : f32
    %816 = vector.broadcast %cst_530 : f32 to vector<2x128xf32>
    %817 = arith.cmpf ogt, %815, %816 : vector<2x128xf32>
    %cst_531 = arith.constant 0.778800785 : f32
    %818 = vector.broadcast %cst_531 : f32 to vector<2x128xf32>
    %819 = arith.mulf %815, %818 : vector<2x128xf32>
    %cst_532 = arith.constant 0.000000e+00 : f32
    %820 = vector.broadcast %cst_532 : f32 to vector<2x128xf32>
    %821 = arith.select %817, %820, %819 : vector<2x128xi1>, vector<2x128xf32>
    %c0_533 = arith.constant 0 : index
    %c0_534 = arith.constant 0 : index
    %822 = vector.load %arg10[%c0_533, %c0_534] : memref<2x128xf32, #tpu.memory_space<vmem>>, vector<2x128xf32>
    tpu.vector_store %arg10[%c0_533, %c0_534], %821 {strides = array<i32>} : memref<2x128xf32, #tpu.memory_space<vmem>>, vector<2x128xf32>,
    %823 = arith.extui %817 : vector<2x128xi1> to vector<2x128xi32>
    %824 = arith.sitofp %823 : vector<2x128xi32> to vector<2x128xf32>
    %825 = arith.truncf %824 : vector<2x128xf32> to vector<2x128xbf16>
    %c16 = arith.constant 16 : index
    %c0_535 = arith.constant 0 : index
    %c0_536 = arith.constant 0 : index
    %826 = vector.load %arg6[%c16, %c0_535, %c0_536] : memref<32x2x128xbf16, #tpu.memory_space<vmem>>, vector<1x2x128xbf16>
    %827 = vector.shape_cast %826 : vector<1x2x128xbf16> to vector<2x128xbf16>
    %828 = vector.shape_cast %825 : vector<2x128xbf16> to vector<1x2x128xbf16>
    tpu.vector_store %arg6[%c16, %c0_535, %c0_536], %828 {strides = array<i32>} : memref<32x2x128xbf16, #tpu.memory_space<vmem>>, vector<1x2x128xbf16>,
    %cst_537 = arith.constant 0.778800785 : f32
    %829 = arith.mulf %782, %cst_537 : f32
    %cst_538 = arith.constant 1.000000e+00 : f32
    %830 = arith.addf %829, %cst_538 : f32
    %cst_539 = arith.constant 0.36787945 : f32
    %831 = arith.mulf %784, %cst_539 : f32
    %cst_540 = arith.constant 1.000000e+00 : f32
    %832 = arith.addf %831, %cst_540 : f32
    %833 = arith.subf %830, %832 : f32
    %834 = vector.broadcast %833 : f32 to vector<2x512xf32>
    %835 = arith.mulf %3, %834 : vector<2x512xf32>
    %836 = arith.addf %835, %7 : vector<2x512xf32>
    %c0_541 = arith.constant 0 : index
    %c0_542 = arith.constant 0 : index
    %837 = vector.load %arg7[%c0_541, %c0_542] : memref<2x512xf32, #tpu.memory_space<vmem>>, vector<2x512xf32>
    %838 = arith.addf %837, %836 : vector<2x512xf32>
    %cst_543 = arith.constant 1.000000e+00 : f32
    %839 = vector.broadcast %cst_543 : f32 to vector<2x512xf32>
    %840 = arith.cmpf ogt, %838, %839 : vector<2x512xf32>
    %cst_544 = arith.constant 0.778800785 : f32
    %841 = vector.broadcast %cst_544 : f32 to vector<2x512xf32>
    %842 = arith.mulf %838, %841 : vector<2x512xf32>
    %cst_545 = arith.constant 0.000000e+00 : f32
    %843 = vector.broadcast %cst_545 : f32 to vector<2x512xf32>
    %844 = arith.select %840, %843, %842 : vector<2x512xi1>, vector<2x512xf32>
    %c0_546 = arith.constant 0 : index
    %c0_547 = arith.constant 0 : index
    %845 = vector.load %arg7[%c0_546, %c0_547] : memref<2x512xf32, #tpu.memory_space<vmem>>, vector<2x512xf32>
    tpu.vector_store %arg7[%c0_546, %c0_547], %844 {strides = array<i32>} : memref<2x512xf32, #tpu.memory_space<vmem>>, vector<2x512xf32>,
    %846 = arith.extui %840 : vector<2x512xi1> to vector<2x512xi32>
    %847 = arith.sitofp %846 : vector<2x512xi32> to vector<2x512xf32>
    %848 = arith.truncf %847 : vector<2x512xf32> to vector<2x512xbf16>
    %cst_548 = arith.constant dense<0.000000e+00> : vector<2x128xf32>
    %849 = tpu.matmul %848, %4, %cst_548 {dimension_numbers = #tpu.dot_dimension_numbers<[1], [0], [0], [1], [0, 0, 1, 1], [], []>} : vector<2x512xbf16>, vector<512x128xbf16>, vector<2x128xf32> -> vector<2x128xf32>
    %c0_549 = arith.constant 0 : index
    %c0_550 = arith.constant 0 : index
    %850 = vector.load %arg8[%c0_549, %c0_550] : memref<2x128xf32, #tpu.memory_space<vmem>>, vector<2x128xf32>
    %cst_551 = arith.constant 0.778800785 : f32
    %851 = vector.broadcast %cst_551 : f32 to vector<2x128xf32>
    %852 = arith.mulf %850, %851 : vector<2x128xf32>
    %853 = arith.addf %852, %849 : vector<2x128xf32>
    %c0_552 = arith.constant 0 : index
    %c0_553 = arith.constant 0 : index
    %854 = vector.load %arg9[%c0_552, %c0_553] : memref<2x128xf32, #tpu.memory_space<vmem>>, vector<2x128xf32>
    %cst_554 = arith.constant 0.36787945 : f32
    %855 = vector.broadcast %cst_554 : f32 to vector<2x128xf32>
    %856 = arith.mulf %854, %855 : vector<2x128xf32>
    %857 = arith.addf %856, %849 : vector<2x128xf32>
    %c0_555 = arith.constant 0 : index
    %c0_556 = arith.constant 0 : index
    %858 = vector.load %arg8[%c0_555, %c0_556] : memref<2x128xf32, #tpu.memory_space<vmem>>, vector<2x128xf32>
    tpu.vector_store %arg8[%c0_555, %c0_556], %853 {strides = array<i32>} : memref<2x128xf32, #tpu.memory_space<vmem>>, vector<2x128xf32>,
    %c0_557 = arith.constant 0 : index
    %c0_558 = arith.constant 0 : index
    %859 = vector.load %arg9[%c0_557, %c0_558] : memref<2x128xf32, #tpu.memory_space<vmem>>, vector<2x128xf32>
    tpu.vector_store %arg9[%c0_557, %c0_558], %857 {strides = array<i32>} : memref<2x128xf32, #tpu.memory_space<vmem>>, vector<2x128xf32>,
    %860 = arith.subf %853, %857 : vector<2x128xf32>
    %861 = arith.addf %860, %10 : vector<2x128xf32>
    %c0_559 = arith.constant 0 : index
    %c0_560 = arith.constant 0 : index
    %862 = vector.load %arg10[%c0_559, %c0_560] : memref<2x128xf32, #tpu.memory_space<vmem>>, vector<2x128xf32>
    %863 = arith.addf %862, %861 : vector<2x128xf32>
    %cst_561 = arith.constant 1.000000e+00 : f32
    %864 = vector.broadcast %cst_561 : f32 to vector<2x128xf32>
    %865 = arith.cmpf ogt, %863, %864 : vector<2x128xf32>
    %cst_562 = arith.constant 0.778800785 : f32
    %866 = vector.broadcast %cst_562 : f32 to vector<2x128xf32>
    %867 = arith.mulf %863, %866 : vector<2x128xf32>
    %cst_563 = arith.constant 0.000000e+00 : f32
    %868 = vector.broadcast %cst_563 : f32 to vector<2x128xf32>
    %869 = arith.select %865, %868, %867 : vector<2x128xi1>, vector<2x128xf32>
    %c0_564 = arith.constant 0 : index
    %c0_565 = arith.constant 0 : index
    %870 = vector.load %arg10[%c0_564, %c0_565] : memref<2x128xf32, #tpu.memory_space<vmem>>, vector<2x128xf32>
    tpu.vector_store %arg10[%c0_564, %c0_565], %869 {strides = array<i32>} : memref<2x128xf32, #tpu.memory_space<vmem>>, vector<2x128xf32>,
    %871 = arith.extui %865 : vector<2x128xi1> to vector<2x128xi32>
    %872 = arith.sitofp %871 : vector<2x128xi32> to vector<2x128xf32>
    %873 = arith.truncf %872 : vector<2x128xf32> to vector<2x128xbf16>
    %c17 = arith.constant 17 : index
    %c0_566 = arith.constant 0 : index
    %c0_567 = arith.constant 0 : index
    %874 = vector.load %arg6[%c17, %c0_566, %c0_567] : memref<32x2x128xbf16, #tpu.memory_space<vmem>>, vector<1x2x128xbf16>
    %875 = vector.shape_cast %874 : vector<1x2x128xbf16> to vector<2x128xbf16>
    %876 = vector.shape_cast %873 : vector<2x128xbf16> to vector<1x2x128xbf16>
    tpu.vector_store %arg6[%c17, %c0_566, %c0_567], %876 {strides = array<i32>} : memref<32x2x128xbf16, #tpu.memory_space<vmem>>, vector<1x2x128xbf16>,
    %cst_568 = arith.constant 0.778800785 : f32
    %877 = arith.mulf %830, %cst_568 : f32
    %cst_569 = arith.constant 1.000000e+00 : f32
    %878 = arith.addf %877, %cst_569 : f32
    %cst_570 = arith.constant 0.36787945 : f32
    %879 = arith.mulf %832, %cst_570 : f32
    %cst_571 = arith.constant 1.000000e+00 : f32
    %880 = arith.addf %879, %cst_571 : f32
    %881 = arith.subf %878, %880 : f32
    %882 = vector.broadcast %881 : f32 to vector<2x512xf32>
    %883 = arith.mulf %3, %882 : vector<2x512xf32>
    %884 = arith.addf %883, %7 : vector<2x512xf32>
    %c0_572 = arith.constant 0 : index
    %c0_573 = arith.constant 0 : index
    %885 = vector.load %arg7[%c0_572, %c0_573] : memref<2x512xf32, #tpu.memory_space<vmem>>, vector<2x512xf32>
    %886 = arith.addf %885, %884 : vector<2x512xf32>
    %cst_574 = arith.constant 1.000000e+00 : f32
    %887 = vector.broadcast %cst_574 : f32 to vector<2x512xf32>
    %888 = arith.cmpf ogt, %886, %887 : vector<2x512xf32>
    %cst_575 = arith.constant 0.778800785 : f32
    %889 = vector.broadcast %cst_575 : f32 to vector<2x512xf32>
    %890 = arith.mulf %886, %889 : vector<2x512xf32>
    %cst_576 = arith.constant 0.000000e+00 : f32
    %891 = vector.broadcast %cst_576 : f32 to vector<2x512xf32>
    %892 = arith.select %888, %891, %890 : vector<2x512xi1>, vector<2x512xf32>
    %c0_577 = arith.constant 0 : index
    %c0_578 = arith.constant 0 : index
    %893 = vector.load %arg7[%c0_577, %c0_578] : memref<2x512xf32, #tpu.memory_space<vmem>>, vector<2x512xf32>
    tpu.vector_store %arg7[%c0_577, %c0_578], %892 {strides = array<i32>} : memref<2x512xf32, #tpu.memory_space<vmem>>, vector<2x512xf32>,
    %894 = arith.extui %888 : vector<2x512xi1> to vector<2x512xi32>
    %895 = arith.sitofp %894 : vector<2x512xi32> to vector<2x512xf32>
    %896 = arith.truncf %895 : vector<2x512xf32> to vector<2x512xbf16>
    %cst_579 = arith.constant dense<0.000000e+00> : vector<2x128xf32>
    %897 = tpu.matmul %896, %4, %cst_579 {dimension_numbers = #tpu.dot_dimension_numbers<[1], [0], [0], [1], [0, 0, 1, 1], [], []>} : vector<2x512xbf16>, vector<512x128xbf16>, vector<2x128xf32> -> vector<2x128xf32>
    %c0_580 = arith.constant 0 : index
    %c0_581 = arith.constant 0 : index
    %898 = vector.load %arg8[%c0_580, %c0_581] : memref<2x128xf32, #tpu.memory_space<vmem>>, vector<2x128xf32>
    %cst_582 = arith.constant 0.778800785 : f32
    %899 = vector.broadcast %cst_582 : f32 to vector<2x128xf32>
    %900 = arith.mulf %898, %899 : vector<2x128xf32>
    %901 = arith.addf %900, %897 : vector<2x128xf32>
    %c0_583 = arith.constant 0 : index
    %c0_584 = arith.constant 0 : index
    %902 = vector.load %arg9[%c0_583, %c0_584] : memref<2x128xf32, #tpu.memory_space<vmem>>, vector<2x128xf32>
    %cst_585 = arith.constant 0.36787945 : f32
    %903 = vector.broadcast %cst_585 : f32 to vector<2x128xf32>
    %904 = arith.mulf %902, %903 : vector<2x128xf32>
    %905 = arith.addf %904, %897 : vector<2x128xf32>
    %c0_586 = arith.constant 0 : index
    %c0_587 = arith.constant 0 : index
    %906 = vector.load %arg8[%c0_586, %c0_587] : memref<2x128xf32, #tpu.memory_space<vmem>>, vector<2x128xf32>
    tpu.vector_store %arg8[%c0_586, %c0_587], %901 {strides = array<i32>} : memref<2x128xf32, #tpu.memory_space<vmem>>, vector<2x128xf32>,
    %c0_588 = arith.constant 0 : index
    %c0_589 = arith.constant 0 : index
    %907 = vector.load %arg9[%c0_588, %c0_589] : memref<2x128xf32, #tpu.memory_space<vmem>>, vector<2x128xf32>
    tpu.vector_store %arg9[%c0_588, %c0_589], %905 {strides = array<i32>} : memref<2x128xf32, #tpu.memory_space<vmem>>, vector<2x128xf32>,
    %908 = arith.subf %901, %905 : vector<2x128xf32>
    %909 = arith.addf %908, %10 : vector<2x128xf32>
    %c0_590 = arith.constant 0 : index
    %c0_591 = arith.constant 0 : index
    %910 = vector.load %arg10[%c0_590, %c0_591] : memref<2x128xf32, #tpu.memory_space<vmem>>, vector<2x128xf32>
    %911 = arith.addf %910, %909 : vector<2x128xf32>
    %cst_592 = arith.constant 1.000000e+00 : f32
    %912 = vector.broadcast %cst_592 : f32 to vector<2x128xf32>
    %913 = arith.cmpf ogt, %911, %912 : vector<2x128xf32>
    %cst_593 = arith.constant 0.778800785 : f32
    %914 = vector.broadcast %cst_593 : f32 to vector<2x128xf32>
    %915 = arith.mulf %911, %914 : vector<2x128xf32>
    %cst_594 = arith.constant 0.000000e+00 : f32
    %916 = vector.broadcast %cst_594 : f32 to vector<2x128xf32>
    %917 = arith.select %913, %916, %915 : vector<2x128xi1>, vector<2x128xf32>
    %c0_595 = arith.constant 0 : index
    %c0_596 = arith.constant 0 : index
    %918 = vector.load %arg10[%c0_595, %c0_596] : memref<2x128xf32, #tpu.memory_space<vmem>>, vector<2x128xf32>
    tpu.vector_store %arg10[%c0_595, %c0_596], %917 {strides = array<i32>} : memref<2x128xf32, #tpu.memory_space<vmem>>, vector<2x128xf32>,
    %919 = arith.extui %913 : vector<2x128xi1> to vector<2x128xi32>
    %920 = arith.sitofp %919 : vector<2x128xi32> to vector<2x128xf32>
    %921 = arith.truncf %920 : vector<2x128xf32> to vector<2x128xbf16>
    %c18 = arith.constant 18 : index
    %c0_597 = arith.constant 0 : index
    %c0_598 = arith.constant 0 : index
    %922 = vector.load %arg6[%c18, %c0_597, %c0_598] : memref<32x2x128xbf16, #tpu.memory_space<vmem>>, vector<1x2x128xbf16>
    %923 = vector.shape_cast %922 : vector<1x2x128xbf16> to vector<2x128xbf16>
    %924 = vector.shape_cast %921 : vector<2x128xbf16> to vector<1x2x128xbf16>
    tpu.vector_store %arg6[%c18, %c0_597, %c0_598], %924 {strides = array<i32>} : memref<32x2x128xbf16, #tpu.memory_space<vmem>>, vector<1x2x128xbf16>,
    %cst_599 = arith.constant 0.778800785 : f32
    %925 = arith.mulf %878, %cst_599 : f32
    %cst_600 = arith.constant 1.000000e+00 : f32
    %926 = arith.addf %925, %cst_600 : f32
    %cst_601 = arith.constant 0.36787945 : f32
    %927 = arith.mulf %880, %cst_601 : f32
    %cst_602 = arith.constant 1.000000e+00 : f32
    %928 = arith.addf %927, %cst_602 : f32
    %929 = arith.subf %926, %928 : f32
    %930 = vector.broadcast %929 : f32 to vector<2x512xf32>
    %931 = arith.mulf %3, %930 : vector<2x512xf32>
    %932 = arith.addf %931, %7 : vector<2x512xf32>
    %c0_603 = arith.constant 0 : index
    %c0_604 = arith.constant 0 : index
    %933 = vector.load %arg7[%c0_603, %c0_604] : memref<2x512xf32, #tpu.memory_space<vmem>>, vector<2x512xf32>
    %934 = arith.addf %933, %932 : vector<2x512xf32>
    %cst_605 = arith.constant 1.000000e+00 : f32
    %935 = vector.broadcast %cst_605 : f32 to vector<2x512xf32>
    %936 = arith.cmpf ogt, %934, %935 : vector<2x512xf32>
    %cst_606 = arith.constant 0.778800785 : f32
    %937 = vector.broadcast %cst_606 : f32 to vector<2x512xf32>
    %938 = arith.mulf %934, %937 : vector<2x512xf32>
    %cst_607 = arith.constant 0.000000e+00 : f32
    %939 = vector.broadcast %cst_607 : f32 to vector<2x512xf32>
    %940 = arith.select %936, %939, %938 : vector<2x512xi1>, vector<2x512xf32>
    %c0_608 = arith.constant 0 : index
    %c0_609 = arith.constant 0 : index
    %941 = vector.load %arg7[%c0_608, %c0_609] : memref<2x512xf32, #tpu.memory_space<vmem>>, vector<2x512xf32>
    tpu.vector_store %arg7[%c0_608, %c0_609], %940 {strides = array<i32>} : memref<2x512xf32, #tpu.memory_space<vmem>>, vector<2x512xf32>,
    %942 = arith.extui %936 : vector<2x512xi1> to vector<2x512xi32>
    %943 = arith.sitofp %942 : vector<2x512xi32> to vector<2x512xf32>
    %944 = arith.truncf %943 : vector<2x512xf32> to vector<2x512xbf16>
    %cst_610 = arith.constant dense<0.000000e+00> : vector<2x128xf32>
    %945 = tpu.matmul %944, %4, %cst_610 {dimension_numbers = #tpu.dot_dimension_numbers<[1], [0], [0], [1], [0, 0, 1, 1], [], []>} : vector<2x512xbf16>, vector<512x128xbf16>, vector<2x128xf32> -> vector<2x128xf32>
    %c0_611 = arith.constant 0 : index
    %c0_612 = arith.constant 0 : index
    %946 = vector.load %arg8[%c0_611, %c0_612] : memref<2x128xf32, #tpu.memory_space<vmem>>, vector<2x128xf32>
    %cst_613 = arith.constant 0.778800785 : f32
    %947 = vector.broadcast %cst_613 : f32 to vector<2x128xf32>
    %948 = arith.mulf %946, %947 : vector<2x128xf32>
    %949 = arith.addf %948, %945 : vector<2x128xf32>
    %c0_614 = arith.constant 0 : index
    %c0_615 = arith.constant 0 : index
    %950 = vector.load %arg9[%c0_614, %c0_615] : memref<2x128xf32, #tpu.memory_space<vmem>>, vector<2x128xf32>
    %cst_616 = arith.constant 0.36787945 : f32
    %951 = vector.broadcast %cst_616 : f32 to vector<2x128xf32>
    %952 = arith.mulf %950, %951 : vector<2x128xf32>
    %953 = arith.addf %952, %945 : vector<2x128xf32>
    %c0_617 = arith.constant 0 : index
    %c0_618 = arith.constant 0 : index
    %954 = vector.load %arg8[%c0_617, %c0_618] : memref<2x128xf32, #tpu.memory_space<vmem>>, vector<2x128xf32>
    tpu.vector_store %arg8[%c0_617, %c0_618], %949 {strides = array<i32>} : memref<2x128xf32, #tpu.memory_space<vmem>>, vector<2x128xf32>,
    %c0_619 = arith.constant 0 : index
    %c0_620 = arith.constant 0 : index
    %955 = vector.load %arg9[%c0_619, %c0_620] : memref<2x128xf32, #tpu.memory_space<vmem>>, vector<2x128xf32>
    tpu.vector_store %arg9[%c0_619, %c0_620], %953 {strides = array<i32>} : memref<2x128xf32, #tpu.memory_space<vmem>>, vector<2x128xf32>,
    %956 = arith.subf %949, %953 : vector<2x128xf32>
    %957 = arith.addf %956, %10 : vector<2x128xf32>
    %c0_621 = arith.constant 0 : index
    %c0_622 = arith.constant 0 : index
    %958 = vector.load %arg10[%c0_621, %c0_622] : memref<2x128xf32, #tpu.memory_space<vmem>>, vector<2x128xf32>
    %959 = arith.addf %958, %957 : vector<2x128xf32>
    %cst_623 = arith.constant 1.000000e+00 : f32
    %960 = vector.broadcast %cst_623 : f32 to vector<2x128xf32>
    %961 = arith.cmpf ogt, %959, %960 : vector<2x128xf32>
    %cst_624 = arith.constant 0.778800785 : f32
    %962 = vector.broadcast %cst_624 : f32 to vector<2x128xf32>
    %963 = arith.mulf %959, %962 : vector<2x128xf32>
    %cst_625 = arith.constant 0.000000e+00 : f32
    %964 = vector.broadcast %cst_625 : f32 to vector<2x128xf32>
    %965 = arith.select %961, %964, %963 : vector<2x128xi1>, vector<2x128xf32>
    %c0_626 = arith.constant 0 : index
    %c0_627 = arith.constant 0 : index
    %966 = vector.load %arg10[%c0_626, %c0_627] : memref<2x128xf32, #tpu.memory_space<vmem>>, vector<2x128xf32>
    tpu.vector_store %arg10[%c0_626, %c0_627], %965 {strides = array<i32>} : memref<2x128xf32, #tpu.memory_space<vmem>>, vector<2x128xf32>,
    %967 = arith.extui %961 : vector<2x128xi1> to vector<2x128xi32>
    %968 = arith.sitofp %967 : vector<2x128xi32> to vector<2x128xf32>
    %969 = arith.truncf %968 : vector<2x128xf32> to vector<2x128xbf16>
    %c19 = arith.constant 19 : index
    %c0_628 = arith.constant 0 : index
    %c0_629 = arith.constant 0 : index
    %970 = vector.load %arg6[%c19, %c0_628, %c0_629] : memref<32x2x128xbf16, #tpu.memory_space<vmem>>, vector<1x2x128xbf16>
    %971 = vector.shape_cast %970 : vector<1x2x128xbf16> to vector<2x128xbf16>
    %972 = vector.shape_cast %969 : vector<2x128xbf16> to vector<1x2x128xbf16>
    tpu.vector_store %arg6[%c19, %c0_628, %c0_629], %972 {strides = array<i32>} : memref<32x2x128xbf16, #tpu.memory_space<vmem>>, vector<1x2x128xbf16>,
    %cst_630 = arith.constant 0.778800785 : f32
    %973 = arith.mulf %926, %cst_630 : f32
    %cst_631 = arith.constant 1.000000e+00 : f32
    %974 = arith.addf %973, %cst_631 : f32
    %cst_632 = arith.constant 0.36787945 : f32
    %975 = arith.mulf %928, %cst_632 : f32
    %cst_633 = arith.constant 1.000000e+00 : f32
    %976 = arith.addf %975, %cst_633 : f32
    %977 = arith.subf %974, %976 : f32
    %978 = vector.broadcast %977 : f32 to vector<2x512xf32>
    %979 = arith.mulf %3, %978 : vector<2x512xf32>
    %980 = arith.addf %979, %7 : vector<2x512xf32>
    %c0_634 = arith.constant 0 : index
    %c0_635 = arith.constant 0 : index
    %981 = vector.load %arg7[%c0_634, %c0_635] : memref<2x512xf32, #tpu.memory_space<vmem>>, vector<2x512xf32>
    %982 = arith.addf %981, %980 : vector<2x512xf32>
    %cst_636 = arith.constant 1.000000e+00 : f32
    %983 = vector.broadcast %cst_636 : f32 to vector<2x512xf32>
    %984 = arith.cmpf ogt, %982, %983 : vector<2x512xf32>
    %cst_637 = arith.constant 0.778800785 : f32
    %985 = vector.broadcast %cst_637 : f32 to vector<2x512xf32>
    %986 = arith.mulf %982, %985 : vector<2x512xf32>
    %cst_638 = arith.constant 0.000000e+00 : f32
    %987 = vector.broadcast %cst_638 : f32 to vector<2x512xf32>
    %988 = arith.select %984, %987, %986 : vector<2x512xi1>, vector<2x512xf32>
    %c0_639 = arith.constant 0 : index
    %c0_640 = arith.constant 0 : index
    %989 = vector.load %arg7[%c0_639, %c0_640] : memref<2x512xf32, #tpu.memory_space<vmem>>, vector<2x512xf32>
    tpu.vector_store %arg7[%c0_639, %c0_640], %988 {strides = array<i32>} : memref<2x512xf32, #tpu.memory_space<vmem>>, vector<2x512xf32>,
    %990 = arith.extui %984 : vector<2x512xi1> to vector<2x512xi32>
    %991 = arith.sitofp %990 : vector<2x512xi32> to vector<2x512xf32>
    %992 = arith.truncf %991 : vector<2x512xf32> to vector<2x512xbf16>
    %cst_641 = arith.constant dense<0.000000e+00> : vector<2x128xf32>
    %993 = tpu.matmul %992, %4, %cst_641 {dimension_numbers = #tpu.dot_dimension_numbers<[1], [0], [0], [1], [0, 0, 1, 1], [], []>} : vector<2x512xbf16>, vector<512x128xbf16>, vector<2x128xf32> -> vector<2x128xf32>
    %c0_642 = arith.constant 0 : index
    %c0_643 = arith.constant 0 : index
    %994 = vector.load %arg8[%c0_642, %c0_643] : memref<2x128xf32, #tpu.memory_space<vmem>>, vector<2x128xf32>
    %cst_644 = arith.constant 0.778800785 : f32
    %995 = vector.broadcast %cst_644 : f32 to vector<2x128xf32>
    %996 = arith.mulf %994, %995 : vector<2x128xf32>
    %997 = arith.addf %996, %993 : vector<2x128xf32>
    %c0_645 = arith.constant 0 : index
    %c0_646 = arith.constant 0 : index
    %998 = vector.load %arg9[%c0_645, %c0_646] : memref<2x128xf32, #tpu.memory_space<vmem>>, vector<2x128xf32>
    %cst_647 = arith.constant 0.36787945 : f32
    %999 = vector.broadcast %cst_647 : f32 to vector<2x128xf32>
    %1000 = arith.mulf %998, %999 : vector<2x128xf32>
    %1001 = arith.addf %1000, %993 : vector<2x128xf32>
    %c0_648 = arith.constant 0 : index
    %c0_649 = arith.constant 0 : index
    %1002 = vector.load %arg8[%c0_648, %c0_649] : memref<2x128xf32, #tpu.memory_space<vmem>>, vector<2x128xf32>
    tpu.vector_store %arg8[%c0_648, %c0_649], %997 {strides = array<i32>} : memref<2x128xf32, #tpu.memory_space<vmem>>, vector<2x128xf32>,
    %c0_650 = arith.constant 0 : index
    %c0_651 = arith.constant 0 : index
    %1003 = vector.load %arg9[%c0_650, %c0_651] : memref<2x128xf32, #tpu.memory_space<vmem>>, vector<2x128xf32>
    tpu.vector_store %arg9[%c0_650, %c0_651], %1001 {strides = array<i32>} : memref<2x128xf32, #tpu.memory_space<vmem>>, vector<2x128xf32>,
    %1004 = arith.subf %997, %1001 : vector<2x128xf32>
    %1005 = arith.addf %1004, %10 : vector<2x128xf32>
    %c0_652 = arith.constant 0 : index
    %c0_653 = arith.constant 0 : index
    %1006 = vector.load %arg10[%c0_652, %c0_653] : memref<2x128xf32, #tpu.memory_space<vmem>>, vector<2x128xf32>
    %1007 = arith.addf %1006, %1005 : vector<2x128xf32>
    %cst_654 = arith.constant 1.000000e+00 : f32
    %1008 = vector.broadcast %cst_654 : f32 to vector<2x128xf32>
    %1009 = arith.cmpf ogt, %1007, %1008 : vector<2x128xf32>
    %cst_655 = arith.constant 0.778800785 : f32
    %1010 = vector.broadcast %cst_655 : f32 to vector<2x128xf32>
    %1011 = arith.mulf %1007, %1010 : vector<2x128xf32>
    %cst_656 = arith.constant 0.000000e+00 : f32
    %1012 = vector.broadcast %cst_656 : f32 to vector<2x128xf32>
    %1013 = arith.select %1009, %1012, %1011 : vector<2x128xi1>, vector<2x128xf32>
    %c0_657 = arith.constant 0 : index
    %c0_658 = arith.constant 0 : index
    %1014 = vector.load %arg10[%c0_657, %c0_658] : memref<2x128xf32, #tpu.memory_space<vmem>>, vector<2x128xf32>
    tpu.vector_store %arg10[%c0_657, %c0_658], %1013 {strides = array<i32>} : memref<2x128xf32, #tpu.memory_space<vmem>>, vector<2x128xf32>,
    %1015 = arith.extui %1009 : vector<2x128xi1> to vector<2x128xi32>
    %1016 = arith.sitofp %1015 : vector<2x128xi32> to vector<2x128xf32>
    %1017 = arith.truncf %1016 : vector<2x128xf32> to vector<2x128xbf16>
    %c20 = arith.constant 20 : index
    %c0_659 = arith.constant 0 : index
    %c0_660 = arith.constant 0 : index
    %1018 = vector.load %arg6[%c20, %c0_659, %c0_660] : memref<32x2x128xbf16, #tpu.memory_space<vmem>>, vector<1x2x128xbf16>
    %1019 = vector.shape_cast %1018 : vector<1x2x128xbf16> to vector<2x128xbf16>
    %1020 = vector.shape_cast %1017 : vector<2x128xbf16> to vector<1x2x128xbf16>
    tpu.vector_store %arg6[%c20, %c0_659, %c0_660], %1020 {strides = array<i32>} : memref<32x2x128xbf16, #tpu.memory_space<vmem>>, vector<1x2x128xbf16>,
    %cst_661 = arith.constant 0.778800785 : f32
    %1021 = arith.mulf %974, %cst_661 : f32
    %cst_662 = arith.constant 1.000000e+00 : f32
    %1022 = arith.addf %1021, %cst_662 : f32
    %cst_663 = arith.constant 0.36787945 : f32
    %1023 = arith.mulf %976, %cst_663 : f32
    %cst_664 = arith.constant 1.000000e+00 : f32
    %1024 = arith.addf %1023, %cst_664 : f32
    %1025 = arith.subf %1022, %1024 : f32
    %1026 = vector.broadcast %1025 : f32 to vector<2x512xf32>
    %1027 = arith.mulf %3, %1026 : vector<2x512xf32>
    %1028 = arith.addf %1027, %7 : vector<2x512xf32>
    %c0_665 = arith.constant 0 : index
    %c0_666 = arith.constant 0 : index
    %1029 = vector.load %arg7[%c0_665, %c0_666] : memref<2x512xf32, #tpu.memory_space<vmem>>, vector<2x512xf32>
    %1030 = arith.addf %1029, %1028 : vector<2x512xf32>
    %cst_667 = arith.constant 1.000000e+00 : f32
    %1031 = vector.broadcast %cst_667 : f32 to vector<2x512xf32>
    %1032 = arith.cmpf ogt, %1030, %1031 : vector<2x512xf32>
    %cst_668 = arith.constant 0.778800785 : f32
    %1033 = vector.broadcast %cst_668 : f32 to vector<2x512xf32>
    %1034 = arith.mulf %1030, %1033 : vector<2x512xf32>
    %cst_669 = arith.constant 0.000000e+00 : f32
    %1035 = vector.broadcast %cst_669 : f32 to vector<2x512xf32>
    %1036 = arith.select %1032, %1035, %1034 : vector<2x512xi1>, vector<2x512xf32>
    %c0_670 = arith.constant 0 : index
    %c0_671 = arith.constant 0 : index
    %1037 = vector.load %arg7[%c0_670, %c0_671] : memref<2x512xf32, #tpu.memory_space<vmem>>, vector<2x512xf32>
    tpu.vector_store %arg7[%c0_670, %c0_671], %1036 {strides = array<i32>} : memref<2x512xf32, #tpu.memory_space<vmem>>, vector<2x512xf32>,
    %1038 = arith.extui %1032 : vector<2x512xi1> to vector<2x512xi32>
    %1039 = arith.sitofp %1038 : vector<2x512xi32> to vector<2x512xf32>
    %1040 = arith.truncf %1039 : vector<2x512xf32> to vector<2x512xbf16>
    %cst_672 = arith.constant dense<0.000000e+00> : vector<2x128xf32>
    %1041 = tpu.matmul %1040, %4, %cst_672 {dimension_numbers = #tpu.dot_dimension_numbers<[1], [0], [0], [1], [0, 0, 1, 1], [], []>} : vector<2x512xbf16>, vector<512x128xbf16>, vector<2x128xf32> -> vector<2x128xf32>
    %c0_673 = arith.constant 0 : index
    %c0_674 = arith.constant 0 : index
    %1042 = vector.load %arg8[%c0_673, %c0_674] : memref<2x128xf32, #tpu.memory_space<vmem>>, vector<2x128xf32>
    %cst_675 = arith.constant 0.778800785 : f32
    %1043 = vector.broadcast %cst_675 : f32 to vector<2x128xf32>
    %1044 = arith.mulf %1042, %1043 : vector<2x128xf32>
    %1045 = arith.addf %1044, %1041 : vector<2x128xf32>
    %c0_676 = arith.constant 0 : index
    %c0_677 = arith.constant 0 : index
    %1046 = vector.load %arg9[%c0_676, %c0_677] : memref<2x128xf32, #tpu.memory_space<vmem>>, vector<2x128xf32>
    %cst_678 = arith.constant 0.36787945 : f32
    %1047 = vector.broadcast %cst_678 : f32 to vector<2x128xf32>
    %1048 = arith.mulf %1046, %1047 : vector<2x128xf32>
    %1049 = arith.addf %1048, %1041 : vector<2x128xf32>
    %c0_679 = arith.constant 0 : index
    %c0_680 = arith.constant 0 : index
    %1050 = vector.load %arg8[%c0_679, %c0_680] : memref<2x128xf32, #tpu.memory_space<vmem>>, vector<2x128xf32>
    tpu.vector_store %arg8[%c0_679, %c0_680], %1045 {strides = array<i32>} : memref<2x128xf32, #tpu.memory_space<vmem>>, vector<2x128xf32>,
    %c0_681 = arith.constant 0 : index
    %c0_682 = arith.constant 0 : index
    %1051 = vector.load %arg9[%c0_681, %c0_682] : memref<2x128xf32, #tpu.memory_space<vmem>>, vector<2x128xf32>
    tpu.vector_store %arg9[%c0_681, %c0_682], %1049 {strides = array<i32>} : memref<2x128xf32, #tpu.memory_space<vmem>>, vector<2x128xf32>,
    %1052 = arith.subf %1045, %1049 : vector<2x128xf32>
    %1053 = arith.addf %1052, %10 : vector<2x128xf32>
    %c0_683 = arith.constant 0 : index
    %c0_684 = arith.constant 0 : index
    %1054 = vector.load %arg10[%c0_683, %c0_684] : memref<2x128xf32, #tpu.memory_space<vmem>>, vector<2x128xf32>
    %1055 = arith.addf %1054, %1053 : vector<2x128xf32>
    %cst_685 = arith.constant 1.000000e+00 : f32
    %1056 = vector.broadcast %cst_685 : f32 to vector<2x128xf32>
    %1057 = arith.cmpf ogt, %1055, %1056 : vector<2x128xf32>
    %cst_686 = arith.constant 0.778800785 : f32
    %1058 = vector.broadcast %cst_686 : f32 to vector<2x128xf32>
    %1059 = arith.mulf %1055, %1058 : vector<2x128xf32>
    %cst_687 = arith.constant 0.000000e+00 : f32
    %1060 = vector.broadcast %cst_687 : f32 to vector<2x128xf32>
    %1061 = arith.select %1057, %1060, %1059 : vector<2x128xi1>, vector<2x128xf32>
    %c0_688 = arith.constant 0 : index
    %c0_689 = arith.constant 0 : index
    %1062 = vector.load %arg10[%c0_688, %c0_689] : memref<2x128xf32, #tpu.memory_space<vmem>>, vector<2x128xf32>
    tpu.vector_store %arg10[%c0_688, %c0_689], %1061 {strides = array<i32>} : memref<2x128xf32, #tpu.memory_space<vmem>>, vector<2x128xf32>,
    %1063 = arith.extui %1057 : vector<2x128xi1> to vector<2x128xi32>
    %1064 = arith.sitofp %1063 : vector<2x128xi32> to vector<2x128xf32>
    %1065 = arith.truncf %1064 : vector<2x128xf32> to vector<2x128xbf16>
    %c21 = arith.constant 21 : index
    %c0_690 = arith.constant 0 : index
    %c0_691 = arith.constant 0 : index
    %1066 = vector.load %arg6[%c21, %c0_690, %c0_691] : memref<32x2x128xbf16, #tpu.memory_space<vmem>>, vector<1x2x128xbf16>
    %1067 = vector.shape_cast %1066 : vector<1x2x128xbf16> to vector<2x128xbf16>
    %1068 = vector.shape_cast %1065 : vector<2x128xbf16> to vector<1x2x128xbf16>
    tpu.vector_store %arg6[%c21, %c0_690, %c0_691], %1068 {strides = array<i32>} : memref<32x2x128xbf16, #tpu.memory_space<vmem>>, vector<1x2x128xbf16>,
    %cst_692 = arith.constant 0.778800785 : f32
    %1069 = arith.mulf %1022, %cst_692 : f32
    %cst_693 = arith.constant 1.000000e+00 : f32
    %1070 = arith.addf %1069, %cst_693 : f32
    %cst_694 = arith.constant 0.36787945 : f32
    %1071 = arith.mulf %1024, %cst_694 : f32
    %cst_695 = arith.constant 1.000000e+00 : f32
    %1072 = arith.addf %1071, %cst_695 : f32
    %1073 = arith.subf %1070, %1072 : f32
    %1074 = vector.broadcast %1073 : f32 to vector<2x512xf32>
    %1075 = arith.mulf %3, %1074 : vector<2x512xf32>
    %1076 = arith.addf %1075, %7 : vector<2x512xf32>
    %c0_696 = arith.constant 0 : index
    %c0_697 = arith.constant 0 : index
    %1077 = vector.load %arg7[%c0_696, %c0_697] : memref<2x512xf32, #tpu.memory_space<vmem>>, vector<2x512xf32>
    %1078 = arith.addf %1077, %1076 : vector<2x512xf32>
    %cst_698 = arith.constant 1.000000e+00 : f32
    %1079 = vector.broadcast %cst_698 : f32 to vector<2x512xf32>
    %1080 = arith.cmpf ogt, %1078, %1079 : vector<2x512xf32>
    %cst_699 = arith.constant 0.778800785 : f32
    %1081 = vector.broadcast %cst_699 : f32 to vector<2x512xf32>
    %1082 = arith.mulf %1078, %1081 : vector<2x512xf32>
    %cst_700 = arith.constant 0.000000e+00 : f32
    %1083 = vector.broadcast %cst_700 : f32 to vector<2x512xf32>
    %1084 = arith.select %1080, %1083, %1082 : vector<2x512xi1>, vector<2x512xf32>
    %c0_701 = arith.constant 0 : index
    %c0_702 = arith.constant 0 : index
    %1085 = vector.load %arg7[%c0_701, %c0_702] : memref<2x512xf32, #tpu.memory_space<vmem>>, vector<2x512xf32>
    tpu.vector_store %arg7[%c0_701, %c0_702], %1084 {strides = array<i32>} : memref<2x512xf32, #tpu.memory_space<vmem>>, vector<2x512xf32>,
    %1086 = arith.extui %1080 : vector<2x512xi1> to vector<2x512xi32>
    %1087 = arith.sitofp %1086 : vector<2x512xi32> to vector<2x512xf32>
    %1088 = arith.truncf %1087 : vector<2x512xf32> to vector<2x512xbf16>
    %cst_703 = arith.constant dense<0.000000e+00> : vector<2x128xf32>
    %1089 = tpu.matmul %1088, %4, %cst_703 {dimension_numbers = #tpu.dot_dimension_numbers<[1], [0], [0], [1], [0, 0, 1, 1], [], []>} : vector<2x512xbf16>, vector<512x128xbf16>, vector<2x128xf32> -> vector<2x128xf32>
    %c0_704 = arith.constant 0 : index
    %c0_705 = arith.constant 0 : index
    %1090 = vector.load %arg8[%c0_704, %c0_705] : memref<2x128xf32, #tpu.memory_space<vmem>>, vector<2x128xf32>
    %cst_706 = arith.constant 0.778800785 : f32
    %1091 = vector.broadcast %cst_706 : f32 to vector<2x128xf32>
    %1092 = arith.mulf %1090, %1091 : vector<2x128xf32>
    %1093 = arith.addf %1092, %1089 : vector<2x128xf32>
    %c0_707 = arith.constant 0 : index
    %c0_708 = arith.constant 0 : index
    %1094 = vector.load %arg9[%c0_707, %c0_708] : memref<2x128xf32, #tpu.memory_space<vmem>>, vector<2x128xf32>
    %cst_709 = arith.constant 0.36787945 : f32
    %1095 = vector.broadcast %cst_709 : f32 to vector<2x128xf32>
    %1096 = arith.mulf %1094, %1095 : vector<2x128xf32>
    %1097 = arith.addf %1096, %1089 : vector<2x128xf32>
    %c0_710 = arith.constant 0 : index
    %c0_711 = arith.constant 0 : index
    %1098 = vector.load %arg8[%c0_710, %c0_711] : memref<2x128xf32, #tpu.memory_space<vmem>>, vector<2x128xf32>
    tpu.vector_store %arg8[%c0_710, %c0_711], %1093 {strides = array<i32>} : memref<2x128xf32, #tpu.memory_space<vmem>>, vector<2x128xf32>,
    %c0_712 = arith.constant 0 : index
    %c0_713 = arith.constant 0 : index
    %1099 = vector.load %arg9[%c0_712, %c0_713] : memref<2x128xf32, #tpu.memory_space<vmem>>, vector<2x128xf32>
    tpu.vector_store %arg9[%c0_712, %c0_713], %1097 {strides = array<i32>} : memref<2x128xf32, #tpu.memory_space<vmem>>, vector<2x128xf32>,
    %1100 = arith.subf %1093, %1097 : vector<2x128xf32>
    %1101 = arith.addf %1100, %10 : vector<2x128xf32>
    %c0_714 = arith.constant 0 : index
    %c0_715 = arith.constant 0 : index
    %1102 = vector.load %arg10[%c0_714, %c0_715] : memref<2x128xf32, #tpu.memory_space<vmem>>, vector<2x128xf32>
    %1103 = arith.addf %1102, %1101 : vector<2x128xf32>
    %cst_716 = arith.constant 1.000000e+00 : f32
    %1104 = vector.broadcast %cst_716 : f32 to vector<2x128xf32>
    %1105 = arith.cmpf ogt, %1103, %1104 : vector<2x128xf32>
    %cst_717 = arith.constant 0.778800785 : f32
    %1106 = vector.broadcast %cst_717 : f32 to vector<2x128xf32>
    %1107 = arith.mulf %1103, %1106 : vector<2x128xf32>
    %cst_718 = arith.constant 0.000000e+00 : f32
    %1108 = vector.broadcast %cst_718 : f32 to vector<2x128xf32>
    %1109 = arith.select %1105, %1108, %1107 : vector<2x128xi1>, vector<2x128xf32>
    %c0_719 = arith.constant 0 : index
    %c0_720 = arith.constant 0 : index
    %1110 = vector.load %arg10[%c0_719, %c0_720] : memref<2x128xf32, #tpu.memory_space<vmem>>, vector<2x128xf32>
    tpu.vector_store %arg10[%c0_719, %c0_720], %1109 {strides = array<i32>} : memref<2x128xf32, #tpu.memory_space<vmem>>, vector<2x128xf32>,
    %1111 = arith.extui %1105 : vector<2x128xi1> to vector<2x128xi32>
    %1112 = arith.sitofp %1111 : vector<2x128xi32> to vector<2x128xf32>
    %1113 = arith.truncf %1112 : vector<2x128xf32> to vector<2x128xbf16>
    %c22 = arith.constant 22 : index
    %c0_721 = arith.constant 0 : index
    %c0_722 = arith.constant 0 : index
    %1114 = vector.load %arg6[%c22, %c0_721, %c0_722] : memref<32x2x128xbf16, #tpu.memory_space<vmem>>, vector<1x2x128xbf16>
    %1115 = vector.shape_cast %1114 : vector<1x2x128xbf16> to vector<2x128xbf16>
    %1116 = vector.shape_cast %1113 : vector<2x128xbf16> to vector<1x2x128xbf16>
    tpu.vector_store %arg6[%c22, %c0_721, %c0_722], %1116 {strides = array<i32>} : memref<32x2x128xbf16, #tpu.memory_space<vmem>>, vector<1x2x128xbf16>,
    %cst_723 = arith.constant 0.778800785 : f32
    %1117 = arith.mulf %1070, %cst_723 : f32
    %cst_724 = arith.constant 1.000000e+00 : f32
    %1118 = arith.addf %1117, %cst_724 : f32
    %cst_725 = arith.constant 0.36787945 : f32
    %1119 = arith.mulf %1072, %cst_725 : f32
    %cst_726 = arith.constant 1.000000e+00 : f32
    %1120 = arith.addf %1119, %cst_726 : f32
    %1121 = arith.subf %1118, %1120 : f32
    %1122 = vector.broadcast %1121 : f32 to vector<2x512xf32>
    %1123 = arith.mulf %3, %1122 : vector<2x512xf32>
    %1124 = arith.addf %1123, %7 : vector<2x512xf32>
    %c0_727 = arith.constant 0 : index
    %c0_728 = arith.constant 0 : index
    %1125 = vector.load %arg7[%c0_727, %c0_728] : memref<2x512xf32, #tpu.memory_space<vmem>>, vector<2x512xf32>
    %1126 = arith.addf %1125, %1124 : vector<2x512xf32>
    %cst_729 = arith.constant 1.000000e+00 : f32
    %1127 = vector.broadcast %cst_729 : f32 to vector<2x512xf32>
    %1128 = arith.cmpf ogt, %1126, %1127 : vector<2x512xf32>
    %cst_730 = arith.constant 0.778800785 : f32
    %1129 = vector.broadcast %cst_730 : f32 to vector<2x512xf32>
    %1130 = arith.mulf %1126, %1129 : vector<2x512xf32>
    %cst_731 = arith.constant 0.000000e+00 : f32
    %1131 = vector.broadcast %cst_731 : f32 to vector<2x512xf32>
    %1132 = arith.select %1128, %1131, %1130 : vector<2x512xi1>, vector<2x512xf32>
    %c0_732 = arith.constant 0 : index
    %c0_733 = arith.constant 0 : index
    %1133 = vector.load %arg7[%c0_732, %c0_733] : memref<2x512xf32, #tpu.memory_space<vmem>>, vector<2x512xf32>
    tpu.vector_store %arg7[%c0_732, %c0_733], %1132 {strides = array<i32>} : memref<2x512xf32, #tpu.memory_space<vmem>>, vector<2x512xf32>,
    %1134 = arith.extui %1128 : vector<2x512xi1> to vector<2x512xi32>
    %1135 = arith.sitofp %1134 : vector<2x512xi32> to vector<2x512xf32>
    %1136 = arith.truncf %1135 : vector<2x512xf32> to vector<2x512xbf16>
    %cst_734 = arith.constant dense<0.000000e+00> : vector<2x128xf32>
    %1137 = tpu.matmul %1136, %4, %cst_734 {dimension_numbers = #tpu.dot_dimension_numbers<[1], [0], [0], [1], [0, 0, 1, 1], [], []>} : vector<2x512xbf16>, vector<512x128xbf16>, vector<2x128xf32> -> vector<2x128xf32>
    %c0_735 = arith.constant 0 : index
    %c0_736 = arith.constant 0 : index
    %1138 = vector.load %arg8[%c0_735, %c0_736] : memref<2x128xf32, #tpu.memory_space<vmem>>, vector<2x128xf32>
    %cst_737 = arith.constant 0.778800785 : f32
    %1139 = vector.broadcast %cst_737 : f32 to vector<2x128xf32>
    %1140 = arith.mulf %1138, %1139 : vector<2x128xf32>
    %1141 = arith.addf %1140, %1137 : vector<2x128xf32>
    %c0_738 = arith.constant 0 : index
    %c0_739 = arith.constant 0 : index
    %1142 = vector.load %arg9[%c0_738, %c0_739] : memref<2x128xf32, #tpu.memory_space<vmem>>, vector<2x128xf32>
    %cst_740 = arith.constant 0.36787945 : f32
    %1143 = vector.broadcast %cst_740 : f32 to vector<2x128xf32>
    %1144 = arith.mulf %1142, %1143 : vector<2x128xf32>
    %1145 = arith.addf %1144, %1137 : vector<2x128xf32>
    %c0_741 = arith.constant 0 : index
    %c0_742 = arith.constant 0 : index
    %1146 = vector.load %arg8[%c0_741, %c0_742] : memref<2x128xf32, #tpu.memory_space<vmem>>, vector<2x128xf32>
    tpu.vector_store %arg8[%c0_741, %c0_742], %1141 {strides = array<i32>} : memref<2x128xf32, #tpu.memory_space<vmem>>, vector<2x128xf32>,
    %c0_743 = arith.constant 0 : index
    %c0_744 = arith.constant 0 : index
    %1147 = vector.load %arg9[%c0_743, %c0_744] : memref<2x128xf32, #tpu.memory_space<vmem>>, vector<2x128xf32>
    tpu.vector_store %arg9[%c0_743, %c0_744], %1145 {strides = array<i32>} : memref<2x128xf32, #tpu.memory_space<vmem>>, vector<2x128xf32>,
    %1148 = arith.subf %1141, %1145 : vector<2x128xf32>
    %1149 = arith.addf %1148, %10 : vector<2x128xf32>
    %c0_745 = arith.constant 0 : index
    %c0_746 = arith.constant 0 : index
    %1150 = vector.load %arg10[%c0_745, %c0_746] : memref<2x128xf32, #tpu.memory_space<vmem>>, vector<2x128xf32>
    %1151 = arith.addf %1150, %1149 : vector<2x128xf32>
    %cst_747 = arith.constant 1.000000e+00 : f32
    %1152 = vector.broadcast %cst_747 : f32 to vector<2x128xf32>
    %1153 = arith.cmpf ogt, %1151, %1152 : vector<2x128xf32>
    %cst_748 = arith.constant 0.778800785 : f32
    %1154 = vector.broadcast %cst_748 : f32 to vector<2x128xf32>
    %1155 = arith.mulf %1151, %1154 : vector<2x128xf32>
    %cst_749 = arith.constant 0.000000e+00 : f32
    %1156 = vector.broadcast %cst_749 : f32 to vector<2x128xf32>
    %1157 = arith.select %1153, %1156, %1155 : vector<2x128xi1>, vector<2x128xf32>
    %c0_750 = arith.constant 0 : index
    %c0_751 = arith.constant 0 : index
    %1158 = vector.load %arg10[%c0_750, %c0_751] : memref<2x128xf32, #tpu.memory_space<vmem>>, vector<2x128xf32>
    tpu.vector_store %arg10[%c0_750, %c0_751], %1157 {strides = array<i32>} : memref<2x128xf32, #tpu.memory_space<vmem>>, vector<2x128xf32>,
    %1159 = arith.extui %1153 : vector<2x128xi1> to vector<2x128xi32>
    %1160 = arith.sitofp %1159 : vector<2x128xi32> to vector<2x128xf32>
    %1161 = arith.truncf %1160 : vector<2x128xf32> to vector<2x128xbf16>
    %c23 = arith.constant 23 : index
    %c0_752 = arith.constant 0 : index
    %c0_753 = arith.constant 0 : index
    %1162 = vector.load %arg6[%c23, %c0_752, %c0_753] : memref<32x2x128xbf16, #tpu.memory_space<vmem>>, vector<1x2x128xbf16>
    %1163 = vector.shape_cast %1162 : vector<1x2x128xbf16> to vector<2x128xbf16>
    %1164 = vector.shape_cast %1161 : vector<2x128xbf16> to vector<1x2x128xbf16>
    tpu.vector_store %arg6[%c23, %c0_752, %c0_753], %1164 {strides = array<i32>} : memref<32x2x128xbf16, #tpu.memory_space<vmem>>, vector<1x2x128xbf16>,
    %cst_754 = arith.constant 0.778800785 : f32
    %1165 = arith.mulf %1118, %cst_754 : f32
    %cst_755 = arith.constant 1.000000e+00 : f32
    %1166 = arith.addf %1165, %cst_755 : f32
    %cst_756 = arith.constant 0.36787945 : f32
    %1167 = arith.mulf %1120, %cst_756 : f32
    %cst_757 = arith.constant 1.000000e+00 : f32
    %1168 = arith.addf %1167, %cst_757 : f32
    %1169 = arith.subf %1166, %1168 : f32
    %1170 = vector.broadcast %1169 : f32 to vector<2x512xf32>
    %1171 = arith.mulf %3, %1170 : vector<2x512xf32>
    %1172 = arith.addf %1171, %7 : vector<2x512xf32>
    %c0_758 = arith.constant 0 : index
    %c0_759 = arith.constant 0 : index
    %1173 = vector.load %arg7[%c0_758, %c0_759] : memref<2x512xf32, #tpu.memory_space<vmem>>, vector<2x512xf32>
    %1174 = arith.addf %1173, %1172 : vector<2x512xf32>
    %cst_760 = arith.constant 1.000000e+00 : f32
    %1175 = vector.broadcast %cst_760 : f32 to vector<2x512xf32>
    %1176 = arith.cmpf ogt, %1174, %1175 : vector<2x512xf32>
    %cst_761 = arith.constant 0.778800785 : f32
    %1177 = vector.broadcast %cst_761 : f32 to vector<2x512xf32>
    %1178 = arith.mulf %1174, %1177 : vector<2x512xf32>
    %cst_762 = arith.constant 0.000000e+00 : f32
    %1179 = vector.broadcast %cst_762 : f32 to vector<2x512xf32>
    %1180 = arith.select %1176, %1179, %1178 : vector<2x512xi1>, vector<2x512xf32>
    %c0_763 = arith.constant 0 : index
    %c0_764 = arith.constant 0 : index
    %1181 = vector.load %arg7[%c0_763, %c0_764] : memref<2x512xf32, #tpu.memory_space<vmem>>, vector<2x512xf32>
    tpu.vector_store %arg7[%c0_763, %c0_764], %1180 {strides = array<i32>} : memref<2x512xf32, #tpu.memory_space<vmem>>, vector<2x512xf32>,
    %1182 = arith.extui %1176 : vector<2x512xi1> to vector<2x512xi32>
    %1183 = arith.sitofp %1182 : vector<2x512xi32> to vector<2x512xf32>
    %1184 = arith.truncf %1183 : vector<2x512xf32> to vector<2x512xbf16>
    %cst_765 = arith.constant dense<0.000000e+00> : vector<2x128xf32>
    %1185 = tpu.matmul %1184, %4, %cst_765 {dimension_numbers = #tpu.dot_dimension_numbers<[1], [0], [0], [1], [0, 0, 1, 1], [], []>} : vector<2x512xbf16>, vector<512x128xbf16>, vector<2x128xf32> -> vector<2x128xf32>
    %c0_766 = arith.constant 0 : index
    %c0_767 = arith.constant 0 : index
    %1186 = vector.load %arg8[%c0_766, %c0_767] : memref<2x128xf32, #tpu.memory_space<vmem>>, vector<2x128xf32>
    %cst_768 = arith.constant 0.778800785 : f32
    %1187 = vector.broadcast %cst_768 : f32 to vector<2x128xf32>
    %1188 = arith.mulf %1186, %1187 : vector<2x128xf32>
    %1189 = arith.addf %1188, %1185 : vector<2x128xf32>
    %c0_769 = arith.constant 0 : index
    %c0_770 = arith.constant 0 : index
    %1190 = vector.load %arg9[%c0_769, %c0_770] : memref<2x128xf32, #tpu.memory_space<vmem>>, vector<2x128xf32>
    %cst_771 = arith.constant 0.36787945 : f32
    %1191 = vector.broadcast %cst_771 : f32 to vector<2x128xf32>
    %1192 = arith.mulf %1190, %1191 : vector<2x128xf32>
    %1193 = arith.addf %1192, %1185 : vector<2x128xf32>
    %c0_772 = arith.constant 0 : index
    %c0_773 = arith.constant 0 : index
    %1194 = vector.load %arg8[%c0_772, %c0_773] : memref<2x128xf32, #tpu.memory_space<vmem>>, vector<2x128xf32>
    tpu.vector_store %arg8[%c0_772, %c0_773], %1189 {strides = array<i32>} : memref<2x128xf32, #tpu.memory_space<vmem>>, vector<2x128xf32>,
    %c0_774 = arith.constant 0 : index
    %c0_775 = arith.constant 0 : index
    %1195 = vector.load %arg9[%c0_774, %c0_775] : memref<2x128xf32, #tpu.memory_space<vmem>>, vector<2x128xf32>
    tpu.vector_store %arg9[%c0_774, %c0_775], %1193 {strides = array<i32>} : memref<2x128xf32, #tpu.memory_space<vmem>>, vector<2x128xf32>,
    %1196 = arith.subf %1189, %1193 : vector<2x128xf32>
    %1197 = arith.addf %1196, %10 : vector<2x128xf32>
    %c0_776 = arith.constant 0 : index
    %c0_777 = arith.constant 0 : index
    %1198 = vector.load %arg10[%c0_776, %c0_777] : memref<2x128xf32, #tpu.memory_space<vmem>>, vector<2x128xf32>
    %1199 = arith.addf %1198, %1197 : vector<2x128xf32>
    %cst_778 = arith.constant 1.000000e+00 : f32
    %1200 = vector.broadcast %cst_778 : f32 to vector<2x128xf32>
    %1201 = arith.cmpf ogt, %1199, %1200 : vector<2x128xf32>
    %cst_779 = arith.constant 0.778800785 : f32
    %1202 = vector.broadcast %cst_779 : f32 to vector<2x128xf32>
    %1203 = arith.mulf %1199, %1202 : vector<2x128xf32>
    %cst_780 = arith.constant 0.000000e+00 : f32
    %1204 = vector.broadcast %cst_780 : f32 to vector<2x128xf32>
    %1205 = arith.select %1201, %1204, %1203 : vector<2x128xi1>, vector<2x128xf32>
    %c0_781 = arith.constant 0 : index
    %c0_782 = arith.constant 0 : index
    %1206 = vector.load %arg10[%c0_781, %c0_782] : memref<2x128xf32, #tpu.memory_space<vmem>>, vector<2x128xf32>
    tpu.vector_store %arg10[%c0_781, %c0_782], %1205 {strides = array<i32>} : memref<2x128xf32, #tpu.memory_space<vmem>>, vector<2x128xf32>,
    %1207 = arith.extui %1201 : vector<2x128xi1> to vector<2x128xi32>
    %1208 = arith.sitofp %1207 : vector<2x128xi32> to vector<2x128xf32>
    %1209 = arith.truncf %1208 : vector<2x128xf32> to vector<2x128xbf16>
    %c24 = arith.constant 24 : index
    %c0_783 = arith.constant 0 : index
    %c0_784 = arith.constant 0 : index
    %1210 = vector.load %arg6[%c24, %c0_783, %c0_784] : memref<32x2x128xbf16, #tpu.memory_space<vmem>>, vector<1x2x128xbf16>
    %1211 = vector.shape_cast %1210 : vector<1x2x128xbf16> to vector<2x128xbf16>
    %1212 = vector.shape_cast %1209 : vector<2x128xbf16> to vector<1x2x128xbf16>
    tpu.vector_store %arg6[%c24, %c0_783, %c0_784], %1212 {strides = array<i32>} : memref<32x2x128xbf16, #tpu.memory_space<vmem>>, vector<1x2x128xbf16>,
    %cst_785 = arith.constant 0.778800785 : f32
    %1213 = arith.mulf %1166, %cst_785 : f32
    %cst_786 = arith.constant 1.000000e+00 : f32
    %1214 = arith.addf %1213, %cst_786 : f32
    %cst_787 = arith.constant 0.36787945 : f32
    %1215 = arith.mulf %1168, %cst_787 : f32
    %cst_788 = arith.constant 1.000000e+00 : f32
    %1216 = arith.addf %1215, %cst_788 : f32
    %1217 = arith.subf %1214, %1216 : f32
    %1218 = vector.broadcast %1217 : f32 to vector<2x512xf32>
    %1219 = arith.mulf %3, %1218 : vector<2x512xf32>
    %1220 = arith.addf %1219, %7 : vector<2x512xf32>
    %c0_789 = arith.constant 0 : index
    %c0_790 = arith.constant 0 : index
    %1221 = vector.load %arg7[%c0_789, %c0_790] : memref<2x512xf32, #tpu.memory_space<vmem>>, vector<2x512xf32>
    %1222 = arith.addf %1221, %1220 : vector<2x512xf32>
    %cst_791 = arith.constant 1.000000e+00 : f32
    %1223 = vector.broadcast %cst_791 : f32 to vector<2x512xf32>
    %1224 = arith.cmpf ogt, %1222, %1223 : vector<2x512xf32>
    %cst_792 = arith.constant 0.778800785 : f32
    %1225 = vector.broadcast %cst_792 : f32 to vector<2x512xf32>
    %1226 = arith.mulf %1222, %1225 : vector<2x512xf32>
    %cst_793 = arith.constant 0.000000e+00 : f32
    %1227 = vector.broadcast %cst_793 : f32 to vector<2x512xf32>
    %1228 = arith.select %1224, %1227, %1226 : vector<2x512xi1>, vector<2x512xf32>
    %c0_794 = arith.constant 0 : index
    %c0_795 = arith.constant 0 : index
    %1229 = vector.load %arg7[%c0_794, %c0_795] : memref<2x512xf32, #tpu.memory_space<vmem>>, vector<2x512xf32>
    tpu.vector_store %arg7[%c0_794, %c0_795], %1228 {strides = array<i32>} : memref<2x512xf32, #tpu.memory_space<vmem>>, vector<2x512xf32>,
    %1230 = arith.extui %1224 : vector<2x512xi1> to vector<2x512xi32>
    %1231 = arith.sitofp %1230 : vector<2x512xi32> to vector<2x512xf32>
    %1232 = arith.truncf %1231 : vector<2x512xf32> to vector<2x512xbf16>
    %cst_796 = arith.constant dense<0.000000e+00> : vector<2x128xf32>
    %1233 = tpu.matmul %1232, %4, %cst_796 {dimension_numbers = #tpu.dot_dimension_numbers<[1], [0], [0], [1], [0, 0, 1, 1], [], []>} : vector<2x512xbf16>, vector<512x128xbf16>, vector<2x128xf32> -> vector<2x128xf32>
    %c0_797 = arith.constant 0 : index
    %c0_798 = arith.constant 0 : index
    %1234 = vector.load %arg8[%c0_797, %c0_798] : memref<2x128xf32, #tpu.memory_space<vmem>>, vector<2x128xf32>
    %cst_799 = arith.constant 0.778800785 : f32
    %1235 = vector.broadcast %cst_799 : f32 to vector<2x128xf32>
    %1236 = arith.mulf %1234, %1235 : vector<2x128xf32>
    %1237 = arith.addf %1236, %1233 : vector<2x128xf32>
    %c0_800 = arith.constant 0 : index
    %c0_801 = arith.constant 0 : index
    %1238 = vector.load %arg9[%c0_800, %c0_801] : memref<2x128xf32, #tpu.memory_space<vmem>>, vector<2x128xf32>
    %cst_802 = arith.constant 0.36787945 : f32
    %1239 = vector.broadcast %cst_802 : f32 to vector<2x128xf32>
    %1240 = arith.mulf %1238, %1239 : vector<2x128xf32>
    %1241 = arith.addf %1240, %1233 : vector<2x128xf32>
    %c0_803 = arith.constant 0 : index
    %c0_804 = arith.constant 0 : index
    %1242 = vector.load %arg8[%c0_803, %c0_804] : memref<2x128xf32, #tpu.memory_space<vmem>>, vector<2x128xf32>
    tpu.vector_store %arg8[%c0_803, %c0_804], %1237 {strides = array<i32>} : memref<2x128xf32, #tpu.memory_space<vmem>>, vector<2x128xf32>,
    %c0_805 = arith.constant 0 : index
    %c0_806 = arith.constant 0 : index
    %1243 = vector.load %arg9[%c0_805, %c0_806] : memref<2x128xf32, #tpu.memory_space<vmem>>, vector<2x128xf32>
    tpu.vector_store %arg9[%c0_805, %c0_806], %1241 {strides = array<i32>} : memref<2x128xf32, #tpu.memory_space<vmem>>, vector<2x128xf32>,
    %1244 = arith.subf %1237, %1241 : vector<2x128xf32>
    %1245 = arith.addf %1244, %10 : vector<2x128xf32>
    %c0_807 = arith.constant 0 : index
    %c0_808 = arith.constant 0 : index
    %1246 = vector.load %arg10[%c0_807, %c0_808] : memref<2x128xf32, #tpu.memory_space<vmem>>, vector<2x128xf32>
    %1247 = arith.addf %1246, %1245 : vector<2x128xf32>
    %cst_809 = arith.constant 1.000000e+00 : f32
    %1248 = vector.broadcast %cst_809 : f32 to vector<2x128xf32>
    %1249 = arith.cmpf ogt, %1247, %1248 : vector<2x128xf32>
    %cst_810 = arith.constant 0.778800785 : f32
    %1250 = vector.broadcast %cst_810 : f32 to vector<2x128xf32>
    %1251 = arith.mulf %1247, %1250 : vector<2x128xf32>
    %cst_811 = arith.constant 0.000000e+00 : f32
    %1252 = vector.broadcast %cst_811 : f32 to vector<2x128xf32>
    %1253 = arith.select %1249, %1252, %1251 : vector<2x128xi1>, vector<2x128xf32>
    %c0_812 = arith.constant 0 : index
    %c0_813 = arith.constant 0 : index
    %1254 = vector.load %arg10[%c0_812, %c0_813] : memref<2x128xf32, #tpu.memory_space<vmem>>, vector<2x128xf32>
    tpu.vector_store %arg10[%c0_812, %c0_813], %1253 {strides = array<i32>} : memref<2x128xf32, #tpu.memory_space<vmem>>, vector<2x128xf32>,
    %1255 = arith.extui %1249 : vector<2x128xi1> to vector<2x128xi32>
    %1256 = arith.sitofp %1255 : vector<2x128xi32> to vector<2x128xf32>
    %1257 = arith.truncf %1256 : vector<2x128xf32> to vector<2x128xbf16>
    %c25 = arith.constant 25 : index
    %c0_814 = arith.constant 0 : index
    %c0_815 = arith.constant 0 : index
    %1258 = vector.load %arg6[%c25, %c0_814, %c0_815] : memref<32x2x128xbf16, #tpu.memory_space<vmem>>, vector<1x2x128xbf16>
    %1259 = vector.shape_cast %1258 : vector<1x2x128xbf16> to vector<2x128xbf16>
    %1260 = vector.shape_cast %1257 : vector<2x128xbf16> to vector<1x2x128xbf16>
    tpu.vector_store %arg6[%c25, %c0_814, %c0_815], %1260 {strides = array<i32>} : memref<32x2x128xbf16, #tpu.memory_space<vmem>>, vector<1x2x128xbf16>,
    %cst_816 = arith.constant 0.778800785 : f32
    %1261 = arith.mulf %1214, %cst_816 : f32
    %cst_817 = arith.constant 1.000000e+00 : f32
    %1262 = arith.addf %1261, %cst_817 : f32
    %cst_818 = arith.constant 0.36787945 : f32
    %1263 = arith.mulf %1216, %cst_818 : f32
    %cst_819 = arith.constant 1.000000e+00 : f32
    %1264 = arith.addf %1263, %cst_819 : f32
    %1265 = arith.subf %1262, %1264 : f32
    %1266 = vector.broadcast %1265 : f32 to vector<2x512xf32>
    %1267 = arith.mulf %3, %1266 : vector<2x512xf32>
    %1268 = arith.addf %1267, %7 : vector<2x512xf32>
    %c0_820 = arith.constant 0 : index
    %c0_821 = arith.constant 0 : index
    %1269 = vector.load %arg7[%c0_820, %c0_821] : memref<2x512xf32, #tpu.memory_space<vmem>>, vector<2x512xf32>
    %1270 = arith.addf %1269, %1268 : vector<2x512xf32>
    %cst_822 = arith.constant 1.000000e+00 : f32
    %1271 = vector.broadcast %cst_822 : f32 to vector<2x512xf32>
    %1272 = arith.cmpf ogt, %1270, %1271 : vector<2x512xf32>
    %cst_823 = arith.constant 0.778800785 : f32
    %1273 = vector.broadcast %cst_823 : f32 to vector<2x512xf32>
    %1274 = arith.mulf %1270, %1273 : vector<2x512xf32>
    %cst_824 = arith.constant 0.000000e+00 : f32
    %1275 = vector.broadcast %cst_824 : f32 to vector<2x512xf32>
    %1276 = arith.select %1272, %1275, %1274 : vector<2x512xi1>, vector<2x512xf32>
    %c0_825 = arith.constant 0 : index
    %c0_826 = arith.constant 0 : index
    %1277 = vector.load %arg7[%c0_825, %c0_826] : memref<2x512xf32, #tpu.memory_space<vmem>>, vector<2x512xf32>
    tpu.vector_store %arg7[%c0_825, %c0_826], %1276 {strides = array<i32>} : memref<2x512xf32, #tpu.memory_space<vmem>>, vector<2x512xf32>,
    %1278 = arith.extui %1272 : vector<2x512xi1> to vector<2x512xi32>
    %1279 = arith.sitofp %1278 : vector<2x512xi32> to vector<2x512xf32>
    %1280 = arith.truncf %1279 : vector<2x512xf32> to vector<2x512xbf16>
    %cst_827 = arith.constant dense<0.000000e+00> : vector<2x128xf32>
    %1281 = tpu.matmul %1280, %4, %cst_827 {dimension_numbers = #tpu.dot_dimension_numbers<[1], [0], [0], [1], [0, 0, 1, 1], [], []>} : vector<2x512xbf16>, vector<512x128xbf16>, vector<2x128xf32> -> vector<2x128xf32>
    %c0_828 = arith.constant 0 : index
    %c0_829 = arith.constant 0 : index
    %1282 = vector.load %arg8[%c0_828, %c0_829] : memref<2x128xf32, #tpu.memory_space<vmem>>, vector<2x128xf32>
    %cst_830 = arith.constant 0.778800785 : f32
    %1283 = vector.broadcast %cst_830 : f32 to vector<2x128xf32>
    %1284 = arith.mulf %1282, %1283 : vector<2x128xf32>
    %1285 = arith.addf %1284, %1281 : vector<2x128xf32>
    %c0_831 = arith.constant 0 : index
    %c0_832 = arith.constant 0 : index
    %1286 = vector.load %arg9[%c0_831, %c0_832] : memref<2x128xf32, #tpu.memory_space<vmem>>, vector<2x128xf32>
    %cst_833 = arith.constant 0.36787945 : f32
    %1287 = vector.broadcast %cst_833 : f32 to vector<2x128xf32>
    %1288 = arith.mulf %1286, %1287 : vector<2x128xf32>
    %1289 = arith.addf %1288, %1281 : vector<2x128xf32>
    %c0_834 = arith.constant 0 : index
    %c0_835 = arith.constant 0 : index
    %1290 = vector.load %arg8[%c0_834, %c0_835] : memref<2x128xf32, #tpu.memory_space<vmem>>, vector<2x128xf32>
    tpu.vector_store %arg8[%c0_834, %c0_835], %1285 {strides = array<i32>} : memref<2x128xf32, #tpu.memory_space<vmem>>, vector<2x128xf32>,
    %c0_836 = arith.constant 0 : index
    %c0_837 = arith.constant 0 : index
    %1291 = vector.load %arg9[%c0_836, %c0_837] : memref<2x128xf32, #tpu.memory_space<vmem>>, vector<2x128xf32>
    tpu.vector_store %arg9[%c0_836, %c0_837], %1289 {strides = array<i32>} : memref<2x128xf32, #tpu.memory_space<vmem>>, vector<2x128xf32>,
    %1292 = arith.subf %1285, %1289 : vector<2x128xf32>
    %1293 = arith.addf %1292, %10 : vector<2x128xf32>
    %c0_838 = arith.constant 0 : index
    %c0_839 = arith.constant 0 : index
    %1294 = vector.load %arg10[%c0_838, %c0_839] : memref<2x128xf32, #tpu.memory_space<vmem>>, vector<2x128xf32>
    %1295 = arith.addf %1294, %1293 : vector<2x128xf32>
    %cst_840 = arith.constant 1.000000e+00 : f32
    %1296 = vector.broadcast %cst_840 : f32 to vector<2x128xf32>
    %1297 = arith.cmpf ogt, %1295, %1296 : vector<2x128xf32>
    %cst_841 = arith.constant 0.778800785 : f32
    %1298 = vector.broadcast %cst_841 : f32 to vector<2x128xf32>
    %1299 = arith.mulf %1295, %1298 : vector<2x128xf32>
    %cst_842 = arith.constant 0.000000e+00 : f32
    %1300 = vector.broadcast %cst_842 : f32 to vector<2x128xf32>
    %1301 = arith.select %1297, %1300, %1299 : vector<2x128xi1>, vector<2x128xf32>
    %c0_843 = arith.constant 0 : index
    %c0_844 = arith.constant 0 : index
    %1302 = vector.load %arg10[%c0_843, %c0_844] : memref<2x128xf32, #tpu.memory_space<vmem>>, vector<2x128xf32>
    tpu.vector_store %arg10[%c0_843, %c0_844], %1301 {strides = array<i32>} : memref<2x128xf32, #tpu.memory_space<vmem>>, vector<2x128xf32>,
    %1303 = arith.extui %1297 : vector<2x128xi1> to vector<2x128xi32>
    %1304 = arith.sitofp %1303 : vector<2x128xi32> to vector<2x128xf32>
    %1305 = arith.truncf %1304 : vector<2x128xf32> to vector<2x128xbf16>
    %c26 = arith.constant 26 : index
    %c0_845 = arith.constant 0 : index
    %c0_846 = arith.constant 0 : index
    %1306 = vector.load %arg6[%c26, %c0_845, %c0_846] : memref<32x2x128xbf16, #tpu.memory_space<vmem>>, vector<1x2x128xbf16>
    %1307 = vector.shape_cast %1306 : vector<1x2x128xbf16> to vector<2x128xbf16>
    %1308 = vector.shape_cast %1305 : vector<2x128xbf16> to vector<1x2x128xbf16>
    tpu.vector_store %arg6[%c26, %c0_845, %c0_846], %1308 {strides = array<i32>} : memref<32x2x128xbf16, #tpu.memory_space<vmem>>, vector<1x2x128xbf16>,
    %cst_847 = arith.constant 0.778800785 : f32
    %1309 = arith.mulf %1262, %cst_847 : f32
    %cst_848 = arith.constant 1.000000e+00 : f32
    %1310 = arith.addf %1309, %cst_848 : f32
    %cst_849 = arith.constant 0.36787945 : f32
    %1311 = arith.mulf %1264, %cst_849 : f32
    %cst_850 = arith.constant 1.000000e+00 : f32
    %1312 = arith.addf %1311, %cst_850 : f32
    %1313 = arith.subf %1310, %1312 : f32
    %1314 = vector.broadcast %1313 : f32 to vector<2x512xf32>
    %1315 = arith.mulf %3, %1314 : vector<2x512xf32>
    %1316 = arith.addf %1315, %7 : vector<2x512xf32>
    %c0_851 = arith.constant 0 : index
    %c0_852 = arith.constant 0 : index
    %1317 = vector.load %arg7[%c0_851, %c0_852] : memref<2x512xf32, #tpu.memory_space<vmem>>, vector<2x512xf32>
    %1318 = arith.addf %1317, %1316 : vector<2x512xf32>
    %cst_853 = arith.constant 1.000000e+00 : f32
    %1319 = vector.broadcast %cst_853 : f32 to vector<2x512xf32>
    %1320 = arith.cmpf ogt, %1318, %1319 : vector<2x512xf32>
    %cst_854 = arith.constant 0.778800785 : f32
    %1321 = vector.broadcast %cst_854 : f32 to vector<2x512xf32>
    %1322 = arith.mulf %1318, %1321 : vector<2x512xf32>
    %cst_855 = arith.constant 0.000000e+00 : f32
    %1323 = vector.broadcast %cst_855 : f32 to vector<2x512xf32>
    %1324 = arith.select %1320, %1323, %1322 : vector<2x512xi1>, vector<2x512xf32>
    %c0_856 = arith.constant 0 : index
    %c0_857 = arith.constant 0 : index
    %1325 = vector.load %arg7[%c0_856, %c0_857] : memref<2x512xf32, #tpu.memory_space<vmem>>, vector<2x512xf32>
    tpu.vector_store %arg7[%c0_856, %c0_857], %1324 {strides = array<i32>} : memref<2x512xf32, #tpu.memory_space<vmem>>, vector<2x512xf32>,
    %1326 = arith.extui %1320 : vector<2x512xi1> to vector<2x512xi32>
    %1327 = arith.sitofp %1326 : vector<2x512xi32> to vector<2x512xf32>
    %1328 = arith.truncf %1327 : vector<2x512xf32> to vector<2x512xbf16>
    %cst_858 = arith.constant dense<0.000000e+00> : vector<2x128xf32>
    %1329 = tpu.matmul %1328, %4, %cst_858 {dimension_numbers = #tpu.dot_dimension_numbers<[1], [0], [0], [1], [0, 0, 1, 1], [], []>} : vector<2x512xbf16>, vector<512x128xbf16>, vector<2x128xf32> -> vector<2x128xf32>
    %c0_859 = arith.constant 0 : index
    %c0_860 = arith.constant 0 : index
    %1330 = vector.load %arg8[%c0_859, %c0_860] : memref<2x128xf32, #tpu.memory_space<vmem>>, vector<2x128xf32>
    %cst_861 = arith.constant 0.778800785 : f32
    %1331 = vector.broadcast %cst_861 : f32 to vector<2x128xf32>
    %1332 = arith.mulf %1330, %1331 : vector<2x128xf32>
    %1333 = arith.addf %1332, %1329 : vector<2x128xf32>
    %c0_862 = arith.constant 0 : index
    %c0_863 = arith.constant 0 : index
    %1334 = vector.load %arg9[%c0_862, %c0_863] : memref<2x128xf32, #tpu.memory_space<vmem>>, vector<2x128xf32>
    %cst_864 = arith.constant 0.36787945 : f32
    %1335 = vector.broadcast %cst_864 : f32 to vector<2x128xf32>
    %1336 = arith.mulf %1334, %1335 : vector<2x128xf32>
    %1337 = arith.addf %1336, %1329 : vector<2x128xf32>
    %c0_865 = arith.constant 0 : index
    %c0_866 = arith.constant 0 : index
    %1338 = vector.load %arg8[%c0_865, %c0_866] : memref<2x128xf32, #tpu.memory_space<vmem>>, vector<2x128xf32>
    tpu.vector_store %arg8[%c0_865, %c0_866], %1333 {strides = array<i32>} : memref<2x128xf32, #tpu.memory_space<vmem>>, vector<2x128xf32>,
    %c0_867 = arith.constant 0 : index
    %c0_868 = arith.constant 0 : index
    %1339 = vector.load %arg9[%c0_867, %c0_868] : memref<2x128xf32, #tpu.memory_space<vmem>>, vector<2x128xf32>
    tpu.vector_store %arg9[%c0_867, %c0_868], %1337 {strides = array<i32>} : memref<2x128xf32, #tpu.memory_space<vmem>>, vector<2x128xf32>,
    %1340 = arith.subf %1333, %1337 : vector<2x128xf32>
    %1341 = arith.addf %1340, %10 : vector<2x128xf32>
    %c0_869 = arith.constant 0 : index
    %c0_870 = arith.constant 0 : index
    %1342 = vector.load %arg10[%c0_869, %c0_870] : memref<2x128xf32, #tpu.memory_space<vmem>>, vector<2x128xf32>
    %1343 = arith.addf %1342, %1341 : vector<2x128xf32>
    %cst_871 = arith.constant 1.000000e+00 : f32
    %1344 = vector.broadcast %cst_871 : f32 to vector<2x128xf32>
    %1345 = arith.cmpf ogt, %1343, %1344 : vector<2x128xf32>
    %cst_872 = arith.constant 0.778800785 : f32
    %1346 = vector.broadcast %cst_872 : f32 to vector<2x128xf32>
    %1347 = arith.mulf %1343, %1346 : vector<2x128xf32>
    %cst_873 = arith.constant 0.000000e+00 : f32
    %1348 = vector.broadcast %cst_873 : f32 to vector<2x128xf32>
    %1349 = arith.select %1345, %1348, %1347 : vector<2x128xi1>, vector<2x128xf32>
    %c0_874 = arith.constant 0 : index
    %c0_875 = arith.constant 0 : index
    %1350 = vector.load %arg10[%c0_874, %c0_875] : memref<2x128xf32, #tpu.memory_space<vmem>>, vector<2x128xf32>
    tpu.vector_store %arg10[%c0_874, %c0_875], %1349 {strides = array<i32>} : memref<2x128xf32, #tpu.memory_space<vmem>>, vector<2x128xf32>,
    %1351 = arith.extui %1345 : vector<2x128xi1> to vector<2x128xi32>
    %1352 = arith.sitofp %1351 : vector<2x128xi32> to vector<2x128xf32>
    %1353 = arith.truncf %1352 : vector<2x128xf32> to vector<2x128xbf16>
    %c27 = arith.constant 27 : index
    %c0_876 = arith.constant 0 : index
    %c0_877 = arith.constant 0 : index
    %1354 = vector.load %arg6[%c27, %c0_876, %c0_877] : memref<32x2x128xbf16, #tpu.memory_space<vmem>>, vector<1x2x128xbf16>
    %1355 = vector.shape_cast %1354 : vector<1x2x128xbf16> to vector<2x128xbf16>
    %1356 = vector.shape_cast %1353 : vector<2x128xbf16> to vector<1x2x128xbf16>
    tpu.vector_store %arg6[%c27, %c0_876, %c0_877], %1356 {strides = array<i32>} : memref<32x2x128xbf16, #tpu.memory_space<vmem>>, vector<1x2x128xbf16>,
    %cst_878 = arith.constant 0.778800785 : f32
    %1357 = arith.mulf %1310, %cst_878 : f32
    %cst_879 = arith.constant 1.000000e+00 : f32
    %1358 = arith.addf %1357, %cst_879 : f32
    %cst_880 = arith.constant 0.36787945 : f32
    %1359 = arith.mulf %1312, %cst_880 : f32
    %cst_881 = arith.constant 1.000000e+00 : f32
    %1360 = arith.addf %1359, %cst_881 : f32
    %1361 = arith.subf %1358, %1360 : f32
    %1362 = vector.broadcast %1361 : f32 to vector<2x512xf32>
    %1363 = arith.mulf %3, %1362 : vector<2x512xf32>
    %1364 = arith.addf %1363, %7 : vector<2x512xf32>
    %c0_882 = arith.constant 0 : index
    %c0_883 = arith.constant 0 : index
    %1365 = vector.load %arg7[%c0_882, %c0_883] : memref<2x512xf32, #tpu.memory_space<vmem>>, vector<2x512xf32>
    %1366 = arith.addf %1365, %1364 : vector<2x512xf32>
    %cst_884 = arith.constant 1.000000e+00 : f32
    %1367 = vector.broadcast %cst_884 : f32 to vector<2x512xf32>
    %1368 = arith.cmpf ogt, %1366, %1367 : vector<2x512xf32>
    %cst_885 = arith.constant 0.778800785 : f32
    %1369 = vector.broadcast %cst_885 : f32 to vector<2x512xf32>
    %1370 = arith.mulf %1366, %1369 : vector<2x512xf32>
    %cst_886 = arith.constant 0.000000e+00 : f32
    %1371 = vector.broadcast %cst_886 : f32 to vector<2x512xf32>
    %1372 = arith.select %1368, %1371, %1370 : vector<2x512xi1>, vector<2x512xf32>
    %c0_887 = arith.constant 0 : index
    %c0_888 = arith.constant 0 : index
    %1373 = vector.load %arg7[%c0_887, %c0_888] : memref<2x512xf32, #tpu.memory_space<vmem>>, vector<2x512xf32>
    tpu.vector_store %arg7[%c0_887, %c0_888], %1372 {strides = array<i32>} : memref<2x512xf32, #tpu.memory_space<vmem>>, vector<2x512xf32>,
    %1374 = arith.extui %1368 : vector<2x512xi1> to vector<2x512xi32>
    %1375 = arith.sitofp %1374 : vector<2x512xi32> to vector<2x512xf32>
    %1376 = arith.truncf %1375 : vector<2x512xf32> to vector<2x512xbf16>
    %cst_889 = arith.constant dense<0.000000e+00> : vector<2x128xf32>
    %1377 = tpu.matmul %1376, %4, %cst_889 {dimension_numbers = #tpu.dot_dimension_numbers<[1], [0], [0], [1], [0, 0, 1, 1], [], []>} : vector<2x512xbf16>, vector<512x128xbf16>, vector<2x128xf32> -> vector<2x128xf32>
    %c0_890 = arith.constant 0 : index
    %c0_891 = arith.constant 0 : index
    %1378 = vector.load %arg8[%c0_890, %c0_891] : memref<2x128xf32, #tpu.memory_space<vmem>>, vector<2x128xf32>
    %cst_892 = arith.constant 0.778800785 : f32
    %1379 = vector.broadcast %cst_892 : f32 to vector<2x128xf32>
    %1380 = arith.mulf %1378, %1379 : vector<2x128xf32>
    %1381 = arith.addf %1380, %1377 : vector<2x128xf32>
    %c0_893 = arith.constant 0 : index
    %c0_894 = arith.constant 0 : index
    %1382 = vector.load %arg9[%c0_893, %c0_894] : memref<2x128xf32, #tpu.memory_space<vmem>>, vector<2x128xf32>
    %cst_895 = arith.constant 0.36787945 : f32
    %1383 = vector.broadcast %cst_895 : f32 to vector<2x128xf32>
    %1384 = arith.mulf %1382, %1383 : vector<2x128xf32>
    %1385 = arith.addf %1384, %1377 : vector<2x128xf32>
    %c0_896 = arith.constant 0 : index
    %c0_897 = arith.constant 0 : index
    %1386 = vector.load %arg8[%c0_896, %c0_897] : memref<2x128xf32, #tpu.memory_space<vmem>>, vector<2x128xf32>
    tpu.vector_store %arg8[%c0_896, %c0_897], %1381 {strides = array<i32>} : memref<2x128xf32, #tpu.memory_space<vmem>>, vector<2x128xf32>,
    %c0_898 = arith.constant 0 : index
    %c0_899 = arith.constant 0 : index
    %1387 = vector.load %arg9[%c0_898, %c0_899] : memref<2x128xf32, #tpu.memory_space<vmem>>, vector<2x128xf32>
    tpu.vector_store %arg9[%c0_898, %c0_899], %1385 {strides = array<i32>} : memref<2x128xf32, #tpu.memory_space<vmem>>, vector<2x128xf32>,
    %1388 = arith.subf %1381, %1385 : vector<2x128xf32>
    %1389 = arith.addf %1388, %10 : vector<2x128xf32>
    %c0_900 = arith.constant 0 : index
    %c0_901 = arith.constant 0 : index
    %1390 = vector.load %arg10[%c0_900, %c0_901] : memref<2x128xf32, #tpu.memory_space<vmem>>, vector<2x128xf32>
    %1391 = arith.addf %1390, %1389 : vector<2x128xf32>
    %cst_902 = arith.constant 1.000000e+00 : f32
    %1392 = vector.broadcast %cst_902 : f32 to vector<2x128xf32>
    %1393 = arith.cmpf ogt, %1391, %1392 : vector<2x128xf32>
    %cst_903 = arith.constant 0.778800785 : f32
    %1394 = vector.broadcast %cst_903 : f32 to vector<2x128xf32>
    %1395 = arith.mulf %1391, %1394 : vector<2x128xf32>
    %cst_904 = arith.constant 0.000000e+00 : f32
    %1396 = vector.broadcast %cst_904 : f32 to vector<2x128xf32>
    %1397 = arith.select %1393, %1396, %1395 : vector<2x128xi1>, vector<2x128xf32>
    %c0_905 = arith.constant 0 : index
    %c0_906 = arith.constant 0 : index
    %1398 = vector.load %arg10[%c0_905, %c0_906] : memref<2x128xf32, #tpu.memory_space<vmem>>, vector<2x128xf32>
    tpu.vector_store %arg10[%c0_905, %c0_906], %1397 {strides = array<i32>} : memref<2x128xf32, #tpu.memory_space<vmem>>, vector<2x128xf32>,
    %1399 = arith.extui %1393 : vector<2x128xi1> to vector<2x128xi32>
    %1400 = arith.sitofp %1399 : vector<2x128xi32> to vector<2x128xf32>
    %1401 = arith.truncf %1400 : vector<2x128xf32> to vector<2x128xbf16>
    %c28 = arith.constant 28 : index
    %c0_907 = arith.constant 0 : index
    %c0_908 = arith.constant 0 : index
    %1402 = vector.load %arg6[%c28, %c0_907, %c0_908] : memref<32x2x128xbf16, #tpu.memory_space<vmem>>, vector<1x2x128xbf16>
    %1403 = vector.shape_cast %1402 : vector<1x2x128xbf16> to vector<2x128xbf16>
    %1404 = vector.shape_cast %1401 : vector<2x128xbf16> to vector<1x2x128xbf16>
    tpu.vector_store %arg6[%c28, %c0_907, %c0_908], %1404 {strides = array<i32>} : memref<32x2x128xbf16, #tpu.memory_space<vmem>>, vector<1x2x128xbf16>,
    %cst_909 = arith.constant 0.778800785 : f32
    %1405 = arith.mulf %1358, %cst_909 : f32
    %cst_910 = arith.constant 1.000000e+00 : f32
    %1406 = arith.addf %1405, %cst_910 : f32
    %cst_911 = arith.constant 0.36787945 : f32
    %1407 = arith.mulf %1360, %cst_911 : f32
    %cst_912 = arith.constant 1.000000e+00 : f32
    %1408 = arith.addf %1407, %cst_912 : f32
    %1409 = arith.subf %1406, %1408 : f32
    %1410 = vector.broadcast %1409 : f32 to vector<2x512xf32>
    %1411 = arith.mulf %3, %1410 : vector<2x512xf32>
    %1412 = arith.addf %1411, %7 : vector<2x512xf32>
    %c0_913 = arith.constant 0 : index
    %c0_914 = arith.constant 0 : index
    %1413 = vector.load %arg7[%c0_913, %c0_914] : memref<2x512xf32, #tpu.memory_space<vmem>>, vector<2x512xf32>
    %1414 = arith.addf %1413, %1412 : vector<2x512xf32>
    %cst_915 = arith.constant 1.000000e+00 : f32
    %1415 = vector.broadcast %cst_915 : f32 to vector<2x512xf32>
    %1416 = arith.cmpf ogt, %1414, %1415 : vector<2x512xf32>
    %cst_916 = arith.constant 0.778800785 : f32
    %1417 = vector.broadcast %cst_916 : f32 to vector<2x512xf32>
    %1418 = arith.mulf %1414, %1417 : vector<2x512xf32>
    %cst_917 = arith.constant 0.000000e+00 : f32
    %1419 = vector.broadcast %cst_917 : f32 to vector<2x512xf32>
    %1420 = arith.select %1416, %1419, %1418 : vector<2x512xi1>, vector<2x512xf32>
    %c0_918 = arith.constant 0 : index
    %c0_919 = arith.constant 0 : index
    %1421 = vector.load %arg7[%c0_918, %c0_919] : memref<2x512xf32, #tpu.memory_space<vmem>>, vector<2x512xf32>
    tpu.vector_store %arg7[%c0_918, %c0_919], %1420 {strides = array<i32>} : memref<2x512xf32, #tpu.memory_space<vmem>>, vector<2x512xf32>,
    %1422 = arith.extui %1416 : vector<2x512xi1> to vector<2x512xi32>
    %1423 = arith.sitofp %1422 : vector<2x512xi32> to vector<2x512xf32>
    %1424 = arith.truncf %1423 : vector<2x512xf32> to vector<2x512xbf16>
    %cst_920 = arith.constant dense<0.000000e+00> : vector<2x128xf32>
    %1425 = tpu.matmul %1424, %4, %cst_920 {dimension_numbers = #tpu.dot_dimension_numbers<[1], [0], [0], [1], [0, 0, 1, 1], [], []>} : vector<2x512xbf16>, vector<512x128xbf16>, vector<2x128xf32> -> vector<2x128xf32>
    %c0_921 = arith.constant 0 : index
    %c0_922 = arith.constant 0 : index
    %1426 = vector.load %arg8[%c0_921, %c0_922] : memref<2x128xf32, #tpu.memory_space<vmem>>, vector<2x128xf32>
    %cst_923 = arith.constant 0.778800785 : f32
    %1427 = vector.broadcast %cst_923 : f32 to vector<2x128xf32>
    %1428 = arith.mulf %1426, %1427 : vector<2x128xf32>
    %1429 = arith.addf %1428, %1425 : vector<2x128xf32>
    %c0_924 = arith.constant 0 : index
    %c0_925 = arith.constant 0 : index
    %1430 = vector.load %arg9[%c0_924, %c0_925] : memref<2x128xf32, #tpu.memory_space<vmem>>, vector<2x128xf32>
    %cst_926 = arith.constant 0.36787945 : f32
    %1431 = vector.broadcast %cst_926 : f32 to vector<2x128xf32>
    %1432 = arith.mulf %1430, %1431 : vector<2x128xf32>
    %1433 = arith.addf %1432, %1425 : vector<2x128xf32>
    %c0_927 = arith.constant 0 : index
    %c0_928 = arith.constant 0 : index
    %1434 = vector.load %arg8[%c0_927, %c0_928] : memref<2x128xf32, #tpu.memory_space<vmem>>, vector<2x128xf32>
    tpu.vector_store %arg8[%c0_927, %c0_928], %1429 {strides = array<i32>} : memref<2x128xf32, #tpu.memory_space<vmem>>, vector<2x128xf32>,
    %c0_929 = arith.constant 0 : index
    %c0_930 = arith.constant 0 : index
    %1435 = vector.load %arg9[%c0_929, %c0_930] : memref<2x128xf32, #tpu.memory_space<vmem>>, vector<2x128xf32>
    tpu.vector_store %arg9[%c0_929, %c0_930], %1433 {strides = array<i32>} : memref<2x128xf32, #tpu.memory_space<vmem>>, vector<2x128xf32>,
    %1436 = arith.subf %1429, %1433 : vector<2x128xf32>
    %1437 = arith.addf %1436, %10 : vector<2x128xf32>
    %c0_931 = arith.constant 0 : index
    %c0_932 = arith.constant 0 : index
    %1438 = vector.load %arg10[%c0_931, %c0_932] : memref<2x128xf32, #tpu.memory_space<vmem>>, vector<2x128xf32>
    %1439 = arith.addf %1438, %1437 : vector<2x128xf32>
    %cst_933 = arith.constant 1.000000e+00 : f32
    %1440 = vector.broadcast %cst_933 : f32 to vector<2x128xf32>
    %1441 = arith.cmpf ogt, %1439, %1440 : vector<2x128xf32>
    %cst_934 = arith.constant 0.778800785 : f32
    %1442 = vector.broadcast %cst_934 : f32 to vector<2x128xf32>
    %1443 = arith.mulf %1439, %1442 : vector<2x128xf32>
    %cst_935 = arith.constant 0.000000e+00 : f32
    %1444 = vector.broadcast %cst_935 : f32 to vector<2x128xf32>
    %1445 = arith.select %1441, %1444, %1443 : vector<2x128xi1>, vector<2x128xf32>
    %c0_936 = arith.constant 0 : index
    %c0_937 = arith.constant 0 : index
    %1446 = vector.load %arg10[%c0_936, %c0_937] : memref<2x128xf32, #tpu.memory_space<vmem>>, vector<2x128xf32>
    tpu.vector_store %arg10[%c0_936, %c0_937], %1445 {strides = array<i32>} : memref<2x128xf32, #tpu.memory_space<vmem>>, vector<2x128xf32>,
    %1447 = arith.extui %1441 : vector<2x128xi1> to vector<2x128xi32>
    %1448 = arith.sitofp %1447 : vector<2x128xi32> to vector<2x128xf32>
    %1449 = arith.truncf %1448 : vector<2x128xf32> to vector<2x128xbf16>
    %c29 = arith.constant 29 : index
    %c0_938 = arith.constant 0 : index
    %c0_939 = arith.constant 0 : index
    %1450 = vector.load %arg6[%c29, %c0_938, %c0_939] : memref<32x2x128xbf16, #tpu.memory_space<vmem>>, vector<1x2x128xbf16>
    %1451 = vector.shape_cast %1450 : vector<1x2x128xbf16> to vector<2x128xbf16>
    %1452 = vector.shape_cast %1449 : vector<2x128xbf16> to vector<1x2x128xbf16>
    tpu.vector_store %arg6[%c29, %c0_938, %c0_939], %1452 {strides = array<i32>} : memref<32x2x128xbf16, #tpu.memory_space<vmem>>, vector<1x2x128xbf16>,
    %cst_940 = arith.constant 0.778800785 : f32
    %1453 = arith.mulf %1406, %cst_940 : f32
    %cst_941 = arith.constant 1.000000e+00 : f32
    %1454 = arith.addf %1453, %cst_941 : f32
    %cst_942 = arith.constant 0.36787945 : f32
    %1455 = arith.mulf %1408, %cst_942 : f32
    %cst_943 = arith.constant 1.000000e+00 : f32
    %1456 = arith.addf %1455, %cst_943 : f32
    %1457 = arith.subf %1454, %1456 : f32
    %1458 = vector.broadcast %1457 : f32 to vector<2x512xf32>
    %1459 = arith.mulf %3, %1458 : vector<2x512xf32>
    %1460 = arith.addf %1459, %7 : vector<2x512xf32>
    %c0_944 = arith.constant 0 : index
    %c0_945 = arith.constant 0 : index
    %1461 = vector.load %arg7[%c0_944, %c0_945] : memref<2x512xf32, #tpu.memory_space<vmem>>, vector<2x512xf32>
    %1462 = arith.addf %1461, %1460 : vector<2x512xf32>
    %cst_946 = arith.constant 1.000000e+00 : f32
    %1463 = vector.broadcast %cst_946 : f32 to vector<2x512xf32>
    %1464 = arith.cmpf ogt, %1462, %1463 : vector<2x512xf32>
    %cst_947 = arith.constant 0.778800785 : f32
    %1465 = vector.broadcast %cst_947 : f32 to vector<2x512xf32>
    %1466 = arith.mulf %1462, %1465 : vector<2x512xf32>
    %cst_948 = arith.constant 0.000000e+00 : f32
    %1467 = vector.broadcast %cst_948 : f32 to vector<2x512xf32>
    %1468 = arith.select %1464, %1467, %1466 : vector<2x512xi1>, vector<2x512xf32>
    %c0_949 = arith.constant 0 : index
    %c0_950 = arith.constant 0 : index
    %1469 = vector.load %arg7[%c0_949, %c0_950] : memref<2x512xf32, #tpu.memory_space<vmem>>, vector<2x512xf32>
    tpu.vector_store %arg7[%c0_949, %c0_950], %1468 {strides = array<i32>} : memref<2x512xf32, #tpu.memory_space<vmem>>, vector<2x512xf32>,
    %1470 = arith.extui %1464 : vector<2x512xi1> to vector<2x512xi32>
    %1471 = arith.sitofp %1470 : vector<2x512xi32> to vector<2x512xf32>
    %1472 = arith.truncf %1471 : vector<2x512xf32> to vector<2x512xbf16>
    %cst_951 = arith.constant dense<0.000000e+00> : vector<2x128xf32>
    %1473 = tpu.matmul %1472, %4, %cst_951 {dimension_numbers = #tpu.dot_dimension_numbers<[1], [0], [0], [1], [0, 0, 1, 1], [], []>} : vector<2x512xbf16>, vector<512x128xbf16>, vector<2x128xf32> -> vector<2x128xf32>
    %c0_952 = arith.constant 0 : index
    %c0_953 = arith.constant 0 : index
    %1474 = vector.load %arg8[%c0_952, %c0_953] : memref<2x128xf32, #tpu.memory_space<vmem>>, vector<2x128xf32>
    %cst_954 = arith.constant 0.778800785 : f32
    %1475 = vector.broadcast %cst_954 : f32 to vector<2x128xf32>
    %1476 = arith.mulf %1474, %1475 : vector<2x128xf32>
    %1477 = arith.addf %1476, %1473 : vector<2x128xf32>
    %c0_955 = arith.constant 0 : index
    %c0_956 = arith.constant 0 : index
    %1478 = vector.load %arg9[%c0_955, %c0_956] : memref<2x128xf32, #tpu.memory_space<vmem>>, vector<2x128xf32>
    %cst_957 = arith.constant 0.36787945 : f32
    %1479 = vector.broadcast %cst_957 : f32 to vector<2x128xf32>
    %1480 = arith.mulf %1478, %1479 : vector<2x128xf32>
    %1481 = arith.addf %1480, %1473 : vector<2x128xf32>
    %c0_958 = arith.constant 0 : index
    %c0_959 = arith.constant 0 : index
    %1482 = vector.load %arg8[%c0_958, %c0_959] : memref<2x128xf32, #tpu.memory_space<vmem>>, vector<2x128xf32>
    tpu.vector_store %arg8[%c0_958, %c0_959], %1477 {strides = array<i32>} : memref<2x128xf32, #tpu.memory_space<vmem>>, vector<2x128xf32>,
    %c0_960 = arith.constant 0 : index
    %c0_961 = arith.constant 0 : index
    %1483 = vector.load %arg9[%c0_960, %c0_961] : memref<2x128xf32, #tpu.memory_space<vmem>>, vector<2x128xf32>
    tpu.vector_store %arg9[%c0_960, %c0_961], %1481 {strides = array<i32>} : memref<2x128xf32, #tpu.memory_space<vmem>>, vector<2x128xf32>,
    %1484 = arith.subf %1477, %1481 : vector<2x128xf32>
    %1485 = arith.addf %1484, %10 : vector<2x128xf32>
    %c0_962 = arith.constant 0 : index
    %c0_963 = arith.constant 0 : index
    %1486 = vector.load %arg10[%c0_962, %c0_963] : memref<2x128xf32, #tpu.memory_space<vmem>>, vector<2x128xf32>
    %1487 = arith.addf %1486, %1485 : vector<2x128xf32>
    %cst_964 = arith.constant 1.000000e+00 : f32
    %1488 = vector.broadcast %cst_964 : f32 to vector<2x128xf32>
    %1489 = arith.cmpf ogt, %1487, %1488 : vector<2x128xf32>
    %cst_965 = arith.constant 0.778800785 : f32
    %1490 = vector.broadcast %cst_965 : f32 to vector<2x128xf32>
    %1491 = arith.mulf %1487, %1490 : vector<2x128xf32>
    %cst_966 = arith.constant 0.000000e+00 : f32
    %1492 = vector.broadcast %cst_966 : f32 to vector<2x128xf32>
    %1493 = arith.select %1489, %1492, %1491 : vector<2x128xi1>, vector<2x128xf32>
    %c0_967 = arith.constant 0 : index
    %c0_968 = arith.constant 0 : index
    %1494 = vector.load %arg10[%c0_967, %c0_968] : memref<2x128xf32, #tpu.memory_space<vmem>>, vector<2x128xf32>
    tpu.vector_store %arg10[%c0_967, %c0_968], %1493 {strides = array<i32>} : memref<2x128xf32, #tpu.memory_space<vmem>>, vector<2x128xf32>,
    %1495 = arith.extui %1489 : vector<2x128xi1> to vector<2x128xi32>
    %1496 = arith.sitofp %1495 : vector<2x128xi32> to vector<2x128xf32>
    %1497 = arith.truncf %1496 : vector<2x128xf32> to vector<2x128xbf16>
    %c30 = arith.constant 30 : index
    %c0_969 = arith.constant 0 : index
    %c0_970 = arith.constant 0 : index
    %1498 = vector.load %arg6[%c30, %c0_969, %c0_970] : memref<32x2x128xbf16, #tpu.memory_space<vmem>>, vector<1x2x128xbf16>
    %1499 = vector.shape_cast %1498 : vector<1x2x128xbf16> to vector<2x128xbf16>
    %1500 = vector.shape_cast %1497 : vector<2x128xbf16> to vector<1x2x128xbf16>
    tpu.vector_store %arg6[%c30, %c0_969, %c0_970], %1500 {strides = array<i32>} : memref<32x2x128xbf16, #tpu.memory_space<vmem>>, vector<1x2x128xbf16>,
    %cst_971 = arith.constant 0.778800785 : f32
    %1501 = arith.mulf %1454, %cst_971 : f32
    %cst_972 = arith.constant 1.000000e+00 : f32
    %1502 = arith.addf %1501, %cst_972 : f32
    %cst_973 = arith.constant 0.36787945 : f32
    %1503 = arith.mulf %1456, %cst_973 : f32
    %cst_974 = arith.constant 1.000000e+00 : f32
    %1504 = arith.addf %1503, %cst_974 : f32
    %1505 = arith.subf %1502, %1504 : f32
    %1506 = vector.broadcast %1505 : f32 to vector<2x512xf32>
    %1507 = arith.mulf %3, %1506 : vector<2x512xf32>
    %1508 = arith.addf %1507, %7 : vector<2x512xf32>
    %c0_975 = arith.constant 0 : index
    %c0_976 = arith.constant 0 : index
    %1509 = vector.load %arg7[%c0_975, %c0_976] : memref<2x512xf32, #tpu.memory_space<vmem>>, vector<2x512xf32>
    %1510 = arith.addf %1509, %1508 : vector<2x512xf32>
    %cst_977 = arith.constant 1.000000e+00 : f32
    %1511 = vector.broadcast %cst_977 : f32 to vector<2x512xf32>
    %1512 = arith.cmpf ogt, %1510, %1511 : vector<2x512xf32>
    %cst_978 = arith.constant 0.778800785 : f32
    %1513 = vector.broadcast %cst_978 : f32 to vector<2x512xf32>
    %1514 = arith.mulf %1510, %1513 : vector<2x512xf32>
    %cst_979 = arith.constant 0.000000e+00 : f32
    %1515 = vector.broadcast %cst_979 : f32 to vector<2x512xf32>
    %1516 = arith.select %1512, %1515, %1514 : vector<2x512xi1>, vector<2x512xf32>
    %c0_980 = arith.constant 0 : index
    %c0_981 = arith.constant 0 : index
    %1517 = vector.load %arg7[%c0_980, %c0_981] : memref<2x512xf32, #tpu.memory_space<vmem>>, vector<2x512xf32>
    tpu.vector_store %arg7[%c0_980, %c0_981], %1516 {strides = array<i32>} : memref<2x512xf32, #tpu.memory_space<vmem>>, vector<2x512xf32>,
    %1518 = arith.extui %1512 : vector<2x512xi1> to vector<2x512xi32>
    %1519 = arith.sitofp %1518 : vector<2x512xi32> to vector<2x512xf32>
    %1520 = arith.truncf %1519 : vector<2x512xf32> to vector<2x512xbf16>
    %cst_982 = arith.constant dense<0.000000e+00> : vector<2x128xf32>
    %1521 = tpu.matmul %1520, %4, %cst_982 {dimension_numbers = #tpu.dot_dimension_numbers<[1], [0], [0], [1], [0, 0, 1, 1], [], []>} : vector<2x512xbf16>, vector<512x128xbf16>, vector<2x128xf32> -> vector<2x128xf32>
    %c0_983 = arith.constant 0 : index
    %c0_984 = arith.constant 0 : index
    %1522 = vector.load %arg8[%c0_983, %c0_984] : memref<2x128xf32, #tpu.memory_space<vmem>>, vector<2x128xf32>
    %cst_985 = arith.constant 0.778800785 : f32
    %1523 = vector.broadcast %cst_985 : f32 to vector<2x128xf32>
    %1524 = arith.mulf %1522, %1523 : vector<2x128xf32>
    %1525 = arith.addf %1524, %1521 : vector<2x128xf32>
    %c0_986 = arith.constant 0 : index
    %c0_987 = arith.constant 0 : index
    %1526 = vector.load %arg9[%c0_986, %c0_987] : memref<2x128xf32, #tpu.memory_space<vmem>>, vector<2x128xf32>
    %cst_988 = arith.constant 0.36787945 : f32
    %1527 = vector.broadcast %cst_988 : f32 to vector<2x128xf32>
    %1528 = arith.mulf %1526, %1527 : vector<2x128xf32>
    %1529 = arith.addf %1528, %1521 : vector<2x128xf32>
    %c0_989 = arith.constant 0 : index
    %c0_990 = arith.constant 0 : index
    %1530 = vector.load %arg8[%c0_989, %c0_990] : memref<2x128xf32, #tpu.memory_space<vmem>>, vector<2x128xf32>
    tpu.vector_store %arg8[%c0_989, %c0_990], %1525 {strides = array<i32>} : memref<2x128xf32, #tpu.memory_space<vmem>>, vector<2x128xf32>,
    %c0_991 = arith.constant 0 : index
    %c0_992 = arith.constant 0 : index
    %1531 = vector.load %arg9[%c0_991, %c0_992] : memref<2x128xf32, #tpu.memory_space<vmem>>, vector<2x128xf32>
    tpu.vector_store %arg9[%c0_991, %c0_992], %1529 {strides = array<i32>} : memref<2x128xf32, #tpu.memory_space<vmem>>, vector<2x128xf32>,
    %1532 = arith.subf %1525, %1529 : vector<2x128xf32>
    %1533 = arith.addf %1532, %10 : vector<2x128xf32>
    %c0_993 = arith.constant 0 : index
    %c0_994 = arith.constant 0 : index
    %1534 = vector.load %arg10[%c0_993, %c0_994] : memref<2x128xf32, #tpu.memory_space<vmem>>, vector<2x128xf32>
    %1535 = arith.addf %1534, %1533 : vector<2x128xf32>
    %cst_995 = arith.constant 1.000000e+00 : f32
    %1536 = vector.broadcast %cst_995 : f32 to vector<2x128xf32>
    %1537 = arith.cmpf ogt, %1535, %1536 : vector<2x128xf32>
    %cst_996 = arith.constant 0.778800785 : f32
    %1538 = vector.broadcast %cst_996 : f32 to vector<2x128xf32>
    %1539 = arith.mulf %1535, %1538 : vector<2x128xf32>
    %cst_997 = arith.constant 0.000000e+00 : f32
    %1540 = vector.broadcast %cst_997 : f32 to vector<2x128xf32>
    %1541 = arith.select %1537, %1540, %1539 : vector<2x128xi1>, vector<2x128xf32>
    %c0_998 = arith.constant 0 : index
    %c0_999 = arith.constant 0 : index
    %1542 = vector.load %arg10[%c0_998, %c0_999] : memref<2x128xf32, #tpu.memory_space<vmem>>, vector<2x128xf32>
    tpu.vector_store %arg10[%c0_998, %c0_999], %1541 {strides = array<i32>} : memref<2x128xf32, #tpu.memory_space<vmem>>, vector<2x128xf32>,
    %1543 = arith.extui %1537 : vector<2x128xi1> to vector<2x128xi32>
    %1544 = arith.sitofp %1543 : vector<2x128xi32> to vector<2x128xf32>
    %1545 = arith.truncf %1544 : vector<2x128xf32> to vector<2x128xbf16>
    %c31 = arith.constant 31 : index
    %c0_1000 = arith.constant 0 : index
    %c0_1001 = arith.constant 0 : index
    %1546 = vector.load %arg6[%c31, %c0_1000, %c0_1001] : memref<32x2x128xbf16, #tpu.memory_space<vmem>>, vector<1x2x128xbf16>
    %1547 = vector.shape_cast %1546 : vector<1x2x128xbf16> to vector<2x128xbf16>
    %1548 = vector.shape_cast %1545 : vector<2x128xbf16> to vector<1x2x128xbf16>
    tpu.vector_store %arg6[%c31, %c0_1000, %c0_1001], %1548 {strides = array<i32>} : memref<32x2x128xbf16, #tpu.memory_space<vmem>>, vector<1x2x128xbf16>,
    %c0_1002 = arith.constant 0 : index
    %1549 = memref.load %arg11[%c0_1002] : memref<2xf32, #tpu.memory_space<smem>>
    memref.store %1502, %arg11[%c0_1002] : memref<2xf32, #tpu.memory_space<smem>>
    %c1_1003 = arith.constant 1 : index
    %1550 = memref.load %arg11[%c1_1003] : memref<2xf32, #tpu.memory_space<smem>>
    memref.store %1504, %arg11[%c1_1003] : memref<2xf32, #tpu.memory_space<smem>>
    return
  }
  func.func @transform_0(%arg0: i32, %arg1: i32) -> (i32, i32) {
    %c0_i32 = arith.constant 0 : i32
    %c0_i32_0 = arith.constant 0 : i32
    return %arg0, %c0_i32 : i32, i32
  }
  func.func @transform_1(%arg0: i32, %arg1: i32) -> (i32, i32) {
    %c0_i32 = arith.constant 0 : i32
    %c0_i32_0 = arith.constant 0 : i32
    %c0_i32_1 = arith.constant 0 : i32
    return %c0_i32, %c0_i32_0 : i32, i32
  }
  func.func @transform_2(%arg0: i32, %arg1: i32) -> (i32, i32) {
    %c0_i32 = arith.constant 0 : i32
    %c0_i32_0 = arith.constant 0 : i32
    %c0_i32_1 = arith.constant 0 : i32
    return %c0_i32, %c0_i32_0 : i32, i32
  }
  func.func @transform_3(%arg0: i32, %arg1: i32) -> (i32, i32) {
    %c0_i32 = arith.constant 0 : i32
    %c0_i32_0 = arith.constant 0 : i32
    %c0_i32_1 = arith.constant 0 : i32
    return %c0_i32, %c0_i32_0 : i32, i32
  }
  func.func @transform_4(%arg0: i32, %arg1: i32) -> (i32, i32, i32) {
    %c0_i32 = arith.constant 0 : i32
    %c0_i32_0 = arith.constant 0 : i32
    return %arg1, %arg0, %c0_i32 : i32, i32, i32
  }
}

</mosaic_0001>

<bundles_post_ra>
// kernel: tpu_custom_call.1
= control target key start
LH: loop header
LB: loop body
LE: loop exit
PB: predicated region body
PF: predicated region fallthrough
CT: control target
= control target key end

     0   :  { %9 = vsyncpa [#allocation8], 0  ;;  %s9927_s0 = inlined_call_operand.hbm [shape: f32[2,512], index: 0, kind: input, shape index: {}]   ;;  %s9928_s1 = inlined_call_operand.hbm [shape: f32[1,512], index: 1, kind: input, shape index: {}]   ;;  %s9929_s2 = inlined_call_operand.hbm [shape: bf16[512,128], index: 2, kind: input, shape index: {}]   ;;  %s9930_s3 = inlined_call_operand.vmem [shape: f32[1,128], index: 3, kind: input, shape index: {}]   ;;  %s9931_s4 = inlined_call_operand.hbm [shape: bf16[64,2,128], index: 4, kind: output, shape index: {}]  }
   0x1   :  { %10 = vsyncpa [#allocation11], 0 }
   0x2   :  { %11 = vsyncpa [#allocation9], 0 }
   0x3   :  { %13 = vsyncpa [#allocation9 + $0x1], 0  ;;  %s7283_s15 = smov 0   ;;  %s7285_s16 = smov 0  }
   0x4   :  { %s7287_s17 = smov 0   ;;  %s7289_s18 = smov 0  }
   0x5   :  { %s7291_s19 = smov 0   ;;  %s7293_s20 = smov 0  }
   0x6 LB: > { %s5241_s21 = sadd.s32 4294967295, %s7244_s20   ;;  %s5242_s22 = sadd.s32 4294967294, %s7244_s20   ;;  %s7244_s20 = sphi %s7293_s20, %s19_s20   ;;  %s7240_s19 = sphi %s7291_s19, %s9950_s19   ;;  %s7236_s18 = sphi %s7289_s18, %s9949_s18   ;;  %s7232_s17 = sphi %s7287_s17, %s9948_s17   ;;  %s7228_s16 = sphi %s7285_s16, %s9947_s16   ;;  %s7224_s15 = sphi %s7283_s15, %s9946_s15  }
   0x7   : > { %s28_s23 = sadd.s32 1, %s7240_s19  ;;  %s129_s24 = sadd.s32 1, %s7232_s17 }
   0x8   : > { %p29_p0 = scmp.ge.s32.totalorder %s28_s23, 2  ;;  %p139_p1 = scmp.ne.s32.totalorder %s7232_s17, %s7228_s16 }
   0x9   : > { %p140_p2 = scmp.eq.s32.totalorder %s5241_s21, 1  ;;  %p145_p3 = scmp.ne.s32.totalorder %s7228_s16, %s7224_s15 }
   0xa   : > { %s9952_s23 = smov (%p29_p0, %s28_s23), 0  ;;  %p146_p5 = scmp.eq.s32.totalorder %s5242_s22, 1 }
   0xb   : > { %p7323_p4 = por %p140_p2, %p139_p1  ;;  %s124_s26 = ssub.s32 %s7240_s19, %s9952_s23 }
   0xc   : > { %p5243_p6 = scmp.ge.s32.totalorder %s7244_s20, 1  ;;  %p127_p7 = scmp.eq.s32.totalorder %s124_s26, 0 }
   0xd   : > { %s9936_s25 = scalar_select %p7323_p4, 1, 0 }
   0xe   : > { %p7330_p8 = por %p146_p5, %p145_p3  ;;  %p153_p9 = scmp.lt.s32.totalorder %s7244_s20, 3 }
   0xf   : > { %s7336_s28 = scalar_select %p127_p7, %s7232_s17, %s129_s24  }
  0x10   : > { %s9937_s27 = scalar_select %p7330_p8, 1, 0 }
  0x11   : > { %p7338_p10 = pnand %p5243_p6, %p153_p9  ;;  %p7342_p11 = scmp.eq.s32.totalorder %s5241_s21, 0 }
  0x12   : > { %s7246_s5 = smov [#allocation10]   ;;  %s7247_s8 = smov [#allocation7]  }
  0x13   : > { %s9938_s29 = scalar_select %p7338_p10, 1, 0 }
  0x14   : > { %s9939_s30 = scalar_select %p7342_p11, 1, 0 }
  0x15   : > { %p6810_p12 = pneg %p7338_p10  ;;  %s180_s6 = sshll.u32 %s7246_s5, 4  ;;  %s181_s6 = int_to_ptr.vmem [resolvable:$true] %s180_s6 }
  0x16   : > { %s169_s9 = sshll.u32 %s7247_s8, 4  ;;  %s7074_s12 = scalar_lea.hbm %s9928_s1, 64  ;;  %s7354_s9 = int_to_ptr.vmem [resolvable:$true] %s169_s9 }
  0x17   : > { %p7350_p13 = pnand %p7342_p11, %p6810_p12  ;;  %p7075_p0 = scmp.ne.s32.totalorder %s9928_s1, %s7074_s12 }
  0x18   : > { %p7081_p5 = scmp.lt.u32.totalorder %s7074_s12, %s9928_s1 }
  0x19   : > { %p7364_p1 = pneg %p7350_p13 }
  0x1b   : > { %p7077_p2 = pnand %p7364_p1, %p7075_p0 }
  0x1d   : > { %p7078_p3 = pneg %p7077_p2 }
  0x1f   : > { %p7083_p6 = pnand %p7081_p5, %p7078_p3 }
  0x21   : > { %7086 = shalt.err (!%p7083_p6)
}
  0x22   : > { %s7087_s26 = scalar_lea.vmem %s181_s6, 64  ;;  %p7095_p8 = scmp.lt.s32.totalorder %s181_s6, %s181_s6 }
  0x23   : > { %p7088_p7 = scmp.ne.s32.totalorder %s181_s6, %s7087_s26  ;;  %p7096_p4 = scmp.lt.s32.totalorder %s7087_s26, %s7087_s26 }
  0x25   : > { %p7090_p9 = pnand %p7088_p7, %p7364_p1  ;;  %p7097_p11 = por %p7096_p4, %p7095_p8 }
  0x27   : > { %p7091_p12 = pneg %p7090_p9 }
  0x29   : > { %p7098_p10 = pnand %p7097_p11, %p7091_p12 }
  0x2b   : > { %7101 = shalt.err (!%p7098_p10)
}
  0x2c   : > { %6816 = dma.hbm_to_vmem [thread:$0]  (!%p7350_p13), %s9928_s1, 64, %s181_s6, [#allocation11]  }
  0x2d   : > { %s7102_s12 = scalar_lea.hbm %s9927_s0, 128 }
  0x2e   : > { %p7103_p0 = scmp.ne.s32.totalorder %s9927_s0, %s7102_s12  ;;  %p7109_p8 = scmp.lt.u32.totalorder %s7102_s12, %s9927_s0 }
  0x30   : > { %p7105_p2 = pnand %p7103_p0, %p7364_p1 }
  0x32   : > { %p7106_p4 = pneg %p7105_p2 }
  0x34   : > { %p7111_p10 = pnand %p7109_p8, %p7106_p4 }
  0x36   : > { %7114 = shalt.err (!%p7111_p10)
}
  0x37   : > { %s7115_s6 = scalar_lea.vmem %s7354_s9, 128  ;;  %p7123_p6 = scmp.lt.s32.totalorder %s7354_s9, %s7354_s9 }
  0x38   : > { %p7116_p11 = scmp.ne.s32.totalorder %s7354_s9, %s7115_s6  ;;  %p7124_p7 = scmp.lt.s32.totalorder %s7115_s6, %s7115_s6 }
  0x3a   : > { %p7118_p3 = pnand %p7116_p11, %p7364_p1  ;;  %p7125_p9 = por %p7124_p7, %p7123_p6 }
  0x3c   : > { %p7119_p5 = pneg %p7118_p3 }
  0x3e   : > { %p7126_p12 = pnand %p7125_p9, %p7119_p5 }
  0x40   : > { %7129 = shalt.err (!%p7126_p12)
}
  0x41   : > { %6813 = dma.hbm_to_vmem [thread:$0]  (!%p7350_p13), %s9927_s0, 128, %s7354_s9, [#allocation8]  }
  0x42   : > { %s7248_s8 = smov [#allocation12]   ;;  %s7130_s13 = scalar_lea.hbm %s9929_s2, 4096 }
  0x43   : > { %s190_s10 = sshll.u32 %s7248_s8, 4  ;;  %p7131_p0 = scmp.ne.s32.totalorder %s9929_s2, %s7130_s13  ;;  %s191_s10 = int_to_ptr.vmem [resolvable:$true] %s190_s10 }
  0x44   : > { %p7137_p8 = scmp.lt.u32.totalorder %s7130_s13, %s9929_s2 }
  0x45   : > { %p7133_p2 = pnand %p7131_p0, %p7364_p1 }
  0x47   : > { %p7134_p4 = pneg %p7133_p2 }
  0x49   : > { %p7139_p10 = pnand %p7137_p8, %p7134_p4 }
  0x4b   : > { %7142 = shalt.err (!%p7139_p10)
}
  0x4c   : > { %s7143_s9 = scalar_lea.vmem %s191_s10, 4096  ;;  %p7151_p6 = scmp.lt.s32.totalorder %s191_s10, %s191_s10 }
  0x4d   : > { %p7144_p11 = scmp.ne.s32.totalorder %s191_s10, %s7143_s9  ;;  %p7152_p7 = scmp.lt.s32.totalorder %s7143_s9, %s7143_s9 }
  0x4f   : > { %p7146_p3 = pnand %p7144_p11, %p7364_p1  ;;  %p7153_p9 = por %p7152_p7, %p7151_p6 }
  0x51   : > { %p7147_p5 = pneg %p7146_p3 }
  0x53   : > { %p7154_p12 = pnand %p7153_p9, %p7147_p5 }
  0x55   : > { %7157 = shalt.err (!%p7154_p12)
}
  0x56   : > { %s7249_s26 = smov 64   ;;  %s7250_s5 = smov 4  }
  0x57   : > { %6819 = dma.hbm_to_vmem [thread:$0]  (!%p7350_p13), %s9929_s2, 4096, %s191_s10, [#allocation11], %s7249_s26, %s7249_s26, %s7250_s5  }
  0x58   : > { %p9942_p0 = scmp.ne.s32.totalorder %s9938_s29, 0 }
  0x59   : > { %p9943_p2 = scmp.ne.s32.totalorder (!%p9942_p0), %s9939_s30, 0 }
  0x5a   : > { %209 = sbr.rel (%p9942_p0) target bundleno = 1381 (0x565), region = 36 }
  0x61   : > { %7211 = dma.done.wait (%p9943_p2), [#allocation8], 128  }
  0x62   : > { %7213 = vsyncadd (%p9943_p2), [#allocation8], 4294967168 }
  0x63   : > { %7215 = dma.done.wait (%p9943_p2), [#allocation11], 4160  }
  0x64   : > { %7217 = vsyncadd (%p9943_p2), [#allocation11], 4294963136  ;;  %s235_s7 = sand.u32 1, %s7228_s16   ;;  %p5252_p13 = scmp.ne.s32.totalorder %s7236_s18, 0 }
  0x65   : > { %s5251_s21 = sshll.u32 %s235_s7, 5  ;;  %v7251_v0 = vmov (!%p5252_p13), 0.0   ;;  %s7252_s29 = smov (!%p5252_p13), 0.0  }
  0x66   : > { %s7434_s10 = scalar_lea.vmem [#allocation13], %s5251_s21  ;;  %243 = sbr.rel (%p5252_p13) target bundleno = 109 (0x6d), region = 52  ;;  %244 = vst [vmem:[#allocation2] sm:$0xff] (!%p5252_p13), %v7251_v0  ;;  %245 = vst [vmem:[#allocation3] sm:$0x3] (!%p5252_p13), %v7251_v0 }
  0x67   : > { %246 = vst [vmem:[#allocation4] sm:$0x3] (!%p5252_p13), %v7251_v0  ;;  %247 = vst [vmem:[#allocation5] sm:$0x3] (!%p5252_p13), %v7251_v0  ;;  %249 = sst [smem:[#allocation6]] (!%p5252_p13), %s7252_s29 }
  0x68   : > { %251 = sst [smem:[#allocation6 + $0x1]] (!%p5252_p13), %s7252_s29 }
  0x6d PF: > { %v7437_v1 = vld [vmem:[#allocation12 + $0x40] sm:$0xff]   ;;  %v7448_v5 = vld [vmem:[#allocation12 + $0x48] sm:$0xff]   ;;  %v7460_v9 = vld [vmem:[#allocation12 + $0x50] sm:$0xff]   ;;  %v319_v20 = vlaneseq  ;;  %s342_s30 = sld [smem:[#allocation6]]  ;;  %s5254_s12 = sld [smem:[#allocation6 + $0x1]]  ;;  %v7254_v63 = vmov 0.0  }
  0x6e   : > { %v7439_v2 = vld [vmem:[#allocation12 + $0xc0] sm:$0xff]   ;;  %5388 = vmatprep.subr.bf16.mxu0 %v7437_v1  ;;  %v7451_v6 = vld [vmem:[#allocation12 + $0xc8] sm:$0xff]   ;;  %v7463_v10 = vld [vmem:[#allocation12 + $0xd0] sm:$0xff]   ;;  %v7253_v44 = vmov 1983009808   ;;  %p9944_p4 = scmp.ne.s32.totalorder %s9936_s25, 0 }
  0x6f   : > { %v7442_v3 = vld [vmem:[#allocation12] sm:$0xff]   ;;  %5410 = vmatprep.subr.bf16.mxu1 %v7439_v2  ;;  %v7454_v7 = vld [vmem:[#allocation12 + $0x8] sm:$0xff]   ;;  %v7466_v11 = vld [vmem:[#allocation12 + $0x10] sm:$0xff]   ;;  %v320_v25 = vshrl.u32 %v319_v20, 7  ;;  %v354_v45 = vunpack.c.l.s4 %v7253_v44 }
  0x70   : > { %v7445_v4 = vld [vmem:[#allocation12 + $0x80] sm:$0xff]   ;;  %5389 = vmatpush3.bf16.msra.mxu0 %v7442_v3  ;;  %v7457_v8 = vld [vmem:[#allocation12 + $0x88] sm:$0xff]   ;;  %v7469_v12 = vld [vmem:[#allocation12 + $0x90] sm:$0xff]  }
  0x71   : > { %5411 = vmatpush3.bf16.msra.mxu1 %v7445_v4  ;;  %5390 = vmatprep.subr.bf16.mxu0 %v7448_v5  ;;  %v7472_v13 = vld [vmem:[#allocation12 + $0x58] sm:$0xff]   ;;  %v7484_v17 = vld [vmem:[#allocation12 + $0x60] sm:$0xff]   ;;  %v7496_v22 = vld [vmem:[#allocation12 + $0x68] sm:$0xff]   ;;  %v321_v30 = vsub.s32 0, %v320_v25  ;;  %v325_v32 = vsub.s32 1, %v320_v25  ;;  %v329_v34 = vsub.s32 2, %v320_v25  ;;  %v355_v48 = vunpack.c.0.s8 %v354_v45 }
  0x72   : > { %5412 = vmatprep.subr.bf16.mxu1 %v7451_v6  ;;  %v7475_v14 = vld [vmem:[#allocation12 + $0xd8] sm:$0xff]   ;;  %v7487_v18 = vld [vmem:[#allocation12 + $0xe0] sm:$0xff]   ;;  %v7499_v23 = vld [vmem:[#allocation12 + $0xe8] sm:$0xff]   ;;  %v333_v36 = vsub.s32 3, %v320_v25 }
  0x73   : > { %v7478_v15 = vld [vmem:[#allocation12 + $0x18] sm:$0xff]   ;;  %v7490_v19 = vld [vmem:[#allocation12 + $0x20] sm:$0xff]   ;;  %v7502_v24 = vld [vmem:[#allocation12 + $0x28] sm:$0xff]   ;;  %s344_s13 = smul.f32 0.7788008, %s342_s30  ;;  %v7535_v49 = vsub.s32 %v355_v48, %v320_v25 }
  0x74   : > { %5391 = vmatpush3.bf16.msra.mxu0 %v7454_v7  ;;  %v7481_v16 = vld [vmem:[#allocation12 + $0x98] sm:$0xff]   ;;  %v7493_v21 = vld [vmem:[#allocation12 + $0xa0] sm:$0xff]   ;;  %v7505_v26 = vld [vmem:[#allocation12 + $0xa8] sm:$0xff]   ;;  %s346_s14 = smul.f32 0.36787945, %s5254_s12 }
  0x75   : > { %5413 = vmatpush3.bf16.msra.mxu1 %v7457_v8  ;;  %5392 = vmatprep.subr.bf16.mxu0 %v7460_v9  ;;  %v7508_v27 = vld [vmem:[#allocation12 + $0x70] sm:$0xff]   ;;  %v7520_v33 = vld [vmem:[#allocation12 + $0x78] sm:$0xff]   ;;  %s345_s22 = sadd.f32 1.0, %s344_s13  ;;  %v370_v56 = vld [vmem:[#allocation2] sm:$0xff] }
  0x76   : > { %5414 = vmatprep.subr.bf16.mxu1 %v7463_v10  ;;  %v7511_v28 = vld [vmem:[#allocation12 + $0xf0] sm:$0xff]   ;;  %v7523_v35 = vld [vmem:[#allocation12 + $0xf8] sm:$0xff]   ;;  %s347_s24 = sadd.f32 1.0, %s346_s14 }
  0x77   : > { %v7514_v29 = vld [vmem:[#allocation12 + $0x30] sm:$0xff]   ;;  %v7526_v37 = vld [vmem:[#allocation12 + $0x38] sm:$0xff]   ;;  %s696_s6 = smul.f32 0.7788008, %s345_s22 }
  0x78   : > { %5393 = vmatpush3.bf16.msra.mxu0 %v7466_v11  ;;  %v7517_v31 = vld [vmem:[#allocation12 + $0xb0] sm:$0xff]   ;;  %v7529_v38 = vld [vmem:[#allocation12 + $0xb8] sm:$0xff]   ;;  %s348_s9 = ssub.f32 %s345_s22, %s347_s24  ;;  %s698_s26 = smul.f32 0.36787945, %s347_s24 }
  0x79   : > { %5415 = vmatpush3.bf16.msra.mxu1 %v7469_v12  ;;  %5394 = vmatprep.subr.bf16.mxu0 %v7472_v13  ;;  %v317_v39 = vld [vmem:[#allocation10] sm:$0xf]  ;;  %v7539_v52 = vld [vmem:[#allocation7] sm:$0xff]  ;;  %s697_s5 = sadd.f32 1.0, %s696_s6 }
  0x7a   : > { %5416 = vmatprep.subr.bf16.mxu1 %v7475_v14  ;;  %v322_v40 = vrot.slane %v317_v39, %v321_v30  ;;  %v326_v41 = vrot.slane %v317_v39, %v325_v32  ;;  %v330_v42 = vrot.slane %v317_v39, %v329_v34  ;;  %v334_v43 = vrot.slane %v317_v39, %v333_v36  ;;  %s699_s8 = sadd.f32 1.0, %s698_s26 }
  0x7b   : > { %v349_v54 = vstv %s348_s9  ;;  %s839_s11 = smul.f32 0.7788008, %s697_s5 }
  0x7c   : > { %5395 = vmatpush3.bf16.msra.mxu0 %v7478_v15  ;;  %v351_v46 = vcombine.low %v322_v40, %v326_v41  ;;  %v352_v47 = vcombine.low %v330_v42, %v334_v43  ;;  %v350_v55 = vmul.f32 %v349_v54, %v7539_v52  ;;  %s700_s21 = ssub.f32 %s697_s5, %s699_s8  ;;  %s841_s29 = smul.f32 0.36787945, %s699_s8 }
  0x7d   : > { %5417 = vmatpush3.bf16.msra.mxu1 %v7481_v16  ;;  %5396 = vmatprep.subr.bf16.mxu0 %v7484_v17  ;;  %s7546_s30 = sadd.f32 1.0, %s839_s11 }
  0x7e   : > { %5418 = vmatprep.subr.bf16.mxu1 %v7487_v18  ;;  %v359_v50 = vrot.slane %v351_v46, %v7535_v49  ;;  %v366_v51 = vrot.slane %v352_v47, %v7535_v49  ;;  %v701_v58 = vstv %s700_s21  ;;  %s7548_s12 = sadd.f32 1.0, %s841_s29 }
  0x7f   : > { %v702_v60 = vmul.f32 %v701_v58, %v7539_v52  ;;  %s982_s14 = smul.f32 0.7788008, %s7546_s30 }
  0x80   : > { %5397 = vmatpush3.bf16.msra.mxu0 %v7490_v19  ;;  %v7541_v53 = vcombine.low %v359_v50, %v366_v51  ;;  %s843_s13 = ssub.f32 %s7546_s30, %s7548_s12  ;;  %s984_s22 = smul.f32 0.36787945, %s7548_s12 }
  0x81   : > { %5419 = vmatpush3.bf16.msra.mxu1 %v7493_v21  ;;  %5398 = vmatprep.subr.bf16.mxu0 %v7496_v22  ;;  %s7599_s24 = sadd.f32 1.0, %s982_s14 }
  0x82   : > { %5420 = vmatprep.subr.bf16.mxu1 %v7499_v23  ;;  %v369_v57 = vadd.f32 %v7541_v53, %v350_v55  ;;  %v703_v62 = vadd.f32 %v702_v60, %v7541_v53  ;;  %v844_v46 = vstv %s843_s13  ;;  %s7602_s6 = sadd.f32 1.0, %s984_s22 }
  0x83   : > { %v845_v51 = vmul.f32 %v844_v46, %v7539_v52  ;;  %s1125_s26 = smul.f32 0.7788008, %s7599_s24 }
  0x84   : > { %5399 = vmatpush3.bf16.msra.mxu0 %v7502_v24  ;;  %v371_v59 = vadd.f32 %v370_v56, %v369_v57  ;;  %s986_s9 = ssub.f32 %s7599_s24, %s7602_s6  ;;  %s1127_s5 = smul.f32 0.36787945, %s7602_s6 }
  0x85   : > { %5421 = vmatpush3.bf16.msra.mxu1 %v7505_v26  ;;  %5400 = vmatprep.subr.bf16.mxu0 %v7508_v27  ;;  %v846_v58 = vadd.f32 %v845_v51, %v7541_v53  ;;  %s7658_s8 = sadd.f32 1.0, %s1125_s26 }
  0x86   : > { %5422 = vmatprep.subr.bf16.mxu1 %v7511_v28  ;;  %vm372_vm0 = vcmp.gt.f32.partialorder %v371_v59, 1.0  ;;  %v373_v61 = vmul.f32 0.7788008, %v371_v59  ;;  %s7661_s11 = sadd.f32 1.0, %s1127_s5 }
  0x87   : > { %v5255_v0 = vsel %vm372_vm0, 1.0, %v7254_v63  ;;  %s1268_s29 = smul.f32 0.7788008, %s7658_s8 }
  0x88   : > { %5401 = vmatpush3.bf16.msra.mxu0 %v7514_v29  ;;  %v374_v20 = vsel %vm372_vm0, 0.0, %v373_v61  ;;  %v386_v25 = vrot.slane %v5255_v0, %v7535_v49  ;;  %v379_v30 = vcombine.high %v5255_v0, %v5255_v0  ;;  %s1129_s21 = ssub.f32 %s7658_s8, %s7661_s11  ;;  %s1270_s30 = smul.f32 0.36787945, %s7661_s11 }
  0x89   : > { %5423 = vmatpush3.bf16.msra.mxu1 %v7517_v31  ;;  %5402 = vmatprep.subr.bf16.mxu0 %v7520_v33  ;;  %v705_v32 = vadd.f32 %v703_v62, %v374_v20  ;;  %s7717_s12 = sadd.f32 1.0, %s1268_s29 }
  0x8a   : > { %5424 = vmatprep.subr.bf16.mxu1 %v7523_v35  ;;  %v394_v34 = vcombine.high %v386_v25, %v386_v25  ;;  %v393_v36 = vrot.slane %v379_v30, %v7535_v49  ;;  %v400_v39 = vpack.c.bf16 %v386_v25, %v386_v25  ;;  %s7720_s13 = sadd.f32 1.0, %s1270_s30 }
  0x8b   : > { %vm706_vm1 = vcmp.gt.f32.partialorder %v705_v32, 1.0  ;;  %v707_v54 = vmul.f32 0.7788008, %v705_v32  ;;  %s1411_s22 = smul.f32 0.7788008, %s7717_s12 }
  0x8c   : > { %5403 = vmatpush3.bf16.msra.mxu0 %v7526_v37  ;;  %v401_v40 = vpack.c.bf16 %v394_v34, %v394_v34  ;;  %v395_v41 = vcombine.high %v393_v36, %v393_v36  ;;  %v5289_v42 = vsel %vm706_vm1, 1.0, %v7254_v63  ;;  %v402_v43 = vpack.c.bf16 %v393_v36, %v393_v36  ;;  %s1272_s14 = ssub.f32 %s7717_s12, %s7720_s13  ;;  %s1413_s24 = smul.f32 0.36787945, %s7720_s13 }
  0x8d   : > { %5425 = vmatpush3.bf16.msra.mxu1 %v7529_v38  ;;  %5432 = vmatprep.subr.bf16.mxu0 %v7437_v1  ;;  %v7559_v44 = vrot.slane %v5289_v42, %v7535_v49  ;;  %v713_v45 = vcombine.high %v5289_v42, %v5289_v42  ;;  %v708_v59 = vsel %vm706_vm1, 0.0, %v707_v54  ;;  %s7776_s6 = sadd.f32 1.0, %s1411_s22 }
  0x8e   : > { %5454 = vmatprep.subr.bf16.mxu1 %v7439_v2  ;;  %628 = vmatprep.mubr.bf16.mxu0 %v401_v40  ;;  %v403_v47 = vpack.c.bf16 %v395_v41, %v395_v41  ;;  %v848_v60 = vadd.f32 %v846_v58, %v708_v59  ;;  %v1130_v58 = vstv %s1129_s21 }
  0x8f   : > { %629 = vmatmul.mubr.bf16.vlgmr.msra.gmra.mrb[0].mxu0 %v400_v39  ;;  %v728_v48 = vcombine.high %v7559_v44, %v7559_v44  ;;  %v7564_v50 = vrot.slane %v713_v45, %v7535_v49  ;;  %v734_v32 = vpack.c.bf16 %v7559_v44, %v7559_v44  ;;  %v987_v39 = vstv %s986_s9  ;;  %s7779_s9 = sadd.f32 1.0, %s1413_s24  ;;  %s1554_s5 = smul.f32 0.7788008, %s7776_s6 }
  0x90   : > { %668 = vmatprep.mubr.bf16.mxu1 %v403_v47  ;;  %5433 = vmatpush3.bf16.msra.mxu0 %v7442_v3  ;;  %vm849_vm2 = vcmp.gt.f32.partialorder %v848_v60, 1.0  ;;  %v988_v41 = vmul.f32 %v987_v39, %v7539_v52  ;;  %v850_v42 = vmul.f32 0.7788008, %v848_v60  ;;  %v1131_v60 = vmul.f32 %v1130_v58, %v7539_v52 }
  0x91   : > { %669 = vmatmul.mubr.bf16.vlgmr.msra.gmra.mrb[0].mxu1 %v402_v43  ;;  %5434 = vmatprep.subr.bf16.mxu0 %v7448_v5  ;;  %v735_v55 = vpack.c.bf16 %v728_v48, %v728_v48  ;;  %v729_v56 = vcombine.high %v7564_v50, %v7564_v50  ;;  %v5292_v61 = vsel %vm849_vm2, 1.0, %v7254_v63  ;;  %v736_v36 = vpack.c.bf16 %v7564_v50, %v7564_v50  ;;  %s1415_s26 = ssub.f32 %s7776_s6, %s7779_s9  ;;  %s1556_s8 = smul.f32 0.36787945, %s7779_s9 }
  0x92   : > { %5455 = vmatpush3.bf16.msra.mxu1 %v7445_v4  ;;  %v856_v62 = vcombine.high %v5292_v61, %v5292_v61  ;;  %v7597_v0 = vrot.slane %v5292_v61, %v7535_v49  ;;  %v989_v43 = vadd.f32 %v988_v41, %v7541_v53  ;;  %v851_v44 = vsel %vm849_vm2, 0.0, %v850_v42  ;;  %s7835_s11 = sadd.f32 1.0, %s1554_s5 }
  0x93   : > { %5456 = vmatprep.subr.bf16.mxu1 %v7451_v6  ;;  %770 = vmatprep.mubr.bf16.mxu0 %v735_v55  ;;  %v737_v57 = vpack.c.bf16 %v729_v56, %v729_v56  ;;  %s7838_s21 = sadd.f32 1.0, %s1556_s8 }
  0x94   : > { %5435 = vmatpush3.bf16.msra.mxu0 %v7454_v7  ;;  %v7606_v20 = vrot.slane %v856_v62, %v7535_v49  ;;  %v871_v25 = vcombine.high %v7597_v0, %v7597_v0  ;;  %v991_v45 = vadd.f32 %v989_v43, %v851_v44  ;;  %v877_v55 = vpack.c.bf16 %v7597_v0, %v7597_v0  ;;  %s1697_s30 = smul.f32 0.7788008, %s7835_s11 }
  0x95   : > { %5436 = vmatprep.subr.bf16.mxu0 %v7460_v9  ;;  %810 = vmatprep.mubr.bf16.mxu1 %v737_v57  ;;  %v1132_v62 = vadd.f32 %v1131_v60, %v7541_v53  ;;  %v1273_v43 = vstv %s1272_s14  ;;  %s1558_s29 = ssub.f32 %s7835_s11, %s7838_s21  ;;  %s1699_s12 = smul.f32 0.36787945, %s7838_s21 }
  0x96   : > { %5457 = vmatpush3.bf16.msra.mxu1 %v7457_v8  ;;  %v872_v30 = vcombine.high %v7606_v20, %v7606_v20  ;;  %v878_v34 = vpack.c.bf16 %v871_v25, %v871_v25  ;;  %vm992_vm3 = vcmp.gt.f32.partialorder %v991_v45, 1.0  ;;  %v879_v57 = vpack.c.bf16 %v7606_v20, %v7606_v20  ;;  %s7898_s13 = sadd.f32 1.0, %s1697_s30 }
  0x97   : > { %5458 = vmatprep.subr.bf16.mxu1 %v7463_v10  ;;  %v5295_v46 = vsel %vm992_vm3, 1.0, %v7254_v63  ;;  %v993_v61 = vmul.f32 0.7788008, %v991_v45  ;;  %v1274_v45 = vmul.f32 %v1273_v43, %v7539_v52  ;;  %s7901_s14 = sadd.f32 1.0, %s1699_s12 }
  0x98   : > { %5437 = vmatpush3.bf16.msra.mxu0 %v7466_v11  ;;  %v880_v40 = vpack.c.bf16 %v872_v30, %v872_v30  ;;  %v999_v47 = vcombine.high %v5295_v46, %v5295_v46  ;;  %v7656_v48 = vrot.slane %v5295_v46, %v7535_v49  ;;  %s1840_s24 = smul.f32 0.7788008, %s7898_s13 }
  0x99   : > { %5438 = vmatprep.subr.bf16.mxu0 %v7472_v13  ;;  %v994_v0 = vsel %vm992_vm3, 0.0, %v993_v61  ;;  %s1701_s22 = ssub.f32 %s7898_s13, %s7901_s14  ;;  %s1842_s6 = smul.f32 0.36787945, %s7901_s14 }
  0x9a   : > { %5459 = vmatpush3.bf16.msra.mxu1 %v7469_v12  ;;  %v7665_v50 = vrot.slane %v999_v47, %v7535_v49  ;;  %v1014_v51 = vcombine.high %v7656_v48, %v7656_v48  ;;  %v1134_v20 = vadd.f32 %v1132_v62, %v994_v0  ;;  %v1275_v47 = vadd.f32 %v1274_v45, %v7541_v53  ;;  %s7995_s9 = sadd.f32 1.0, %s1840_s24 }
  0x9b   : > { %5460 = vmatprep.subr.bf16.mxu1 %v7475_v14  ;;  %v1416_v62 = vstv %s1415_s26  ;;  %s7998_s26 = sadd.f32 1.0, %s1842_s6 }
  0x9c   : > { %5439 = vmatpush3.bf16.msra.mxu0 %v7478_v15  ;;  %v1015_v54 = vcombine.high %v7665_v50, %v7665_v50  ;;  %v1021_v56 = vpack.c.bf16 %v1014_v51, %v1014_v51  ;;  %vm1135_vm4 = vcmp.gt.f32.partialorder %v1134_v20, 1.0  ;;  %v1022_v42 = vpack.c.bf16 %v7665_v50, %v7665_v50  ;;  %s1983_s21 = smul.f32 0.7788008, %s7995_s9 }
  0x9d   : > { %5440 = vmatprep.subr.bf16.mxu0 %v7484_v17  ;;  %v5298_v25 = vsel %vm1135_vm4, 1.0, %v7254_v63  ;;  %v1136_v46 = vmul.f32 0.7788008, %v1134_v20  ;;  %v1417_v20 = vmul.f32 %v1416_v62, %v7539_v52  ;;  %v7948_v62 = vld [vmem:[#allocation12 + $0x50] sm:$0xff]   ;;  %s1844_s5 = ssub.f32 %s7995_s9, %s7998_s26 }
  0x9e   : > { %5461 = vmatpush3.bf16.msra.mxu1 %v7481_v16  ;;  %v1023_v59 = vpack.c.bf16 %v1015_v54, %v1015_v54  ;;  %v1142_v30 = vcombine.high %v5298_v25, %v5298_v25  ;;  %s8076_s30 = sadd.f32 1.0, %s1983_s21 }
  0x9f   : > { %5462 = vmatprep.subr.bf16.mxu1 %v7487_v18 }
  0xa0   : > { %5441 = vmatpush3.bf16.msra.mxu0 %v7490_v19  ;;  %s2126_s14 = smul.f32 0.7788008, %s8076_s30 }
  0xa1   : > { %5442 = vmatprep.subr.bf16.mxu0 %v7496_v22 }
  0xa2   : > { %5463 = vmatpush3.bf16.msra.mxu1 %v7493_v21  ;;  %s8166_s24 = sadd.f32 1.0, %s2126_s14 }
  0xa3   : > { %5464 = vmatprep.subr.bf16.mxu1 %v7499_v23 }
  0xa4   : > { %5443 = vmatpush3.bf16.msra.mxu0 %v7502_v24 }
  0xa5   : > { %5444 = vmatprep.subr.bf16.mxu0 %v7508_v27 }
  0xa6   : > { %5465 = vmatpush3.bf16.msra.mxu1 %v7505_v26 }
  0xa7   : > { %5466 = vmatprep.subr.bf16.mxu1 %v7511_v28 }
  0xa8   : > { %5445 = vmatpush3.bf16.msra.mxu0 %v7514_v29 }
  0xa9   : > { %5446 = vmatprep.subr.bf16.mxu0 %v7520_v33 }
  0xaa   : > { %5467 = vmatpush3.bf16.msra.mxu1 %v7517_v31 }
  0xab   : > { %5468 = vmatprep.subr.bf16.mxu1 %v7523_v35 }
  0xac   : > { %5447 = vmatpush3.bf16.msra.mxu0 %v7526_v37 }
  0xad   : > { %5476 = vmatprep.subr.bf16.mxu0 %v7437_v1 }
  0xae   : > { %5469 = vmatpush3.bf16.msra.mxu1 %v7529_v38 }
  0xaf   : > { %771 = vmatmul.mubr.bf16.vlgmr.msra.gmra.mrb[4].mxu0 %v734_v32  ;;  %5498 = vmatprep.subr.bf16.mxu1 %v7439_v2  ;;  %v7715_v32 = vrot.slane %v5298_v25, %v7535_v49 }
  0xb0   : > { %5477 = vmatpush3.bf16.msra.mxu0 %v7442_v3  ;;  %913 = vmatprep.mubr.bf16.mxu0 %v878_v34  ;;  %v7724_v34 = vrot.slane %v1142_v30, %v7535_v49  ;;  %v1418_v30 = vadd.f32 %v1417_v20, %v7541_v53  ;;  %v7953_v20 = vld [vmem:[#allocation12 + $0x88] sm:$0xff]  }
  0xb1   : > { %811 = vmatmul.mubr.bf16.vlgmr.msra.gmra.mrb[4].mxu1 %v736_v36  ;;  %5478 = vmatprep.subr.bf16.mxu0 %v7448_v5  ;;  %v1157_v36 = vcombine.high %v7715_v32, %v7715_v32 }
  0xb2   : > { %5499 = vmatpush3.bf16.msra.mxu1 %v7445_v4  ;;  %953 = vmatprep.mubr.bf16.mxu1 %v880_v40  ;;  %v1158_v39 = vcombine.high %v7724_v34, %v7724_v34  ;;  %v1020_v40 = vpack.c.bf16 %v7656_v48, %v7656_v48  ;;  %v1137_v48 = vsel %vm1135_vm4, 0.0, %v1136_v46  ;;  %v1165_v61 = vpack.c.bf16 %v7724_v34, %v7724_v34 }
  0xb3   : > { %5500 = vmatprep.subr.bf16.mxu1 %v7451_v6  ;;  %v1164_v41 = vpack.c.bf16 %v1157_v36, %v1157_v36  ;;  %v1277_v50 = vadd.f32 %v1275_v47, %v1137_v48  ;;  %v1559_v47 = vstv %s1558_s29  ;;  %s1985_s29 = smul.f32 0.36787945, %s7998_s26 }
  0xb4   : > { %5479 = vmatpush3.bf16.msra.mxu0 %v7454_v7  ;;  %v1166_v44 = vpack.c.bf16 %v1158_v39, %v1158_v39  ;;  %s2269_s26 = smul.f32 0.7788008, %s8166_s24 }
  0xb5   : > { %5480 = vmatprep.subr.bf16.mxu0 %v7460_v9  ;;  %vm1278_vm5 = vcmp.gt.f32.partialorder %v1277_v50, 1.0  ;;  %v1279_v25 = vmul.f32 0.7788008, %v1277_v50  ;;  %v1560_v50 = vmul.f32 %v1559_v47, %v7539_v52  ;;  %s8084_s12 = sadd.f32 1.0, %s1985_s29 }
  0xb6   : > { %5501 = vmatpush3.bf16.msra.mxu1 %v7457_v8  ;;  %v5301_v51 = vsel %vm1278_vm5, 1.0, %v7254_v63  ;;  %s8234_s8 = sadd.f32 1.0, %s2269_s26 }
  0xb7   : > { %5502 = vmatprep.subr.bf16.mxu1 %v7463_v10  ;;  %v1285_v54 = vcombine.high %v5301_v51, %v5301_v51  ;;  %s1987_s13 = ssub.f32 %s8076_s30, %s8084_s12 }
  0xb8   : > { %5481 = vmatpush3.bf16.msra.mxu0 %v7466_v11  ;;  %s2412_s29 = smul.f32 0.7788008, %s8234_s8 }
  0xb9   : > { %5482 = vmatprep.subr.bf16.mxu0 %v7472_v13 }
  0xba   : > { %5503 = vmatpush3.bf16.msra.mxu1 %v7469_v12 }
  0xbb   : > { %5504 = vmatprep.subr.bf16.mxu1 %v7475_v14 }
  0xbc   : > { %5483 = vmatpush3.bf16.msra.mxu0 %v7478_v15 }
  0xbd   : > { %5484 = vmatprep.subr.bf16.mxu0 %v7484_v17 }
  0xbe   : > { %5505 = vmatpush3.bf16.msra.mxu1 %v7481_v16 }
  0xbf   : > { %5506 = vmatprep.subr.bf16.mxu1 %v7487_v18 }
  0xc0   : > { %5485 = vmatpush3.bf16.msra.mxu0 %v7490_v19 }
  0xc1   : > { %5486 = vmatprep.subr.bf16.mxu0 %v7496_v22 }
  0xc2   : > { %5507 = vmatpush3.bf16.msra.mxu1 %v7493_v21 }
  0xc3   : > { %5508 = vmatprep.subr.bf16.mxu1 %v7499_v23 }
  0xc4   : > { %5487 = vmatpush3.bf16.msra.mxu0 %v7502_v24 }
  0xc5   : > { %5488 = vmatprep.subr.bf16.mxu0 %v7508_v27 }
  0xc6   : > { %5509 = vmatpush3.bf16.msra.mxu1 %v7505_v26 }
  0xc7   : > { %5510 = vmatprep.subr.bf16.mxu1 %v7511_v28 }
  0xc8   : > { %5489 = vmatpush3.bf16.msra.mxu0 %v7514_v29 }
  0xc9   : > { %5490 = vmatprep.subr.bf16.mxu0 %v7520_v33 }
  0xca   : > { %5511 = vmatpush3.bf16.msra.mxu1 %v7517_v31 }
  0xcb   : > { %5512 = vmatprep.subr.bf16.mxu1 %v7523_v35 }
  0xcc   : > { %5491 = vmatpush3.bf16.msra.mxu0 %v7526_v37 }
  0xcd   : > { %5520 = vmatprep.subr.bf16.mxu0 %v7437_v1 }
  0xce   : > { %5513 = vmatpush3.bf16.msra.mxu1 %v7529_v38 }
  0xcf   : > { %914 = vmatmul.mubr.bf16.vlgmr.msra.gmra.mrb[8].mxu0 %v877_v55  ;;  %5542 = vmatprep.subr.bf16.mxu1 %v7439_v2  ;;  %v7774_v55 = vrot.slane %v5301_v51, %v7535_v49 }
  0xd0   : > { %5521 = vmatpush3.bf16.msra.mxu0 %v7442_v3  ;;  %1056 = vmatprep.mubr.bf16.mxu0 %v1021_v56  ;;  %v7783_v56 = vrot.slane %v1285_v54, %v7535_v49  ;;  %v7930_v54 = vld [vmem:[#allocation12] sm:$0xff]  }
  0xd1   : > { %954 = vmatmul.mubr.bf16.vlgmr.msra.gmra.mrb[8].mxu1 %v879_v57  ;;  %5522 = vmatprep.subr.bf16.mxu0 %v7448_v5  ;;  %v1300_v57 = vcombine.high %v7774_v55, %v7774_v55 }
  0xd2   : > { %5543 = vmatpush3.bf16.msra.mxu1 %v7445_v4  ;;  %1096 = vmatprep.mubr.bf16.mxu1 %v1023_v59  ;;  %v1301_v58 = vcombine.high %v7783_v56, %v7783_v56  ;;  %v1163_v59 = vpack.c.bf16 %v7715_v32, %v7715_v32  ;;  %v1280_v32 = vsel %vm1278_vm5, 0.0, %v1279_v25  ;;  %v1308_v46 = vpack.c.bf16 %v7783_v56, %v7783_v56  ;;  %v7934_v56 = vld [vmem:[#allocation12 + $0x48] sm:$0xff]   ;;  %v7956_v25 = vld [vmem:[#allocation12 + $0xd0] sm:$0xff]  }
  0xd3   : > { %5544 = vmatprep.subr.bf16.mxu1 %v7451_v6  ;;  %v1307_v60 = vpack.c.bf16 %v1300_v57, %v1300_v57  ;;  %v1420_v34 = vadd.f32 %v1418_v30, %v1280_v32  ;;  %v7959_v30 = vld [vmem:[#allocation12 + $0x10] sm:$0xff]  }
  0xd4   : > { %5523 = vmatpush3.bf16.msra.mxu0 %v7454_v7  ;;  %v1309_v0 = vpack.c.bf16 %v1301_v58, %v1301_v58  ;;  %v7938_v58 = vld [vmem:[#allocation12 + $0x80] sm:$0xff]  }
  0xd5   : > { %5524 = vmatprep.subr.bf16.mxu0 %v7460_v9  ;;  %vm1421_vm6 = vcmp.gt.f32.partialorder %v1420_v34, 1.0  ;;  %v1422_v51 = vmul.f32 0.7788008, %v1420_v34  ;;  %v7964_v34 = vld [vmem:[#allocation12 + $0x58] sm:$0xff]  }
  0xd6   : > { %5545 = vmatpush3.bf16.msra.mxu1 %v7457_v8  ;;  %v5304_v36 = vsel %vm1421_vm6, 1.0, %v7254_v63 }
  0xd7   : > { %5546 = vmatprep.subr.bf16.mxu1 %v7463_v10  ;;  %v1428_v39 = vcombine.high %v5304_v36, %v5304_v36 }
  0xd8   : > { %5525 = vmatpush3.bf16.msra.mxu0 %v7466_v11 }
  0xd9   : > { %5526 = vmatprep.subr.bf16.mxu0 %v7472_v13 }
  0xda   : > { %5547 = vmatpush3.bf16.msra.mxu1 %v7469_v12 }
  0xdb   : > { %5548 = vmatprep.subr.bf16.mxu1 %v7475_v14 }
  0xdc   : > { %5527 = vmatpush3.bf16.msra.mxu0 %v7478_v15 }
  0xdd   : > { %5528 = vmatprep.subr.bf16.mxu0 %v7484_v17 }
  0xde   : > { %5549 = vmatpush3.bf16.msra.mxu1 %v7481_v16 }
  0xdf   : > { %5550 = vmatprep.subr.bf16.mxu1 %v7487_v18 }
  0xe0   : > { %5529 = vmatpush3.bf16.msra.mxu0 %v7490_v19 }
  0xe1   : > { %5530 = vmatprep.subr.bf16.mxu0 %v7496_v22 }
  0xe2   : > { %5551 = vmatpush3.bf16.msra.mxu1 %v7493_v21 }
  0xe3   : > { %5552 = vmatprep.subr.bf16.mxu1 %v7499_v23 }
  0xe4   : > { %5531 = vmatpush3.bf16.msra.mxu0 %v7502_v24 }
  0xe5   : > { %5532 = vmatprep.subr.bf16.mxu0 %v7508_v27 }
  0xe6   : > { %5553 = vmatpush3.bf16.msra.mxu1 %v7505_v26 }
  0xe7   : > { %5554 = vmatprep.subr.bf16.mxu1 %v7511_v28 }
  0xe8   : > { %5533 = vmatpush3.bf16.msra.mxu0 %v7514_v29 }
  0xe9   : > { %5534 = vmatprep.subr.bf16.mxu0 %v7520_v33 }
  0xea   : > { %5555 = vmatpush3.bf16.msra.mxu1 %v7517_v31 }
  0xeb   : > { %5556 = vmatprep.subr.bf16.mxu1 %v7523_v35 }
  0xec   : > { %5535 = vmatpush3.bf16.msra.mxu0 %v7526_v37 }
  0xed   : > { %5564 = vmatprep.subr.bf16.mxu0 %v7437_v1 }
  0xee   : > { %5557 = vmatpush3.bf16.msra.mxu1 %v7529_v38 }
  0xef   : > { %1057 = vmatmul.mubr.bf16.vlgmr.msra.gmra.mrb[12].mxu0 %v1020_v40  ;;  %5586 = vmatprep.subr.bf16.mxu1 %v7439_v2  ;;  %v7833_v40 = vrot.slane %v5304_v36, %v7535_v49  ;;  %v7967_v36 = vld [vmem:[#allocation12 + $0x90] sm:$0xff]  }
  0xf0   : > { %5565 = vmatpush3.bf16.msra.mxu0 %v7442_v3  ;;  %1199 = vmatprep.mubr.bf16.mxu0 %v1164_v41  ;;  %v7842_v41 = vrot.slane %v1428_v39, %v7535_v49  ;;  %v7970_v39 = vld [vmem:[#allocation12 + $0xd8] sm:$0xff]  }
  0xf1   : > { %1097 = vmatmul.mubr.bf16.vlgmr.msra.gmra.mrb[12].mxu1 %v1022_v42  ;;  %5566 = vmatprep.subr.bf16.mxu0 %v7448_v5  ;;  %v1443_v42 = vcombine.high %v7833_v40, %v7833_v40 }
  0xf2   : > { %5587 = vmatpush3.bf16.msra.mxu1 %v7445_v4  ;;  %1239 = vmatprep.mubr.bf16.mxu1 %v1166_v44  ;;  %v1444_v43 = vcombine.high %v7842_v41, %v7842_v41  ;;  %v1306_v44 = vpack.c.bf16 %v7774_v55, %v7774_v55 }
  0xf3   : > { %5588 = vmatprep.subr.bf16.mxu1 %v7451_v6  ;;  %v1450_v45 = vpack.c.bf16 %v1443_v42, %v1443_v42 }
  0xf4   : > { %5567 = vmatpush3.bf16.msra.mxu0 %v7454_v7  ;;  %v1452_v48 = vpack.c.bf16 %v1444_v43, %v1444_v43 }
  0xf5   : > { %5568 = vmatprep.subr.bf16.mxu0 %v7460_v9 }
  0xf6   : > { %5589 = vmatpush3.bf16.msra.mxu1 %v7457_v8 }
  0xf7   : > { %5590 = vmatprep.subr.bf16.mxu1 %v7463_v10 }
  0xf8   : > { %5569 = vmatpush3.bf16.msra.mxu0 %v7466_v11 }
  0xf9   : > { %5570 = vmatprep.subr.bf16.mxu0 %v7472_v13 }
  0xfa   : > { %5591 = vmatpush3.bf16.msra.mxu1 %v7469_v12 }
  0xfb   : > { %5592 = vmatprep.subr.bf16.mxu1 %v7475_v14 }
  0xfc   : > { %5571 = vmatpush3.bf16.msra.mxu0 %v7478_v15 }
  0xfd   : > { %5572 = vmatprep.subr.bf16.mxu0 %v7484_v17 }
  0xfe   : > { %5593 = vmatpush3.bf16.msra.mxu1 %v7481_v16 }
  0xff   : > { %5594 = vmatprep.subr.bf16.mxu1 %v7487_v18 }
 0x100   : > { %5573 = vmatpush3.bf16.msra.mxu0 %v7490_v19 }
 0x101   : > { %5574 = vmatprep.subr.bf16.mxu0 %v7496_v22 }
 0x102   : > { %5595 = vmatpush3.bf16.msra.mxu1 %v7493_v21 }
 0x103   : > { %5596 = vmatprep.subr.bf16.mxu1 %v7499_v23 }
 0x104   : > { %5575 = vmatpush3.bf16.msra.mxu0 %v7502_v24 }
 0x105   : > { %5576 = vmatprep.subr.bf16.mxu0 %v7508_v27 }
 0x106   : > { %5597 = vmatpush3.bf16.msra.mxu1 %v7505_v26 }
 0x107   : > { %5598 = vmatprep.subr.bf16.mxu1 %v7511_v28 }
 0x108   : > { %5577 = vmatpush3.bf16.msra.mxu0 %v7514_v29 }
 0x109   : > { %5578 = vmatprep.subr.bf16.mxu0 %v7520_v33 }
 0x10a   : > { %5599 = vmatpush3.bf16.msra.mxu1 %v7517_v31 }
 0x10b   : > { %5600 = vmatprep.subr.bf16.mxu1 %v7523_v35 }
 0x10c   : > { %5579 = vmatpush3.bf16.msra.mxu0 %v7526_v37 }
 0x10d   : > { %5608 = vmatprep.subr.bf16.mxu0 %v7437_v1 }
 0x10e   : > { %5601 = vmatpush3.bf16.msra.mxu1 %v7529_v38 }
 0x10f   : > { %1200 = vmatmul.mubr.bf16.vlgmr.msra.gmra.mrb[16].mxu0 %v1163_v59  ;;  %5630 = vmatprep.subr.bf16.mxu1 %v7439_v2  ;;  %v7941_v59 = vld [vmem:[#allocation12 + $0xc8] sm:$0xff]  }
 0x110   : > { %5609 = vmatpush3.bf16.msra.mxu0 %v7442_v3  ;;  %1342 = vmatprep.mubr.bf16.mxu0 %v1307_v60  ;;  %v7944_v60 = vld [vmem:[#allocation12 + $0x8] sm:$0xff]  }
 0x111   : > { %1240 = vmatmul.mubr.bf16.vlgmr.msra.gmra.mrb[16].mxu1 %v1165_v61  ;;  %5610 = vmatprep.subr.bf16.mxu0 %v7448_v5 }
 0x112   : > { %5631 = vmatpush3.bf16.msra.mxu1 %v7445_v4  ;;  %1382 = vmatprep.mubr.bf16.mxu1 %v1309_v0 }
 0x113   : > { %5632 = vmatprep.subr.bf16.mxu1 %v7451_v6 }
 0x114   : > { %5611 = vmatpush3.bf16.msra.mxu0 %v7454_v7 }
 0x115   : > { %5612 = vmatprep.subr.bf16.mxu0 %v7460_v9 }
 0x116   : > { %5633 = vmatpush3.bf16.msra.mxu1 %v7457_v8 }
 0x117   : > { %5634 = vmatprep.subr.bf16.mxu1 %v7463_v10 }
 0x118   : > { %5613 = vmatpush3.bf16.msra.mxu0 %v7466_v11 }
 0x119   : > { %5614 = vmatprep.subr.bf16.mxu0 %v7472_v13 }
 0x11a   : > { %5635 = vmatpush3.bf16.msra.mxu1 %v7469_v12 }
 0x11b   : > { %5636 = vmatprep.subr.bf16.mxu1 %v7475_v14 }
 0x11c   : > { %5615 = vmatpush3.bf16.msra.mxu0 %v7478_v15 }
 0x11d   : > { %5616 = vmatprep.subr.bf16.mxu0 %v7484_v17 }
 0x11e   : > { %5637 = vmatpush3.bf16.msra.mxu1 %v7481_v16 }
 0x11f   : > { %5638 = vmatprep.subr.bf16.mxu1 %v7487_v18 }
 0x120   : > { %5617 = vmatpush3.bf16.msra.mxu0 %v7490_v19 }
 0x121   : > { %5618 = vmatprep.subr.bf16.mxu0 %v7496_v22 }
 0x122   : > { %5639 = vmatpush3.bf16.msra.mxu1 %v7493_v21 }
 0x123   : > { %5640 = vmatprep.subr.bf16.mxu1 %v7499_v23 }
 0x124   : > { %5619 = vmatpush3.bf16.msra.mxu0 %v7502_v24 }
 0x125   : > { %5620 = vmatprep.subr.bf16.mxu0 %v7508_v27 }
 0x126   : > { %5641 = vmatpush3.bf16.msra.mxu1 %v7505_v26 }
 0x127   : > { %5642 = vmatprep.subr.bf16.mxu1 %v7511_v28 }
 0x128   : > { %5621 = vmatpush3.bf16.msra.mxu0 %v7514_v29 }
 0x129   : > { %5622 = vmatprep.subr.bf16.mxu0 %v7520_v33 }
 0x12a   : > { %5643 = vmatpush3.bf16.msra.mxu1 %v7517_v31 }
 0x12b   : > { %5644 = vmatprep.subr.bf16.mxu1 %v7523_v35 }
 0x12c   : > { %5623 = vmatpush3.bf16.msra.mxu0 %v7526_v37 }
 0x12d   : > { %5652 = vmatprep.subr.bf16.mxu0 %v7437_v1  ;;  %v1561_v1 = vadd.f32 %v1560_v50, %v7541_v53 }
 0x12e   : > { %5645 = vmatpush3.bf16.msra.mxu1 %v7529_v38 }
 0x12f   : > { %1343 = vmatmul.mubr.bf16.vlgmr.msra.gmra.mrb[20].mxu0 %v1306_v44  ;;  %5674 = vmatprep.subr.bf16.mxu1 %v7439_v2  ;;  %v1423_v2 = vsel %vm1421_vm6, 0.0, %v1422_v51 }
 0x130   : > { %5653 = vmatpush3.bf16.msra.mxu0 %v7442_v3  ;;  %1485 = vmatprep.mubr.bf16.mxu0 %v1450_v45  ;;  %v7875_v3 = vadd.f32 %v1561_v1, %v1423_v2  ;;  %v676_v45 = vld [vmem:[#allocation3] sm:$0x3] }
 0x131   : > { %1383 = vmatmul.mubr.bf16.vlgmr.msra.gmra.mrb[20].mxu1 %v1308_v46  ;;  %5654 = vmatprep.subr.bf16.mxu0 %v7448_v5  ;;  %v679_v46 = vld [vmem:[#allocation4] sm:$0x3] }
 0x132   : > { %5675 = vmatpush3.bf16.msra.mxu1 %v7445_v4  ;;  %1525 = vmatprep.mubr.bf16.mxu1 %v1452_v48  ;;  %vm1564_vm7 = vcmp.gt.f32.partialorder %v7875_v3, 1.0  ;;  %v1565_v57 = vmul.f32 0.7788008, %v7875_v3  ;;  %v680_v51 = vmul.f32 0.36787945, %v679_v46 }
 0x133   : > { %5676 = vmatprep.subr.bf16.mxu1 %v7451_v6  ;;  %v5307_v4 = vsel %vm1564_vm7, 1.0, %v7254_v63 }
 0x134   : > { %5655 = vmatpush3.bf16.msra.mxu0 %v7454_v7  ;;  %v1571_v5 = vcombine.high %v5307_v4, %v5307_v4  ;;  %v7896_v6 = vrot.slane %v5307_v4, %v7535_v49  ;;  %v1566_v0 = vsel %vm1564_vm7, 0.0, %v1565_v57 }
 0x135   : > { %5656 = vmatprep.subr.bf16.mxu0 %v7460_v9 }
 0x136   : > { %5677 = vmatpush3.bf16.msra.mxu1 %v7457_v8  ;;  %v7905_v7 = vrot.slane %v1571_v5, %v7535_v49  ;;  %v1586_v8 = vcombine.high %v7896_v6, %v7896_v6 }
 0x137   : > { %5678 = vmatprep.subr.bf16.mxu1 %v7463_v10  ;;  %v1449_v10 = vpack.c.bf16 %v7833_v40, %v7833_v40  ;;  %v7973_v40 = vld [vmem:[#allocation12 + $0x18] sm:$0xff]  }
 0x138   : > { %5657 = vmatpush3.bf16.msra.mxu0 %v7466_v11  ;;  %v1587_v9 = vcombine.high %v7905_v7, %v7905_v7  ;;  %v1593_v11 = vpack.c.bf16 %v1586_v8, %v1586_v8 }
 0x139   : > { %5658 = vmatprep.subr.bf16.mxu0 %v7472_v13  ;;  %v7923_v13 = vld [vmem:[#allocation12 + $0x40] sm:$0xff]  }
 0x13a   : > { %5679 = vmatpush3.bf16.msra.mxu1 %v7469_v12  ;;  %v1451_v12 = vpack.c.bf16 %v7842_v41, %v7842_v41  ;;  %v7978_v41 = vld [vmem:[#allocation12 + $0x98] sm:$0xff]  }
 0x13b   : > { %5680 = vmatprep.subr.bf16.mxu1 %v7475_v14  ;;  %v1702_v14 = vstv %s1701_s22  ;;  %s2128_s22 = smul.f32 0.36787945, %s8084_s12  ;;  %s8302_s12 = sadd.f32 1.0, %s2412_s29 }
 0x13c   : > { %5659 = vmatpush3.bf16.msra.mxu0 %v7478_v15  ;;  %v1595_v15 = vpack.c.bf16 %v1587_v9, %v1587_v9  ;;  %v1703_v55 = vmul.f32 %v1702_v14, %v7539_v52  ;;  %v1594_v9 = vpack.c.bf16 %v7905_v7, %v7905_v7 }
 0x13d   : > { %5660 = vmatprep.subr.bf16.mxu0 %v7484_v17  ;;  %s8172_s6 = sadd.f32 1.0, %s2128_s22  ;;  %s2555_s22 = smul.f32 0.7788008, %s8302_s12 }
 0x13e   : > { %5681 = vmatpush3.bf16.msra.mxu1 %v7481_v16  ;;  %v7927_v16 = vld [vmem:[#allocation12 + $0xc0] sm:$0xff]   ;;  %v1704_v61 = vadd.f32 %v1703_v55, %v7541_v53 }
 0x13f   : > { %5682 = vmatprep.subr.bf16.mxu1 %v7487_v18  ;;  %s2130_s9 = ssub.f32 %s8166_s24, %s8172_s6 }
 0x140   : > { %5661 = vmatpush3.bf16.msra.mxu0 %v7490_v19  ;;  %v7962_v32 = vadd.f32 %v1704_v61, %v1566_v0  ;;  %v8052_v61 = vld [vmem:[#allocation12 + $0x60] sm:$0xff]  }
 0x141   : > { %5662 = vmatprep.subr.bf16.mxu0 %v7496_v22  ;;  %v8056_v0 = vld [vmem:[#allocation12 + $0xe0] sm:$0xff]  }
 0x142   : > { %5683 = vmatpush3.bf16.msra.mxu1 %v7493_v21  ;;  %vm1707_vm8 = vcmp.gt.f32.partialorder %v7962_v32, 1.0  ;;  %v1708_v7 = vmul.f32 0.7788008, %v7962_v32 }
 0x143   : > { %5684 = vmatprep.subr.bf16.mxu1 %v7499_v23  ;;  %v5310_v42 = vsel %vm1707_vm8, 1.0, %v7254_v63 }
 0x144   : > { %5663 = vmatpush3.bf16.msra.mxu0 %v7502_v24  ;;  %v1709_v55 = vsel %vm1707_vm8, 0.0, %v1708_v7  ;;  %v8108_v7 = vld [vmem:[#allocation12 + $0xb0] sm:$0xff]  }
 0x145   : > { %5664 = vmatprep.subr.bf16.mxu0 %v7508_v27 }
 0x146   : > { %5685 = vmatpush3.bf16.msra.mxu1 %v7505_v26 }
 0x147   : > { %5686 = vmatprep.subr.bf16.mxu1 %v7511_v28 }
 0x148   : > { %5665 = vmatpush3.bf16.msra.mxu0 %v7514_v29 }
 0x149   : > { %5666 = vmatprep.subr.bf16.mxu0 %v7520_v33 }
 0x14a   : > { %5687 = vmatpush3.bf16.msra.mxu1 %v7517_v31 }
 0x14b   : > { %5688 = vmatprep.subr.bf16.mxu1 %v7523_v35 }
 0x14c   : > { %5667 = vmatpush3.bf16.msra.mxu0 %v7526_v37 }
 0x14d   : > { %5696 = vmatprep.subr.bf16.mxu0 %v7923_v13 }
 0x14e   : > { %5689 = vmatpush3.bf16.msra.mxu1 %v7529_v38 }
 0x14f   : > { %1486 = vmatmul.mubr.bf16.vlgmr.msra.gmra.mrb[24].mxu0 %v1449_v10  ;;  %5718 = vmatprep.subr.bf16.mxu1 %v7927_v16  ;;  %v1845_v10 = vstv %s1844_s5  ;;  %s2271_s5 = smul.f32 0.36787945, %s8172_s6  ;;  %s8370_s6 = sadd.f32 1.0, %s2555_s22 }
 0x150   : > { %5697 = vmatpush3.bf16.msra.mxu0 %v7930_v54  ;;  %1628 = vmatprep.mubr.bf16.mxu0 %v1593_v11 }
 0x151   : > { %1526 = vmatmul.mubr.bf16.vlgmr.msra.gmra.mrb[24].mxu1 %v1451_v12  ;;  %5698 = vmatprep.subr.bf16.mxu0 %v7934_v56  ;;  %s8240_s11 = sadd.f32 1.0, %s2271_s5  ;;  %s2698_s5 = smul.f32 0.7788008, %s8370_s6 }
 0x152   : > { %5719 = vmatpush3.bf16.msra.mxu1 %v7938_v58  ;;  %1668 = vmatprep.mubr.bf16.mxu1 %v1595_v15 }
 0x153   : > { %5720 = vmatprep.subr.bf16.mxu1 %v7941_v59  ;;  %s2273_s21 = ssub.f32 %s8234_s8, %s8240_s11  ;;  %s2414_s30 = smul.f32 0.36787945, %s8240_s11 }
 0x154   : > { %5699 = vmatpush3.bf16.msra.mxu0 %v7944_v60  ;;  %s8470_s11 = sadd.f32 1.0, %s2698_s5 }
 0x155   : > { %5700 = vmatprep.subr.bf16.mxu0 %v7948_v62 }
 0x156   : > { %5721 = vmatpush3.bf16.msra.mxu1 %v7953_v20 }
 0x157   : > { %5722 = vmatprep.subr.bf16.mxu1 %v7956_v25 }
 0x158   : > { %5701 = vmatpush3.bf16.msra.mxu0 %v7959_v30 }
 0x159   : > { %5702 = vmatprep.subr.bf16.mxu0 %v7964_v34 }
 0x15a   : > { %5723 = vmatpush3.bf16.msra.mxu1 %v7967_v36 }
 0x15b   : > { %5724 = vmatprep.subr.bf16.mxu1 %v7970_v39 }
 0x15c   : > { %5703 = vmatpush3.bf16.msra.mxu0 %v7973_v40 }
 0x15d   : > { %5704 = vmatprep.subr.bf16.mxu0 %v7484_v17  ;;  %v1714_v17 = vcombine.high %v5310_v42, %v5310_v42 }
 0x15e   : > { %5725 = vmatpush3.bf16.msra.mxu1 %v7978_v41 }
 0x15f   : > { %5726 = vmatprep.subr.bf16.mxu1 %v7487_v18 }
 0x160   : > { %5705 = vmatpush3.bf16.msra.mxu0 %v7490_v19  ;;  %v7993_v19 = vrot.slane %v5310_v42, %v7535_v49  ;;  %v8063_v42 = vld [vmem:[#allocation12 + $0x20] sm:$0xff]  }
 0x161   : > { %5706 = vmatprep.subr.bf16.mxu0 %v7496_v22 }
 0x162   : > { %5727 = vmatpush3.bf16.msra.mxu1 %v7493_v21  ;;  %v5404_v43 = vpop.f32.mrb[0].mxu0 }
 0x163   : > { %v5405_v44 = vpop.f32.mrb[1].mxu0  ;;  %5728 = vmatprep.subr.bf16.mxu1 %v7499_v23  ;;  %v677_v23 = vmul.f32 0.7788008, %v676_v45 }
 0x164   : > { %v5426_v18 = vpop.f32.mrb[0].mxu1  ;;  %v5406_v47 = vadd.f32 %v5405_v44, %v5404_v43  ;;  %v5407_v48 = vpop.f32.mrb[2].mxu0  ;;  %5707 = vmatpush3.bf16.msra.mxu0 %v7502_v24  ;;  %v8002_v24 = vrot.slane %v1714_v17, %v7535_v49  ;;  %v8067_v43 = vld [vmem:[#allocation12 + $0x68] sm:$0xff]   ;;  %v8070_v17 = vld [vmem:[#allocation12 + $0xa0] sm:$0xff]  }
 0x165   : > { %v5427_v22 = vpop.f32.mrb[1].mxu1  ;;  %v5408_v21 = vpop.f32.mrb[3].mxu0  ;;  %5708 = vmatprep.subr.bf16.mxu0 %v7508_v27  ;;  %v1729_v27 = vcombine.high %v7993_v19, %v7993_v19 }
 0x166   : > { %v5428_v50 = vadd.f32 %v5427_v22, %v5426_v18  ;;  %v5429_v1 = vpop.f32.mrb[2].mxu1  ;;  %5729 = vmatpush3.bf16.msra.mxu1 %v7505_v26  ;;  %v1730_v26 = vcombine.high %v8002_v24, %v8002_v24  ;;  %v8073_v18 = vld [vmem:[#allocation12 + $0xe8] sm:$0xff]  }
 0x167   : > { %v5430_v2 = vpop.f32.mrb[3].mxu1  ;;  %5730 = vmatprep.subr.bf16.mxu1 %v7511_v28  ;;  %v8017_v28 = vld [vmem:[%s9930_s3] ss:$0 sm:$0xff]  ;;  %v1736_v8 = vpack.c.bf16 %v1729_v27, %v1729_v27  ;;  %v8078_v21 = vld [vmem:[#allocation12 + $0x28] sm:$0xff]  }
 0x168   : > { %v671_v3 = vadd.f32 %v5428_v50, %v5406_v47  ;;  %5709 = vmatpush3.bf16.msra.mxu0 %v7514_v29  ;;  %v1592_v29 = vpack.c.bf16 %v7896_v6, %v7896_v6 }
 0x169   : > { %5710 = vmatprep.subr.bf16.mxu0 %v7520_v33 }
 0x16a   : > { %v678_v4 = vadd.f32 %v677_v23, %v671_v3  ;;  %v681_v5 = vadd.f32 %v680_v51, %v671_v3  ;;  %5731 = vmatpush3.bf16.msra.mxu1 %v7517_v31  ;;  %v686_v31 = vld [vmem:[#allocation5] sm:$0x3] }
 0x16b   : > { %5732 = vmatprep.subr.bf16.mxu1 %v7523_v35  ;;  %v1738_v35 = vpack.c.bf16 %v1730_v26, %v1730_v26  ;;  %v8086_v3 = vld [vmem:[#allocation12 + $0x70] sm:$0xff]  }
 0x16c   : > { %682 = vst [vmem:[#allocation3] sm:$0x3] %v678_v4  ;;  %683 = vst [vmem:[#allocation4] sm:$0x3] %v681_v5  ;;  %v684_v33 = vsub.f32 %v678_v4, %v681_v5  ;;  %5711 = vmatpush3.bf16.msra.mxu0 %v7526_v37  ;;  %v1846_v37 = vmul.f32 %v1845_v10, %v7539_v52  ;;  %v8089_v5 = vld [vmem:[#allocation12 + $0xa8] sm:$0xff]   ;;  %v8098_v10 = vld [vmem:[#allocation12 + $0x30] sm:$0xff]  }
 0x16d   : > { %5740 = vmatprep.subr.bf16.mxu0 %v7923_v13 }
 0x16e   : > { %v685_v11 = vadd.f32 %v8017_v28, %v684_v33  ;;  %5733 = vmatpush3.bf16.msra.mxu1 %v7529_v38  ;;  %v1847_v52 = vadd.f32 %v1846_v37, %v7541_v53  ;;  %v8095_v33 = vld [vmem:[#allocation12 + $0xf0] sm:$0xff]  }
 0x16f   : > { %1629 = vmatmul.mubr.bf16.vlgmr.msra.gmra.mrb[28].mxu0 %v1592_v29  ;;  %5762 = vmatprep.subr.bf16.mxu1 %v7927_v16 }
 0x170   : > { %v687_v6 = vadd.f32 %v686_v31, %v685_v11  ;;  %5741 = vmatpush3.bf16.msra.mxu0 %v7930_v54  ;;  %1771 = vmatprep.mubr.bf16.mxu0 %v1736_v8  ;;  %v8045_v57 = vadd.f32 %v1847_v52, %v1709_v55  ;;  %v8118_v52 = vld [vmem:[#allocation12 + $0x38] sm:$0xff]  }
 0x171   : > { %1669 = vmatmul.mubr.bf16.vlgmr.msra.gmra.mrb[28].mxu1 %v1594_v9  ;;  %5742 = vmatprep.subr.bf16.mxu0 %v7934_v56 }
 0x172   : > { %vm688_vm9 = vcmp.gt.f32.partialorder %v687_v6, 1.0  ;;  %v689_v12 = vmul.f32 0.7788008, %v687_v6  ;;  %5763 = vmatpush3.bf16.msra.mxu1 %v7938_v58  ;;  %1811 = vmatprep.mubr.bf16.mxu1 %v1738_v35  ;;  %vm1850_vm10 = vcmp.gt.f32.partialorder %v8045_v57, 1.0  ;;  %v8103_v35 = vld [vmem:[#allocation12 + $0x78] sm:$0xff]  }
 0x173   : > { %v5288_v38 = vsel %vm688_vm9, 1.0, %v7254_v63  ;;  %5764 = vmatprep.subr.bf16.mxu1 %v7941_v59  ;;  %v5313_v32 = vsel %vm1850_vm10, 1.0, %v7254_v63  ;;  %v818_v23 = vld [vmem:[#allocation3] sm:$0x3]  ;;  %v821_v51 = vld [vmem:[#allocation4] sm:$0x3] }
 0x174   : > { %v690_v14 = vsel %vm688_vm9, 0.0, %v689_v12  ;;  %v694_v15 = vpack.c.bf16 %v5288_v38, %v5288_v38  ;;  %5743 = vmatpush3.bf16.msra.mxu0 %v7944_v60  ;;  %v1857_v45 = vcombine.high %v5313_v32, %v5313_v32  ;;  %v8082_v50 = vrot.slane %v5313_v32, %v7535_v49  ;;  %v8113_v38 = vld [vmem:[#allocation12 + $0xf8] sm:$0xff]  }
 0x175   : > { %691 = vst [vmem:[#allocation5] sm:$0x3] %v690_v14  ;;  %5744 = vmatprep.subr.bf16.mxu0 %v7948_v62  ;;  %v819_v31 = vmul.f32 0.7788008, %v818_v23  ;;  %v822_v9 = vmul.f32 0.36787945, %v821_v51  ;;  %v1735_v14 = vpack.c.bf16 %v7993_v19, %v7993_v19  ;;  %v1737_v32 = vpack.c.bf16 %v8002_v24, %v8002_v24 }
 0x176   : > { %695 = vst [vmem:[%s7434_s10] sm:$0x1] %v694_v15  ;;  %5765 = vmatpush3.bf16.msra.mxu1 %v7953_v20  ;;  %v8093_v26 = vrot.slane %v1857_v45, %v7535_v49  ;;  %v1872_v11 = vcombine.high %v8082_v50, %v8082_v50  ;;  %v1851_v23 = vmul.f32 0.7788008, %v8045_v57 }
 0x177   : > { %5766 = vmatprep.subr.bf16.mxu1 %v7956_v25 }
 0x178   : > { %5745 = vmatpush3.bf16.msra.mxu0 %v7959_v30  ;;  %v1873_v12 = vcombine.high %v8093_v26, %v8093_v26  ;;  %v1879_v55 = vpack.c.bf16 %v1872_v11, %v1872_v11 }
 0x179   : > { %5746 = vmatprep.subr.bf16.mxu0 %v7964_v34 }
 0x17a   : > { %5767 = vmatpush3.bf16.msra.mxu1 %v7967_v36  ;;  %v1881_v19 = vpack.c.bf16 %v1873_v12, %v1873_v12 }
 0x17b   : > { %5768 = vmatprep.subr.bf16.mxu1 %v7970_v39 }
 0x17c   : > { %5747 = vmatpush3.bf16.msra.mxu0 %v7973_v40 }
 0x17d   : > { %5748 = vmatprep.subr.bf16.mxu0 %v8052_v61 }
 0x17e   : > { %5769 = vmatpush3.bf16.msra.mxu1 %v7978_v41 }
 0x17f   : > { %5770 = vmatprep.subr.bf16.mxu1 %v8056_v0 }
 0x180   : > { %5749 = vmatpush3.bf16.msra.mxu0 %v8063_v42 }
 0x181   : > { %5750 = vmatprep.subr.bf16.mxu0 %v8067_v43 }
 0x182   : > { %5771 = vmatpush3.bf16.msra.mxu1 %v8070_v17  ;;  %v5448_v44 = vpop.f32.mrb[4].mxu0 }
 0x183   : > { %v5449_v46 = vpop.f32.mrb[5].mxu0  ;;  %5772 = vmatprep.subr.bf16.mxu1 %v8073_v18 }
 0x184   : > { %v5470_v47 = vpop.f32.mrb[4].mxu1  ;;  %v5450_v48 = vadd.f32 %v5449_v46, %v5448_v44  ;;  %v5451_v22 = vpop.f32.mrb[6].mxu0  ;;  %5751 = vmatpush3.bf16.msra.mxu0 %v8078_v21  ;;  %v1988_v44 = vstv %s1987_s13  ;;  %v8125_v46 = vld [vmem:[#allocation12 + $0xb8] sm:$0xff]   ;;  %s8308_s13 = sadd.f32 1.0, %s2414_s30 }
 0x185   : > { %v5471_v1 = vpop.f32.mrb[5].mxu1  ;;  %v5452_v2 = vpop.f32.mrb[7].mxu0  ;;  %5752 = vmatprep.subr.bf16.mxu0 %v8086_v3  ;;  %v8130_v22 = vld [vmem:[#allocation7] sm:$0xff] }
 0x186   : > { %v5472_v27 = vadd.f32 %v5471_v1, %v5470_v47  ;;  %v5473_v4 = vpop.f32.mrb[6].mxu1  ;;  %5773 = vmatpush3.bf16.msra.mxu1 %v8089_v5  ;;  %v828_v47 = vld [vmem:[#allocation5] sm:$0x3]  ;;  %v1989_v24 = vmul.f32 %v8130_v22, %v1988_v44  ;;  %s2416_s14 = ssub.f32 %s8302_s12, %s8308_s13  ;;  %s2557_s24 = smul.f32 0.36787945, %s8308_s13 }
 0x187   : > { %v5474_v29 = vpop.f32.mrb[7].mxu1  ;;  %5774 = vmatprep.subr.bf16.mxu1 %v8095_v33  ;;  %s2841_s13 = smul.f32 0.7788008, %s8470_s11 }
 0x188   : > { %v813_v8 = vadd.f32 %v5472_v27, %v5450_v48  ;;  %5753 = vmatpush3.bf16.msra.mxu0 %v8098_v10  ;;  %v1990_v4 = vadd.f32 %v1989_v24, %v7541_v53  ;;  %v1852_v29 = vsel %vm1850_vm10, 0.0, %v1851_v23 }
 0x189   : > { %5754 = vmatprep.subr.bf16.mxu0 %v8103_v35  ;;  %s8555_s22 = sadd.f32 1.0, %s2841_s13 }
 0x18a   : > { %v820_v6 = vadd.f32 %v819_v31, %v813_v8  ;;  %v823_v37 = vadd.f32 %v822_v9, %v813_v8  ;;  %5775 = vmatpush3.bf16.msra.mxu1 %v8108_v7  ;;  %v8147_v8 = vadd.f32 %v1990_v4, %v1852_v29  ;;  %v1878_v29 = vpack.c.bf16 %v8082_v50, %v8082_v50 }
 0x18b   : > { %5776 = vmatprep.subr.bf16.mxu1 %v8113_v38 }
 0x18c   : > { %824 = vst [vmem:[#allocation3] sm:$0x3] %v820_v6  ;;  %825 = vst [vmem:[#allocation4] sm:$0x3] %v823_v37  ;;  %v826_v15 = vsub.f32 %v820_v6, %v823_v37  ;;  %5755 = vmatpush3.bf16.msra.mxu0 %v8118_v52  ;;  %vm1993_vm12 = vcmp.gt.f32.partialorder %v8147_v8, 1.0 }
 0x18d   : > { %5784 = vmatprep.subr.bf16.mxu0 %v7923_v13  ;;  %v5316_v57 = vsel %vm1993_vm12, 1.0, %v7254_v63 }
 0x18e   : > { %v827_v45 = vadd.f32 %v8017_v28, %v826_v15  ;;  %5777 = vmatpush3.bf16.msra.mxu1 %v8125_v46  ;;  %v2000_v9 = vcombine.high %v5316_v57, %v5316_v57 }
 0x18f   : > { %1772 = vmatmul.mubr.bf16.vlgmr.msra.gmra.mrb[32].mxu0 %v1735_v14  ;;  %5806 = vmatprep.subr.bf16.mxu1 %v7927_v16  ;;  %v8170_v14 = vrot.slane %v5316_v57, %v7535_v49 }
 0x190   : > { %v829_v48 = vadd.f32 %v828_v47, %v827_v45  ;;  %5785 = vmatpush3.bf16.msra.mxu0 %v7930_v54  ;;  %1914 = vmatprep.mubr.bf16.mxu0 %v1879_v55  ;;  %v8177_v47 = vrot.slane %v2000_v9, %v7535_v49  ;;  %v1880_v9 = vpack.c.bf16 %v8093_v26, %v8093_v26  ;;  %v1994_v26 = vmul.f32 0.7788008, %v8147_v8 }
 0x191   : > { %1812 = vmatmul.mubr.bf16.vlgmr.msra.gmra.mrb[32].mxu1 %v1737_v32  ;;  %5786 = vmatprep.subr.bf16.mxu0 %v7934_v56 }
 0x192   : > { %vm830_vm11 = vcmp.gt.f32.partialorder %v829_v48, 1.0  ;;  %v831_v51 = vmul.f32 0.7788008, %v829_v48  ;;  %5807 = vmatpush3.bf16.msra.mxu1 %v7938_v58  ;;  %1954 = vmatprep.mubr.bf16.mxu1 %v1881_v19  ;;  %v2016_v4 = vcombine.high %v8177_v47, %v8177_v47 }
 0x193   : > { %v5290_v1 = vsel %vm830_vm11, 1.0, %v7254_v63  ;;  %5808 = vmatprep.subr.bf16.mxu1 %v7941_v59  ;;  %v961_v15 = vld [vmem:[#allocation3] sm:$0x3]  ;;  %v964_v55 = vld [vmem:[#allocation4] sm:$0x3] }
 0x194   : > { %v832_v2 = vsel %vm830_vm11, 0.0, %v831_v51  ;;  %v836_v27 = vpack.c.bf16 %v5290_v1, %v5290_v1  ;;  %5787 = vmatpush3.bf16.msra.mxu0 %v7944_v60  ;;  %v962_v23 = vmul.f32 0.7788008, %v961_v15  ;;  %v965_v51 = vmul.f32 0.36787945, %v964_v55 }
 0x195   : > { %833 = vst [vmem:[#allocation5] sm:$0x3] %v832_v2  ;;  %5788 = vmatprep.subr.bf16.mxu0 %v7948_v62  ;;  %v2015_v1 = vcombine.high %v8170_v14, %v8170_v14 }
 0x196   : > { %5291 = vst [vmem:[%s7434_s10 + $0x1] sm:$0x1] %v836_v27  ;;  %5809 = vmatpush3.bf16.msra.mxu1 %v7953_v20 }
 0x197   : > { %5810 = vmatprep.subr.bf16.mxu1 %v7956_v25 }
 0x198   : > { %5789 = vmatpush3.bf16.msra.mxu0 %v7959_v30 }
 0x199   : > { %5790 = vmatprep.subr.bf16.mxu0 %v7964_v34 }
 0x19a   : > { %5811 = vmatpush3.bf16.msra.mxu1 %v7967_v36 }
 0x19b   : > { %5812 = vmatprep.subr.bf16.mxu1 %v7970_v39 }
 0x19c   : > { %5791 = vmatpush3.bf16.msra.mxu0 %v7973_v40 }
 0x19d   : > { %5792 = vmatprep.subr.bf16.mxu0 %v8052_v61 }
 0x19e   : > { %5813 = vmatpush3.bf16.msra.mxu1 %v7978_v41 }
 0x19f   : > { %5814 = vmatprep.subr.bf16.mxu1 %v8056_v0 }
 0x1a0   : > { %5793 = vmatpush3.bf16.msra.mxu0 %v8063_v42 }
 0x1a1   : > { %5794 = vmatprep.subr.bf16.mxu0 %v8067_v43 }
 0x1a2   : > { %5815 = vmatpush3.bf16.msra.mxu1 %v8070_v17  ;;  %v5492_v31 = vpop.f32.mrb[8].mxu0 }
 0x1a3   : > { %v5493_v11 = vpop.f32.mrb[9].mxu0  ;;  %5816 = vmatprep.subr.bf16.mxu1 %v8073_v18 }
 0x1a4   : > { %v5514_v6 = vpop.f32.mrb[8].mxu1  ;;  %v5494_v37 = vadd.f32 %v5493_v11, %v5492_v31  ;;  %v5495_v12 = vpop.f32.mrb[10].mxu0  ;;  %5795 = vmatpush3.bf16.msra.mxu0 %v8078_v21  ;;  %v2022_v31 = vpack.c.bf16 %v2015_v1, %v2015_v1  ;;  %v2131_v11 = vstv %s2130_s9  ;;  %s8376_s9 = sadd.f32 1.0, %s2557_s24 }
 0x1a5   : > { %v5515_v32 = vpop.f32.mrb[9].mxu1  ;;  %v5496_v44 = vpop.f32.mrb[11].mxu0  ;;  %5796 = vmatprep.subr.bf16.mxu0 %v8086_v3  ;;  %v971_v12 = vld [vmem:[#allocation5] sm:$0x3]  ;;  %v2132_v15 = vmul.f32 %v8130_v22, %v2131_v11 }
 0x1a6   : > { %v5516_v45 = vadd.f32 %v5515_v32, %v5514_v6  ;;  %v5517_v19 = vpop.f32.mrb[10].mxu1  ;;  %5817 = vmatpush3.bf16.msra.mxu1 %v8089_v5  ;;  %s2559_s26 = ssub.f32 %s8370_s6, %s8376_s9  ;;  %s2700_s8 = smul.f32 0.36787945, %s8376_s9 }
 0x1a7   : > { %v5518_v48 = vpop.f32.mrb[11].mxu1  ;;  %5818 = vmatprep.subr.bf16.mxu1 %v8095_v33  ;;  %v2133_v19 = vadd.f32 %v2132_v15, %v7541_v53  ;;  %s2984_s9 = smul.f32 0.7788008, %s8555_s22 }
 0x1a8   : > { %v956_v24 = vadd.f32 %v5516_v45, %v5494_v37  ;;  %5797 = vmatpush3.bf16.msra.mxu0 %v8098_v10  ;;  %v2024_v37 = vpack.c.bf16 %v2016_v4, %v2016_v4  ;;  %v1995_v48 = vsel %vm1993_vm12, 0.0, %v1994_v26 }
 0x1a9   : > { %5798 = vmatprep.subr.bf16.mxu0 %v8103_v35  ;;  %s8645_s5 = sadd.f32 1.0, %s2984_s9 }
 0x1aa   : > { %v963_v2 = vadd.f32 %v962_v23, %v956_v24  ;;  %v966_v27 = vadd.f32 %v965_v51, %v956_v24  ;;  %5819 = vmatpush3.bf16.msra.mxu1 %v8108_v7  ;;  %v8215_v24 = vadd.f32 %v2133_v19, %v1995_v48  ;;  %v2021_v48 = vpack.c.bf16 %v8170_v14, %v8170_v14 }
 0x1ab   : > { %5820 = vmatprep.subr.bf16.mxu1 %v8113_v38 }
 0x1ac   : > { %967 = vst [vmem:[#allocation3] sm:$0x3] %v963_v2  ;;  %968 = vst [vmem:[#allocation4] sm:$0x3] %v966_v27  ;;  %v969_v57 = vsub.f32 %v963_v2, %v966_v27  ;;  %5799 = vmatpush3.bf16.msra.mxu0 %v8118_v52  ;;  %vm2136_vm14 = vcmp.gt.f32.partialorder %v8215_v24, 1.0 }
 0x1ad   : > { %5828 = vmatprep.subr.bf16.mxu0 %v7923_v13  ;;  %v5319_v8 = vsel %vm2136_vm14, 1.0, %v7254_v63 }
 0x1ae   : > { %v970_v6 = vadd.f32 %v8017_v28, %v969_v57  ;;  %5821 = vmatpush3.bf16.msra.mxu1 %v8125_v46  ;;  %v2143_v51 = vcombine.high %v5319_v8, %v5319_v8 }
 0x1af   : > { %1915 = vmatmul.mubr.bf16.vlgmr.msra.gmra.mrb[36].mxu0 %v1878_v29  ;;  %5850 = vmatprep.subr.bf16.mxu1 %v7927_v16  ;;  %v8238_v29 = vrot.slane %v5319_v8, %v7535_v49 }
 0x1b0   : > { %v972_v50 = vadd.f32 %v971_v12, %v970_v6  ;;  %5829 = vmatpush3.bf16.msra.mxu0 %v7930_v54  ;;  %2057 = vmatprep.mubr.bf16.mxu0 %v2022_v31  ;;  %v8245_v12 = vrot.slane %v2143_v51, %v7535_v49  ;;  %v2023_v51 = vpack.c.bf16 %v8177_v47, %v8177_v47  ;;  %v2137_v47 = vmul.f32 0.7788008, %v8215_v24 }
 0x1b1   : > { %1955 = vmatmul.mubr.bf16.vlgmr.msra.gmra.mrb[36].mxu1 %v1880_v9  ;;  %5830 = vmatprep.subr.bf16.mxu0 %v7934_v56 }
 0x1b2   : > { %vm973_vm13 = vcmp.gt.f32.partialorder %v972_v50, 1.0  ;;  %v974_v55 = vmul.f32 0.7788008, %v972_v50  ;;  %5851 = vmatpush3.bf16.msra.mxu1 %v7938_v58  ;;  %2097 = vmatprep.mubr.bf16.mxu1 %v2024_v37  ;;  %v2159_v19 = vcombine.high %v8245_v12, %v8245_v12 }
 0x1b3   : > { %v5293_v32 = vsel %vm973_vm13, 1.0, %v7254_v63  ;;  %5852 = vmatprep.subr.bf16.mxu1 %v7941_v59  ;;  %v1104_v57 = vld [vmem:[#allocation3] sm:$0x3]  ;;  %v1107_v31 = vld [vmem:[#allocation4] sm:$0x3] }
 0x1b4   : > { %v975_v44 = vsel %vm973_vm13, 0.0, %v974_v55  ;;  %v979_v45 = vpack.c.bf16 %v5293_v32, %v5293_v32  ;;  %5831 = vmatpush3.bf16.msra.mxu0 %v7944_v60  ;;  %v1105_v26 = vmul.f32 0.7788008, %v1104_v57  ;;  %v1108_v55 = vmul.f32 0.36787945, %v1107_v31 }
 0x1b5   : > { %976 = vst [vmem:[#allocation5] sm:$0x3] %v975_v44  ;;  %5832 = vmatprep.subr.bf16.mxu0 %v7948_v62  ;;  %v2158_v32 = vcombine.high %v8238_v29, %v8238_v29 }
 0x1b6   : > { %5294 = vst [vmem:[%s7434_s10 + $0x2] sm:$0x1] %v979_v45  ;;  %5853 = vmatpush3.bf16.msra.mxu1 %v7953_v20 }
 0x1b7   : > { %5854 = vmatprep.subr.bf16.mxu1 %v7956_v25 }
 0x1b8   : > { %5833 = vmatpush3.bf16.msra.mxu0 %v7959_v30 }
 0x1b9   : > { %5834 = vmatprep.subr.bf16.mxu0 %v7964_v34 }
 0x1ba   : > { %5855 = vmatpush3.bf16.msra.mxu1 %v7967_v36 }
 0x1bb   : > { %5856 = vmatprep.subr.bf16.mxu1 %v7970_v39 }
 0x1bc   : > { %5835 = vmatpush3.bf16.msra.mxu0 %v7973_v40 }
 0x1bd   : > { %5836 = vmatprep.subr.bf16.mxu0 %v8052_v61 }
 0x1be   : > { %5857 = vmatpush3.bf16.msra.mxu1 %v7978_v41 }
 0x1bf   : > { %5858 = vmatprep.subr.bf16.mxu1 %v8056_v0 }
 0x1c0   : > { %5837 = vmatpush3.bf16.msra.mxu0 %v8063_v42 }
 0x1c1   : > { %5838 = vmatprep.subr.bf16.mxu0 %v8067_v43 }
 0x1c2   : > { %5859 = vmatpush3.bf16.msra.mxu1 %v8070_v17  ;;  %v5536_v23 = vpop.f32.mrb[12].mxu0 }
 0x1c3   : > { %v5537_v1 = vpop.f32.mrb[13].mxu0  ;;  %5860 = vmatprep.subr.bf16.mxu1 %v8073_v18 }
 0x1c4   : > { %v5558_v2 = vpop.f32.mrb[12].mxu1  ;;  %v5538_v27 = vadd.f32 %v5537_v1, %v5536_v23  ;;  %v5539_v4 = vpop.f32.mrb[14].mxu0  ;;  %5839 = vmatpush3.bf16.msra.mxu0 %v8078_v21  ;;  %v2165_v23 = vpack.c.bf16 %v2158_v32, %v2158_v32  ;;  %v2274_v1 = vstv %s2273_s21  ;;  %s8476_s21 = sadd.f32 1.0, %s2700_s8 }
 0x1c5   : > { %v5559_v9 = vpop.f32.mrb[13].mxu1  ;;  %v5540_v11 = vpop.f32.mrb[15].mxu0  ;;  %5840 = vmatprep.subr.bf16.mxu0 %v8086_v3  ;;  %v1114_v4 = vld [vmem:[#allocation5] sm:$0x3]  ;;  %v2275_v57 = vmul.f32 %v8130_v22, %v2274_v1 }
 0x1c6   : > { %v5560_v6 = vadd.f32 %v5559_v9, %v5558_v2  ;;  %v5561_v37 = vpop.f32.mrb[14].mxu1  ;;  %5861 = vmatpush3.bf16.msra.mxu1 %v8089_v5  ;;  %s2702_s29 = ssub.f32 %s8470_s11, %s8476_s21 }
 0x1c7   : > { %v5562_v50 = vpop.f32.mrb[15].mxu1  ;;  %5862 = vmatprep.subr.bf16.mxu1 %v8095_v33  ;;  %v2276_v37 = vadd.f32 %v2275_v57, %v7541_v53 }
 0x1c8   : > { %v1099_v15 = vadd.f32 %v5560_v6, %v5538_v27  ;;  %5841 = vmatpush3.bf16.msra.mxu0 %v8098_v10  ;;  %v2167_v27 = vpack.c.bf16 %v2159_v19, %v2159_v19  ;;  %v2138_v50 = vsel %vm2136_vm14, 0.0, %v2137_v47 }
 0x1c9   : > { %5842 = vmatprep.subr.bf16.mxu0 %v8103_v35 }
 0x1ca   : > { %v1106_v44 = vadd.f32 %v1105_v26, %v1099_v15  ;;  %v1109_v45 = vadd.f32 %v1108_v55, %v1099_v15  ;;  %5863 = vmatpush3.bf16.msra.mxu1 %v8108_v7  ;;  %v8283_v15 = vadd.f32 %v2276_v37, %v2138_v50  ;;  %v2164_v50 = vpack.c.bf16 %v8238_v29, %v8238_v29 }
 0x1cb   : > { %5864 = vmatprep.subr.bf16.mxu1 %v8113_v38 }
 0x1cc   : > { %1110 = vst [vmem:[#allocation3] sm:$0x3] %v1106_v44  ;;  %1111 = vst [vmem:[#allocation4] sm:$0x3] %v1109_v45  ;;  %v1112_v8 = vsub.f32 %v1106_v44, %v1109_v45  ;;  %5843 = vmatpush3.bf16.msra.mxu0 %v8118_v52  ;;  %vm2279_vm0 = vcmp.gt.f32.partialorder %v8283_v15, 1.0 }
 0x1cd   : > { %5872 = vmatprep.subr.bf16.mxu0 %v7923_v13  ;;  %v5322_v24 = vsel %vm2279_vm0, 1.0, %v7254_v63 }
 0x1ce   : > { %v1113_v2 = vadd.f32 %v8017_v28, %v1112_v8  ;;  %5865 = vmatpush3.bf16.msra.mxu1 %v8125_v46  ;;  %v2286_v55 = vcombine.high %v5322_v24, %v5322_v24 }
 0x1cf   : > { %2058 = vmatmul.mubr.bf16.vlgmr.msra.gmra.mrb[40].mxu0 %v2021_v48  ;;  %5894 = vmatprep.subr.bf16.mxu1 %v7927_v16  ;;  %v8306_v48 = vrot.slane %v5322_v24, %v7535_v49 }
 0x1d0   : > { %v1115_v14 = vadd.f32 %v1114_v4, %v1113_v2  ;;  %5873 = vmatpush3.bf16.msra.mxu0 %v7930_v54  ;;  %2200 = vmatprep.mubr.bf16.mxu0 %v2165_v23  ;;  %v8313_v4 = vrot.slane %v2286_v55, %v7535_v49  ;;  %v2166_v55 = vpack.c.bf16 %v8245_v12, %v8245_v12 }
 0x1d1   : > { %2098 = vmatmul.mubr.bf16.vlgmr.msra.gmra.mrb[40].mxu1 %v2023_v51  ;;  %5874 = vmatprep.subr.bf16.mxu0 %v7934_v56 }
 0x1d2   : > { %vm1116_vm15 = vcmp.gt.f32.partialorder %v1115_v14, 1.0  ;;  %v1117_v31 = vmul.f32 0.7788008, %v1115_v14  ;;  %5895 = vmatpush3.bf16.msra.mxu1 %v7938_v58  ;;  %2240 = vmatprep.mubr.bf16.mxu1 %v2167_v27  ;;  %v2302_v37 = vcombine.high %v8313_v4, %v8313_v4 }
 0x1d3   : > { %v5296_v9 = vsel %vm1116_vm15, 1.0, %v7254_v63  ;;  %5896 = vmatprep.subr.bf16.mxu1 %v7941_v59  ;;  %v1247_v8 = vld [vmem:[#allocation3] sm:$0x3]  ;;  %v1250_v23 = vld [vmem:[#allocation4] sm:$0x3] }
 0x1d4   : > { %v1118_v11 = vsel %vm1116_vm15, 0.0, %v1117_v31  ;;  %v1122_v6 = vpack.c.bf16 %v5296_v9, %v5296_v9  ;;  %5875 = vmatpush3.bf16.msra.mxu0 %v7944_v60  ;;  %v1248_v47 = vmul.f32 0.7788008, %v1247_v8  ;;  %v1251_v31 = vmul.f32 0.36787945, %v1250_v23 }
 0x1d5   : > { %1119 = vst [vmem:[#allocation5] sm:$0x3] %v1118_v11  ;;  %5876 = vmatprep.subr.bf16.mxu0 %v7948_v62  ;;  %v2301_v9 = vcombine.high %v8306_v48, %v8306_v48 }
 0x1d6   : > { %5297 = vst [vmem:[%s7434_s10 + $0x3] sm:$0x1] %v1122_v6  ;;  %5897 = vmatpush3.bf16.msra.mxu1 %v7953_v20 }
 0x1d7   : > { %5898 = vmatprep.subr.bf16.mxu1 %v7956_v25 }
 0x1d8   : > { %5877 = vmatpush3.bf16.msra.mxu0 %v7959_v30 }
 0x1d9   : > { %5878 = vmatprep.subr.bf16.mxu0 %v7964_v34 }
 0x1da   : > { %5899 = vmatpush3.bf16.msra.mxu1 %v7967_v36 }
 0x1db   : > { %5900 = vmatprep.subr.bf16.mxu1 %v7970_v39 }
 0x1dc   : > { %5879 = vmatpush3.bf16.msra.mxu0 %v7973_v40 }
 0x1dd   : > { %5880 = vmatprep.subr.bf16.mxu0 %v8052_v61 }
 0x1de   : > { %5901 = vmatpush3.bf16.msra.mxu1 %v7978_v41 }
 0x1df   : > { %5902 = vmatprep.subr.bf16.mxu1 %v8056_v0 }
 0x1e0   : > { %5881 = vmatpush3.bf16.msra.mxu0 %v8063_v42 }
 0x1e1   : > { %5882 = vmatprep.subr.bf16.mxu0 %v8067_v43 }
 0x1e2   : > { %5903 = vmatpush3.bf16.msra.mxu1 %v8070_v17  ;;  %v5580_v26 = vpop.f32.mrb[16].mxu0 }
 0x1e3   : > { %v5581_v32 = vpop.f32.mrb[17].mxu0  ;;  %5904 = vmatprep.subr.bf16.mxu1 %v8073_v18 }
 0x1e4   : > { %v5602_v44 = vpop.f32.mrb[16].mxu1  ;;  %v5582_v45 = vadd.f32 %v5581_v32, %v5580_v26  ;;  %v5583_v19 = vpop.f32.mrb[18].mxu0  ;;  %5883 = vmatpush3.bf16.msra.mxu0 %v8078_v21  ;;  %v2308_v26 = vpack.c.bf16 %v2301_v9, %v2301_v9  ;;  %v2417_v32 = vstv %s2416_s14  ;;  %s2843_s14 = smul.f32 0.36787945, %s8476_s21 }
 0x1e5   : > { %v5603_v51 = vpop.f32.mrb[17].mxu1  ;;  %v5584_v1 = vpop.f32.mrb[19].mxu0  ;;  %5884 = vmatprep.subr.bf16.mxu0 %v8086_v3  ;;  %v1257_v19 = vld [vmem:[#allocation5] sm:$0x3]  ;;  %v2418_v8 = vmul.f32 %v8130_v22, %v2417_v32  ;;  %v8399_v32 = vld [vmem:[#allocation12 + $0x40] sm:$0xff]  }
 0x1e6   : > { %v5604_v2 = vadd.f32 %v5603_v51, %v5602_v44  ;;  %v5605_v27 = vpop.f32.mrb[18].mxu1  ;;  %5905 = vmatpush3.bf16.msra.mxu1 %v8089_v5  ;;  %s8563_s24 = sadd.f32 1.0, %s2843_s14  ;;  %s3127_s21 = smul.f32 0.7788008, %s8645_s5 }
 0x1e7   : > { %v5606_v14 = vpop.f32.mrb[19].mxu1  ;;  %5906 = vmatprep.subr.bf16.mxu1 %v8095_v33  ;;  %v2419_v51 = vadd.f32 %v2418_v8, %v7541_v53 }
 0x1e8   : > { %v1242_v57 = vadd.f32 %v5604_v2, %v5582_v45  ;;  %5885 = vmatpush3.bf16.msra.mxu0 %v8098_v10  ;;  %v2310_v45 = vpack.c.bf16 %v2302_v37, %v2302_v37  ;;  %s2845_s6 = ssub.f32 %s8555_s22, %s8563_s24 }
 0x1e9   : > { %5886 = vmatprep.subr.bf16.mxu0 %v8103_v35  ;;  %s8713_s30 = sadd.f32 1.0, %s3127_s21 }
 0x1ea   : > { %v1249_v11 = vadd.f32 %v1248_v47, %v1242_v57  ;;  %v1252_v6 = vadd.f32 %v1251_v31, %v1242_v57  ;;  %5907 = vmatpush3.bf16.msra.mxu1 %v8108_v7 }
 0x1eb   : > { %5908 = vmatprep.subr.bf16.mxu1 %v8113_v38  ;;  %s3270_s14 = smul.f32 0.7788008, %s8713_s30 }
 0x1ec   : > { %1253 = vst [vmem:[#allocation3] sm:$0x3] %v1249_v11  ;;  %1254 = vst [vmem:[#allocation4] sm:$0x3] %v1252_v6  ;;  %v1255_v24 = vsub.f32 %v1249_v11, %v1252_v6  ;;  %5887 = vmatpush3.bf16.msra.mxu0 %v8118_v52 }
 0x1ed   : > { %5916 = vmatprep.subr.bf16.mxu0 %v7923_v13  ;;  %v2280_v13 = vmul.f32 0.7788008, %v8283_v15 }
 0x1ee   : > { %v1256_v44 = vadd.f32 %v8017_v28, %v1255_v24  ;;  %5909 = vmatpush3.bf16.msra.mxu1 %v8125_v46 }
 0x1ef   : > { %2201 = vmatmul.mubr.bf16.vlgmr.msra.gmra.mrb[44].mxu0 %v2164_v50  ;;  %5938 = vmatprep.subr.bf16.mxu1 %v7927_v16  ;;  %v2307_v50 = vpack.c.bf16 %v8306_v48, %v8306_v48 }
 0x1f0   : > { %v1258_v29 = vadd.f32 %v1257_v19, %v1256_v44  ;;  %5917 = vmatpush3.bf16.msra.mxu0 %v7930_v54  ;;  %2343 = vmatprep.mubr.bf16.mxu0 %v2308_v26  ;;  %v2560_v44 = vstv %s2559_s26  ;;  %s2986_s26 = smul.f32 0.36787945, %s8563_s24  ;;  %s8781_s24 = sadd.f32 1.0, %s3270_s14 }
 0x1f1   : > { %2241 = vmatmul.mubr.bf16.vlgmr.msra.gmra.mrb[44].mxu1 %v2166_v55  ;;  %5918 = vmatprep.subr.bf16.mxu0 %v7934_v56  ;;  %v2281_v56 = vsel %vm2279_vm0, 0.0, %v2280_v13  ;;  %v2309_v55 = vpack.c.bf16 %v8313_v4, %v8313_v4  ;;  %v8407_v13 = vld [vmem:[#allocation12] sm:$0xff]   ;;  %v2561_v4 = vmul.f32 %v8130_v22, %v2560_v44 }
 0x1f2   : > { %vm1259_vm1 = vcmp.gt.f32.partialorder %v1258_v29, 1.0  ;;  %v1260_v12 = vmul.f32 0.7788008, %v1258_v29  ;;  %5939 = vmatpush3.bf16.msra.mxu1 %v7938_v58  ;;  %2383 = vmatprep.mubr.bf16.mxu1 %v2310_v45  ;;  %v8351_v58 = vadd.f32 %v2419_v51, %v2281_v56  ;;  %v8404_v29 = vld [vmem:[#allocation12 + $0xc0] sm:$0xff]   ;;  %v8419_v51 = vld [vmem:[#allocation12 + $0xc8] sm:$0xff]   ;;  %s8651_s8 = sadd.f32 1.0, %s2986_s26 }
 0x1f3   : > { %v5299_v23 = vsel %vm1259_vm1, 1.0, %v7254_v63  ;;  %5940 = vmatprep.subr.bf16.mxu1 %v7941_v59  ;;  %s3413_s26 = smul.f32 0.7788008, %s8781_s24 }
 0x1f4   : > { %v1261_v16 = vsel %vm1259_vm1, 0.0, %v1260_v12  ;;  %v1265_v54 = vpack.c.bf16 %v5299_v23, %v5299_v23  ;;  %5919 = vmatpush3.bf16.msra.mxu0 %v7944_v60  ;;  %vm2422_vm2 = vcmp.gt.f32.partialorder %v8351_v58, 1.0  ;;  %v8411_v12 = vld [vmem:[#allocation12 + $0x48] sm:$0xff]   ;;  %s2988_s11 = ssub.f32 %s8645_s5, %s8651_s8 }
 0x1f5   : > { %1262 = vst [vmem:[#allocation5] sm:$0x3] %v1261_v16  ;;  %5920 = vmatprep.subr.bf16.mxu0 %v7948_v62  ;;  %v5325_v59 = vsel %vm2422_vm2, 1.0, %v7254_v63  ;;  %v8415_v16 = vld [vmem:[#allocation12 + $0x80] sm:$0xff]  }
 0x1f6   : > { %5300 = vst [vmem:[%s7434_s10 + $0x4] sm:$0x1] %v1265_v54  ;;  %5941 = vmatpush3.bf16.msra.mxu1 %v7953_v20  ;;  %v2429_v62 = vcombine.high %v5325_v59, %v5325_v59 }
 0x1f7   : > { %5942 = vmatprep.subr.bf16.mxu1 %v7956_v25 }
 0x1f8   : > { %5921 = vmatpush3.bf16.msra.mxu0 %v7959_v30  ;;  %v8381_v27 = vrot.slane %v2429_v62, %v7535_v49  ;;  %v2562_v62 = vadd.f32 %v2561_v4, %v7541_v53 }
 0x1f9   : > { %5922 = vmatprep.subr.bf16.mxu0 %v7964_v34 }
 0x1fa   : > { %5943 = vmatpush3.bf16.msra.mxu1 %v7967_v36  ;;  %v8374_v36 = vrot.slane %v5325_v59, %v7535_v49  ;;  %v2445_v37 = vcombine.high %v8381_v27, %v8381_v27 }
 0x1fb   : > { %5944 = vmatprep.subr.bf16.mxu1 %v7970_v39  ;;  %v1390_v39 = vld [vmem:[#allocation3] sm:$0x3] }
 0x1fc   : > { %5923 = vmatpush3.bf16.msra.mxu0 %v7973_v40  ;;  %v1393_v40 = vld [vmem:[#allocation4] sm:$0x3]  ;;  %v1391_v47 = vmul.f32 0.7788008, %v1390_v39  ;;  %v2444_v9 = vcombine.high %v8374_v36, %v8374_v36  ;;  %v2453_v19 = vpack.c.bf16 %v2445_v37, %v2445_v37  ;;  %v1400_v48 = vld [vmem:[#allocation5] sm:$0x3] }
 0x1fd   : > { %5924 = vmatprep.subr.bf16.mxu0 %v8052_v61  ;;  %v1394_v31 = vmul.f32 0.36787945, %v1393_v40  ;;  %v8438_v39 = vld [vmem:[#allocation12 + $0x10] sm:$0xff]  }
 0x1fe   : > { %5945 = vmatpush3.bf16.msra.mxu1 %v7978_v41  ;;  %v2451_v26 = vpack.c.bf16 %v2444_v9, %v2444_v9 }
 0x1ff   : > { %5946 = vmatprep.subr.bf16.mxu1 %v8056_v0 }
 0x200   : > { %5925 = vmatpush3.bf16.msra.mxu0 %v8063_v42 }
 0x201   : > { %5926 = vmatprep.subr.bf16.mxu0 %v8067_v43 }
 0x202   : > { %5947 = vmatpush3.bf16.msra.mxu1 %v8070_v17  ;;  %v5624_v60 = vpop.f32.mrb[20].mxu0 }
 0x203   : > { %v5625_v20 = vpop.f32.mrb[21].mxu0  ;;  %5948 = vmatprep.subr.bf16.mxu1 %v8073_v18 }
 0x204   : > { %v5646_v25 = vpop.f32.mrb[20].mxu1  ;;  %v5626_v30 = vadd.f32 %v5625_v20, %v5624_v60  ;;  %v5627_v34 = vpop.f32.mrb[22].mxu0  ;;  %5927 = vmatpush3.bf16.msra.mxu0 %v8078_v21  ;;  %v8422_v60 = vld [vmem:[#allocation12 + $0x8] sm:$0xff]   ;;  %v8426_v20 = vld [vmem:[#allocation12 + $0x50] sm:$0xff]  }
 0x205   : > { %v5647_v41 = vpop.f32.mrb[21].mxu1  ;;  %v5628_v15 = vpop.f32.mrb[23].mxu0  ;;  %5928 = vmatprep.subr.bf16.mxu0 %v8086_v3  ;;  %v8435_v34 = vld [vmem:[#allocation12 + $0xd0] sm:$0xff]  }
 0x206   : > { %v5648_v1 = vadd.f32 %v5647_v41, %v5646_v25  ;;  %v5649_v2 = vpop.f32.mrb[22].mxu1  ;;  %5949 = vmatpush3.bf16.msra.mxu1 %v8089_v5  ;;  %v8443_v41 = vld [vmem:[#allocation12 + $0x58] sm:$0xff]  }
 0x207   : > { %v5650_v14 = vpop.f32.mrb[23].mxu1  ;;  %5950 = vmatprep.subr.bf16.mxu1 %v8095_v33  ;;  %v8449_v15 = vld [vmem:[#allocation12 + $0xd8] sm:$0xff]  }
 0x208   : > { %v1385_v57 = vadd.f32 %v5648_v1, %v5626_v30  ;;  %5929 = vmatpush3.bf16.msra.mxu0 %v8098_v10  ;;  %v8432_v30 = vld [vmem:[#allocation12 + $0x88] sm:$0xff]   ;;  %v8452_v1 = vld [vmem:[#allocation12 + $0x18] sm:$0xff]  }
 0x209   : > { %5930 = vmatprep.subr.bf16.mxu0 %v8103_v35  ;;  %v8457_v2 = vld [vmem:[#allocation12 + $0x98] sm:$0xff]  }
 0x20a   : > { %v1392_v11 = vadd.f32 %v1391_v47, %v1385_v57  ;;  %v1395_v6 = vadd.f32 %v1394_v31, %v1385_v57  ;;  %5951 = vmatpush3.bf16.msra.mxu1 %v8108_v7 }
 0x20b   : > { %5952 = vmatprep.subr.bf16.mxu1 %v8113_v38 }
 0x20c   : > { %1396 = vst [vmem:[#allocation3] sm:$0x3] %v1392_v11  ;;  %1397 = vst [vmem:[#allocation4] sm:$0x3] %v1395_v6  ;;  %v1398_v24 = vsub.f32 %v1392_v11, %v1395_v6  ;;  %5931 = vmatpush3.bf16.msra.mxu0 %v8118_v52 }
 0x20d   : > { %5960 = vmatprep.subr.bf16.mxu0 %v8399_v32 }
 0x20e   : > { %v1399_v45 = vadd.f32 %v8017_v28, %v1398_v24  ;;  %5953 = vmatpush3.bf16.msra.mxu1 %v8125_v46  ;;  %v2423_v28 = vmul.f32 0.7788008, %v8351_v58  ;;  %v8446_v58 = vld [vmem:[#allocation12 + $0x90] sm:$0xff]  }
 0x20f   : > { %2344 = vmatmul.mubr.bf16.vlgmr.msra.gmra.mrb[48].mxu0 %v2307_v50  ;;  %5982 = vmatprep.subr.bf16.mxu1 %v8404_v29 }
 0x210   : > { %v1401_v8 = vadd.f32 %v1400_v48, %v1399_v45  ;;  %5961 = vmatpush3.bf16.msra.mxu0 %v8407_v13  ;;  %2486 = vmatprep.mubr.bf16.mxu0 %v2451_v26  ;;  %v2424_v25 = vsel %vm2422_vm2, 0.0, %v2423_v28  ;;  %v8503_v48 = vld [vmem:[%s9930_s3] ss:$0 sm:$0xff] }
 0x211   : > { %2384 = vmatmul.mubr.bf16.vlgmr.msra.gmra.mrb[48].mxu1 %v2309_v55  ;;  %5962 = vmatprep.subr.bf16.mxu0 %v8411_v12  ;;  %v8441_v40 = vadd.f32 %v2562_v62, %v2424_v25  ;;  %v8531_v62 = vld [vmem:[#allocation12 + $0x60] sm:$0xff]  }
 0x212   : > { %vm1402_vm3 = vcmp.gt.f32.partialorder %v1401_v8, 1.0  ;;  %v1403_v23 = vmul.f32 0.7788008, %v1401_v8  ;;  %5983 = vmatpush3.bf16.msra.mxu1 %v8415_v16  ;;  %2526 = vmatprep.mubr.bf16.mxu1 %v2453_v19  ;;  %v8535_v25 = vld [vmem:[#allocation12 + $0xe0] sm:$0xff]  }
 0x213   : > { %v5302_v54 = vsel %vm1402_vm3, 1.0, %v7254_v63  ;;  %5984 = vmatprep.subr.bf16.mxu1 %v8419_v51  ;;  %vm2565_vm4 = vcmp.gt.f32.partialorder %v8441_v40, 1.0  ;;  %v2566_v4 = vmul.f32 0.7788008, %v8441_v40 }
 0x214   : > { %v1404_v56 = vsel %vm1402_vm3, 0.0, %v1403_v23  ;;  %v1408_v59 = vpack.c.bf16 %v5302_v54, %v5302_v54  ;;  %5963 = vmatpush3.bf16.msra.mxu0 %v8422_v60  ;;  %v5328_v14 = vsel %vm2565_vm4, 1.0, %v7254_v63 }
 0x215   : > { %1405 = vst [vmem:[#allocation5] sm:$0x3] %v1404_v56  ;;  %5964 = vmatprep.subr.bf16.mxu0 %v8426_v20  ;;  %v8474_v11 = vrot.slane %v5328_v14, %v7535_v49  ;;  %v2567_v56 = vsel %vm2565_vm4, 0.0, %v2566_v4  ;;  %v8587_v4 = vld [vmem:[#allocation12 + $0xb0] sm:$0xff]  }
 0x216   : > { %5303 = vst [vmem:[%s7434_s10 + $0x5] sm:$0x1] %v1408_v59  ;;  %5985 = vmatpush3.bf16.msra.mxu1 %v8432_v30 }
 0x217   : > { %5986 = vmatprep.subr.bf16.mxu1 %v8435_v34  ;;  %v2587_v44 = vcombine.high %v8474_v11, %v8474_v11 }
 0x218   : > { %5965 = vmatpush3.bf16.msra.mxu0 %v8438_v39 }
 0x219   : > { %5966 = vmatprep.subr.bf16.mxu0 %v8443_v41  ;;  %v2594_v19 = vpack.c.bf16 %v2587_v44, %v2587_v44 }
 0x21a   : > { %5987 = vmatpush3.bf16.msra.mxu1 %v8446_v58 }
 0x21b   : > { %5988 = vmatprep.subr.bf16.mxu1 %v8449_v15 }
 0x21c   : > { %5967 = vmatpush3.bf16.msra.mxu0 %v8452_v1  ;;  %v1543_v8 = vld [vmem:[#allocation5] sm:$0x3] }
 0x21d   : > { %5968 = vmatprep.subr.bf16.mxu0 %v8052_v61  ;;  %v2572_v61 = vcombine.high %v5328_v14, %v5328_v14  ;;  %v8542_v14 = vld [vmem:[#allocation12 + $0x20] sm:$0xff]  }
 0x21e   : > { %5989 = vmatpush3.bf16.msra.mxu1 %v8457_v2 }
 0x21f   : > { %5990 = vmatprep.subr.bf16.mxu1 %v8056_v0  ;;  %v8481_v50 = vrot.slane %v2572_v61, %v7535_v49  ;;  %v8549_v61 = vld [vmem:[#allocation12 + $0xa0] sm:$0xff]  }
 0x220   : > { %5969 = vmatpush3.bf16.msra.mxu0 %v8063_v42  ;;  %v1533_v42 = vld [vmem:[#allocation3] sm:$0x3] }
 0x221   : > { %5970 = vmatprep.subr.bf16.mxu0 %v8067_v43  ;;  %v1536_v43 = vld [vmem:[#allocation4] sm:$0x3]  ;;  %v1534_v26 = vmul.f32 0.7788008, %v1533_v42 }
 0x222   : > { %5991 = vmatpush3.bf16.msra.mxu1 %v8070_v17  ;;  %v5668_v57 = vpop.f32.mrb[24].mxu0  ;;  %v1537_v55 = vmul.f32 0.36787945, %v1536_v43 }
 0x223   : > { %v5669_v47 = vpop.f32.mrb[25].mxu0  ;;  %5992 = vmatprep.subr.bf16.mxu1 %v8073_v18 }
 0x224   : > { %v5690_v0 = vpop.f32.mrb[24].mxu1  ;;  %v5670_v31 = vadd.f32 %v5669_v47, %v5668_v57  ;;  %v5671_v9 = vpop.f32.mrb[26].mxu0  ;;  %5971 = vmatpush3.bf16.msra.mxu0 %v8078_v21  ;;  %v8546_v57 = vld [vmem:[#allocation12 + $0x68] sm:$0xff]  }
 0x225   : > { %v5691_v17 = vpop.f32.mrb[25].mxu1  ;;  %v5672_v6 = vpop.f32.mrb[27].mxu0  ;;  %5972 = vmatprep.subr.bf16.mxu0 %v8086_v3  ;;  %v8552_v9 = vld [vmem:[#allocation12 + $0xe8] sm:$0xff]  }
 0x226   : > { %v5692_v18 = vadd.f32 %v5691_v17, %v5690_v0  ;;  %v5693_v37 = vpop.f32.mrb[26].mxu1  ;;  %5993 = vmatpush3.bf16.msra.mxu1 %v8089_v5  ;;  %v2588_v5 = vcombine.high %v8481_v50, %v8481_v50  ;;  %v8557_v6 = vld [vmem:[#allocation12 + $0x28] sm:$0xff]  }
 0x227   : > { %v5694_v21 = vpop.f32.mrb[27].mxu1  ;;  %5994 = vmatprep.subr.bf16.mxu1 %v8095_v33  ;;  %v2450_v33 = vpack.c.bf16 %v8374_v36, %v8374_v36 }
 0x228   : > { %v1528_v24 = vadd.f32 %v5692_v18, %v5670_v31  ;;  %5973 = vmatpush3.bf16.msra.mxu0 %v8098_v10  ;;  %v2596_v36 = vpack.c.bf16 %v2588_v5, %v2588_v5 }
 0x229   : > { %5974 = vmatprep.subr.bf16.mxu0 %v8103_v35  ;;  %v2452_v35 = vpack.c.bf16 %v8381_v27, %v8381_v27 }
 0x22a   : > { %v1535_v3 = vadd.f32 %v1534_v26, %v1528_v24  ;;  %v1538_v45 = vadd.f32 %v1537_v55, %v1528_v24  ;;  %5995 = vmatpush3.bf16.msra.mxu1 %v8108_v7  ;;  %v2703_v7 = vstv %s2702_s29  ;;  %v8565_v55 = vld [vmem:[#allocation12 + $0x70] sm:$0xff]   ;;  %s3129_s29 = smul.f32 0.36787945, %s8651_s8  ;;  %s8849_s8 = sadd.f32 1.0, %s3413_s26 }
 0x22b   : > { %5996 = vmatprep.subr.bf16.mxu1 %v8113_v38  ;;  %v2704_v27 = vmul.f32 %v8130_v22, %v2703_v7 }
 0x22c   : > { %1539 = vst [vmem:[#allocation3] sm:$0x3] %v1535_v3  ;;  %1540 = vst [vmem:[#allocation4] sm:$0x3] %v1538_v45  ;;  %v1541_v10 = vsub.f32 %v1535_v3, %v1538_v45  ;;  %5975 = vmatpush3.bf16.msra.mxu0 %v8118_v52  ;;  %v8568_v45 = vld [vmem:[#allocation12 + $0xa8] sm:$0xff]   ;;  %s8719_s12 = sadd.f32 1.0, %s3129_s29 }
 0x22d   : > { %6004 = vmatprep.subr.bf16.mxu0 %v8399_v32  ;;  %v2705_v22 = vadd.f32 %v2704_v27, %v7541_v53  ;;  %s3556_s29 = smul.f32 0.7788008, %s8849_s8 }
 0x22e   : > { %v1542_v38 = vadd.f32 %v8503_v48, %v1541_v10  ;;  %5997 = vmatpush3.bf16.msra.mxu1 %v8125_v46  ;;  %v8574_v10 = vld [vmem:[#allocation12 + $0xf0] sm:$0xff]   ;;  %s3131_s13 = ssub.f32 %s8713_s30, %s8719_s12  ;;  %s3272_s22 = smul.f32 0.36787945, %s8719_s12 }
 0x22f   : > { %2487 = vmatmul.mubr.bf16.vlgmr.msra.gmra.mrb[52].mxu0 %v2450_v33  ;;  %6026 = vmatprep.subr.bf16.mxu1 %v8404_v29  ;;  %v8524_v59 = vadd.f32 %v2705_v22, %v2567_v56  ;;  %v8597_v22 = vld [vmem:[#allocation12 + $0x38] sm:$0xff]   ;;  %s8949_s12 = sadd.f32 1.0, %s3556_s29 }
 0x230   : > { %v1544_v52 = vadd.f32 %v1543_v8, %v1542_v38  ;;  %6005 = vmatpush3.bf16.msra.mxu0 %v8407_v13  ;;  %2629 = vmatprep.mubr.bf16.mxu0 %v2594_v19  ;;  %v8577_v38 = vld [vmem:[#allocation12 + $0x30] sm:$0xff]   ;;  %v8582_v8 = vld [vmem:[#allocation12 + $0x78] sm:$0xff]  }
 0x231   : > { %2527 = vmatmul.mubr.bf16.vlgmr.msra.gmra.mrb[52].mxu1 %v2452_v35  ;;  %6006 = vmatprep.subr.bf16.mxu0 %v8411_v12  ;;  %vm2708_vm6 = vcmp.gt.f32.partialorder %v8524_v59, 1.0 }
 0x232   : > { %vm1545_vm5 = vcmp.gt.f32.partialorder %v1544_v52, 1.0  ;;  %v1546_v28 = vmul.f32 0.7788008, %v1544_v52  ;;  %6027 = vmatpush3.bf16.msra.mxu1 %v8415_v16  ;;  %2669 = vmatprep.mubr.bf16.mxu1 %v2596_v36  ;;  %v5331_v40 = vsel %vm2708_vm6, 1.0, %v7254_v63 }
 0x233   : > { %v5305_v46 = vsel %vm1545_vm5, 1.0, %v7254_v63  ;;  %6028 = vmatprep.subr.bf16.mxu1 %v8419_v51  ;;  %v2715_v0 = vcombine.high %v5331_v40, %v5331_v40  ;;  %v8561_v18 = vrot.slane %v5331_v40, %v7535_v49  ;;  %v1676_v37 = vld [vmem:[#allocation3] sm:$0x3]  ;;  %v1679_v21 = vld [vmem:[#allocation4] sm:$0x3]  ;;  %v2595_v40 = vpack.c.bf16 %v8481_v50, %v8481_v50 }
 0x234   : > { %v1547_v23 = vsel %vm1545_vm5, 0.0, %v1546_v28  ;;  %v1551_v54 = vpack.c.bf16 %v5305_v46, %v5305_v46  ;;  %6007 = vmatpush3.bf16.msra.mxu0 %v8422_v60  ;;  %v1677_v35 = vmul.f32 0.7788008, %v1676_v37  ;;  %v1680_v7 = vmul.f32 0.36787945, %v1679_v21  ;;  %v8592_v46 = vld [vmem:[#allocation12 + $0xf8] sm:$0xff]  }
 0x235   : > { %1548 = vst [vmem:[#allocation5] sm:$0x3] %v1547_v23  ;;  %6008 = vmatprep.subr.bf16.mxu0 %v8426_v20  ;;  %v8572_v5 = vrot.slane %v2715_v0, %v7535_v49  ;;  %v2730_v36 = vcombine.high %v8561_v18, %v8561_v18  ;;  %v2593_v23 = vpack.c.bf16 %v8474_v11, %v8474_v11  ;;  %v2709_v37 = vmul.f32 0.7788008, %v8524_v59 }
 0x236   : > { %5306 = vst [vmem:[%s7434_s10 + $0x6] sm:$0x1] %v1551_v54  ;;  %6029 = vmatpush3.bf16.msra.mxu1 %v8432_v30 }
 0x237   : > { %6030 = vmatprep.subr.bf16.mxu1 %v8435_v34  ;;  %v2731_v28 = vcombine.high %v8572_v5, %v8572_v5  ;;  %v2737_v56 = vpack.c.bf16 %v2730_v36, %v2730_v36 }
 0x238   : > { %6009 = vmatpush3.bf16.msra.mxu0 %v8438_v39 }
 0x239   : > { %6010 = vmatprep.subr.bf16.mxu0 %v8443_v41  ;;  %v2739_v11 = vpack.c.bf16 %v2731_v28, %v2731_v28 }
 0x23a   : > { %6031 = vmatpush3.bf16.msra.mxu1 %v8446_v58 }
 0x23b   : > { %6032 = vmatprep.subr.bf16.mxu1 %v8449_v15 }
 0x23c   : > { %6011 = vmatpush3.bf16.msra.mxu0 %v8452_v1 }
 0x23d   : > { %6012 = vmatprep.subr.bf16.mxu0 %v8531_v62 }
 0x23e   : > { %6033 = vmatpush3.bf16.msra.mxu1 %v8457_v2 }
 0x23f   : > { %6034 = vmatprep.subr.bf16.mxu1 %v8535_v25 }
 0x240   : > { %6013 = vmatpush3.bf16.msra.mxu0 %v8542_v14 }
 0x241   : > { %6014 = vmatprep.subr.bf16.mxu0 %v8546_v57 }
 0x242   : > { %6035 = vmatpush3.bf16.msra.mxu1 %v8549_v61  ;;  %v5712_v47 = vpop.f32.mrb[28].mxu0 }
 0x243   : > { %v5713_v31 = vpop.f32.mrb[29].mxu0  ;;  %6036 = vmatprep.subr.bf16.mxu1 %v8552_v9 }
 0x244   : > { %v5734_v42 = vpop.f32.mrb[28].mxu1  ;;  %v5714_v43 = vadd.f32 %v5713_v31, %v5712_v47  ;;  %v5715_v17 = vpop.f32.mrb[30].mxu0  ;;  %6015 = vmatpush3.bf16.msra.mxu0 %v8557_v6  ;;  %v2846_v47 = vstv %s2845_s6  ;;  %v8604_v31 = vld [vmem:[#allocation12 + $0xb8] sm:$0xff]   ;;  %s8787_s6 = sadd.f32 1.0, %s3272_s22 }
 0x245   : > { %v5735_v24 = vpop.f32.mrb[29].mxu1  ;;  %v5716_v26 = vpop.f32.mrb[31].mxu0  ;;  %6016 = vmatprep.subr.bf16.mxu0 %v8565_v55  ;;  %v8609_v17 = vld [vmem:[#allocation7] sm:$0xff] }
 0x246   : > { %v5736_v44 = vadd.f32 %v5735_v24, %v5734_v42  ;;  %v5737_v3 = vpop.f32.mrb[30].mxu1  ;;  %6037 = vmatpush3.bf16.msra.mxu1 %v8568_v45  ;;  %v1686_v42 = vld [vmem:[#allocation5] sm:$0x3]  ;;  %v2847_v50 = vmul.f32 %v8609_v17, %v2846_v47  ;;  %s3274_s9 = ssub.f32 %s8781_s24, %s8787_s6  ;;  %s3415_s5 = smul.f32 0.36787945, %s8787_s6 }
 0x247   : > { %v5738_v33 = vpop.f32.mrb[31].mxu1  ;;  %6038 = vmatprep.subr.bf16.mxu1 %v8574_v10  ;;  %s3699_s6 = smul.f32 0.7788008, %s8949_s12 }
 0x248   : > { %v1671_v19 = vadd.f32 %v5736_v44, %v5714_v43  ;;  %6017 = vmatpush3.bf16.msra.mxu0 %v8577_v38  ;;  %v2848_v3 = vadd.f32 %v2847_v50, %v7541_v53  ;;  %v2710_v33 = vsel %vm2708_vm6, 0.0, %v2709_v37 }
 0x249   : > { %6018 = vmatprep.subr.bf16.mxu0 %v8582_v8  ;;  %s9034_s26 = sadd.f32 1.0, %s3699_s6 }
 0x24a   : > { %v1678_v52 = vadd.f32 %v1677_v35, %v1671_v19  ;;  %v1681_v27 = vadd.f32 %v1680_v7, %v1671_v19  ;;  %6039 = vmatpush3.bf16.msra.mxu1 %v8587_v4  ;;  %v8626_v19 = vadd.f32 %v2848_v3, %v2710_v33  ;;  %v2736_v33 = vpack.c.bf16 %v8561_v18, %v8561_v18 }
 0x24b   : > { %6040 = vmatprep.subr.bf16.mxu1 %v8592_v46 }
 0x24c   : > { %1682 = vst [vmem:[#allocation3] sm:$0x3] %v1678_v52  ;;  %1683 = vst [vmem:[#allocation4] sm:$0x3] %v1681_v27  ;;  %v1684_v54 = vsub.f32 %v1678_v52, %v1681_v27  ;;  %6019 = vmatpush3.bf16.msra.mxu0 %v8597_v22  ;;  %vm2851_vm8 = vcmp.gt.f32.partialorder %v8626_v19, 1.0 }
 0x24d   : > { %6048 = vmatprep.subr.bf16.mxu0 %v8399_v32  ;;  %v5334_v59 = vsel %vm2851_vm8, 1.0, %v7254_v63 }
 0x24e   : > { %v1685_v0 = vadd.f32 %v8503_v48, %v1684_v54  ;;  %6041 = vmatpush3.bf16.msra.mxu1 %v8604_v31  ;;  %v2858_v7 = vcombine.high %v5334_v59, %v5334_v59 }
 0x24f   : > { %2630 = vmatmul.mubr.bf16.vlgmr.msra.gmra.mrb[56].mxu0 %v2593_v23  ;;  %6070 = vmatprep.subr.bf16.mxu1 %v8404_v29  ;;  %v8649_v23 = vrot.slane %v5334_v59, %v7535_v49 }
 0x250   : > { %v1687_v43 = vadd.f32 %v1686_v42, %v1685_v0  ;;  %6049 = vmatpush3.bf16.msra.mxu0 %v8407_v13  ;;  %2772 = vmatprep.mubr.bf16.mxu0 %v2737_v56  ;;  %v8656_v42 = vrot.slane %v2858_v7, %v7535_v49  ;;  %v2738_v7 = vpack.c.bf16 %v8572_v5, %v8572_v5  ;;  %v2852_v5 = vmul.f32 0.7788008, %v8626_v19 }
 0x251   : > { %2670 = vmatmul.mubr.bf16.vlgmr.msra.gmra.mrb[56].mxu1 %v2595_v40  ;;  %6050 = vmatprep.subr.bf16.mxu0 %v8411_v12 }
 0x252   : > { %vm1688_vm7 = vcmp.gt.f32.partialorder %v1687_v43, 1.0  ;;  %v1689_v21 = vmul.f32 0.7788008, %v1687_v43  ;;  %6071 = vmatpush3.bf16.msra.mxu1 %v8415_v16  ;;  %2812 = vmatprep.mubr.bf16.mxu1 %v2739_v11  ;;  %v2874_v3 = vcombine.high %v8656_v42, %v8656_v42 }
 0x253   : > { %v5308_v24 = vsel %vm1688_vm7, 1.0, %v7254_v63  ;;  %6072 = vmatprep.subr.bf16.mxu1 %v8419_v51  ;;  %v1819_v54 = vld [vmem:[#allocation3] sm:$0x3]  ;;  %v1822_v56 = vld [vmem:[#allocation4] sm:$0x3] }
 0x254   : > { %v1690_v26 = vsel %vm1688_vm7, 0.0, %v1689_v21  ;;  %v1694_v44 = vpack.c.bf16 %v5308_v24, %v5308_v24  ;;  %6051 = vmatpush3.bf16.msra.mxu0 %v8422_v60  ;;  %v1820_v37 = vmul.f32 0.7788008, %v1819_v54  ;;  %v1823_v21 = vmul.f32 0.36787945, %v1822_v56 }
 0x255   : > { %1691 = vst [vmem:[#allocation5] sm:$0x3] %v1690_v26  ;;  %6052 = vmatprep.subr.bf16.mxu0 %v8426_v20  ;;  %v2873_v24 = vcombine.high %v8649_v23, %v8649_v23 }
 0x256   : > { %5309 = vst [vmem:[%s7434_s10 + $0x7] sm:$0x1] %v1694_v44  ;;  %6073 = vmatpush3.bf16.msra.mxu1 %v8432_v30 }
 0x257   : > { %6074 = vmatprep.subr.bf16.mxu1 %v8435_v34 }
 0x258   : > { %6053 = vmatpush3.bf16.msra.mxu0 %v8438_v39 }
 0x259   : > { %6054 = vmatprep.subr.bf16.mxu0 %v8443_v41 }
 0x25a   : > { %6075 = vmatpush3.bf16.msra.mxu1 %v8446_v58 }
 0x25b   : > { %6076 = vmatprep.subr.bf16.mxu1 %v8449_v15 }
 0x25c   : > { %6055 = vmatpush3.bf16.msra.mxu0 %v8452_v1 }
 0x25d   : > { %6056 = vmatprep.subr.bf16.mxu0 %v8531_v62 }
 0x25e   : > { %6077 = vmatpush3.bf16.msra.mxu1 %v8457_v2 }
 0x25f   : > { %6078 = vmatprep.subr.bf16.mxu1 %v8535_v25 }
 0x260   : > { %6057 = vmatpush3.bf16.msra.mxu0 %v8542_v14 }
 0x261   : > { %6058 = vmatprep.subr.bf16.mxu0 %v8546_v57 }
 0x262   : > { %6079 = vmatpush3.bf16.msra.mxu1 %v8549_v61  ;;  %v5756_v35 = vpop.f32.mrb[32].mxu0 }
 0x263   : > { %v5757_v36 = vpop.f32.mrb[33].mxu0  ;;  %6080 = vmatprep.subr.bf16.mxu1 %v8552_v9 }
 0x264   : > { %v5778_v52 = vpop.f32.mrb[32].mxu1  ;;  %v5758_v27 = vadd.f32 %v5757_v36, %v5756_v35  ;;  %v5759_v28 = vpop.f32.mrb[34].mxu0  ;;  %6059 = vmatpush3.bf16.msra.mxu0 %v8557_v6  ;;  %v2880_v35 = vpack.c.bf16 %v2873_v24, %v2873_v24  ;;  %v2989_v36 = vstv %s2988_s11  ;;  %s8855_s11 = sadd.f32 1.0, %s3415_s5 }
 0x265   : > { %v5779_v40 = vpop.f32.mrb[33].mxu1  ;;  %v5760_v47 = vpop.f32.mrb[35].mxu0  ;;  %6060 = vmatprep.subr.bf16.mxu0 %v8565_v55  ;;  %v1829_v28 = vld [vmem:[#allocation5] sm:$0x3]  ;;  %v2990_v54 = vmul.f32 %v8609_v17, %v2989_v36 }
 0x266   : > { %v5780_v0 = vadd.f32 %v5779_v40, %v5778_v52  ;;  %v5781_v11 = vpop.f32.mrb[34].mxu1  ;;  %6081 = vmatpush3.bf16.msra.mxu1 %v8568_v45  ;;  %s3417_s21 = ssub.f32 %s8849_s8, %s8855_s11  ;;  %s3558_s30 = smul.f32 0.36787945, %s8855_s11 }
 0x267   : > { %v5782_v43 = vpop.f32.mrb[35].mxu1  ;;  %6082 = vmatprep.subr.bf16.mxu1 %v8574_v10  ;;  %v2991_v11 = vadd.f32 %v2990_v54, %v7541_v53  ;;  %s3842_s11 = smul.f32 0.7788008, %s9034_s26 }
 0x268   : > { %v1814_v50 = vadd.f32 %v5780_v0, %v5758_v27  ;;  %6061 = vmatpush3.bf16.msra.mxu0 %v8577_v38  ;;  %v2882_v27 = vpack.c.bf16 %v2874_v3, %v2874_v3  ;;  %v2853_v43 = vsel %vm2851_vm8, 0.0, %v2852_v5 }
 0x269   : > { %6062 = vmatprep.subr.bf16.mxu0 %v8582_v8  ;;  %s9124_s29 = sadd.f32 1.0, %s3842_s11 }
 0x26a   : > { %v1821_v26 = vadd.f32 %v1820_v37, %v1814_v50  ;;  %v1824_v44 = vadd.f32 %v1823_v21, %v1814_v50  ;;  %6083 = vmatpush3.bf16.msra.mxu1 %v8587_v4  ;;  %v8694_v50 = vadd.f32 %v2991_v11, %v2853_v43  ;;  %v2879_v43 = vpack.c.bf16 %v8649_v23, %v8649_v23 }
 0x26b   : > { %6084 = vmatprep.subr.bf16.mxu1 %v8592_v46 }
 0x26c   : > { %1825 = vst [vmem:[#allocation3] sm:$0x3] %v1821_v26  ;;  %1826 = vst [vmem:[#allocation4] sm:$0x3] %v1824_v44  ;;  %v1827_v59 = vsub.f32 %v1821_v26, %v1824_v44  ;;  %6063 = vmatpush3.bf16.msra.mxu0 %v8597_v22  ;;  %vm2994_vm10 = vcmp.gt.f32.partialorder %v8694_v50, 1.0 }
 0x26d   : > { %6092 = vmatprep.subr.bf16.mxu0 %v8399_v32  ;;  %v5337_v19 = vsel %vm2994_vm10, 1.0, %v7254_v63 }
 0x26e   : > { %v1828_v52 = vadd.f32 %v8503_v48, %v1827_v59  ;;  %6085 = vmatpush3.bf16.msra.mxu1 %v8604_v31  ;;  %v3001_v21 = vcombine.high %v5337_v19, %v5337_v19 }
 0x26f   : > { %2773 = vmatmul.mubr.bf16.vlgmr.msra.gmra.mrb[60].mxu0 %v2736_v33  ;;  %6114 = vmatprep.subr.bf16.mxu1 %v8404_v29  ;;  %v8717_v33 = vrot.slane %v5337_v19, %v7535_v49 }
 0x270   : > { %v1830_v18 = vadd.f32 %v1829_v28, %v1828_v52  ;;  %6093 = vmatpush3.bf16.msra.mxu0 %v8407_v13  ;;  %2915 = vmatprep.mubr.bf16.mxu0 %v2880_v35  ;;  %v8724_v28 = vrot.slane %v3001_v21, %v7535_v49  ;;  %v2881_v21 = vpack.c.bf16 %v8656_v42, %v8656_v42  ;;  %v2995_v42 = vmul.f32 0.7788008, %v8694_v50 }
 0x271   : > { %2813 = vmatmul.mubr.bf16.vlgmr.msra.gmra.mrb[60].mxu1 %v2738_v7  ;;  %6094 = vmatprep.subr.bf16.mxu0 %v8411_v12 }
 0x272   : > { %vm1831_vm9 = vcmp.gt.f32.partialorder %v1830_v18, 1.0  ;;  %v1832_v56 = vmul.f32 0.7788008, %v1830_v18  ;;  %6115 = vmatpush3.bf16.msra.mxu1 %v8415_v16  ;;  %2955 = vmatprep.mubr.bf16.mxu1 %v2882_v27  ;;  %v3017_v11 = vcombine.high %v8724_v28, %v8724_v28 }
 0x273   : > { %v5311_v40 = vsel %vm1831_vm9, 1.0, %v7254_v63  ;;  %6116 = vmatprep.subr.bf16.mxu1 %v8419_v51  ;;  %v1962_v59 = vld [vmem:[#allocation3] sm:$0x3]  ;;  %v1965_v35 = vld [vmem:[#allocation4] sm:$0x3] }
 0x274   : > { %v1833_v47 = vsel %vm1831_vm9, 0.0, %v1832_v56  ;;  %v1837_v0 = vpack.c.bf16 %v5311_v40, %v5311_v40  ;;  %6095 = vmatpush3.bf16.msra.mxu0 %v8422_v60  ;;  %v1963_v5 = vmul.f32 0.7788008, %v1962_v59  ;;  %v1966_v56 = vmul.f32 0.36787945, %v1965_v35 }
 0x275   : > { %1834 = vst [vmem:[#allocation5] sm:$0x3] %v1833_v47  ;;  %6096 = vmatprep.subr.bf16.mxu0 %v8426_v20  ;;  %v3016_v40 = vcombine.high %v8717_v33, %v8717_v33 }
 0x276   : > { %5312 = vst [vmem:[%s7434_s10 + $0x8] sm:$0x1] %v1837_v0  ;;  %6117 = vmatpush3.bf16.msra.mxu1 %v8432_v30 }
 0x277   : > { %6118 = vmatprep.subr.bf16.mxu1 %v8435_v34 }
 0x278   : > { %6097 = vmatpush3.bf16.msra.mxu0 %v8438_v39 }
 0x279   : > { %6098 = vmatprep.subr.bf16.mxu0 %v8443_v41 }
 0x27a   : > { %6119 = vmatpush3.bf16.msra.mxu1 %v8446_v58 }
 0x27b   : > { %6120 = vmatprep.subr.bf16.mxu1 %v8449_v15 }
 0x27c   : > { %6099 = vmatpush3.bf16.msra.mxu0 %v8452_v1 }
 0x27d   : > { %6100 = vmatprep.subr.bf16.mxu0 %v8531_v62 }
 0x27e   : > { %6121 = vmatpush3.bf16.msra.mxu1 %v8457_v2 }
 0x27f   : > { %6122 = vmatprep.subr.bf16.mxu1 %v8535_v25 }
 0x280   : > { %6101 = vmatpush3.bf16.msra.mxu0 %v8542_v14 }
 0x281   : > { %6102 = vmatprep.subr.bf16.mxu0 %v8546_v57 }
 0x282   : > { %6123 = vmatpush3.bf16.msra.mxu1 %v8549_v61  ;;  %v5800_v37 = vpop.f32.mrb[36].mxu0 }
 0x283   : > { %v5801_v24 = vpop.f32.mrb[37].mxu0  ;;  %6124 = vmatprep.subr.bf16.mxu1 %v8552_v9 }
 0x284   : > { %v5822_v26 = vpop.f32.mrb[36].mxu1  ;;  %v5802_v44 = vadd.f32 %v5801_v24, %v5800_v37  ;;  %v5803_v3 = vpop.f32.mrb[38].mxu0  ;;  %6103 = vmatpush3.bf16.msra.mxu0 %v8557_v6  ;;  %v3023_v37 = vpack.c.bf16 %v3016_v40, %v3016_v40  ;;  %v3132_v24 = vstv %s3131_s13  ;;  %s8955_s13 = sadd.f32 1.0, %s3558_s30 }
 0x285   : > { %v5823_v7 = vpop.f32.mrb[37].mxu1  ;;  %v5804_v36 = vpop.f32.mrb[39].mxu0  ;;  %6104 = vmatprep.subr.bf16.mxu0 %v8565_v55  ;;  %v1972_v3 = vld [vmem:[#allocation5] sm:$0x3]  ;;  %v3133_v59 = vmul.f32 %v8609_v17, %v3132_v24 }
 0x286   : > { %v5824_v52 = vadd.f32 %v5823_v7, %v5822_v26  ;;  %v5825_v27 = vpop.f32.mrb[38].mxu1  ;;  %6125 = vmatpush3.bf16.msra.mxu1 %v8568_v45  ;;  %s3560_s14 = ssub.f32 %s8949_s12, %s8955_s13 }
 0x287   : > { %v5826_v18 = vpop.f32.mrb[39].mxu1  ;;  %6126 = vmatprep.subr.bf16.mxu1 %v8574_v10  ;;  %v3134_v27 = vadd.f32 %v3133_v59, %v7541_v53 }
 0x288   : > { %v1957_v54 = vadd.f32 %v5824_v52, %v5802_v44  ;;  %6105 = vmatpush3.bf16.msra.mxu0 %v8577_v38  ;;  %v3025_v44 = vpack.c.bf16 %v3017_v11, %v3017_v11  ;;  %v2996_v18 = vsel %vm2994_vm10, 0.0, %v2995_v42 }
 0x289   : > { %6106 = vmatprep.subr.bf16.mxu0 %v8582_v8 }
 0x28a   : > { %v1964_v47 = vadd.f32 %v1963_v5, %v1957_v54  ;;  %v1967_v0 = vadd.f32 %v1966_v56, %v1957_v54  ;;  %6127 = vmatpush3.bf16.msra.mxu1 %v8587_v4  ;;  %v8762_v54 = vadd.f32 %v3134_v27, %v2996_v18  ;;  %v3022_v18 = vpack.c.bf16 %v8717_v33, %v8717_v33 }
 0x28b   : > { %6128 = vmatprep.subr.bf16.mxu1 %v8592_v46 }
 0x28c   : > { %1968 = vst [vmem:[#allocation3] sm:$0x3] %v1964_v47  ;;  %1969 = vst [vmem:[#allocation4] sm:$0x3] %v1967_v0  ;;  %v1970_v19 = vsub.f32 %v1964_v47, %v1967_v0  ;;  %6107 = vmatpush3.bf16.msra.mxu0 %v8597_v22  ;;  %vm3137_vm12 = vcmp.gt.f32.partialorder %v8762_v54, 1.0 }
 0x28d   : > { %6136 = vmatprep.subr.bf16.mxu0 %v8399_v32  ;;  %v5340_v50 = vsel %vm3137_vm12, 1.0, %v7254_v63 }
 0x28e   : > { %v1971_v26 = vadd.f32 %v8503_v48, %v1970_v19  ;;  %6129 = vmatpush3.bf16.msra.mxu1 %v8604_v31  ;;  %v3144_v56 = vcombine.high %v5340_v50, %v5340_v50 }
 0x28f   : > { %2916 = vmatmul.mubr.bf16.vlgmr.msra.gmra.mrb[64].mxu0 %v2879_v43  ;;  %6158 = vmatprep.subr.bf16.mxu1 %v8404_v29  ;;  %v8785_v43 = vrot.slane %v5340_v50, %v7535_v49 }
 0x290   : > { %v1973_v23 = vadd.f32 %v1972_v3, %v1971_v26  ;;  %6137 = vmatpush3.bf16.msra.mxu0 %v8407_v13  ;;  %3058 = vmatprep.mubr.bf16.mxu0 %v3023_v37  ;;  %v8792_v3 = vrot.slane %v3144_v56, %v7535_v49  ;;  %v3024_v56 = vpack.c.bf16 %v8724_v28, %v8724_v28 }
 0x291   : > { %2956 = vmatmul.mubr.bf16.vlgmr.msra.gmra.mrb[64].mxu1 %v2881_v21  ;;  %6138 = vmatprep.subr.bf16.mxu0 %v8411_v12 }
 0x292   : > { %vm1974_vm11 = vcmp.gt.f32.partialorder %v1973_v23, 1.0  ;;  %v1975_v35 = vmul.f32 0.7788008, %v1973_v23  ;;  %6159 = vmatpush3.bf16.msra.mxu1 %v8415_v16  ;;  %3098 = vmatprep.mubr.bf16.mxu1 %v3025_v44  ;;  %v3160_v27 = vcombine.high %v8792_v3, %v8792_v3 }
 0x293   : > { %v5314_v7 = vsel %vm1974_vm11, 1.0, %v7254_v63  ;;  %6160 = vmatprep.subr.bf16.mxu1 %v8419_v51  ;;  %v2105_v19 = vld [vmem:[#allocation3] sm:$0x3]  ;;  %v2108_v37 = vld [vmem:[#allocation4] sm:$0x3] }
 0x294   : > { %v1976_v36 = vsel %vm1974_vm11, 0.0, %v1975_v35  ;;  %v1980_v52 = vpack.c.bf16 %v5314_v7, %v5314_v7  ;;  %6139 = vmatpush3.bf16.msra.mxu0 %v8422_v60  ;;  %v2106_v42 = vmul.f32 0.7788008, %v2105_v19  ;;  %v2109_v35 = vmul.f32 0.36787945, %v2108_v37 }
 0x295   : > { %1977 = vst [vmem:[#allocation5] sm:$0x3] %v1976_v36  ;;  %6140 = vmatprep.subr.bf16.mxu0 %v8426_v20  ;;  %v3159_v7 = vcombine.high %v8785_v43, %v8785_v43 }
 0x296   : > { %5315 = vst [vmem:[%s7434_s10 + $0x9] sm:$0x1] %v1980_v52  ;;  %6161 = vmatpush3.bf16.msra.mxu1 %v8432_v30 }
 0x297   : > { %6162 = vmatprep.subr.bf16.mxu1 %v8435_v34 }
 0x298   : > { %6141 = vmatpush3.bf16.msra.mxu0 %v8438_v39 }
 0x299   : > { %6142 = vmatprep.subr.bf16.mxu0 %v8443_v41 }
 0x29a   : > { %6163 = vmatpush3.bf16.msra.mxu1 %v8446_v58 }
 0x29b   : > { %6164 = vmatprep.subr.bf16.mxu1 %v8449_v15 }
 0x29c   : > { %6143 = vmatpush3.bf16.msra.mxu0 %v8452_v1 }
 0x29d   : > { %6144 = vmatprep.subr.bf16.mxu0 %v8531_v62 }
 0x29e   : > { %6165 = vmatpush3.bf16.msra.mxu1 %v8457_v2 }
 0x29f   : > { %6166 = vmatprep.subr.bf16.mxu1 %v8535_v25 }
 0x2a0   : > { %6145 = vmatpush3.bf16.msra.mxu0 %v8542_v14 }
 0x2a1   : > { %6146 = vmatprep.subr.bf16.mxu0 %v8546_v57 }
 0x2a2   : > { %6167 = vmatpush3.bf16.msra.mxu1 %v8549_v61  ;;  %v5844_v5 = vpop.f32.mrb[40].mxu0 }
 0x2a3   : > { %v5845_v40 = vpop.f32.mrb[41].mxu0  ;;  %6168 = vmatprep.subr.bf16.mxu1 %v8552_v9 }
 0x2a4   : > { %v5866_v47 = vpop.f32.mrb[40].mxu1  ;;  %v5846_v0 = vadd.f32 %v5845_v40, %v5844_v5  ;;  %v5847_v11 = vpop.f32.mrb[42].mxu0  ;;  %6147 = vmatpush3.bf16.msra.mxu0 %v8557_v6  ;;  %v3166_v5 = vpack.c.bf16 %v3159_v7, %v3159_v7  ;;  %v3275_v40 = vstv %s3274_s9  ;;  %s3701_s9 = smul.f32 0.36787945, %s8955_s13 }
 0x2a5   : > { %v5867_v21 = vpop.f32.mrb[41].mxu1  ;;  %v5848_v24 = vpop.f32.mrb[43].mxu0  ;;  %6148 = vmatprep.subr.bf16.mxu0 %v8565_v55  ;;  %v2115_v11 = vld [vmem:[#allocation5] sm:$0x3]  ;;  %v3276_v19 = vmul.f32 %v8609_v17, %v3275_v40  ;;  %v8878_v40 = vld [vmem:[#allocation12 + $0x40] sm:$0xff]  }
 0x2a6   : > { %v5868_v26 = vadd.f32 %v5867_v21, %v5866_v47  ;;  %v5869_v44 = vpop.f32.mrb[42].mxu1  ;;  %6169 = vmatpush3.bf16.msra.mxu1 %v8568_v45  ;;  %s9042_s5 = sadd.f32 1.0, %s3701_s9  ;;  %s3985_s13 = smul.f32 0.7788008, %s9124_s29 }
 0x2a7   : > { %v5870_v23 = vpop.f32.mrb[43].mxu1  ;;  %6170 = vmatprep.subr.bf16.mxu1 %v8574_v10  ;;  %v3277_v21 = vadd.f32 %v3276_v19, %v7541_v53 }
 0x2a8   : > { %v2100_v59 = vadd.f32 %v5868_v26, %v5846_v0  ;;  %6149 = vmatpush3.bf16.msra.mxu0 %v8577_v38  ;;  %v3168_v0 = vpack.c.bf16 %v3160_v27, %v3160_v27  ;;  %s3703_s8 = ssub.f32 %s9034_s26, %s9042_s5 }
 0x2a9   : > { %6150 = vmatprep.subr.bf16.mxu0 %v8582_v8  ;;  %s9192_s22 = sadd.f32 1.0, %s3985_s13 }
 0x2aa   : > { %v2107_v36 = vadd.f32 %v2106_v42, %v2100_v59  ;;  %v2110_v52 = vadd.f32 %v2109_v35, %v2100_v59  ;;  %6171 = vmatpush3.bf16.msra.mxu1 %v8587_v4 }
 0x2ab   : > { %6172 = vmatprep.subr.bf16.mxu1 %v8592_v46  ;;  %s4128_s9 = smul.f32 0.7788008, %s9192_s22 }
 0x2ac   : > { %2111 = vst [vmem:[#allocation3] sm:$0x3] %v2107_v36  ;;  %2112 = vst [vmem:[#allocation4] sm:$0x3] %v2110_v52  ;;  %v2113_v50 = vsub.f32 %v2107_v36, %v2110_v52  ;;  %6151 = vmatpush3.bf16.msra.mxu0 %v8597_v22 }
 0x2ad   : > { %6180 = vmatprep.subr.bf16.mxu0 %v8399_v32  ;;  %v3138_v32 = vmul.f32 0.7788008, %v8762_v54 }
 0x2ae   : > { %v2114_v47 = vadd.f32 %v8503_v48, %v2113_v50  ;;  %6173 = vmatpush3.bf16.msra.mxu1 %v8604_v31 }
 0x2af   : > { %3059 = vmatmul.mubr.bf16.vlgmr.msra.gmra.mrb[68].mxu0 %v3022_v18  ;;  %6202 = vmatprep.subr.bf16.mxu1 %v8404_v29  ;;  %v3165_v18 = vpack.c.bf16 %v8785_v43, %v8785_v43 }
 0x2b0   : > { %v2116_v33 = vadd.f32 %v2115_v11, %v2114_v47  ;;  %6181 = vmatpush3.bf16.msra.mxu0 %v8407_v13  ;;  %3201 = vmatprep.mubr.bf16.mxu0 %v3166_v5  ;;  %v3418_v47 = vstv %s3417_s21  ;;  %s3844_s21 = smul.f32 0.36787945, %s9042_s5  ;;  %s9260_s5 = sadd.f32 1.0, %s4128_s9 }
 0x2b1   : > { %3099 = vmatmul.mubr.bf16.vlgmr.msra.gmra.mrb[68].mxu1 %v3024_v56  ;;  %6182 = vmatprep.subr.bf16.mxu0 %v8411_v12  ;;  %v3139_v12 = vsel %vm3137_vm12, 0.0, %v3138_v32  ;;  %v3167_v56 = vpack.c.bf16 %v8792_v3, %v8792_v3  ;;  %v8886_v32 = vld [vmem:[#allocation12] sm:$0xff]   ;;  %v3419_v3 = vmul.f32 %v8609_v17, %v3418_v47 }
 0x2b2   : > { %vm2117_vm13 = vcmp.gt.f32.partialorder %v2116_v33, 1.0  ;;  %v2118_v28 = vmul.f32 0.7788008, %v2116_v33  ;;  %6203 = vmatpush3.bf16.msra.mxu1 %v8415_v16  ;;  %3241 = vmatprep.mubr.bf16.mxu1 %v3168_v0  ;;  %v8830_v16 = vadd.f32 %v3277_v21, %v3139_v12  ;;  %v8883_v33 = vld [vmem:[#allocation12 + $0xc0] sm:$0xff]   ;;  %v8898_v21 = vld [vmem:[#allocation12 + $0xc8] sm:$0xff]   ;;  %s9130_s30 = sadd.f32 1.0, %s3844_s21 }
 0x2b3   : > { %v5317_v37 = vsel %vm2117_vm13, 1.0, %v7254_v63  ;;  %6204 = vmatprep.subr.bf16.mxu1 %v8419_v51  ;;  %s4271_s21 = smul.f32 0.7788008, %s9260_s5 }
 0x2b4   : > { %v2119_v29 = vsel %vm2117_vm13, 0.0, %v2118_v28  ;;  %v2123_v13 = vpack.c.bf16 %v5317_v37, %v5317_v37  ;;  %6183 = vmatpush3.bf16.msra.mxu0 %v8422_v60  ;;  %vm3280_vm14 = vcmp.gt.f32.partialorder %v8830_v16, 1.0  ;;  %v8890_v28 = vld [vmem:[#allocation12 + $0x48] sm:$0xff]   ;;  %s3846_s12 = ssub.f32 %s9124_s29, %s9130_s30 }
 0x2b5   : > { %2120 = vst [vmem:[#allocation5] sm:$0x3] %v2119_v29  ;;  %6184 = vmatprep.subr.bf16.mxu0 %v8426_v20  ;;  %v5343_v51 = vsel %vm3280_vm14, 1.0, %v7254_v63  ;;  %v8894_v29 = vld [vmem:[#allocation12 + $0x80] sm:$0xff]  }
 0x2b6   : > { %5318 = vst [vmem:[%s7434_s10 + $0xa] sm:$0x1] %v2123_v13  ;;  %6205 = vmatpush3.bf16.msra.mxu1 %v8432_v30  ;;  %v3287_v20 = vcombine.high %v5343_v51, %v5343_v51 }
 0x2b7   : > { %6206 = vmatprep.subr.bf16.mxu1 %v8435_v34 }
 0x2b8   : > { %6185 = vmatpush3.bf16.msra.mxu0 %v8438_v39  ;;  %v8860_v44 = vrot.slane %v3287_v20, %v7535_v49  ;;  %v3420_v20 = vadd.f32 %v3419_v3, %v7541_v53 }
 0x2b9   : > { %6186 = vmatprep.subr.bf16.mxu0 %v8443_v41 }
 0x2ba   : > { %6207 = vmatpush3.bf16.msra.mxu1 %v8446_v58  ;;  %v8853_v58 = vrot.slane %v5343_v51, %v7535_v49  ;;  %v3303_v27 = vcombine.high %v8860_v44, %v8860_v44 }
 0x2bb   : > { %6208 = vmatprep.subr.bf16.mxu1 %v8449_v15  ;;  %v2248_v15 = vld [vmem:[#allocation3] sm:$0x3] }
 0x2bc   : > { %6187 = vmatpush3.bf16.msra.mxu0 %v8452_v1  ;;  %v2251_v1 = vld [vmem:[#allocation4] sm:$0x3]  ;;  %v2249_v42 = vmul.f32 0.7788008, %v2248_v15  ;;  %v3302_v7 = vcombine.high %v8853_v58, %v8853_v58  ;;  %v3311_v11 = vpack.c.bf16 %v3303_v27, %v3303_v27  ;;  %v2258_v43 = vld [vmem:[#allocation5] sm:$0x3] }
 0x2bd   : > { %6188 = vmatprep.subr.bf16.mxu0 %v8531_v62  ;;  %v2252_v35 = vmul.f32 0.36787945, %v2251_v1  ;;  %v8917_v15 = vld [vmem:[#allocation12 + $0x10] sm:$0xff]  }
 0x2be   : > { %6209 = vmatpush3.bf16.msra.mxu1 %v8457_v2  ;;  %v3309_v5 = vpack.c.bf16 %v3302_v7, %v3302_v7 }
 0x2bf   : > { %6210 = vmatprep.subr.bf16.mxu1 %v8535_v25 }
 0x2c0   : > { %6189 = vmatpush3.bf16.msra.mxu0 %v8542_v14 }
 0x2c1   : > { %6190 = vmatprep.subr.bf16.mxu0 %v8546_v57 }
 0x2c2   : > { %6211 = vmatpush3.bf16.msra.mxu1 %v8549_v61  ;;  %v5888_v60 = vpop.f32.mrb[44].mxu0 }
 0x2c3   : > { %v5889_v30 = vpop.f32.mrb[45].mxu0  ;;  %6212 = vmatprep.subr.bf16.mxu1 %v8552_v9 }
 0x2c4   : > { %v5910_v34 = vpop.f32.mrb[44].mxu1  ;;  %v5890_v39 = vadd.f32 %v5889_v30, %v5888_v60  ;;  %v5891_v41 = vpop.f32.mrb[46].mxu0  ;;  %6191 = vmatpush3.bf16.msra.mxu0 %v8557_v6  ;;  %v8901_v60 = vld [vmem:[#allocation12 + $0x8] sm:$0xff]   ;;  %v8905_v30 = vld [vmem:[#allocation12 + $0x50] sm:$0xff]  }
 0x2c5   : > { %v5911_v2 = vpop.f32.mrb[45].mxu1  ;;  %v5892_v54 = vpop.f32.mrb[47].mxu0  ;;  %6192 = vmatprep.subr.bf16.mxu0 %v8565_v55  ;;  %v8914_v41 = vld [vmem:[#allocation12 + $0xd0] sm:$0xff]  }
 0x2c6   : > { %v5912_v24 = vadd.f32 %v5911_v2, %v5910_v34  ;;  %v5913_v26 = vpop.f32.mrb[46].mxu1  ;;  %6213 = vmatpush3.bf16.msra.mxu1 %v8568_v45  ;;  %v8922_v2 = vld [vmem:[#allocation12 + $0x58] sm:$0xff]  }
 0x2c7   : > { %v5914_v23 = vpop.f32.mrb[47].mxu1  ;;  %6214 = vmatprep.subr.bf16.mxu1 %v8574_v10  ;;  %v8928_v54 = vld [vmem:[#allocation12 + $0xd8] sm:$0xff]  }
 0x2c8   : > { %v2243_v59 = vadd.f32 %v5912_v24, %v5890_v39  ;;  %6193 = vmatpush3.bf16.msra.mxu0 %v8577_v38  ;;  %v8911_v39 = vld [vmem:[#allocation12 + $0x88] sm:$0xff]   ;;  %v8931_v24 = vld [vmem:[#allocation12 + $0x18] sm:$0xff]  }
 0x2c9   : > { %6194 = vmatprep.subr.bf16.mxu0 %v8582_v8  ;;  %v8936_v26 = vld [vmem:[#allocation12 + $0x98] sm:$0xff]  }
 0x2ca   : > { %v2250_v36 = vadd.f32 %v2249_v42, %v2243_v59  ;;  %v2253_v52 = vadd.f32 %v2252_v35, %v2243_v59  ;;  %6215 = vmatpush3.bf16.msra.mxu1 %v8587_v4 }
 0x2cb   : > { %6216 = vmatprep.subr.bf16.mxu1 %v8592_v46 }
 0x2cc   : > { %2254 = vst [vmem:[#allocation3] sm:$0x3] %v2250_v36  ;;  %2255 = vst [vmem:[#allocation4] sm:$0x3] %v2253_v52  ;;  %v2256_v50 = vsub.f32 %v2250_v36, %v2253_v52  ;;  %6195 = vmatpush3.bf16.msra.mxu0 %v8597_v22 }
 0x2cd   : > { %6224 = vmatprep.subr.bf16.mxu0 %v8878_v40 }
 0x2ce   : > { %v2257_v0 = vadd.f32 %v8503_v48, %v2256_v50  ;;  %6217 = vmatpush3.bf16.msra.mxu1 %v8604_v31  ;;  %v3281_v48 = vmul.f32 0.7788008, %v8830_v16  ;;  %v8925_v16 = vld [vmem:[#allocation12 + $0x90] sm:$0xff]  }
 0x2cf   : > { %3202 = vmatmul.mubr.bf16.vlgmr.msra.gmra.mrb[72].mxu0 %v3165_v18  ;;  %6246 = vmatprep.subr.bf16.mxu1 %v8883_v33 }
 0x2d0   : > { %v2259_v19 = vadd.f32 %v2258_v43, %v2257_v0  ;;  %6225 = vmatpush3.bf16.msra.mxu0 %v8886_v32  ;;  %3344 = vmatprep.mubr.bf16.mxu0 %v3309_v5  ;;  %v3282_v34 = vsel %vm3280_vm14, 0.0, %v3281_v48  ;;  %v8982_v43 = vld [vmem:[%s9930_s3] ss:$0 sm:$0xff] }
 0x2d1   : > { %3242 = vmatmul.mubr.bf16.vlgmr.msra.gmra.mrb[72].mxu1 %v3167_v56  ;;  %6226 = vmatprep.subr.bf16.mxu0 %v8890_v28  ;;  %v8920_v1 = vadd.f32 %v3420_v20, %v3282_v34  ;;  %v9010_v20 = vld [vmem:[#allocation12 + $0x60] sm:$0xff]  }
 0x2d2   : > { %vm2260_vm15 = vcmp.gt.f32.partialorder %v2259_v19, 1.0  ;;  %v2261_v37 = vmul.f32 0.7788008, %v2259_v19  ;;  %6247 = vmatpush3.bf16.msra.mxu1 %v8894_v29  ;;  %3384 = vmatprep.mubr.bf16.mxu1 %v3311_v11  ;;  %v9014_v34 = vld [vmem:[#allocation12 + $0xe0] sm:$0xff]  }
 0x2d3   : > { %v5320_v13 = vsel %vm2260_vm15, 1.0, %v7254_v63  ;;  %6248 = vmatprep.subr.bf16.mxu1 %v8898_v21  ;;  %vm3423_vm0 = vcmp.gt.f32.partialorder %v8920_v1, 1.0  ;;  %v3424_v3 = vmul.f32 0.7788008, %v8920_v1 }
 0x2d4   : > { %v2262_v12 = vsel %vm2260_vm15, 0.0, %v2261_v37  ;;  %v2266_v51 = vpack.c.bf16 %v5320_v13, %v5320_v13  ;;  %6227 = vmatpush3.bf16.msra.mxu0 %v8901_v60  ;;  %v5346_v23 = vsel %vm3423_vm0, 1.0, %v7254_v63 }
 0x2d5   : > { %2263 = vst [vmem:[#allocation5] sm:$0x3] %v2262_v12  ;;  %6228 = vmatprep.subr.bf16.mxu0 %v8905_v30  ;;  %v8953_v36 = vrot.slane %v5346_v23, %v7535_v49  ;;  %v3425_v12 = vsel %vm3423_vm0, 0.0, %v3424_v3  ;;  %v9066_v3 = vld [vmem:[#allocation12 + $0xb0] sm:$0xff]  }
 0x2d6   : > { %5321 = vst [vmem:[%s7434_s10 + $0xb] sm:$0x1] %v2266_v51  ;;  %6249 = vmatpush3.bf16.msra.mxu1 %v8911_v39 }
 0x2d7   : > { %6250 = vmatprep.subr.bf16.mxu1 %v8914_v41  ;;  %v3445_v47 = vcombine.high %v8953_v36, %v8953_v36 }
 0x2d8   : > { %6229 = vmatpush3.bf16.msra.mxu0 %v8917_v15 }
 0x2d9   : > { %6230 = vmatprep.subr.bf16.mxu0 %v8922_v2  ;;  %v3452_v11 = vpack.c.bf16 %v3445_v47, %v3445_v47 }
 0x2da   : > { %6251 = vmatpush3.bf16.msra.mxu1 %v8925_v16 }
 0x2db   : > { %6252 = vmatprep.subr.bf16.mxu1 %v8928_v54 }
 0x2dc   : > { %6231 = vmatpush3.bf16.msra.mxu0 %v8931_v24  ;;  %v2401_v19 = vld [vmem:[#allocation5] sm:$0x3] }
 0x2dd   : > { %6232 = vmatprep.subr.bf16.mxu0 %v8531_v62  ;;  %v3430_v62 = vcombine.high %v5346_v23, %v5346_v23  ;;  %v9021_v23 = vld [vmem:[#allocation12 + $0x20] sm:$0xff]  }
 0x2de   : > { %6253 = vmatpush3.bf16.msra.mxu1 %v8936_v26 }
 0x2df   : > { %6254 = vmatprep.subr.bf16.mxu1 %v8535_v25  ;;  %v8960_v18 = vrot.slane %v3430_v62, %v7535_v49  ;;  %v9028_v62 = vld [vmem:[#allocation12 + $0xa0] sm:$0xff]  }
 0x2e0   : > { %6233 = vmatpush3.bf16.msra.mxu0 %v8542_v14 }
 0x2e1   : > { %6234 = vmatprep.subr.bf16.mxu0 %v8546_v57  ;;  %v2391_v57 = vld [vmem:[#allocation3] sm:$0x3] }
 0x2e2   : > { %6255 = vmatpush3.bf16.msra.mxu1 %v8549_v61  ;;  %v5932_v59 = vpop.f32.mrb[48].mxu0  ;;  %v2394_v61 = vld [vmem:[#allocation4] sm:$0x3]  ;;  %v2392_v5 = vmul.f32 0.7788008, %v2391_v57 }
 0x2e3   : > { %v5933_v42 = vpop.f32.mrb[49].mxu0  ;;  %6256 = vmatprep.subr.bf16.mxu1 %v8552_v9  ;;  %v2395_v56 = vmul.f32 0.36787945, %v2394_v61 }
 0x2e4   : > { %v5954_v25 = vpop.f32.mrb[48].mxu1  ;;  %v5934_v35 = vadd.f32 %v5933_v42, %v5932_v59  ;;  %v5935_v7 = vpop.f32.mrb[50].mxu0  ;;  %6235 = vmatpush3.bf16.msra.mxu0 %v8557_v6  ;;  %v9025_v59 = vld [vmem:[#allocation12 + $0x68] sm:$0xff]  }
 0x2e5   : > { %v5955_v14 = vpop.f32.mrb[49].mxu1  ;;  %v5936_v52 = vpop.f32.mrb[51].mxu0  ;;  %6236 = vmatprep.subr.bf16.mxu0 %v8565_v55  ;;  %v9031_v7 = vld [vmem:[#allocation12 + $0xe8] sm:$0xff]  }
 0x2e6   : > { %v5956_v9 = vadd.f32 %v5955_v14, %v5954_v25  ;;  %v5957_v27 = vpop.f32.mrb[50].mxu1  ;;  %6257 = vmatpush3.bf16.msra.mxu1 %v8568_v45  ;;  %v3446_v45 = vcombine.high %v8960_v18, %v8960_v18  ;;  %v9036_v52 = vld [vmem:[#allocation12 + $0x28] sm:$0xff]  }
 0x2e7   : > { %v5958_v6 = vpop.f32.mrb[51].mxu1  ;;  %6258 = vmatprep.subr.bf16.mxu1 %v8574_v10  ;;  %v3308_v10 = vpack.c.bf16 %v8853_v58, %v8853_v58 }
 0x2e8   : > { %v2386_v50 = vadd.f32 %v5956_v9, %v5934_v35  ;;  %6237 = vmatpush3.bf16.msra.mxu0 %v8577_v38  ;;  %v3454_v58 = vpack.c.bf16 %v3446_v45, %v3446_v45 }
 0x2e9   : > { %6238 = vmatprep.subr.bf16.mxu0 %v8582_v8  ;;  %v3310_v8 = vpack.c.bf16 %v8860_v44, %v8860_v44 }
 0x2ea   : > { %v2393_v55 = vadd.f32 %v2392_v5, %v2386_v50  ;;  %v2396_v0 = vadd.f32 %v2395_v56, %v2386_v50  ;;  %6259 = vmatpush3.bf16.msra.mxu1 %v8587_v4  ;;  %v3561_v4 = vstv %s3560_s14  ;;  %v9044_v56 = vld [vmem:[#allocation12 + $0x70] sm:$0xff]   ;;  %s3987_s14 = smul.f32 0.36787945, %s9130_s30  ;;  %s9328_s30 = sadd.f32 1.0, %s4271_s21 }
 0x2eb   : > { %6260 = vmatprep.subr.bf16.mxu1 %v8592_v46  ;;  %v3562_v44 = vmul.f32 %v8609_v17, %v3561_v4 }
 0x2ec   : > { %2397 = vst [vmem:[#allocation3] sm:$0x3] %v2393_v55  ;;  %2398 = vst [vmem:[#allocation4] sm:$0x3] %v2396_v0  ;;  %v2399_v38 = vsub.f32 %v2393_v55, %v2396_v0  ;;  %6239 = vmatpush3.bf16.msra.mxu0 %v8597_v22  ;;  %v9047_v0 = vld [vmem:[#allocation12 + $0xa8] sm:$0xff]   ;;  %s9198_s24 = sadd.f32 1.0, %s3987_s14 }
 0x2ed   : > { %6268 = vmatprep.subr.bf16.mxu0 %v8878_v40  ;;  %v3563_v17 = vadd.f32 %v3562_v44, %v7541_v53  ;;  %s4414_s14 = smul.f32 0.7788008, %s9328_s30 }
 0x2ee   : > { %v2400_v46 = vadd.f32 %v8982_v43, %v2399_v38  ;;  %6261 = vmatpush3.bf16.msra.mxu1 %v8604_v31  ;;  %v9053_v38 = vld [vmem:[#allocation12 + $0xf0] sm:$0xff]   ;;  %s3989_s6 = ssub.f32 %s9192_s22, %s9198_s24  ;;  %s4130_s26 = smul.f32 0.36787945, %s9198_s24 }
 0x2ef   : > { %3345 = vmatmul.mubr.bf16.vlgmr.msra.gmra.mrb[76].mxu0 %v3308_v10  ;;  %6290 = vmatprep.subr.bf16.mxu1 %v8883_v33  ;;  %v9003_v51 = vadd.f32 %v3563_v17, %v3425_v12  ;;  %v9076_v17 = vld [vmem:[#allocation12 + $0x38] sm:$0xff]   ;;  %s9428_s24 = sadd.f32 1.0, %s4414_s14 }
 0x2f0   : > { %v2402_v22 = vadd.f32 %v2401_v19, %v2400_v46  ;;  %6269 = vmatpush3.bf16.msra.mxu0 %v8886_v32  ;;  %3487 = vmatprep.mubr.bf16.mxu0 %v3452_v11  ;;  %v9056_v46 = vld [vmem:[#allocation12 + $0x30] sm:$0xff]   ;;  %v9061_v19 = vld [vmem:[#allocation12 + $0x78] sm:$0xff]  }
 0x2f1   : > { %3385 = vmatmul.mubr.bf16.vlgmr.msra.gmra.mrb[76].mxu1 %v3310_v8  ;;  %6270 = vmatprep.subr.bf16.mxu0 %v8890_v28  ;;  %vm3566_vm2 = vcmp.gt.f32.partialorder %v9003_v51, 1.0 }
 0x2f2   : > { %vm2403_vm1 = vcmp.gt.f32.partialorder %v2402_v22, 1.0  ;;  %v2404_v48 = vmul.f32 0.7788008, %v2402_v22  ;;  %6291 = vmatpush3.bf16.msra.mxu1 %v8894_v29  ;;  %3527 = vmatprep.mubr.bf16.mxu1 %v3454_v58  ;;  %v5349_v1 = vsel %vm3566_vm2, 1.0, %v7254_v63 }
 0x2f3   : > { %v5323_v31 = vsel %vm2403_vm1, 1.0, %v7254_v63  ;;  %6292 = vmatprep.subr.bf16.mxu1 %v8898_v21  ;;  %v3573_v25 = vcombine.high %v5349_v1, %v5349_v1  ;;  %v9040_v9 = vrot.slane %v5349_v1, %v7535_v49  ;;  %v2534_v6 = vld [vmem:[#allocation3] sm:$0x3]  ;;  %v2537_v50 = vld [vmem:[#allocation4] sm:$0x3]  ;;  %v3453_v1 = vpack.c.bf16 %v8960_v18, %v8960_v18 }
 0x2f4   : > { %v2405_v37 = vsel %vm2403_vm1, 0.0, %v2404_v48  ;;  %v2409_v13 = vpack.c.bf16 %v5323_v31, %v5323_v31  ;;  %6271 = vmatpush3.bf16.msra.mxu0 %v8901_v60  ;;  %v2535_v8 = vmul.f32 0.7788008, %v2534_v6  ;;  %v2538_v4 = vmul.f32 0.36787945, %v2537_v50  ;;  %v9071_v31 = vld [vmem:[#allocation12 + $0xf8] sm:$0xff]  }
 0x2f5   : > { %2406 = vst [vmem:[#allocation5] sm:$0x3] %v2405_v37  ;;  %6272 = vmatprep.subr.bf16.mxu0 %v8905_v30  ;;  %v9051_v45 = vrot.slane %v3573_v25, %v7535_v49  ;;  %v3588_v58 = vcombine.high %v9040_v9, %v9040_v9  ;;  %v3451_v37 = vpack.c.bf16 %v8953_v36, %v8953_v36 }
 0x2f6   : > { %5324 = vst [vmem:[%s7434_s10 + $0xc] sm:$0x1] %v2409_v13  ;;  %6293 = vmatpush3.bf16.msra.mxu1 %v8911_v39 }
 0x2f7   : > { %6294 = vmatprep.subr.bf16.mxu1 %v8914_v41  ;;  %v3589_v48 = vcombine.high %v9051_v45, %v9051_v45  ;;  %v3595_v12 = vpack.c.bf16 %v3588_v58, %v3588_v58 }
 0x2f8   : > { %6273 = vmatpush3.bf16.msra.mxu0 %v8917_v15 }
 0x2f9   : > { %6274 = vmatprep.subr.bf16.mxu0 %v8922_v2  ;;  %v3597_v36 = vpack.c.bf16 %v3589_v48, %v3589_v48 }
 0x2fa   : > { %6295 = vmatpush3.bf16.msra.mxu1 %v8925_v16 }
 0x2fb   : > { %6296 = vmatprep.subr.bf16.mxu1 %v8928_v54 }
 0x2fc   : > { %6275 = vmatpush3.bf16.msra.mxu0 %v8931_v24 }
 0x2fd   : > { %6276 = vmatprep.subr.bf16.mxu0 %v9010_v20 }
 0x2fe   : > { %6297 = vmatpush3.bf16.msra.mxu1 %v8936_v26 }
 0x2ff   : > { %6298 = vmatprep.subr.bf16.mxu1 %v9014_v34 }
 0x300   : > { %6277 = vmatpush3.bf16.msra.mxu0 %v9021_v23 }
 0x301   : > { %6278 = vmatprep.subr.bf16.mxu0 %v9025_v59 }
 0x302   : > { %6299 = vmatpush3.bf16.msra.mxu1 %v9028_v62  ;;  %v5976_v42 = vpop.f32.mrb[52].mxu0 }
 0x303   : > { %v5977_v35 = vpop.f32.mrb[53].mxu0  ;;  %6300 = vmatprep.subr.bf16.mxu1 %v9031_v7 }
 0x304   : > { %v5998_v14 = vpop.f32.mrb[52].mxu1  ;;  %v5978_v57 = vadd.f32 %v5977_v35, %v5976_v42  ;;  %v5979_v61 = vpop.f32.mrb[54].mxu0  ;;  %6279 = vmatpush3.bf16.msra.mxu0 %v9036_v52  ;;  %v3704_v42 = vstv %s3703_s8  ;;  %v9083_v35 = vld [vmem:[#allocation12 + $0xb8] sm:$0xff]   ;;  %s9266_s8 = sadd.f32 1.0, %s4130_s26 }
 0x305   : > { %v5999_v27 = vpop.f32.mrb[53].mxu1  ;;  %v5980_v5 = vpop.f32.mrb[55].mxu0  ;;  %6280 = vmatprep.subr.bf16.mxu0 %v9044_v56  ;;  %v9088_v61 = vld [vmem:[#allocation7] sm:$0xff] }
 0x306   : > { %v6000_v47 = vadd.f32 %v5999_v27, %v5998_v14  ;;  %v6001_v55 = vpop.f32.mrb[54].mxu1  ;;  %6301 = vmatpush3.bf16.msra.mxu1 %v9047_v0  ;;  %v2544_v14 = vld [vmem:[#allocation5] sm:$0x3]  ;;  %v3705_v18 = vmul.f32 %v9088_v61, %v3704_v42  ;;  %v3567_v27 = vmul.f32 0.7788008, %v9003_v51  ;;  %s4132_s11 = ssub.f32 %s9260_s5, %s9266_s8 }
 0x307   : > { %v6002_v10 = vpop.f32.mrb[55].mxu1  ;;  %6302 = vmatprep.subr.bf16.mxu1 %v9053_v38  ;;  %s4273_s29 = smul.f32 0.36787945, %s9266_s8 }
 0x308   : > { %v2529_v11 = vadd.f32 %v6000_v47, %v5978_v57  ;;  %6281 = vmatpush3.bf16.msra.mxu0 %v9056_v46  ;;  %v3706_v55 = vadd.f32 %v3705_v18, %v7541_v53  ;;  %v3568_v10 = vsel %vm3566_vm2, 0.0, %v3567_v27  ;;  %s4557_s8 = smul.f32 0.7788008, %s9428_s24 }
 0x309   : > { %6282 = vmatprep.subr.bf16.mxu0 %v9061_v19 }
 0x30a   : > { %v2536_v22 = vadd.f32 %v2535_v8, %v2529_v11  ;;  %v2539_v44 = vadd.f32 %v2538_v4, %v2529_v11  ;;  %6303 = vmatpush3.bf16.msra.mxu1 %v9066_v3  ;;  %v9105_v11 = vadd.f32 %v3706_v55, %v3568_v10  ;;  %v3594_v10 = vpack.c.bf16 %v9040_v9, %v9040_v9  ;;  %s9513_s21 = sadd.f32 1.0, %s4557_s8 }
 0x30b   : > { %6304 = vmatprep.subr.bf16.mxu1 %v9071_v31 }
 0x30c   : > { %2540 = vst [vmem:[#allocation3] sm:$0x3] %v2536_v22  ;;  %2541 = vst [vmem:[#allocation4] sm:$0x3] %v2539_v44  ;;  %v2542_v13 = vsub.f32 %v2536_v22, %v2539_v44  ;;  %6283 = vmatpush3.bf16.msra.mxu0 %v9076_v17  ;;  %vm3709_vm4 = vcmp.gt.f32.partialorder %v9105_v11, 1.0 }
 0x30d   : > { %6312 = vmatprep.subr.bf16.mxu0 %v8878_v40  ;;  %v5352_v51 = vsel %vm3709_vm4, 1.0, %v7254_v63 }
 0x30e   : > { %v2543_v25 = vadd.f32 %v8982_v43, %v2542_v13  ;;  %6305 = vmatpush3.bf16.msra.mxu1 %v9083_v35  ;;  %v3716_v4 = vcombine.high %v5352_v51, %v5352_v51 }
 0x30f   : > { %3488 = vmatmul.mubr.bf16.vlgmr.msra.gmra.mrb[80].mxu0 %v3451_v37  ;;  %6334 = vmatprep.subr.bf16.mxu1 %v8883_v33  ;;  %v9128_v37 = vrot.slane %v5352_v51, %v7535_v49 }
 0x310   : > { %v2545_v57 = vadd.f32 %v2544_v14, %v2543_v25  ;;  %6313 = vmatpush3.bf16.msra.mxu0 %v8886_v32  ;;  %3630 = vmatprep.mubr.bf16.mxu0 %v3595_v12  ;;  %v9135_v14 = vrot.slane %v3716_v4, %v7535_v49  ;;  %v3596_v4 = vpack.c.bf16 %v9051_v45, %v9051_v45  ;;  %v3710_v45 = vmul.f32 0.7788008, %v9105_v11 }
 0x311   : > { %3528 = vmatmul.mubr.bf16.vlgmr.msra.gmra.mrb[80].mxu1 %v3453_v1  ;;  %6314 = vmatprep.subr.bf16.mxu0 %v8890_v28 }
 0x312   : > { %vm2546_vm3 = vcmp.gt.f32.partialorder %v2545_v57, 1.0  ;;  %v2547_v6 = vmul.f32 0.7788008, %v2545_v57  ;;  %6335 = vmatpush3.bf16.msra.mxu1 %v8894_v29  ;;  %3670 = vmatprep.mubr.bf16.mxu1 %v3597_v36  ;;  %v3732_v55 = vcombine.high %v9135_v14, %v9135_v14 }
 0x313   : > { %v5326_v50 = vsel %vm2546_vm3, 1.0, %v7254_v63  ;;  %6336 = vmatprep.subr.bf16.mxu1 %v8898_v21  ;;  %v2677_v12 = vld [vmem:[#allocation3] sm:$0x3]  ;;  %v2680_v1 = vld [vmem:[#allocation4] sm:$0x3] }
 0x314   : > { %v2548_v5 = vsel %vm2546_vm3, 0.0, %v2547_v6  ;;  %v2552_v47 = vpack.c.bf16 %v5326_v50, %v5326_v50  ;;  %6315 = vmatpush3.bf16.msra.mxu0 %v8901_v60  ;;  %v2678_v27 = vmul.f32 0.7788008, %v2677_v12  ;;  %v2681_v6 = vmul.f32 0.36787945, %v2680_v1 }
 0x315   : > { %2549 = vst [vmem:[#allocation5] sm:$0x3] %v2548_v5  ;;  %6316 = vmatprep.subr.bf16.mxu0 %v8905_v30  ;;  %v3731_v50 = vcombine.high %v9128_v37, %v9128_v37 }
 0x316   : > { %5327 = vst [vmem:[%s7434_s10 + $0xd] sm:$0x1] %v2552_v47  ;;  %6337 = vmatpush3.bf16.msra.mxu1 %v8911_v39 }
 0x317   : > { %6338 = vmatprep.subr.bf16.mxu1 %v8914_v41 }
 0x318   : > { %6317 = vmatpush3.bf16.msra.mxu0 %v8917_v15 }
 0x319   : > { %6318 = vmatprep.subr.bf16.mxu0 %v8922_v2 }
 0x31a   : > { %6339 = vmatpush3.bf16.msra.mxu1 %v8925_v16 }
 0x31b   : > { %6340 = vmatprep.subr.bf16.mxu1 %v8928_v54 }
 0x31c   : > { %6319 = vmatpush3.bf16.msra.mxu0 %v8931_v24 }
 0x31d   : > { %6320 = vmatprep.subr.bf16.mxu0 %v9010_v20 }
 0x31e   : > { %6341 = vmatpush3.bf16.msra.mxu1 %v8936_v26 }
 0x31f   : > { %6342 = vmatprep.subr.bf16.mxu1 %v9014_v34 }
 0x320   : > { %6321 = vmatpush3.bf16.msra.mxu0 %v9021_v23 }
 0x321   : > { %6322 = vmatprep.subr.bf16.mxu0 %v9025_v59 }
 0x322   : > { %6343 = vmatpush3.bf16.msra.mxu1 %v9028_v62  ;;  %v6020_v8 = vpop.f32.mrb[56].mxu0 }
 0x323   : > { %v6021_v58 = vpop.f32.mrb[57].mxu0  ;;  %6344 = vmatprep.subr.bf16.mxu1 %v9031_v7 }
 0x324   : > { %v6042_v22 = vpop.f32.mrb[56].mxu1  ;;  %v6022_v44 = vadd.f32 %v6021_v58, %v6020_v8  ;;  %v6023_v48 = vpop.f32.mrb[58].mxu0  ;;  %6323 = vmatpush3.bf16.msra.mxu0 %v9036_v52  ;;  %v3738_v8 = vpack.c.bf16 %v3731_v50, %v3731_v50  ;;  %v3847_v58 = vstv %s3846_s12  ;;  %s9334_s12 = sadd.f32 1.0, %s4273_s29 }
 0x325   : > { %v6043_v13 = vpop.f32.mrb[57].mxu1  ;;  %v6024_v42 = vpop.f32.mrb[59].mxu0  ;;  %6324 = vmatprep.subr.bf16.mxu0 %v9044_v56  ;;  %v2687_v48 = vld [vmem:[#allocation5] sm:$0x3] }
 0x326   : > { %v6044_v25 = vadd.f32 %v6043_v13, %v6042_v22  ;;  %v6045_v36 = vpop.f32.mrb[58].mxu1  ;;  %6345 = vmatpush3.bf16.msra.mxu1 %v9047_v0  ;;  %v3848_v13 = vmul.f32 %v9088_v61, %v3847_v58  ;;  %s4275_s13 = ssub.f32 %s9328_s30, %s9334_s12  ;;  %s4416_s22 = smul.f32 0.36787945, %s9334_s12 }
 0x327   : > { %v6046_v57 = vpop.f32.mrb[59].mxu1  ;;  %6346 = vmatprep.subr.bf16.mxu1 %v9053_v38  ;;  %s4700_s12 = smul.f32 0.7788008, %s9513_s21 }
 0x328   : > { %v2672_v18 = vadd.f32 %v6044_v25, %v6022_v44  ;;  %6325 = vmatpush3.bf16.msra.mxu0 %v9056_v46  ;;  %v3740_v44 = vpack.c.bf16 %v3732_v55, %v3732_v55  ;;  %v3849_v36 = vadd.f32 %v3848_v13, %v7541_v53  ;;  %v3711_v57 = vsel %vm3709_vm4, 0.0, %v3710_v45 }
 0x329   : > { %6326 = vmatprep.subr.bf16.mxu0 %v9061_v19  ;;  %s9563_s14 = sadd.f32 1.0, %s4700_s12 }
 0x32a   : > { %v2679_v5 = vadd.f32 %v2678_v27, %v2672_v18  ;;  %v2682_v47 = vadd.f32 %v2681_v6, %v2672_v18  ;;  %6347 = vmatpush3.bf16.msra.mxu1 %v9066_v3  ;;  %v9173_v18 = vadd.f32 %v3849_v36, %v3711_v57  ;;  %v3737_v57 = vpack.c.bf16 %v9128_v37, %v9128_v37 }
 0x32b   : > { %6348 = vmatprep.subr.bf16.mxu1 %v9071_v31 }
 0x32c   : > { %2683 = vst [vmem:[#allocation3] sm:$0x3] %v2679_v5  ;;  %2684 = vst [vmem:[#allocation4] sm:$0x3] %v2682_v47  ;;  %v2685_v51 = vsub.f32 %v2679_v5, %v2682_v47  ;;  %6327 = vmatpush3.bf16.msra.mxu0 %v9076_v17  ;;  %vm3852_vm6 = vcmp.gt.f32.partialorder %v9173_v18, 1.0 }
 0x32d   : > { %6356 = vmatprep.subr.bf16.mxu0 %v8878_v40  ;;  %v5355_v11 = vsel %vm3852_vm6, 1.0, %v7254_v63 }
 0x32e   : > { %v2686_v22 = vadd.f32 %v8982_v43, %v2685_v51  ;;  %6349 = vmatpush3.bf16.msra.mxu1 %v9083_v35  ;;  %v3859_v6 = vcombine.high %v5355_v11, %v5355_v11 }
 0x32f   : > { %3631 = vmatmul.mubr.bf16.vlgmr.msra.gmra.mrb[84].mxu0 %v3594_v10  ;;  %6378 = vmatprep.subr.bf16.mxu1 %v8883_v33  ;;  %v9196_v10 = vrot.slane %v5355_v11, %v7535_v49 }
 0x330   : > { %v2688_v9 = vadd.f32 %v2687_v48, %v2686_v22  ;;  %6357 = vmatpush3.bf16.msra.mxu0 %v8886_v32  ;;  %3773 = vmatprep.mubr.bf16.mxu0 %v3738_v8  ;;  %v9203_v48 = vrot.slane %v3859_v6, %v7535_v49  ;;  %v3739_v6 = vpack.c.bf16 %v9135_v14, %v9135_v14  ;;  %v3853_v14 = vmul.f32 0.7788008, %v9173_v18 }
 0x331   : > { %3671 = vmatmul.mubr.bf16.vlgmr.msra.gmra.mrb[84].mxu1 %v3596_v4  ;;  %6358 = vmatprep.subr.bf16.mxu0 %v8890_v28 }
 0x332   : > { %vm2689_vm5 = vcmp.gt.f32.partialorder %v2688_v9, 1.0  ;;  %v2690_v12 = vmul.f32 0.7788008, %v2688_v9  ;;  %6379 = vmatpush3.bf16.msra.mxu1 %v8894_v29  ;;  %3813 = vmatprep.mubr.bf16.mxu1 %v3740_v44  ;;  %v3875_v36 = vcombine.high %v9203_v48, %v9203_v48 }
 0x333   : > { %v5329_v1 = vsel %vm2689_vm5, 1.0, %v7254_v63  ;;  %6380 = vmatprep.subr.bf16.mxu1 %v8898_v21  ;;  %v2820_v8 = vld [vmem:[#allocation3] sm:$0x3]  ;;  %v2823_v4 = vld [vmem:[#allocation4] sm:$0x3] }
 0x334   : > { %v2691_v42 = vsel %vm2689_vm5, 0.0, %v2690_v12  ;;  %v2695_v25 = vpack.c.bf16 %v5329_v1, %v5329_v1  ;;  %6359 = vmatpush3.bf16.msra.mxu0 %v8901_v60  ;;  %v2821_v45 = vmul.f32 0.7788008, %v2820_v8  ;;  %v2824_v12 = vmul.f32 0.36787945, %v2823_v4 }
 0x335   : > { %2692 = vst [vmem:[#allocation5] sm:$0x3] %v2691_v42  ;;  %6360 = vmatprep.subr.bf16.mxu0 %v8905_v30  ;;  %v3874_v1 = vcombine.high %v9196_v10, %v9196_v10 }
 0x336   : > { %5330 = vst [vmem:[%s7434_s10 + $0xe] sm:$0x1] %v2695_v25  ;;  %6381 = vmatpush3.bf16.msra.mxu1 %v8911_v39 }
 0x337   : > { %6382 = vmatprep.subr.bf16.mxu1 %v8914_v41 }
 0x338   : > { %6361 = vmatpush3.bf16.msra.mxu0 %v8917_v15 }
 0x339   : > { %6362 = vmatprep.subr.bf16.mxu0 %v8922_v2 }
 0x33a   : > { %6383 = vmatpush3.bf16.msra.mxu1 %v8925_v16 }
 0x33b   : > { %6384 = vmatprep.subr.bf16.mxu1 %v8928_v54 }
 0x33c   : > { %6363 = vmatpush3.bf16.msra.mxu0 %v8931_v24 }
 0x33d   : > { %6364 = vmatprep.subr.bf16.mxu0 %v9010_v20 }
 0x33e   : > { %6385 = vmatpush3.bf16.msra.mxu1 %v8936_v26 }
 0x33f   : > { %6386 = vmatprep.subr.bf16.mxu1 %v9014_v34 }
 0x340   : > { %6365 = vmatpush3.bf16.msra.mxu0 %v9021_v23 }
 0x341   : > { %6366 = vmatprep.subr.bf16.mxu0 %v9025_v59 }
 0x342   : > { %6387 = vmatpush3.bf16.msra.mxu1 %v9028_v62  ;;  %v6064_v27 = vpop.f32.mrb[60].mxu0 }
 0x343   : > { %v6065_v50 = vpop.f32.mrb[61].mxu0  ;;  %6388 = vmatprep.subr.bf16.mxu1 %v9031_v7 }
 0x344   : > { %v6086_v5 = vpop.f32.mrb[60].mxu1  ;;  %v6066_v47 = vadd.f32 %v6065_v50, %v6064_v27  ;;  %v6067_v55 = vpop.f32.mrb[62].mxu0  ;;  %6367 = vmatpush3.bf16.msra.mxu0 %v9036_v52  ;;  %v3881_v27 = vpack.c.bf16 %v3874_v1, %v3874_v1  ;;  %v3990_v50 = vstv %s3989_s6  ;;  %s9434_s6 = sadd.f32 1.0, %s4416_s22 }
 0x345   : > { %v6087_v51 = vpop.f32.mrb[61].mxu1  ;;  %v6068_v58 = vpop.f32.mrb[63].mxu0  ;;  %6368 = vmatprep.subr.bf16.mxu0 %v9044_v56  ;;  %v2830_v55 = vld [vmem:[#allocation5] sm:$0x3] }
 0x346   : > { %v6088_v22 = vadd.f32 %v6087_v51, %v6086_v5  ;;  %v6089_v44 = vpop.f32.mrb[62].mxu1  ;;  %6389 = vmatpush3.bf16.msra.mxu1 %v9047_v0  ;;  %v3991_v51 = vmul.f32 %v9088_v61, %v3990_v50  ;;  %s4418_s9 = ssub.f32 %s9428_s24, %s9434_s6  ;;  %s4843_s24 = smul.f32 0.7788008, %s9563_s14 }
 0x347   : > { %v6090_v9 = vpop.f32.mrb[63].mxu1  ;;  %6390 = vmatprep.subr.bf16.mxu1 %v9053_v38 }
 0x348   : > { %v2815_v13 = vadd.f32 %v6088_v22, %v6066_v47  ;;  %6369 = vmatpush3.bf16.msra.mxu0 %v9056_v46  ;;  %v3883_v47 = vpack.c.bf16 %v3875_v36, %v3875_v36  ;;  %v3992_v44 = vadd.f32 %v3991_v51, %v7541_v53  ;;  %v3854_v9 = vsel %vm3852_vm6, 0.0, %v3853_v14  ;;  %s4844_s26 = sadd.f32 1.0, %s4843_s24  ;;  %s5148_s24 = sshll.u32 %s7434_s10, 4  ;;  %s9876_s24 = int_to_ptr.vmem [resolvable:$true] %s5148_s24 }
 0x349   : > { %6370 = vmatprep.subr.bf16.mxu0 %v9061_v19 }
 0x34a   : > { %v2822_v42 = vadd.f32 %v2821_v45, %v2815_v13  ;;  %v2825_v25 = vadd.f32 %v2824_v12, %v2815_v13  ;;  %6391 = vmatpush3.bf16.msra.mxu1 %v9066_v3  ;;  %v9241_v13 = vadd.f32 %v3992_v44, %v3854_v9  ;;  %v3880_v9 = vpack.c.bf16 %v9196_v10, %v9196_v10  ;;  %s4986_s8 = smul.f32 0.7788008, %s4844_s26 }
 0x34b   : > { %6392 = vmatprep.subr.bf16.mxu1 %v9071_v31 }
 0x34c   : > { %2826 = vst [vmem:[#allocation3] sm:$0x3] %v2822_v42  ;;  %2827 = vst [vmem:[#allocation4] sm:$0x3] %v2825_v25  ;;  %v2828_v11 = vsub.f32 %v2822_v42, %v2825_v25  ;;  %6371 = vmatpush3.bf16.msra.mxu0 %v9076_v17  ;;  %vm3995_vm8 = vcmp.gt.f32.partialorder %v9241_v13, 1.0 }
 0x34d   : > { %6400 = vmatprep.subr.bf16.mxu0 %v8878_v40  ;;  %v5358_v18 = vsel %vm3995_vm8, 1.0, %v7254_v63 }
 0x34e   : > { %v2829_v5 = vadd.f32 %v8982_v43, %v2828_v11  ;;  %6393 = vmatpush3.bf16.msra.mxu1 %v9083_v35  ;;  %v4002_v12 = vcombine.high %v5358_v18, %v5358_v18 }
 0x34f   : > { %3774 = vmatmul.mubr.bf16.vlgmr.msra.gmra.mrb[88].mxu0 %v3737_v57  ;;  %6422 = vmatprep.subr.bf16.mxu1 %v8883_v33  ;;  %v9264_v57 = vrot.slane %v5358_v18, %v7535_v49 }
 0x350   : > { %v2831_v37 = vadd.f32 %v2830_v55, %v2829_v5  ;;  %6401 = vmatpush3.bf16.msra.mxu0 %v8886_v32  ;;  %3916 = vmatprep.mubr.bf16.mxu0 %v3881_v27  ;;  %v9271_v55 = vrot.slane %v4002_v12, %v7535_v49  ;;  %v3882_v12 = vpack.c.bf16 %v9203_v48, %v9203_v48 }
 0x351   : > { %3814 = vmatmul.mubr.bf16.vlgmr.msra.gmra.mrb[88].mxu1 %v3739_v6  ;;  %6402 = vmatprep.subr.bf16.mxu0 %v8890_v28 }
 0x352   : > { %vm2832_vm7 = vcmp.gt.f32.partialorder %v2831_v37, 1.0  ;;  %v2833_v8 = vmul.f32 0.7788008, %v2831_v37  ;;  %6423 = vmatpush3.bf16.msra.mxu1 %v8894_v29  ;;  %3956 = vmatprep.mubr.bf16.mxu1 %v3883_v47  ;;  %v4018_v44 = vcombine.high %v9271_v55, %v9271_v55 }
 0x353   : > { %v5332_v4 = vsel %vm2832_vm7, 1.0, %v7254_v63  ;;  %6424 = vmatprep.subr.bf16.mxu1 %v8898_v21  ;;  %v2963_v27 = vld [vmem:[#allocation3] sm:$0x3]  ;;  %v2966_v6 = vld [vmem:[#allocation4] sm:$0x3] }
 0x354   : > { %v2834_v58 = vsel %vm2832_vm7, 0.0, %v2833_v8  ;;  %v2838_v22 = vpack.c.bf16 %v5332_v4, %v5332_v4  ;;  %6403 = vmatpush3.bf16.msra.mxu0 %v8901_v60  ;;  %v2964_v14 = vmul.f32 0.7788008, %v2963_v27  ;;  %v2967_v8 = vmul.f32 0.36787945, %v2966_v6 }
 0x355   : > { %2835 = vst [vmem:[#allocation5] sm:$0x3] %v2834_v58  ;;  %6404 = vmatprep.subr.bf16.mxu0 %v8905_v30  ;;  %v4017_v4 = vcombine.high %v9264_v57, %v9264_v57 }
 0x356   : > { %5333 = vst [vmem:[%s7434_s10 + $0xf] sm:$0x1] %v2838_v22  ;;  %6425 = vmatpush3.bf16.msra.mxu1 %v8911_v39 }
 0x357   : > { %6426 = vmatprep.subr.bf16.mxu1 %v8914_v41 }
 0x358   : > { %6405 = vmatpush3.bf16.msra.mxu0 %v8917_v15 }
 0x359   : > { %6406 = vmatprep.subr.bf16.mxu0 %v8922_v2 }
 0x35a   : > { %6427 = vmatpush3.bf16.msra.mxu1 %v8925_v16 }
 0x35b   : > { %6428 = vmatprep.subr.bf16.mxu1 %v8928_v54 }
 0x35c   : > { %6407 = vmatpush3.bf16.msra.mxu0 %v8931_v24 }
 0x35d   : > { %6408 = vmatprep.subr.bf16.mxu0 %v9010_v20 }
 0x35e   : > { %6429 = vmatpush3.bf16.msra.mxu1 %v8936_v26 }
 0x35f   : > { %6430 = vmatprep.subr.bf16.mxu1 %v9014_v34 }
 0x360   : > { %6409 = vmatpush3.bf16.msra.mxu0 %v9021_v23 }
 0x361   : > { %6410 = vmatprep.subr.bf16.mxu0 %v9025_v59 }
 0x362   : > { %6431 = vmatpush3.bf16.msra.mxu1 %v9028_v62  ;;  %v6108_v45 = vpop.f32.mrb[64].mxu0 }
 0x363   : > { %v6109_v1 = vpop.f32.mrb[65].mxu0  ;;  %6432 = vmatprep.subr.bf16.mxu1 %v9031_v7 }
 0x364   : > { %v6130_v42 = vpop.f32.mrb[64].mxu1  ;;  %v6110_v25 = vadd.f32 %v6109_v1, %v6108_v45  ;;  %v6111_v36 = vpop.f32.mrb[66].mxu0  ;;  %6411 = vmatpush3.bf16.msra.mxu0 %v9036_v52  ;;  %v4024_v45 = vpack.c.bf16 %v4017_v4, %v4017_v4  ;;  %v4133_v1 = vstv %s4132_s11  ;;  %s4559_s11 = smul.f32 0.36787945, %s9434_s6 }
 0x365   : > { %v6131_v11 = vpop.f32.mrb[65].mxu1  ;;  %v6112_v50 = vpop.f32.mrb[67].mxu0  ;;  %6412 = vmatprep.subr.bf16.mxu0 %v9044_v56  ;;  %v2973_v36 = vld [vmem:[#allocation5] sm:$0x3] }
 0x366   : > { %v6132_v5 = vadd.f32 %v6131_v11, %v6130_v42  ;;  %v6133_v47 = vpop.f32.mrb[66].mxu1  ;;  %6433 = vmatpush3.bf16.msra.mxu1 %v9047_v0  ;;  %v4134_v11 = vmul.f32 %v9088_v61, %v4133_v1  ;;  %v9357_v1 = vld [vmem:[#allocation12 + $0x40] sm:$0xff]   ;;  %s9521_s29 = sadd.f32 1.0, %s4559_s11 }
 0x367   : > { %v6134_v37 = vpop.f32.mrb[67].mxu1  ;;  %6434 = vmatprep.subr.bf16.mxu1 %v9053_v38 }
 0x368   : > { %v2958_v51 = vadd.f32 %v6132_v5, %v6110_v25  ;;  %6413 = vmatpush3.bf16.msra.mxu0 %v9056_v46  ;;  %v4026_v25 = vpack.c.bf16 %v4018_v44, %v4018_v44  ;;  %v4135_v6 = vadd.f32 %v4134_v11, %v7541_v53  ;;  %s4561_s30 = ssub.f32 %s9513_s21, %s9521_s29 }
 0x369   : > { %6414 = vmatprep.subr.bf16.mxu0 %v9061_v19 }
 0x36a   : > { %v2965_v58 = vadd.f32 %v2964_v14, %v2958_v51  ;;  %v2968_v22 = vadd.f32 %v2967_v8, %v2958_v51  ;;  %6435 = vmatpush3.bf16.msra.mxu1 %v9066_v3 }
 0x36b   : > { %6436 = vmatprep.subr.bf16.mxu1 %v9071_v31 }
 0x36c   : > { %2969 = vst [vmem:[#allocation3] sm:$0x3] %v2965_v58  ;;  %2970 = vst [vmem:[#allocation4] sm:$0x3] %v2968_v22  ;;  %v2971_v18 = vsub.f32 %v2965_v58, %v2968_v22  ;;  %6415 = vmatpush3.bf16.msra.mxu0 %v9076_v17 }
 0x36d   : > { %6444 = vmatprep.subr.bf16.mxu0 %v8878_v40  ;;  %v3996_v40 = vmul.f32 0.7788008, %v9241_v13 }
 0x36e   : > { %v2972_v42 = vadd.f32 %v8982_v43, %v2971_v18  ;;  %6437 = vmatpush3.bf16.msra.mxu1 %v9083_v35 }
 0x36f   : > { %3917 = vmatmul.mubr.bf16.vlgmr.msra.gmra.mrb[92].mxu0 %v3880_v9  ;;  %6466 = vmatprep.subr.bf16.mxu1 %v8883_v33  ;;  %v4023_v9 = vpack.c.bf16 %v9264_v57, %v9264_v57 }
 0x370   : > { %v2974_v10 = vadd.f32 %v2973_v36, %v2972_v42  ;;  %6445 = vmatpush3.bf16.msra.mxu0 %v8886_v32  ;;  %4059 = vmatprep.mubr.bf16.mxu0 %v4024_v45  ;;  %v4276_v42 = vstv %s4275_s13  ;;  %s4702_s13 = smul.f32 0.36787945, %s9521_s29  ;;  %s9598_s29 = sadd.f32 1.0, %s4986_s8 }
 0x371   : > { %3957 = vmatmul.mubr.bf16.vlgmr.msra.gmra.mrb[92].mxu1 %v3882_v12  ;;  %6446 = vmatprep.subr.bf16.mxu0 %v8890_v28  ;;  %v3997_v28 = vsel %vm3995_vm8, 0.0, %v3996_v40  ;;  %v4025_v12 = vpack.c.bf16 %v9271_v55, %v9271_v55  ;;  %v9365_v40 = vld [vmem:[#allocation12] sm:$0xff]   ;;  %v4277_v55 = vmul.f32 %v9088_v61, %v4276_v42  ;;  %s7255_s8 = smov [#allocation13]  }
 0x372   : > { %vm2975_vm9 = vcmp.gt.f32.partialorder %v2974_v10, 1.0  ;;  %v2976_v48 = vmul.f32 0.7788008, %v2974_v10  ;;  %6467 = vmatpush3.bf16.msra.mxu1 %v8894_v29  ;;  %4099 = vmatprep.mubr.bf16.mxu1 %v4026_v25  ;;  %v9309_v29 = vadd.f32 %v4135_v6, %v3997_v28  ;;  %v9362_v10 = vld [vmem:[#allocation12 + $0xc0] sm:$0xff]   ;;  %v9377_v6 = vld [vmem:[#allocation12 + $0xc8] sm:$0xff]   ;;  %s9569_s22 = sadd.f32 1.0, %s4702_s13 }
 0x373   : > { %v5335_v27 = vsel %vm2975_vm9, 1.0, %v7254_v63  ;;  %6468 = vmatprep.subr.bf16.mxu1 %v8898_v21  ;;  %5130 = sst [smem:[#allocation6]] %s9598_s29 }
 0x374   : > { %v2977_v33 = vsel %vm2975_vm9, 0.0, %v2976_v48  ;;  %v2981_v32 = vpack.c.bf16 %v5335_v27, %v5335_v27  ;;  %6447 = vmatpush3.bf16.msra.mxu0 %v8901_v60  ;;  %vm4138_vm10 = vcmp.gt.f32.partialorder %v9309_v29, 1.0  ;;  %v9369_v48 = vld [vmem:[#allocation12 + $0x48] sm:$0xff]   ;;  %s4704_s6 = ssub.f32 %s9563_s14, %s9569_s22 }
 0x375   : > { %2978 = vst [vmem:[#allocation5] sm:$0x3] %v2977_v33  ;;  %6448 = vmatprep.subr.bf16.mxu0 %v8905_v30  ;;  %v5361_v21 = vsel %vm4138_vm10, 1.0, %v7254_v63  ;;  %v9373_v33 = vld [vmem:[#allocation12 + $0x80] sm:$0xff]  }
 0x376   : > { %5336 = vst [vmem:[%s7434_s10 + $0x10] sm:$0x1] %v2981_v32  ;;  %6469 = vmatpush3.bf16.msra.mxu1 %v8911_v39  ;;  %v4145_v30 = vcombine.high %v5361_v21, %v5361_v21 }
 0x377   : > { %6470 = vmatprep.subr.bf16.mxu1 %v8914_v41 }
 0x378   : > { %6449 = vmatpush3.bf16.msra.mxu0 %v8917_v15  ;;  %v9339_v47 = vrot.slane %v4145_v30, %v7535_v49  ;;  %v4278_v30 = vadd.f32 %v4277_v55, %v7541_v53 }
 0x379   : > { %6450 = vmatprep.subr.bf16.mxu0 %v8922_v2 }
 0x37a   : > { %6471 = vmatpush3.bf16.msra.mxu1 %v8925_v16  ;;  %v9332_v16 = vrot.slane %v5361_v21, %v7535_v49  ;;  %v4161_v44 = vcombine.high %v9339_v47, %v9339_v47 }
 0x37b   : > { %6472 = vmatprep.subr.bf16.mxu1 %v8928_v54 }
 0x37c   : > { %6451 = vmatpush3.bf16.msra.mxu0 %v8931_v24  ;;  %v3106_v24 = vld [vmem:[#allocation3] sm:$0x3]  ;;  %v4160_v4 = vcombine.high %v9332_v16, %v9332_v16  ;;  %v4169_v36 = vpack.c.bf16 %v4161_v44, %v4161_v44  ;;  %v3116_v57 = vld [vmem:[#allocation5] sm:$0x3] }
 0x37d   : > { %6452 = vmatprep.subr.bf16.mxu0 %v9010_v20  ;;  %v3107_v14 = vmul.f32 0.7788008, %v3106_v24 }
 0x37e   : > { %6473 = vmatpush3.bf16.msra.mxu1 %v8936_v26  ;;  %v3109_v26 = vld [vmem:[#allocation4] sm:$0x3]  ;;  %v4167_v45 = vpack.c.bf16 %v4160_v4, %v4160_v4 }
 0x37f   : > { %6474 = vmatprep.subr.bf16.mxu1 %v9014_v34  ;;  %v3110_v8 = vmul.f32 0.36787945, %v3109_v26  ;;  %v9401_v26 = vld [vmem:[#allocation12 + $0x58] sm:$0xff]  }
 0x380   : > { %6453 = vmatpush3.bf16.msra.mxu0 %v9021_v23 }
 0x381   : > { %6454 = vmatprep.subr.bf16.mxu0 %v9025_v59 }
 0x382   : > { %6475 = vmatpush3.bf16.msra.mxu1 %v9028_v62  ;;  %v6152_v60 = vpop.f32.mrb[68].mxu0 }
 0x383   : > { %v6153_v39 = vpop.f32.mrb[69].mxu0  ;;  %6476 = vmatprep.subr.bf16.mxu1 %v9031_v7 }
 0x384   : > { %v6174_v41 = vpop.f32.mrb[68].mxu1  ;;  %v6154_v15 = vadd.f32 %v6153_v39, %v6152_v60  ;;  %v6155_v2 = vpop.f32.mrb[70].mxu0  ;;  %6455 = vmatpush3.bf16.msra.mxu0 %v9036_v52  ;;  %v9380_v60 = vld [vmem:[#allocation12 + $0x8] sm:$0xff]   ;;  %v9384_v39 = vld [vmem:[#allocation12 + $0x50] sm:$0xff]  }
 0x385   : > { %v6175_v54 = vpop.f32.mrb[69].mxu1  ;;  %v6156_v13 = vpop.f32.mrb[71].mxu0  ;;  %6456 = vmatprep.subr.bf16.mxu0 %v9044_v56  ;;  %v9393_v2 = vld [vmem:[#allocation12 + $0xd0] sm:$0xff]  }
 0x386   : > { %v6176_v50 = vadd.f32 %v6175_v54, %v6174_v41  ;;  %v6177_v5 = vpop.f32.mrb[70].mxu1  ;;  %6477 = vmatpush3.bf16.msra.mxu1 %v9047_v0  ;;  %v9396_v54 = vld [vmem:[#allocation12 + $0x10] sm:$0xff]   ;;  %v9407_v13 = vld [vmem:[#allocation12 + $0xd8] sm:$0xff]  }
 0x387   : > { %v6178_v37 = vpop.f32.mrb[71].mxu1  ;;  %6478 = vmatprep.subr.bf16.mxu1 %v9053_v38  ;;  %v9415_v5 = vld [vmem:[#allocation12 + $0x98] sm:$0xff]  }
 0x388   : > { %v3101_v51 = vadd.f32 %v6176_v50, %v6154_v15  ;;  %6457 = vmatpush3.bf16.msra.mxu0 %v9056_v46  ;;  %v9390_v15 = vld [vmem:[#allocation12 + $0x88] sm:$0xff]   ;;  %v9410_v50 = vld [vmem:[#allocation12 + $0x18] sm:$0xff]  }
 0x389   : > { %6458 = vmatprep.subr.bf16.mxu0 %v9061_v19 }
 0x38a   : > { %v3108_v58 = vadd.f32 %v3107_v14, %v3101_v51  ;;  %v3111_v22 = vadd.f32 %v3110_v8, %v3101_v51  ;;  %6479 = vmatpush3.bf16.msra.mxu1 %v9066_v3 }
 0x38b   : > { %6480 = vmatprep.subr.bf16.mxu1 %v9071_v31 }
 0x38c   : > { %3112 = vst [vmem:[#allocation3] sm:$0x3] %v3108_v58  ;;  %3113 = vst [vmem:[#allocation4] sm:$0x3] %v3111_v22  ;;  %v3114_v18 = vsub.f32 %v3108_v58, %v3111_v22  ;;  %6459 = vmatpush3.bf16.msra.mxu0 %v9076_v17 }
 0x38d   : > { %6488 = vmatprep.subr.bf16.mxu0 %v9357_v1 }
 0x38e   : > { %v3115_v25 = vadd.f32 %v8982_v43, %v3114_v18  ;;  %6481 = vmatpush3.bf16.msra.mxu1 %v9083_v35  ;;  %v4139_v43 = vmul.f32 0.7788008, %v9309_v29  ;;  %v9404_v29 = vld [vmem:[#allocation12 + $0x90] sm:$0xff]  }
 0x38f   : > { %4060 = vmatmul.mubr.bf16.vlgmr.msra.gmra.mrb[96].mxu0 %v4023_v9  ;;  %6510 = vmatprep.subr.bf16.mxu1 %v9362_v10 }
 0x390   : > { %v3117_v11 = vadd.f32 %v3116_v57, %v3115_v25  ;;  %6489 = vmatpush3.bf16.msra.mxu0 %v9365_v40  ;;  %4202 = vmatprep.mubr.bf16.mxu0 %v4167_v45  ;;  %v4140_v41 = vsel %vm4138_vm10, 0.0, %v4139_v43  ;;  %v9461_v57 = vld [vmem:[%s9930_s3] ss:$0 sm:$0xff] }
 0x391   : > { %4100 = vmatmul.mubr.bf16.vlgmr.msra.gmra.mrb[96].mxu1 %v4025_v12  ;;  %6490 = vmatprep.subr.bf16.mxu0 %v9369_v48  ;;  %v9399_v24 = vadd.f32 %v4278_v30, %v4140_v41  ;;  %v9489_v30 = vld [vmem:[#allocation12 + $0x60] sm:$0xff]  }
 0x392   : > { %vm3118_vm11 = vcmp.gt.f32.partialorder %v3117_v11, 1.0  ;;  %v3119_v27 = vmul.f32 0.7788008, %v3117_v11  ;;  %6511 = vmatpush3.bf16.msra.mxu1 %v9373_v33  ;;  %4242 = vmatprep.mubr.bf16.mxu1 %v4169_v36  ;;  %v9493_v41 = vld [vmem:[#allocation12 + $0xe0] sm:$0xff]  }
 0x393   : > { %v5338_v32 = vsel %vm3118_vm11, 1.0, %v7254_v63  ;;  %6512 = vmatprep.subr.bf16.mxu1 %v9377_v6  ;;  %vm4281_vm12 = vcmp.gt.f32.partialorder %v9399_v24, 1.0  ;;  %v4282_v55 = vmul.f32 0.7788008, %v9399_v24 }
 0x394   : > { %v3120_v28 = vsel %vm3118_vm11, 0.0, %v3119_v27  ;;  %v3124_v21 = vpack.c.bf16 %v5338_v32, %v5338_v32  ;;  %6491 = vmatpush3.bf16.msra.mxu0 %v9380_v60  ;;  %v5364_v37 = vsel %vm4281_vm12, 1.0, %v7254_v63 }
 0x395   : > { %3121 = vst [vmem:[#allocation5] sm:$0x3] %v3120_v28  ;;  %6492 = vmatprep.subr.bf16.mxu0 %v9384_v39  ;;  %v9432_v58 = vrot.slane %v5364_v37, %v7535_v49  ;;  %v4283_v28 = vsel %vm4281_vm12, 0.0, %v4282_v55  ;;  %v9546_v55 = vld [vmem:[#allocation12 + $0xb0] sm:$0xff]  }
 0x396   : > { %5339 = vst [vmem:[%s7434_s10 + $0x11] sm:$0x1] %v3124_v21  ;;  %6513 = vmatpush3.bf16.msra.mxu1 %v9390_v15 }
 0x397   : > { %6514 = vmatprep.subr.bf16.mxu1 %v9393_v2  ;;  %v4303_v42 = vcombine.high %v9432_v58, %v9432_v58 }
 0x398   : > { %6493 = vmatpush3.bf16.msra.mxu0 %v9396_v54 }
 0x399   : > { %6494 = vmatprep.subr.bf16.mxu0 %v9401_v26  ;;  %v4310_v36 = vpack.c.bf16 %v4303_v42, %v4303_v42 }
 0x39a   : > { %6515 = vmatpush3.bf16.msra.mxu1 %v9404_v29 }
 0x39b   : > { %6516 = vmatprep.subr.bf16.mxu1 %v9407_v13 }
 0x39c   : > { %6495 = vmatpush3.bf16.msra.mxu0 %v9410_v50  ;;  %v3259_v11 = vld [vmem:[#allocation5] sm:$0x3] }
 0x39d   : > { %6496 = vmatprep.subr.bf16.mxu0 %v9010_v20  ;;  %v4288_v20 = vcombine.high %v5364_v37, %v5364_v37  ;;  %v9500_v37 = vld [vmem:[#allocation12 + $0x20] sm:$0xff]  }
 0x39e   : > { %6517 = vmatpush3.bf16.msra.mxu1 %v9415_v5 }
 0x39f   : > { %6518 = vmatprep.subr.bf16.mxu1 %v9014_v34  ;;  %v9439_v9 = vrot.slane %v4288_v20, %v7535_v49  ;;  %v9507_v20 = vld [vmem:[#allocation12 + $0xa0] sm:$0xff]  }
 0x3a0   : > { %6497 = vmatpush3.bf16.msra.mxu0 %v9021_v23 }
 0x3a1   : > { %6498 = vmatprep.subr.bf16.mxu0 %v9025_v59  ;;  %v3249_v59 = vld [vmem:[#allocation3] sm:$0x3] }
 0x3a2   : > { %6519 = vmatpush3.bf16.msra.mxu1 %v9028_v62  ;;  %v6196_v51 = vpop.f32.mrb[72].mxu0  ;;  %v3252_v62 = vld [vmem:[#allocation4] sm:$0x3]  ;;  %v3250_v45 = vmul.f32 0.7788008, %v3249_v59 }
 0x3a3   : > { %v6197_v14 = vpop.f32.mrb[73].mxu0  ;;  %6520 = vmatprep.subr.bf16.mxu1 %v9031_v7  ;;  %v3253_v12 = vmul.f32 0.36787945, %v3252_v62 }
 0x3a4   : > { %v6218_v34 = vpop.f32.mrb[72].mxu1  ;;  %v6198_v8 = vadd.f32 %v6197_v14, %v6196_v51  ;;  %v6199_v4 = vpop.f32.mrb[74].mxu0  ;;  %6499 = vmatpush3.bf16.msra.mxu0 %v9036_v52  ;;  %v9504_v51 = vld [vmem:[#allocation12 + $0x68] sm:$0xff]  }
 0x3a5   : > { %v6219_v23 = vpop.f32.mrb[73].mxu1  ;;  %v6200_v22 = vpop.f32.mrb[75].mxu0  ;;  %6500 = vmatprep.subr.bf16.mxu0 %v9044_v56  ;;  %v9510_v4 = vld [vmem:[#allocation12 + $0xe8] sm:$0xff]  }
 0x3a6   : > { %v6220_v7 = vadd.f32 %v6219_v23, %v6218_v34  ;;  %v6221_v44 = vpop.f32.mrb[74].mxu1  ;;  %6521 = vmatpush3.bf16.msra.mxu1 %v9047_v0  ;;  %v4304_v0 = vcombine.high %v9439_v9, %v9439_v9  ;;  %v9515_v22 = vld [vmem:[#allocation12 + $0x28] sm:$0xff]  }
 0x3a7   : > { %v6222_v52 = vpop.f32.mrb[75].mxu1  ;;  %6522 = vmatprep.subr.bf16.mxu1 %v9053_v38  ;;  %v4166_v38 = vpack.c.bf16 %v9332_v16, %v9332_v16 }
 0x3a8   : > { %v3244_v18 = vadd.f32 %v6220_v7, %v6198_v8  ;;  %6501 = vmatpush3.bf16.msra.mxu0 %v9056_v46  ;;  %v4312_v16 = vpack.c.bf16 %v4304_v0, %v4304_v0 }
 0x3a9   : > { %6502 = vmatprep.subr.bf16.mxu0 %v9061_v19  ;;  %v4168_v19 = vpack.c.bf16 %v9339_v47, %v9339_v47 }
 0x3aa   : > { %v3251_v56 = vadd.f32 %v3250_v45, %v3244_v18  ;;  %v3254_v25 = vadd.f32 %v3253_v12, %v3244_v18  ;;  %6523 = vmatpush3.bf16.msra.mxu1 %v9066_v3  ;;  %v4419_v3 = vstv %s4418_s9  ;;  %v9523_v12 = vld [vmem:[#allocation12 + $0x70] sm:$0xff]   ;;  %s4845_s9 = smul.f32 0.36787945, %s9569_s22  ;;  %s5387_s22 = sshll.u32 %s7236_s18, 9 }
 0x3ab   : > { %6524 = vmatprep.subr.bf16.mxu1 %v9071_v31  ;;  %v4420_v47 = vmul.f32 %v9088_v61, %v4419_v3  ;;  %s9881_s18 = scalar_lea.sflag [#allocation9], %s235_s7 }
 0x3ac   : > { %3255 = vst [vmem:[#allocation3] sm:$0x3] %v3251_v56  ;;  %3256 = vst [vmem:[#allocation4] sm:$0x3] %v3254_v25  ;;  %v3257_v46 = vsub.f32 %v3251_v56, %v3254_v25  ;;  %6503 = vmatpush3.bf16.msra.mxu0 %v9076_v17  ;;  %v9526_v25 = vld [vmem:[#allocation12 + $0xa8] sm:$0xff]   ;;  %s4846_s5 = sadd.f32 1.0, %s4845_s9 }
 0x3ad   : > { %6532 = vmatprep.subr.bf16.mxu0 %v9357_v1  ;;  %v4421_v61 = vadd.f32 %v4420_v47, %v7541_v53 }
 0x3ae   : > { %v3258_v31 = vadd.f32 %v9461_v57, %v3257_v46  ;;  %6525 = vmatpush3.bf16.msra.mxu1 %v9083_v35  ;;  %v9532_v46 = vld [vmem:[#allocation12 + $0xf0] sm:$0xff]   ;;  %s4847_s11 = ssub.f32 %s4844_s26, %s4846_s5  ;;  %s4988_s21 = smul.f32 0.36787945, %s4846_s5 }
 0x3af   : > { %4203 = vmatmul.mubr.bf16.vlgmr.msra.gmra.mrb[100].mxu0 %v4166_v38  ;;  %6554 = vmatprep.subr.bf16.mxu1 %v9362_v10  ;;  %v9482_v21 = vadd.f32 %v4421_v61, %v4283_v28  ;;  %v9557_v61 = vld [vmem:[#allocation12 + $0x38] sm:$0xff]   ;;  %s9874_s26 = scalar_lea.hbm %s9931_s4, %s5387_s22  ;;  %s7158_s5 = scalar_lea.vmem %s9876_s24, 512 }
 0x3b0   : > { %v3260_v17 = vadd.f32 %v3259_v11, %v3258_v31  ;;  %6533 = vmatpush3.bf16.msra.mxu0 %v9365_v40  ;;  %4345 = vmatprep.mubr.bf16.mxu0 %v4310_v36  ;;  %v9535_v31 = vld [vmem:[#allocation12 + $0x30] sm:$0xff]   ;;  %v9540_v11 = vld [vmem:[#allocation12 + $0x78] sm:$0xff]   ;;  %p7159_p1 = scmp.ne.s32.totalorder %s9876_s24, %s7158_s5 }
 0x3b1   : > { %4243 = vmatmul.mubr.bf16.vlgmr.msra.gmra.mrb[100].mxu1 %v4168_v19  ;;  %6534 = vmatprep.subr.bf16.mxu0 %v9369_v48  ;;  %vm4424_vm14 = vcmp.gt.f32.partialorder %v9482_v21, 1.0 }
 0x3b2   : > { %vm3261_vm13 = vcmp.gt.f32.partialorder %v3260_v17, 1.0  ;;  %v3262_v43 = vmul.f32 0.7788008, %v3260_v17  ;;  %6555 = vmatpush3.bf16.msra.mxu1 %v9373_v33  ;;  %4385 = vmatprep.mubr.bf16.mxu1 %v4312_v16  ;;  %v5367_v24 = vsel %vm4424_vm14, 1.0, %v7254_v63  ;;  %p7160_p8 = pnand %p7159_p1, %p9944_p4 }
 0x3b3   : > { %v5341_v35 = vsel %vm3261_vm13, 1.0, %v7254_v63  ;;  %6556 = vmatprep.subr.bf16.mxu1 %v9377_v6  ;;  %v4431_v34 = vcombine.high %v5367_v24, %v5367_v24  ;;  %v9519_v7 = vrot.slane %v5367_v24, %v7535_v49  ;;  %v3392_v52 = vld [vmem:[#allocation3] sm:$0x3]  ;;  %v3395_v18 = vld [vmem:[#allocation4] sm:$0x3]  ;;  %v4311_v24 = vpack.c.bf16 %v9439_v9, %v9439_v9 }
 0x3b4   : > { %v3263_v27 = vsel %vm3261_vm13, 0.0, %v3262_v43  ;;  %v3267_v32 = vpack.c.bf16 %v5341_v35, %v5341_v35  ;;  %6535 = vmatpush3.bf16.msra.mxu0 %v9380_v60  ;;  %v3393_v19 = vmul.f32 0.7788008, %v3392_v52  ;;  %v3396_v3 = vmul.f32 0.36787945, %v3395_v18  ;;  %v9552_v35 = vld [vmem:[#allocation12 + $0xf8] sm:$0xff]   ;;  %p7161_p10 = pneg %p7160_p8 }
 0x3b5   : > { %3264 = vst [vmem:[#allocation5] sm:$0x3] %v3263_v27  ;;  %6536 = vmatprep.subr.bf16.mxu0 %v9384_v39  ;;  %v9530_v0 = vrot.slane %v4431_v34, %v7535_v49  ;;  %v4446_v16 = vcombine.high %v9519_v7, %v9519_v7  ;;  %v4309_v27 = vpack.c.bf16 %v9432_v58, %v9432_v58  ;;  %v9566_v58 = vld [vmem:[#allocation12 + $0xb8] sm:$0xff]  }
 0x3b6   : > { %5342 = vst [vmem:[%s7434_s10 + $0x12] sm:$0x1] %v3267_v32  ;;  %6557 = vmatpush3.bf16.msra.mxu1 %v9390_v15 }
 0x3b7   : > { %6558 = vmatprep.subr.bf16.mxu1 %v9393_v2  ;;  %v4447_v43 = vcombine.high %v9530_v0, %v9530_v0  ;;  %v4453_v28 = vpack.c.bf16 %v4446_v16, %v4446_v16 }
 0x3b8   : > { %6537 = vmatpush3.bf16.msra.mxu0 %v9396_v54 }
 0x3b9   : > { %6538 = vmatprep.subr.bf16.mxu0 %v9401_v26 }
 0x3ba   : > { %6559 = vmatpush3.bf16.msra.mxu1 %v9404_v29 }
 0x3bb   : > { %6560 = vmatprep.subr.bf16.mxu1 %v9407_v13 }
 0x3bc   : > { %6539 = vmatpush3.bf16.msra.mxu0 %v9410_v50 }
 0x3bd   : > { %6540 = vmatprep.subr.bf16.mxu0 %v9489_v30 }
 0x3be   : > { %6561 = vmatpush3.bf16.msra.mxu1 %v9415_v5 }
 0x3bf   : > { %6562 = vmatprep.subr.bf16.mxu1 %v9493_v41 }
 0x3c0   : > { %6541 = vmatpush3.bf16.msra.mxu0 %v9500_v37 }
 0x3c1   : > { %6542 = vmatprep.subr.bf16.mxu0 %v9504_v51 }
 0x3c2   : > { %6563 = vmatpush3.bf16.msra.mxu1 %v9507_v20  ;;  %v6240_v14 = vpop.f32.mrb[76].mxu0 }
 0x3c3   : > { %v6241_v8 = vpop.f32.mrb[77].mxu0  ;;  %6564 = vmatprep.subr.bf16.mxu1 %v9510_v4 }
 0x3c4   : > { %v6262_v23 = vpop.f32.mrb[76].mxu1  ;;  %v6242_v59 = vadd.f32 %v6241_v8, %v6240_v14  ;;  %v6243_v62 = vpop.f32.mrb[78].mxu0  ;;  %6543 = vmatpush3.bf16.msra.mxu0 %v9515_v22  ;;  %v4562_v14 = vstv %s4561_s30  ;;  %v4455_v8 = vpack.c.bf16 %v4447_v43, %v4447_v43  ;;  %s9601_s30 = sadd.f32 1.0, %s4988_s21  ;;  %v4848_v43 = vstv %s4847_s11  ;;  %s7162_s11 = sshll.u32 %s7255_s8, 4  ;;  %s7163_s11 = int_to_ptr.vmem [resolvable:$false] %s7162_s11 }
 0x3c5   : > { %v6263_v44 = vpop.f32.mrb[77].mxu1  ;;  %v6244_v45 = vpop.f32.mrb[79].mxu0  ;;  %6544 = vmatprep.subr.bf16.mxu0 %v9523_v12  ;;  %s7164_s21 = scalar_lea.vmem %s7163_s11, 1024  ;;  %p7165_p11 = scmp.lt.s32.totalorder %s9876_s24, %s7163_s11 }
 0x3c6   : > { %v6264_v42 = vadd.f32 %v6263_v44, %v6262_v23  ;;  %v6265_v56 = vpop.f32.mrb[78].mxu1  ;;  %6565 = vmatpush3.bf16.msra.mxu1 %v9526_v25  ;;  %v3402_v23 = vld [vmem:[#allocation5] sm:$0x3]  ;;  %v4425_v44 = vmul.f32 0.7788008, %v9482_v21  ;;  %5132 = sst [smem:[#allocation6 + $0x1]] %s9601_s30  ;;  %p7166_p3 = scmp.lt.s32.totalorder %s7164_s21, %s7158_s5 }
 0x3c7   : > { %v6266_v38 = vpop.f32.mrb[79].mxu1  ;;  %6566 = vmatprep.subr.bf16.mxu1 %v9532_v46  ;;  %s4990_s12 = ssub.f32 %s9598_s29, %s9601_s30 }
 0x3c8   : > { %v3387_v36 = vadd.f32 %v6264_v42, %v6242_v59  ;;  %6545 = vmatpush3.bf16.msra.mxu0 %v9535_v31  ;;  %v9573_v59 = vld [vmem:[#allocation7] sm:$0xff]  ;;  %v4426_v38 = vsel %vm4424_vm14, 0.0, %v4425_v44  ;;  %p7167_p5 = por %p7166_p3, %p7165_p11 }
 0x3c9   : > { %6546 = vmatprep.subr.bf16.mxu0 %v9540_v11  ;;  %v4563_v62 = vmul.f32 %v9573_v59, %v4562_v14 }
 0x3ca   : > { %v3394_v17 = vadd.f32 %v3393_v19, %v3387_v36  ;;  %v3397_v47 = vadd.f32 %v3396_v3, %v3387_v36  ;;  %6567 = vmatpush3.bf16.msra.mxu1 %v9546_v55  ;;  %v4705_v36 = vstv %s4704_s6  ;;  %p7168_p6 = pnand %p7167_p5, %p7161_p10 }
 0x3cb   : > { %6568 = vmatprep.subr.bf16.mxu1 %v9552_v35  ;;  %v4564_v56 = vadd.f32 %v4563_v62, %v7541_v53  ;;  %v4706_v3 = vmul.f32 %v9573_v59, %v4705_v36 }
 0x3cc   : > { %3398 = vst [vmem:[#allocation3] sm:$0x3] %v3394_v17  ;;  %3399 = vst [vmem:[#allocation4] sm:$0x3] %v3397_v47  ;;  %v3400_v32 = vsub.f32 %v3394_v17, %v3397_v47  ;;  %6547 = vmatpush3.bf16.msra.mxu0 %v9557_v61 }
 0x3cd   : > { %6576 = vmatprep.subr.bf16.mxu0 %v9357_v1  ;;  %v4566_v19 = vadd.f32 %v4564_v56, %v4426_v38  ;;  %v4707_v16 = vadd.f32 %v4706_v3, %v7541_v53 }
 0x3ce   : > { %v3401_v34 = vadd.f32 %v9461_v57, %v3400_v32  ;;  %6569 = vmatpush3.bf16.msra.mxu1 %v9566_v58 }
 0x3cf   : > { %4346 = vmatmul.mubr.bf16.vlgmr.msra.gmra.mrb[104].mxu0 %v4309_v27  ;;  %6598 = vmatprep.subr.bf16.mxu1 %v9362_v10  ;;  %v4568_v21 = vmul.f32 0.7788008, %v4566_v19  ;;  %vm4567_vm0 = vcmp.gt.f32.partialorder %v4566_v19, 1.0 }
 0x3d0   : > { %v3403_v9 = vadd.f32 %v3402_v23, %v3401_v34  ;;  %6577 = vmatpush3.bf16.msra.mxu0 %v9365_v40  ;;  %4488 = vmatprep.mubr.bf16.mxu0 %v4453_v28  ;;  %v5370_v47 = vsel %vm4567_vm0, 1.0, %v7254_v63 }
 0x3d1   : > { %4386 = vmatmul.mubr.bf16.vlgmr.msra.gmra.mrb[104].mxu1 %v4311_v24  ;;  %6578 = vmatprep.subr.bf16.mxu0 %v9369_v48  ;;  %v4569_v17 = vsel %vm4567_vm0, 0.0, %v4568_v21  ;;  %v4574_v28 = vcombine.high %v5370_v47, %v5370_v47  ;;  %v4849_v24 = vmul.f32 %v9573_v59, %v4848_v43  ;;  %v9618_v34 = vrot.slane %v5370_v47, %v7535_v49 }
 0x3d2   : > { %vm3404_vm15 = vcmp.gt.f32.partialorder %v3403_v9, 1.0  ;;  %v3405_v52 = vmul.f32 0.7788008, %v3403_v9  ;;  %6599 = vmatpush3.bf16.msra.mxu1 %v9373_v33  ;;  %4528 = vmatprep.mubr.bf16.mxu1 %v4455_v8  ;;  %v9612_v27 = vadd.f32 %v4707_v16, %v4569_v17  ;;  %v4991_v43 = vstv %s4990_s12 }
 0x3d3   : > { %v5344_v18 = vsel %vm3404_vm15, 1.0, %v7254_v63  ;;  %6600 = vmatprep.subr.bf16.mxu1 %v9377_v6  ;;  %v9627_v38 = vrot.slane %v4574_v28, %v7535_v49  ;;  %v4850_v36 = vadd.f32 %v4849_v24, %v7541_v53  ;;  %v4589_v3 = vcombine.high %v9618_v34, %v9618_v34 }
 0x3d4   : > { %v3406_v45 = vsel %vm3404_vm15, 0.0, %v3405_v52  ;;  %v3410_v42 = vpack.c.bf16 %v5344_v18, %v5344_v18  ;;  %6579 = vmatpush3.bf16.msra.mxu0 %v9380_v60  ;;  %v4711_v8 = vmul.f32 0.7788008, %v9612_v27  ;;  %v3535_v52 = vld [vmem:[#allocation3] sm:$0x3]  ;;  %vm4710_vm1 = vcmp.gt.f32.partialorder %v9612_v27, 1.0 }
 0x3d5   : > { %3407 = vst [vmem:[#allocation5] sm:$0x3] %v3406_v45  ;;  %6580 = vmatprep.subr.bf16.mxu0 %v9384_v39  ;;  %v3538_v18 = vld [vmem:[#allocation4] sm:$0x3]  ;;  %v3536_v17 = vmul.f32 0.7788008, %v3535_v52  ;;  %v4590_v24 = vcombine.high %v9627_v38, %v9627_v38  ;;  %v4454_v52 = vpack.c.bf16 %v9530_v0, %v9530_v0 }
 0x3d6   : > { %5345 = vst [vmem:[%s7434_s10 + $0x13] sm:$0x1] %v3410_v42  ;;  %6601 = vmatpush3.bf16.msra.mxu1 %v9390_v15  ;;  %v4712_v21 = vsel %vm4710_vm1, 0.0, %v4711_v8  ;;  %v3539_v47 = vmul.f32 0.36787945, %v3538_v18  ;;  %v4452_v8 = vpack.c.bf16 %v9519_v7, %v9519_v7 }
 0x3d7   : > { %6602 = vmatprep.subr.bf16.mxu1 %v9393_v2  ;;  %v4598_v7 = vpack.c.bf16 %v4590_v24, %v4590_v24 }
 0x3d8   : > { %6581 = vmatpush3.bf16.msra.mxu0 %v9396_v54 }
 0x3d9   : > { %6582 = vmatprep.subr.bf16.mxu0 %v9401_v26 }
 0x3da   : > { %6603 = vmatpush3.bf16.msra.mxu1 %v9404_v29 }
 0x3db   : > { %6604 = vmatprep.subr.bf16.mxu1 %v9407_v13 }
 0x3dc   : > { %6583 = vmatpush3.bf16.msra.mxu0 %v9410_v50 }
 0x3dd   : > { %6584 = vmatprep.subr.bf16.mxu0 %v9489_v30 }
 0x3de   : > { %6605 = vmatpush3.bf16.msra.mxu1 %v9415_v5 }
 0x3df   : > { %6606 = vmatprep.subr.bf16.mxu1 %v9493_v41 }
 0x3e0   : > { %6585 = vmatpush3.bf16.msra.mxu0 %v9500_v37 }
 0x3e1   : > { %6586 = vmatprep.subr.bf16.mxu0 %v9504_v51 }
 0x3e2   : > { %6607 = vmatpush3.bf16.msra.mxu1 %v9507_v20  ;;  %v6284_v32 = vpop.f32.mrb[80].mxu0 }
 0x3e3   : > { %v6285_v14 = vpop.f32.mrb[81].mxu0  ;;  %6608 = vmatprep.subr.bf16.mxu1 %v9510_v4 }
 0x3e4   : > { %v6306_v23 = vpop.f32.mrb[80].mxu1  ;;  %v6286_v9 = vadd.f32 %v6285_v14, %v6284_v32  ;;  %v6287_v62 = vpop.f32.mrb[82].mxu0  ;;  %6587 = vmatpush3.bf16.msra.mxu0 %v9515_v22  ;;  %v9641_v14 = vadd.f32 %v4850_v36, %v4712_v21 }
 0x3e5   : > { %v6307_v44 = vpop.f32.mrb[81].mxu1  ;;  %v6288_v45 = vpop.f32.mrb[83].mxu0  ;;  %6588 = vmatprep.subr.bf16.mxu0 %v9523_v12  ;;  %v4596_v62 = vpack.c.bf16 %v4589_v3, %v4589_v3 }
 0x3e6   : > { %v6308_v42 = vadd.f32 %v6307_v44, %v6306_v23  ;;  %v6309_v56 = vpop.f32.mrb[82].mxu1  ;;  %6609 = vmatpush3.bf16.msra.mxu1 %v9526_v25  ;;  %v4992_v23 = vmul.f32 %v9573_v59, %v4991_v43  ;;  %v4854_v44 = vmul.f32 0.7788008, %v9641_v14  ;;  %v3545_v45 = vld [vmem:[#allocation5] sm:$0x3]  ;;  %vm4853_vm2 = vcmp.gt.f32.partialorder %v9641_v14, 1.0 }
 0x3e7   : > { %v6310_v19 = vpop.f32.mrb[83].mxu1  ;;  %6610 = vmatprep.subr.bf16.mxu1 %v9532_v46 }
 0x3e8   : > { %v3530_v16 = vadd.f32 %v6308_v42, %v6286_v9  ;;  %6589 = vmatpush3.bf16.msra.mxu0 %v9535_v31  ;;  %v4993_v59 = vadd.f32 %v4992_v23, %v7541_v53  ;;  %v4855_v0 = vsel %vm4853_vm2, 0.0, %v4854_v44 }
 0x3e9   : > { %6590 = vmatprep.subr.bf16.mxu0 %v9540_v11 }
 0x3ea   : > { %v3537_v32 = vadd.f32 %v3536_v17, %v3530_v16  ;;  %v3540_v28 = vadd.f32 %v3539_v47, %v3530_v16  ;;  %6611 = vmatpush3.bf16.msra.mxu1 %v9546_v55  ;;  %v9664_v53 = vadd.f32 %v4993_v59, %v4855_v0  ;;  %v5373_v17 = vsel %vm4710_vm1, 1.0, %v7254_v63 }
 0x3eb   : > { %6612 = vmatprep.subr.bf16.mxu1 %v9552_v35  ;;  %v4717_v43 = vcombine.high %v5373_v17, %v5373_v17  ;;  %v9692_v23 = vrot.slane %v5373_v17, %v7535_v49 }
 0x3ec   : > { %v3543_v9 = vsub.f32 %v3537_v32, %v3540_v28  ;;  %3541 = vst [vmem:[#allocation3] sm:$0x3] %v3537_v32  ;;  %3542 = vst [vmem:[#allocation4] sm:$0x3] %v3540_v28  ;;  %6591 = vmatpush3.bf16.msra.mxu0 %v9557_v61  ;;  %v4997_v21 = vmul.f32 0.7788008, %v9664_v53 }
 0x3ed   : > { %6620 = vmatprep.subr.bf16.mxu0 %v9357_v1  ;;  %vm4996_vm4 = vcmp.gt.f32.partialorder %v9664_v53, 1.0 }
 0x3ee   : > { %v3544_v18 = vadd.f32 %v9461_v57, %v3543_v9  ;;  %6613 = vmatpush3.bf16.msra.mxu1 %v9566_v58  ;;  %v4998_v16 = vsel %vm4996_vm4, 0.0, %v4997_v21  ;;  %v4595_v21 = vpack.c.bf16 %v9618_v34, %v9618_v34 }
 0x3ef   : > { %4489 = vmatmul.mubr.bf16.vlgmr.msra.gmra.mrb[108].mxu0 %v4452_v8  ;;  %6642 = vmatprep.subr.bf16.mxu1 %v9362_v10  ;;  %4999 = vst [vmem:[#allocation2] sm:$0xff] %v4998_v16 }
 0x3f0   : > { %v3546_v42 = vadd.f32 %v3545_v45, %v3544_v18  ;;  %6621 = vmatpush3.bf16.msra.mxu0 %v9365_v40  ;;  %4631 = vmatprep.mubr.bf16.mxu0 %v4596_v62 }
 0x3f1   : > { %4529 = vmatmul.mubr.bf16.vlgmr.msra.gmra.mrb[108].mxu1 %v4454_v52  ;;  %6622 = vmatprep.subr.bf16.mxu0 %v9369_v48 }
 0x3f2   : > { %vm3547_vm3 = vcmp.gt.f32.partialorder %v3546_v42, 1.0  ;;  %v3548_v56 = vmul.f32 0.7788008, %v3546_v42  ;;  %6643 = vmatpush3.bf16.msra.mxu1 %v9373_v33  ;;  %4671 = vmatprep.mubr.bf16.mxu1 %v4598_v7  ;;  %v9697_v7 = vrot.slane %v4717_v43, %v7535_v49 }
 0x3f3   : > { %v5347_v36 = vsel %vm3547_vm3, 1.0, %v7254_v63  ;;  %6644 = vmatprep.subr.bf16.mxu1 %v9377_v6  ;;  %v3678_v9 = vld [vmem:[#allocation3] sm:$0x3]  ;;  %v3681_v62 = vld [vmem:[#allocation4] sm:$0x3] }
 0x3f4   : > { %v3549_v19 = vsel %vm3547_vm3, 0.0, %v3548_v56  ;;  %v3553_v3 = vpack.c.bf16 %v5347_v36, %v5347_v36  ;;  %6623 = vmatpush3.bf16.msra.mxu0 %v9380_v60  ;;  %v3679_v42 = vmul.f32 0.7788008, %v3678_v9  ;;  %v3682_v0 = vmul.f32 0.36787945, %v3681_v62 }
 0x3f5   : > { %3550 = vst [vmem:[#allocation5] sm:$0x3] %v3549_v19  ;;  %6624 = vmatprep.subr.bf16.mxu0 %v9384_v39  ;;  %v4732_v56 = vcombine.high %v9692_v23, %v9692_v23  ;;  %v5376_v9 = vsel %vm4853_vm2, 1.0, %v7254_v63 }
 0x3f6   : > { %5348 = vst [vmem:[%s7434_s10 + $0x14] sm:$0x1] %v3553_v3  ;;  %6645 = vmatpush3.bf16.msra.mxu1 %v9390_v15  ;;  %v4733_v3 = vcombine.high %v9697_v7, %v9697_v7 }
 0x3f7   : > { %6646 = vmatprep.subr.bf16.mxu1 %v9393_v2  ;;  %v4739_v17 = vpack.c.bf16 %v4732_v56, %v4732_v56 }
 0x3f8   : > { %6625 = vmatpush3.bf16.msra.mxu0 %v9396_v54 }
 0x3f9   : > { %6626 = vmatprep.subr.bf16.mxu0 %v9401_v26 }
 0x3fa   : > { %6647 = vmatpush3.bf16.msra.mxu1 %v9404_v29 }
 0x3fb   : > { %6648 = vmatprep.subr.bf16.mxu1 %v9407_v13 }
 0x3fc   : > { %6627 = vmatpush3.bf16.msra.mxu0 %v9410_v50 }
 0x3fd   : > { %6628 = vmatprep.subr.bf16.mxu0 %v9489_v30 }
 0x3fe   : > { %6649 = vmatpush3.bf16.msra.mxu1 %v9415_v5 }
 0x3ff   : > { %6650 = vmatprep.subr.bf16.mxu1 %v9493_v41 }
 0x400   : > { %6629 = vmatpush3.bf16.msra.mxu0 %v9500_v37 }
 0x401   : > { %6630 = vmatprep.subr.bf16.mxu0 %v9504_v51 }
 0x402   : > { %6651 = vmatpush3.bf16.msra.mxu1 %v9507_v20  ;;  %v6328_v47 = vpop.f32.mrb[84].mxu0 }
 0x403   : > { %v6329_v32 = vpop.f32.mrb[85].mxu0  ;;  %6652 = vmatprep.subr.bf16.mxu1 %v9510_v4 }
 0x404   : > { %v6350_v28 = vpop.f32.mrb[84].mxu1  ;;  %v6330_v24 = vadd.f32 %v6329_v32, %v6328_v47  ;;  %v6331_v8 = vpop.f32.mrb[86].mxu0  ;;  %6631 = vmatpush3.bf16.msra.mxu0 %v9515_v22  ;;  %v4597_v47 = vpack.c.bf16 %v9627_v38, %v9627_v38  ;;  %v4741_v32 = vpack.c.bf16 %v4733_v3, %v4733_v3 }
 0x405   : > { %v6351_v27 = vpop.f32.mrb[85].mxu1  ;;  %v6332_v44 = vpop.f32.mrb[87].mxu0  ;;  %6632 = vmatprep.subr.bf16.mxu0 %v9523_v12 }
 0x406   : > { %v6352_v52 = vadd.f32 %v6351_v27, %v6350_v28  ;;  %v6353_v18 = vpop.f32.mrb[86].mxu1  ;;  %6653 = vmatpush3.bf16.msra.mxu1 %v9526_v25  ;;  %v3688_v28 = vld [vmem:[#allocation5] sm:$0x3]  ;;  %v4860_v44 = vcombine.high %v5376_v9, %v5376_v9 }
 0x407   : > { %v6354_v45 = vpop.f32.mrb[87].mxu1  ;;  %6654 = vmatprep.subr.bf16.mxu1 %v9532_v46 }
 0x408   : > { %v3673_v59 = vadd.f32 %v6352_v52, %v6330_v24  ;;  %6633 = vmatpush3.bf16.msra.mxu0 %v9535_v31 }
 0x409   : > { %6634 = vmatprep.subr.bf16.mxu0 %v9540_v11 }
 0x40a   : > { %v3680_v36 = vadd.f32 %v3679_v42, %v3673_v59  ;;  %v3683_v19 = vadd.f32 %v3682_v0, %v3673_v59  ;;  %6655 = vmatpush3.bf16.msra.mxu1 %v9546_v55  ;;  %v9744_v42 = vrot.slane %v5376_v9, %v7535_v49  ;;  %v4740_v9 = vpack.c.bf16 %v9697_v7, %v9697_v7 }
 0x40b   : > { %6656 = vmatprep.subr.bf16.mxu1 %v9552_v35 }
 0x40c   : > { %v3686_v16 = vsub.f32 %v3680_v36, %v3683_v19  ;;  %3684 = vst [vmem:[#allocation3] sm:$0x3] %v3680_v36  ;;  %3685 = vst [vmem:[#allocation4] sm:$0x3] %v3683_v19  ;;  %6635 = vmatpush3.bf16.msra.mxu0 %v9557_v61 }
 0x40d   : > { %6664 = vmatprep.subr.bf16.mxu0 %v9357_v1 }
 0x40e   : > { %v3687_v43 = vadd.f32 %v9461_v57, %v3686_v16  ;;  %6657 = vmatpush3.bf16.msra.mxu1 %v9566_v58 }
 0x40f   : > { %4632 = vmatmul.mubr.bf16.vlgmr.msra.gmra.mrb[112].mxu0 %v4595_v21  ;;  %6686 = vmatprep.subr.bf16.mxu1 %v9362_v10  ;;  %v9749_v21 = vrot.slane %v4860_v44, %v7535_v49 }
 0x410   : > { %v3689_v34 = vadd.f32 %v3688_v28, %v3687_v43  ;;  %6665 = vmatpush3.bf16.msra.mxu0 %v9365_v40  ;;  %4774 = vmatprep.mubr.bf16.mxu0 %v4739_v17 }
 0x411   : > { %4672 = vmatmul.mubr.bf16.vlgmr.msra.gmra.mrb[112].mxu1 %v4597_v47  ;;  %6666 = vmatprep.subr.bf16.mxu0 %v9369_v48 }
 0x412   : > { %vm3690_vm5 = vcmp.gt.f32.partialorder %v3689_v34, 1.0  ;;  %v3691_v38 = vmul.f32 0.7788008, %v3689_v34  ;;  %6687 = vmatpush3.bf16.msra.mxu1 %v9373_v33  ;;  %4814 = vmatprep.mubr.bf16.mxu1 %v4741_v32  ;;  %v4875_v32 = vcombine.high %v9744_v42, %v9744_v42 }
 0x413   : > { %v5350_v24 = vsel %vm3690_vm5, 1.0, %v7254_v63  ;;  %6688 = vmatprep.subr.bf16.mxu1 %v9377_v6  ;;  %v3821_v0 = vld [vmem:[#allocation3] sm:$0x3]  ;;  %v3824_v56 = vld [vmem:[#allocation4] sm:$0x3] }
 0x414   : > { %v3692_v8 = vsel %vm3690_vm5, 0.0, %v3691_v38  ;;  %v3696_v27 = vpack.c.bf16 %v5350_v24, %v5350_v24  ;;  %6667 = vmatpush3.bf16.msra.mxu0 %v9380_v60  ;;  %v3822_v47 = vmul.f32 0.7788008, %v3821_v0  ;;  %v3825_v43 = vmul.f32 0.36787945, %v3824_v56 }
 0x415   : > { %3693 = vst [vmem:[#allocation5] sm:$0x3] %v3692_v8  ;;  %6668 = vmatprep.subr.bf16.mxu0 %v9384_v39  ;;  %v4876_v38 = vcombine.high %v9749_v21, %v9749_v21  ;;  %v4738_v24 = vpack.c.bf16 %v9692_v23, %v9692_v23 }
 0x416   : > { %5351 = vst [vmem:[%s7434_s10 + $0x15] sm:$0x1] %v3696_v27  ;;  %6689 = vmatpush3.bf16.msra.mxu1 %v9390_v15  ;;  %v4882_v27 = vpack.c.bf16 %v4875_v32, %v4875_v32 }
 0x417   : > { %6690 = vmatprep.subr.bf16.mxu1 %v9393_v2  ;;  %v4884_v44 = vpack.c.bf16 %v4876_v38, %v4876_v38  ;;  %v7058_v38 = vld [vmem:[#allocation12 + $0xc0] sm:$0xff]  }
 0x418   : > { %6669 = vmatpush3.bf16.msra.mxu0 %v9396_v54 }
 0x419   : > { %6670 = vmatprep.subr.bf16.mxu0 %v9401_v26 }
 0x41a   : > { %6691 = vmatpush3.bf16.msra.mxu1 %v9404_v29 }
 0x41b   : > { %6692 = vmatprep.subr.bf16.mxu1 %v9407_v13 }
 0x41c   : > { %6671 = vmatpush3.bf16.msra.mxu0 %v9410_v50 }
 0x41d   : > { %6672 = vmatprep.subr.bf16.mxu0 %v9489_v30 }
 0x41e   : > { %6693 = vmatpush3.bf16.msra.mxu1 %v9415_v5 }
 0x41f   : > { %6694 = vmatprep.subr.bf16.mxu1 %v9493_v41 }
 0x420   : > { %6673 = vmatpush3.bf16.msra.mxu0 %v9500_v37 }
 0x421   : > { %6674 = vmatprep.subr.bf16.mxu0 %v9504_v51 }
 0x422   : > { %6695 = vmatpush3.bf16.msra.mxu1 %v9507_v20  ;;  %v6372_v62 = vpop.f32.mrb[88].mxu0 }
 0x423   : > { %v6373_v52 = vpop.f32.mrb[89].mxu0  ;;  %6696 = vmatprep.subr.bf16.mxu1 %v9510_v4 }
 0x424   : > { %v6394_v18 = vpop.f32.mrb[88].mxu1  ;;  %v6374_v45 = vadd.f32 %v6373_v52, %v6372_v62  ;;  %v6375_v59 = vpop.f32.mrb[90].mxu0  ;;  %6675 = vmatpush3.bf16.msra.mxu0 %v9515_v22  ;;  %v3831_v52 = vld [vmem:[#allocation5] sm:$0x3] }
 0x425   : > { %v6395_v14 = vpop.f32.mrb[89].mxu1  ;;  %v6376_v36 = vpop.f32.mrb[91].mxu0  ;;  %6676 = vmatprep.subr.bf16.mxu0 %v9523_v12 }
 0x426   : > { %v6396_v19 = vadd.f32 %v6395_v14, %v6394_v18  ;;  %v6397_v3 = vpop.f32.mrb[90].mxu1  ;;  %6697 = vmatpush3.bf16.msra.mxu1 %v9526_v25 }
 0x427   : > { %v6398_v16 = vpop.f32.mrb[91].mxu1  ;;  %6698 = vmatprep.subr.bf16.mxu1 %v9532_v46  ;;  %v4881_v3 = vpack.c.bf16 %v9744_v42, %v9744_v42 }
 0x428   : > { %v3816_v17 = vadd.f32 %v6396_v19, %v6374_v45  ;;  %6677 = vmatpush3.bf16.msra.mxu0 %v9535_v31 }
 0x429   : > { %6678 = vmatprep.subr.bf16.mxu0 %v9540_v11 }
 0x42a   : > { %v3823_v28 = vadd.f32 %v3822_v47, %v3816_v17  ;;  %v3826_v34 = vadd.f32 %v3825_v43, %v3816_v17  ;;  %6699 = vmatpush3.bf16.msra.mxu1 %v9546_v55  ;;  %v4883_v47 = vpack.c.bf16 %v9749_v21, %v9749_v21  ;;  %v7057_v43 = vld [vmem:[#allocation12 + $0x40] sm:$0xff]  }
 0x42b   : > { %6700 = vmatprep.subr.bf16.mxu1 %v9552_v35 }
 0x42c   : > { %v3829_v8 = vsub.f32 %v3823_v28, %v3826_v34  ;;  %3827 = vst [vmem:[#allocation3] sm:$0x3] %v3823_v28  ;;  %3828 = vst [vmem:[#allocation4] sm:$0x3] %v3826_v34  ;;  %6679 = vmatpush3.bf16.msra.mxu0 %v9557_v61 }
 0x42d   : > { %6708 = vmatprep.subr.bf16.mxu0 %v9357_v1 }
 0x42e   : > { %v3830_v62 = vadd.f32 %v9461_v57, %v3829_v8  ;;  %6701 = vmatpush3.bf16.msra.mxu1 %v9566_v58  ;;  %v7060_v8 = vld [vmem:[#allocation12 + $0x48] sm:$0xff]  }
 0x42f   : > { %4775 = vmatmul.mubr.bf16.vlgmr.msra.gmra.mrb[116].mxu0 %v4738_v24  ;;  %6730 = vmatprep.subr.bf16.mxu1 %v9362_v10  ;;  %v5379_v10 = vsel %vm4996_vm4, 1.0, %v7254_v63  ;;  %v7059_v24 = vld [vmem:[#allocation12] sm:$0xff]  }
 0x430   : > { %v3832_v23 = vadd.f32 %v3831_v52, %v3830_v62  ;;  %6709 = vmatpush3.bf16.msra.mxu0 %v9365_v40  ;;  %4917 = vmatprep.mubr.bf16.mxu0 %v4882_v27  ;;  %v7061_v27 = vld [vmem:[#allocation12 + $0x80] sm:$0xff]   ;;  %v7062_v62 = vld [vmem:[#allocation12 + $0xc8] sm:$0xff]  }
 0x431   : > { %4815 = vmatmul.mubr.bf16.vlgmr.msra.gmra.mrb[116].mxu1 %v4740_v9  ;;  %6710 = vmatprep.subr.bf16.mxu0 %v9369_v48  ;;  %v5003_v48 = vcombine.high %v5379_v10, %v5379_v10 }
 0x432   : > { %vm3833_vm6 = vcmp.gt.f32.partialorder %v3832_v23, 1.0  ;;  %v3834_v7 = vmul.f32 0.7788008, %v3832_v23  ;;  %6731 = vmatpush3.bf16.msra.mxu1 %v9373_v33  ;;  %4957 = vmatprep.mubr.bf16.mxu1 %v4884_v44  ;;  %v7063_v23 = vld [vmem:[#allocation12 + $0x8] sm:$0xff]  }
 0x433   : > { %v5353_v1 = vsel %vm3833_vm6, 1.0, %v7254_v63  ;;  %6732 = vmatprep.subr.bf16.mxu1 %v9377_v6 }
 0x434   : > { %v3835_v18 = vsel %vm3833_vm6, 0.0, %v3834_v7  ;;  %v3839_v45 = vpack.c.bf16 %v5353_v1, %v5353_v1  ;;  %6711 = vmatpush3.bf16.msra.mxu0 %v9380_v60  ;;  %v7064_v7 = vld [vmem:[#allocation12 + $0x50] sm:$0xff]   ;;  %v7065_v1 = vld [vmem:[#allocation12 + $0x88] sm:$0xff]  }
 0x435   : > { %3836 = vst [vmem:[#allocation5] sm:$0x3] %v3835_v18  ;;  %6712 = vmatprep.subr.bf16.mxu0 %v9384_v39  ;;  %v7066_v18 = vld [vmem:[#allocation12 + $0xd0] sm:$0xff]  }
 0x436   : > { %5354 = vst [vmem:[%s7434_s10 + $0x16] sm:$0x1] %v3839_v45  ;;  %6733 = vmatpush3.bf16.msra.mxu1 %v9390_v15  ;;  %v9796_v15 = vrot.slane %v5379_v10, %v7535_v49  ;;  %v7067_v45 = vld [vmem:[#allocation12 + $0x10] sm:$0xff]   ;;  %v7068_v10 = vld [vmem:[#allocation12 + $0x58] sm:$0xff]  }
 0x437   : > { %6734 = vmatprep.subr.bf16.mxu1 %v9393_v2 }
 0x438   : > { %6713 = vmatpush3.bf16.msra.mxu0 %v9396_v54  ;;  %v3964_v54 = vld [vmem:[#allocation3] sm:$0x3]  ;;  %v5018_v56 = vcombine.high %v9796_v15, %v9796_v15 }
 0x439   : > { %6714 = vmatprep.subr.bf16.mxu0 %v9401_v26  ;;  %v3967_v26 = vld [vmem:[#allocation4] sm:$0x3]  ;;  %v3965_v14 = vmul.f32 0.7788008, %v3964_v54 }
 0x43a   : > { %6735 = vmatpush3.bf16.msra.mxu1 %v9404_v29  ;;  %v3968_v0 = vmul.f32 0.36787945, %v3967_v26  ;;  %v5025_v17 = vpack.c.bf16 %v5018_v56, %v5018_v56 }
 0x43b   : > { %6736 = vmatprep.subr.bf16.mxu1 %v9407_v13 }
 0x43c   : > { %6715 = vmatpush3.bf16.msra.mxu0 %v9410_v50  ;;  %v3974_v34 = vld [vmem:[#allocation5] sm:$0x3] }
 0x43d   : > { %6716 = vmatprep.subr.bf16.mxu0 %v9489_v30 }
 0x43e   : > { %6737 = vmatpush3.bf16.msra.mxu1 %v9415_v5  ;;  %v9801_v5 = vrot.slane %v5003_v48, %v7535_v49  ;;  %v7070_v48 = vld [vmem:[#allocation12 + $0xd8] sm:$0xff]  }
 0x43f   : > { %6738 = vmatprep.subr.bf16.mxu1 %v9493_v41 }
 0x440   : > { %6717 = vmatpush3.bf16.msra.mxu0 %v9500_v37  ;;  %v5019_v49 = vcombine.high %v9801_v5, %v9801_v5 }
 0x441   : > { %6718 = vmatprep.subr.bf16.mxu0 %v9504_v51 }
 0x442   : > { %6739 = vmatpush3.bf16.msra.mxu1 %v9507_v20  ;;  %v6416_v40 = vpop.f32.mrb[92].mxu0  ;;  %v5027_v28 = vpack.c.bf16 %v5019_v49, %v5019_v49 }
 0x443   : > { %v6417_v33 = vpop.f32.mrb[93].mxu0  ;;  %6740 = vmatprep.subr.bf16.mxu1 %v9510_v4 }
 0x444   : > { %v6438_v6 = vpop.f32.mrb[92].mxu1  ;;  %v6418_v60 = vadd.f32 %v6417_v33, %v6416_v40  ;;  %v6419_v39 = vpop.f32.mrb[94].mxu0  ;;  %6719 = vmatpush3.bf16.msra.mxu0 %v9515_v22  ;;  %v7069_v40 = vld [vmem:[#allocation12 + $0x90] sm:$0xff]   ;;  %v7071_v33 = vld [vmem:[#allocation12 + $0x18] sm:$0xff]  }
 0x445   : > { %v6439_v2 = vpop.f32.mrb[93].mxu1  ;;  %v6420_v29 = vpop.f32.mrb[95].mxu0  ;;  %6720 = vmatprep.subr.bf16.mxu0 %v9523_v12 }
 0x446   : > { %v6440_v13 = vadd.f32 %v6439_v2, %v6438_v6  ;;  %v6441_v50 = vpop.f32.mrb[94].mxu1  ;;  %6741 = vmatpush3.bf16.msra.mxu1 %v9526_v25  ;;  %v7072_v6 = vld [vmem:[#allocation12 + $0x98] sm:$0xff]  }
 0x447   : > { %v6442_v53 = vpop.f32.mrb[95].mxu1  ;;  %6742 = vmatprep.subr.bf16.mxu1 %v9532_v46 }
 0x448   : > { %v3959_v59 = vadd.f32 %v6440_v13, %v6418_v60  ;;  %6721 = vmatpush3.bf16.msra.mxu0 %v9535_v31 }
 0x449   : > { %6722 = vmatprep.subr.bf16.mxu0 %v9540_v11 }
 0x44a   : > { %v3966_v36 = vadd.f32 %v3965_v14, %v3959_v59  ;;  %v3969_v19 = vadd.f32 %v3968_v0, %v3959_v59  ;;  %6743 = vmatpush3.bf16.msra.mxu1 %v9546_v55 }
 0x44b   : > { %6744 = vmatprep.subr.bf16.mxu1 %v9552_v35 }
 0x44c   : > { %v3972_v16 = vsub.f32 %v3966_v36, %v3969_v19  ;;  %3970 = vst [vmem:[#allocation3] sm:$0x3] %v3966_v36  ;;  %3971 = vst [vmem:[#allocation4] sm:$0x3] %v3969_v19  ;;  %6723 = vmatpush3.bf16.msra.mxu0 %v9557_v61 }
 0x44d   : > { %6752 = vmatprep.subr.bf16.mxu0 %v7057_v43 }
 0x44e   : > { %v3973_v32 = vadd.f32 %v9461_v57, %v3972_v16  ;;  %6745 = vmatpush3.bf16.msra.mxu1 %v9566_v58 }
 0x44f   : > { %4918 = vmatmul.mubr.bf16.vlgmr.msra.gmra.mrb[120].mxu0 %v4881_v3  ;;  %6774 = vmatprep.subr.bf16.mxu1 %v7058_v38 }
 0x450   : > { %v3975_v42 = vadd.f32 %v3974_v34, %v3973_v32  ;;  %6753 = vmatpush3.bf16.msra.mxu0 %v7059_v24  ;;  %5060 = vmatprep.mubr.bf16.mxu0 %v5025_v17  ;;  %v9847_v24 = vld [vmem:[%s9930_s3] ss:$0 sm:$0xff] }
 0x451   : > { %4958 = vmatmul.mubr.bf16.vlgmr.msra.gmra.mrb[120].mxu1 %v4883_v47  ;;  %6754 = vmatprep.subr.bf16.mxu0 %v7060_v8 }
 0x452   : > { %vm3976_vm7 = vcmp.gt.f32.partialorder %v3975_v42, 1.0  ;;  %v3977_v21 = vmul.f32 0.7788008, %v3975_v42  ;;  %6775 = vmatpush3.bf16.msra.mxu1 %v7061_v27  ;;  %5100 = vmatprep.mubr.bf16.mxu1 %v5027_v28 }
 0x453   : > { %v5356_v9 = vsel %vm3976_vm7, 1.0, %v7254_v63  ;;  %6776 = vmatprep.subr.bf16.mxu1 %v7062_v62  ;;  %v4107_v29 = vld [vmem:[#allocation3] sm:$0x3]  ;;  %v4110_v13 = vld [vmem:[#allocation4] sm:$0x3] }
 0x454   : > { %v3978_v44 = vsel %vm3976_vm7, 0.0, %v3977_v21  ;;  %v3982_v52 = vpack.c.bf16 %v5356_v9, %v5356_v9  ;;  %6755 = vmatpush3.bf16.msra.mxu0 %v7063_v23  ;;  %v4111_v53 = vmul.f32 0.36787945, %v4110_v13 }
 0x455   : > { %3979 = vst [vmem:[#allocation5] sm:$0x3] %v3978_v44  ;;  %6756 = vmatprep.subr.bf16.mxu0 %v7064_v7 }
 0x456   : > { %5357 = vst [vmem:[%s7434_s10 + $0x17] sm:$0x1] %v3982_v52  ;;  %6777 = vmatpush3.bf16.msra.mxu1 %v7065_v1 }
 0x457   : > { %6778 = vmatprep.subr.bf16.mxu1 %v7066_v18 }
 0x458   : > { %6757 = vmatpush3.bf16.msra.mxu0 %v7067_v45 }
 0x459   : > { %6758 = vmatprep.subr.bf16.mxu0 %v7068_v10 }
 0x45a   : > { %6779 = vmatpush3.bf16.msra.mxu1 %v7069_v40 }
 0x45b   : > { %6780 = vmatprep.subr.bf16.mxu1 %v7070_v48 }
 0x45c   : > { %6759 = vmatpush3.bf16.msra.mxu0 %v7071_v33 }
 0x45d   : > { %6760 = vmatprep.subr.bf16.mxu0 %v9489_v30 }
 0x45e   : > { %6781 = vmatpush3.bf16.msra.mxu1 %v7072_v6 }
 0x45f   : > { %6782 = vmatprep.subr.bf16.mxu1 %v9493_v41 }
 0x460   : > { %6761 = vmatpush3.bf16.msra.mxu0 %v9500_v37 }
 0x461   : > { %6762 = vmatprep.subr.bf16.mxu0 %v9504_v51 }
 0x462   : > { %6783 = vmatpush3.bf16.msra.mxu1 %v9507_v20  ;;  %v6460_v60 = vpop.f32.mrb[96].mxu0 }
 0x463   : > { %v6461_v39 = vpop.f32.mrb[97].mxu0  ;;  %6784 = vmatprep.subr.bf16.mxu1 %v9510_v4  ;;  %v4108_v4 = vmul.f32 0.7788008, %v4107_v29 }
 0x464   : > { %v6482_v2 = vpop.f32.mrb[96].mxu1  ;;  %v6462_v54 = vadd.f32 %v6461_v39, %v6460_v60  ;;  %v6463_v26 = vpop.f32.mrb[98].mxu0  ;;  %6763 = vmatpush3.bf16.msra.mxu0 %v9515_v22 }
 0x465   : > { %v6483_v30 = vpop.f32.mrb[97].mxu1  ;;  %v6464_v50 = vpop.f32.mrb[99].mxu0  ;;  %6764 = vmatprep.subr.bf16.mxu0 %v9523_v12  ;;  %v5024_v12 = vpack.c.bf16 %v9796_v15, %v9796_v15 }
 0x466   : > { %v6484_v41 = vadd.f32 %v6483_v30, %v6482_v2  ;;  %v6485_v37 = vpop.f32.mrb[98].mxu1  ;;  %6785 = vmatpush3.bf16.msra.mxu1 %v9526_v25 }
 0x467   : > { %v6486_v51 = vpop.f32.mrb[99].mxu1  ;;  %6786 = vmatprep.subr.bf16.mxu1 %v9532_v46  ;;  %v5026_v46 = vpack.c.bf16 %v9801_v5, %v9801_v5 }
 0x468   : > { %v4102_v20 = vadd.f32 %v6484_v41, %v6462_v54  ;;  %6765 = vmatpush3.bf16.msra.mxu0 %v9535_v31 }
 0x469   : > { %6766 = vmatprep.subr.bf16.mxu0 %v9540_v11  ;;  %v4117_v11 = vld [vmem:[#allocation5] sm:$0x3] }
 0x46a   : > { %v4109_v22 = vadd.f32 %v4108_v4, %v4102_v20  ;;  %v4112_v59 = vadd.f32 %v4111_v53, %v4102_v20  ;;  %6787 = vmatpush3.bf16.msra.mxu1 %v9546_v55 }
 0x46b   : > { %6788 = vmatprep.subr.bf16.mxu1 %v9552_v35 }
 0x46c   : > { %v4115_v25 = vsub.f32 %v4109_v22, %v4112_v59  ;;  %4113 = vst [vmem:[#allocation3] sm:$0x3] %v4109_v22  ;;  %4114 = vst [vmem:[#allocation4] sm:$0x3] %v4112_v59  ;;  %6767 = vmatpush3.bf16.msra.mxu0 %v9557_v61 }
 0x46e   : > { %v4116_v31 = vadd.f32 %v9461_v57, %v4115_v25  ;;  %6789 = vmatpush3.bf16.msra.mxu1 %v9566_v58 }
 0x46f   : > { %5061 = vmatmul.mubr.bf16.vlgmr.msra.gmra.mrb[124].mxu0 %v5024_v12 }
 0x470   : > { %v4118_v55 = vadd.f32 %v4117_v11, %v4116_v31 }
 0x471   : > { %5101 = vmatmul.mubr.bf16.vlgmr.msra.gmra.mrb[124].mxu1 %v5026_v46 }
 0x472   : > { %vm4119_vm8 = vcmp.gt.f32.partialorder %v4118_v55, 1.0  ;;  %v4120_v35 = vmul.f32 0.7788008, %v4118_v55 }
 0x473   : > { %v5359_v15 = vsel %vm4119_vm8, 1.0, %v7254_v63  ;;  %v4250_v49 = vld [vmem:[#allocation3] sm:$0x3]  ;;  %v4253_v58 = vld [vmem:[#allocation4] sm:$0x3] }
 0x474   : > { %v4121_v14 = vsel %vm4119_vm8, 0.0, %v4120_v35  ;;  %v4125_v0 = vpack.c.bf16 %v5359_v15, %v5359_v15  ;;  %v4251_v32 = vmul.f32 0.7788008, %v4250_v49  ;;  %v4254_v28 = vmul.f32 0.36787945, %v4253_v58 }
 0x475   : > { %4122 = vst [vmem:[#allocation5] sm:$0x3] %v4121_v14 }
 0x476   : > { %5360 = vst [vmem:[%s7434_s10 + $0x18] sm:$0x1] %v4125_v0 }
 0x47c   : > { %v4260_v21 = vld [vmem:[#allocation5] sm:$0x3] }
 0x482   : > { %v6504_v61 = vpop.f32.mrb[100].mxu0 }
 0x483   : > { %v6505_v56 = vpop.f32.mrb[101].mxu0 }
 0x484   : > { %v6526_v36 = vpop.f32.mrb[100].mxu1  ;;  %v6506_v5 = vadd.f32 %v6505_v56, %v6504_v61  ;;  %v6507_v19 = vpop.f32.mrb[102].mxu0 }
 0x485   : > { %v6527_v57 = vpop.f32.mrb[101].mxu1  ;;  %v6508_v3 = vpop.f32.mrb[103].mxu0 }
 0x486   : > { %v6528_v16 = vadd.f32 %v6527_v57, %v6526_v36  ;;  %v6529_v17 = vpop.f32.mrb[102].mxu1 }
 0x487   : > { %v6530_v47 = vpop.f32.mrb[103].mxu1 }
 0x488   : > { %v4245_v43 = vadd.f32 %v6528_v16, %v6506_v5 }
 0x48a   : > { %v4252_v34 = vadd.f32 %v4251_v32, %v4245_v43  ;;  %v4255_v38 = vadd.f32 %v4254_v28, %v4245_v43 }
 0x48c   : > { %v4258_v42 = vsub.f32 %v4252_v34, %v4255_v38  ;;  %4256 = vst [vmem:[#allocation3] sm:$0x3] %v4252_v34  ;;  %4257 = vst [vmem:[#allocation4] sm:$0x3] %v4255_v38 }
 0x48e   : > { %v4259_v8 = vadd.f32 %v9847_v24, %v4258_v42 }
 0x490   : > { %v4261_v27 = vadd.f32 %v4260_v21, %v4259_v8 }
 0x492   : > { %vm4262_vm9 = vcmp.gt.f32.partialorder %v4261_v27, 1.0  ;;  %v4263_v9 = vmul.f32 0.7788008, %v4261_v27 }
 0x493   : > { %v5362_v62 = vsel %vm4262_vm9, 1.0, %v7254_v63  ;;  %v4393_v40 = vld [vmem:[#allocation3] sm:$0x3]  ;;  %v4396_v48 = vld [vmem:[#allocation4] sm:$0x3] }
 0x494   : > { %v4264_v44 = vsel %vm4262_vm9, 0.0, %v4263_v9  ;;  %v4268_v52 = vpack.c.bf16 %v5362_v62, %v5362_v62  ;;  %v4394_v54 = vmul.f32 0.7788008, %v4393_v40  ;;  %v4397_v26 = vmul.f32 0.36787945, %v4396_v48 }
 0x495   : > { %4265 = vst [vmem:[#allocation5] sm:$0x3] %v4264_v44 }
 0x496   : > { %5363 = vst [vmem:[%s7434_s10 + $0x19] sm:$0x1] %v4268_v52 }
 0x49c   : > { %v4403_v41 = vld [vmem:[#allocation5] sm:$0x3] }
 0x4a2   : > { %v6548_v23 = vpop.f32.mrb[104].mxu0 }
 0x4a3   : > { %v6549_v7 = vpop.f32.mrb[105].mxu0 }
 0x4a4   : > { %v6570_v1 = vpop.f32.mrb[104].mxu1  ;;  %v6550_v18 = vadd.f32 %v6549_v7, %v6548_v23  ;;  %v6551_v45 = vpop.f32.mrb[106].mxu0 }
 0x4a5   : > { %v6571_v10 = vpop.f32.mrb[105].mxu1  ;;  %v6552_v33 = vpop.f32.mrb[107].mxu0 }
 0x4a6   : > { %v6572_v6 = vadd.f32 %v6571_v10, %v6570_v1  ;;  %v6573_v60 = vpop.f32.mrb[106].mxu1 }
 0x4a7   : > { %v6574_v39 = vpop.f32.mrb[107].mxu1 }
 0x4a8   : > { %v4388_v2 = vadd.f32 %v6572_v6, %v6550_v18 }
 0x4aa   : > { %v4395_v30 = vadd.f32 %v4394_v54, %v4388_v2  ;;  %v4398_v29 = vadd.f32 %v4397_v26, %v4388_v2 }
 0x4ac   : > { %v4401_v13 = vsub.f32 %v4395_v30, %v4398_v29  ;;  %4399 = vst [vmem:[#allocation3] sm:$0x3] %v4395_v30  ;;  %4400 = vst [vmem:[#allocation4] sm:$0x3] %v4398_v29 }
 0x4ae   : > { %v4402_v50 = vadd.f32 %v9847_v24, %v4401_v13 }
 0x4b0   : > { %v4404_v37 = vadd.f32 %v4403_v41, %v4402_v50 }
 0x4b2   : > { %vm4405_vm10 = vcmp.gt.f32.partialorder %v4404_v37, 1.0  ;;  %v4406_v51 = vmul.f32 0.7788008, %v4404_v37 }
 0x4b3   : > { %v5365_v20 = vsel %vm4405_vm10, 1.0, %v7254_v63  ;;  %v4536_v11 = vld [vmem:[#allocation3] sm:$0x3]  ;;  %v4539_v55 = vld [vmem:[#allocation4] sm:$0x3] }
 0x4b4   : > { %v4407_v4 = vsel %vm4405_vm10, 0.0, %v4406_v51  ;;  %v4411_v53 = vpack.c.bf16 %v5365_v20, %v5365_v20  ;;  %v4537_v56 = vmul.f32 0.7788008, %v4536_v11  ;;  %v4540_v36 = vmul.f32 0.36787945, %v4539_v55 }
 0x4b5   : > { %4408 = vst [vmem:[#allocation5] sm:$0x3] %v4407_v4 }
 0x4b6   : > { %5366 = vst [vmem:[%s7434_s10 + $0x1a] sm:$0x1] %v4411_v53 }
 0x4bc   : > { %v4546_v58 = vld [vmem:[#allocation5] sm:$0x3] }
 0x4c2   : > { %v6592_v22 = vpop.f32.mrb[108].mxu0 }
 0x4c3   : > { %v6593_v59 = vpop.f32.mrb[109].mxu0 }
 0x4c4   : > { %v6614_v12 = vpop.f32.mrb[108].mxu1  ;;  %v6594_v25 = vadd.f32 %v6593_v59, %v6592_v22  ;;  %v6595_v46 = vpop.f32.mrb[110].mxu0 }
 0x4c5   : > { %v6615_v31 = vpop.f32.mrb[109].mxu1  ;;  %v6596_v35 = vpop.f32.mrb[111].mxu0 }
 0x4c6   : > { %v6616_v15 = vadd.f32 %v6615_v31, %v6614_v12  ;;  %v6617_v14 = vpop.f32.mrb[110].mxu1 }
 0x4c7   : > { %v6618_v0 = vpop.f32.mrb[111].mxu1 }
 0x4c8   : > { %v4531_v61 = vadd.f32 %v6616_v15, %v6594_v25 }
 0x4ca   : > { %v4538_v5 = vadd.f32 %v4537_v56, %v4531_v61  ;;  %v4541_v19 = vadd.f32 %v4540_v36, %v4531_v61 }
 0x4cc   : > { %v4544_v57 = vsub.f32 %v4538_v5, %v4541_v19  ;;  %4542 = vst [vmem:[#allocation3] sm:$0x3] %v4538_v5  ;;  %4543 = vst [vmem:[#allocation4] sm:$0x3] %v4541_v19 }
 0x4ce   : > { %v4545_v49 = vadd.f32 %v9847_v24, %v4544_v57 }
 0x4d0   : > { %v4547_v3 = vadd.f32 %v4546_v58, %v4545_v49 }
 0x4d2   : > { %vm4548_vm11 = vcmp.gt.f32.partialorder %v4547_v3, 1.0  ;;  %v4549_v16 = vmul.f32 0.7788008, %v4547_v3 }
 0x4d3   : > { %v5368_v17 = vsel %vm4548_vm11, 1.0, %v7254_v63  ;;  %v4679_v21 = vld [vmem:[#allocation3] sm:$0x3]  ;;  %v4682_v27 = vld [vmem:[#allocation4] sm:$0x3] }
 0x4d4   : > { %v4550_v47 = vsel %vm4548_vm11, 0.0, %v4549_v16  ;;  %v4554_v43 = vpack.c.bf16 %v5368_v17, %v5368_v17  ;;  %v4680_v7 = vmul.f32 0.7788008, %v4679_v21  ;;  %v4683_v1 = vmul.f32 0.36787945, %v4682_v27 }
 0x4d5   : > { %4551 = vst [vmem:[#allocation5] sm:$0x3] %v4550_v47 }
 0x4d6   : > { %5369 = vst [vmem:[%s7434_s10 + $0x1b] sm:$0x1] %v4554_v43 }
 0x4dc   : > { %v4689_v48 = vld [vmem:[#allocation5] sm:$0x3] }
 0x4e2   : > { %v6636_v32 = vpop.f32.mrb[112].mxu0 }
 0x4e3   : > { %v6637_v28 = vpop.f32.mrb[113].mxu0 }
 0x4e4   : > { %v6658_v34 = vpop.f32.mrb[112].mxu1  ;;  %v6638_v38 = vadd.f32 %v6637_v28, %v6636_v32  ;;  %v6639_v42 = vpop.f32.mrb[114].mxu0 }
 0x4e5   : > { %v6659_v8 = vpop.f32.mrb[113].mxu1  ;;  %v6640_v9 = vpop.f32.mrb[115].mxu0 }
 0x4e6   : > { %v6660_v62 = vadd.f32 %v6659_v8, %v6658_v34  ;;  %v6661_v44 = vpop.f32.mrb[114].mxu1 }
 0x4e7   : > { %v6662_v52 = vpop.f32.mrb[115].mxu1 }
 0x4e8   : > { %v4674_v23 = vadd.f32 %v6660_v62, %v6638_v38 }
 0x4ea   : > { %v4681_v18 = vadd.f32 %v4680_v7, %v4674_v23  ;;  %v4684_v45 = vadd.f32 %v4683_v1, %v4674_v23 }
 0x4ec   : > { %v4687_v10 = vsub.f32 %v4681_v18, %v4684_v45  ;;  %4685 = vst [vmem:[#allocation3] sm:$0x3] %v4681_v18  ;;  %4686 = vst [vmem:[#allocation4] sm:$0x3] %v4684_v45 }
 0x4ee   : > { %v4688_v40 = vadd.f32 %v9847_v24, %v4687_v10 }
 0x4f0   : > { %v4690_v33 = vadd.f32 %v4689_v48, %v4688_v40 }
 0x4f2   : > { %vm4691_vm12 = vcmp.gt.f32.partialorder %v4690_v33, 1.0  ;;  %v4692_v6 = vmul.f32 0.7788008, %v4690_v33 }
 0x4f3   : > { %v5371_v60 = vsel %vm4691_vm12, 1.0, %v7254_v63  ;;  %v4822_v41 = vld [vmem:[#allocation3] sm:$0x3]  ;;  %v4825_v37 = vld [vmem:[#allocation4] sm:$0x3] }
 0x4f4   : > { %v4693_v39 = vsel %vm4691_vm12, 0.0, %v4692_v6  ;;  %v4697_v2 = vpack.c.bf16 %v5371_v60, %v5371_v60  ;;  %v4823_v59 = vmul.f32 0.7788008, %v4822_v41  ;;  %v4826_v12 = vmul.f32 0.36787945, %v4825_v37 }
 0x4f5   : > { %4694 = vst [vmem:[#allocation5] sm:$0x3] %v4693_v39 }
 0x4f6   : > { %5372 = vst [vmem:[%s7434_s10 + $0x1c] sm:$0x1] %v4697_v2 }
 0x4fc   : > { %v4832_v55 = vld [vmem:[#allocation5] sm:$0x3] }
 0x502   : > { %v6680_v54 = vpop.f32.mrb[116].mxu0 }
 0x503   : > { %v6681_v26 = vpop.f32.mrb[117].mxu0 }
 0x504   : > { %v6702_v30 = vpop.f32.mrb[116].mxu1  ;;  %v6682_v29 = vadd.f32 %v6681_v26, %v6680_v54  ;;  %v6683_v13 = vpop.f32.mrb[118].mxu0 }
 0x505   : > { %v6703_v50 = vpop.f32.mrb[117].mxu1  ;;  %v6684_v51 = vpop.f32.mrb[119].mxu0 }
 0x506   : > { %v6704_v20 = vadd.f32 %v6703_v50, %v6702_v30  ;;  %v6705_v4 = vpop.f32.mrb[118].mxu1 }
 0x507   : > { %v6706_v53 = vpop.f32.mrb[119].mxu1 }
 0x508   : > { %v4817_v22 = vadd.f32 %v6704_v20, %v6682_v29 }
 0x50a   : > { %v4824_v25 = vadd.f32 %v4823_v59, %v4817_v22  ;;  %v4827_v46 = vadd.f32 %v4826_v12, %v4817_v22 }
 0x50c   : > { %v4830_v31 = vsub.f32 %v4824_v25, %v4827_v46  ;;  %4828 = vst [vmem:[#allocation3] sm:$0x3] %v4824_v25  ;;  %4829 = vst [vmem:[#allocation4] sm:$0x3] %v4827_v46 }
 0x50e   : > { %v4831_v11 = vadd.f32 %v9847_v24, %v4830_v31 }
 0x510   : > { %v4833_v35 = vadd.f32 %v4832_v55, %v4831_v11 }
 0x512   : > { %vm4834_vm13 = vcmp.gt.f32.partialorder %v4833_v35, 1.0  ;;  %v4835_v15 = vmul.f32 0.7788008, %v4833_v35 }
 0x513   : > { %v5374_v14 = vsel %vm4834_vm13, 1.0, %v7254_v63  ;;  %v4965_v58 = vld [vmem:[#allocation3] sm:$0x3]  ;;  %v4968_v3 = vld [vmem:[#allocation4] sm:$0x3] }
 0x514   : > { %v4836_v0 = vsel %vm4834_vm13, 0.0, %v4835_v15  ;;  %v4840_v61 = vpack.c.bf16 %v5374_v14, %v5374_v14  ;;  %v4966_v28 = vmul.f32 0.7788008, %v4965_v58  ;;  %v4969_v34 = vmul.f32 0.36787945, %v4968_v3 }
 0x515   : > { %4837 = vst [vmem:[#allocation5] sm:$0x3] %v4836_v0 }
 0x516   : > { %5375 = vst [vmem:[%s7434_s10 + $0x1d] sm:$0x1] %v4840_v61 }
 0x51c   : > { %v4975_v27 = vld [vmem:[#allocation5] sm:$0x3] }
 0x522   : > { %v6724_v56 = vpop.f32.mrb[120].mxu0 }
 0x523   : > { %v6725_v36 = vpop.f32.mrb[121].mxu0 }
 0x524   : > { %v6746_v5 = vpop.f32.mrb[120].mxu1  ;;  %v6726_v19 = vadd.f32 %v6725_v36, %v6724_v56  ;;  %v6727_v57 = vpop.f32.mrb[122].mxu0 }
 0x525   : > { %v6747_v49 = vpop.f32.mrb[121].mxu1  ;;  %v6728_v16 = vpop.f32.mrb[123].mxu0 }
 0x526   : > { %v6748_v17 = vadd.f32 %v6747_v49, %v6746_v5  ;;  %v6749_v47 = vpop.f32.mrb[122].mxu1 }
 0x527   : > { %v6750_v43 = vpop.f32.mrb[123].mxu1 }
 0x528   : > { %v4960_v32 = vadd.f32 %v6748_v17, %v6726_v19 }
 0x52a   : > { %v4967_v38 = vadd.f32 %v4966_v28, %v4960_v32  ;;  %v4970_v42 = vadd.f32 %v4969_v34, %v4960_v32 }
 0x52c   : > { %v4973_v8 = vsub.f32 %v4967_v38, %v4970_v42  ;;  %4971 = vst [vmem:[#allocation3] sm:$0x3] %v4967_v38  ;;  %4972 = vst [vmem:[#allocation4] sm:$0x3] %v4970_v42 }
 0x52e   : > { %v4974_v21 = vadd.f32 %v9847_v24, %v4973_v8 }
 0x530   : > { %v4976_v9 = vadd.f32 %v4975_v27, %v4974_v21 }
 0x532   : > { %vm4977_vm14 = vcmp.gt.f32.partialorder %v4976_v9, 1.0  ;;  %v4978_v62 = vmul.f32 0.7788008, %v4976_v9 }
 0x533   : > { %v5377_v44 = vsel %vm4977_vm14, 1.0, %v7254_v63  ;;  %v5108_v48 = vld [vmem:[#allocation3] sm:$0x3]  ;;  %v5111_v33 = vld [vmem:[#allocation4] sm:$0x3] }
 0x534   : > { %v4979_v52 = vsel %vm4977_vm14, 0.0, %v4978_v62  ;;  %v4983_v23 = vpack.c.bf16 %v5377_v44, %v5377_v44  ;;  %v5109_v26 = vmul.f32 0.7788008, %v5108_v48  ;;  %v5112_v30 = vmul.f32 0.36787945, %v5111_v33 }
 0x535   : > { %4980 = vst [vmem:[#allocation5] sm:$0x3] %v4979_v52 }
 0x536   : > { %5378 = vst [vmem:[%s7434_s10 + $0x1e] sm:$0x1] %v4983_v23 }
 0x53c   : > { %v5118_v37 = vld [vmem:[#allocation5] sm:$0x3] }
 0x542   : > { %v6768_v7 = vpop.f32.mrb[124].mxu0 }
 0x543   : > { %v6769_v1 = vpop.f32.mrb[125].mxu0 }
 0x544   : > { %v6790_v18 = vpop.f32.mrb[124].mxu1  ;;  %v6770_v45 = vadd.f32 %v6769_v1, %v6768_v7  ;;  %v6771_v10 = vpop.f32.mrb[126].mxu0 }
 0x545   : > { %v6791_v40 = vpop.f32.mrb[125].mxu1  ;;  %v6772_v6 = vpop.f32.mrb[127].mxu0 }
 0x546   : > { %v6792_v60 = vadd.f32 %v6791_v40, %v6790_v18  ;;  %v6793_v39 = vpop.f32.mrb[126].mxu1 }
 0x547   : > { %v6794_v2 = vpop.f32.mrb[127].mxu1 }
 0x548   : > { %v5103_v54 = vadd.f32 %v6792_v60, %v6770_v45 }
 0x54a   : > { %v5110_v29 = vadd.f32 %v5109_v26, %v5103_v54  ;;  %v5113_v13 = vadd.f32 %v5112_v30, %v5103_v54 }
 0x54c   : > { %5114 = vst [vmem:[#allocation3] sm:$0x3] %v5110_v29  ;;  %5115 = vst [vmem:[#allocation4] sm:$0x3] %v5113_v13  ;;  %v5116_v50 = vsub.f32 %v5110_v29, %v5113_v13 }
 0x54e   : > { %v5117_v41 = vadd.f32 %v9847_v24, %v5116_v50 }
 0x550   : > { %v5119_v51 = vadd.f32 %v5118_v37, %v5117_v41 }
 0x552   : > { %vm5120_vm15 = vcmp.gt.f32.partialorder %v5119_v51, 1.0  ;;  %v5121_v20 = vmul.f32 0.7788008, %v5119_v51 }
 0x553   : > { %v5380_v4 = vsel %vm5120_vm15, 1.0, %v7254_v63 }
 0x554   : > { %v5122_v24 = vsel %vm5120_vm15, 0.0, %v5121_v20  ;;  %v5126_v53 = vpack.c.bf16 %v5380_v4, %v5380_v4 }
 0x555   : > { %5123 = vst [vmem:[#allocation5] sm:$0x3] %v5122_v24 }
 0x556   : > { %5381 = vst [vmem:[%s7434_s10 + $0x1f] sm:$0x1] %v5126_v53 }
 0x557   : > { %7171 = shalt.err (!%p7168_p6)
}
 0x558   : > { %s7172_s7 = scalar_lea.hbm %s9874_s26, 512  ;;  %s7176_s30 = scalar_lea.hbm %s9931_s4, 1024 }
 0x559   : > { %p7173_p7 = scmp.ne.s32.totalorder %s9874_s26, %s7172_s7  ;;  %p7177_p0 = scmp.lt.u32.totalorder %s9874_s26, %s9931_s4 }
 0x55a   : > { %p7178_p2 = scmp.lt.u32.totalorder %s7176_s30, %s7172_s7  ;;  %p7180_p1 = scmp.lt.u32.totalorder %s7172_s7, %s9874_s26 }
 0x55b   : > { %p7174_p9 = pnand %p7173_p7, %p9944_p4 }
 0x55c   : > { %p7179_p13 = por %p7178_p2, %p7177_p0 }
 0x55d   : > { %p7175_p12 = pneg %p7174_p9 }
 0x55e   : > { %p7181_p8 = por %p7180_p1, %p7179_p13 }
 0x560   : > { %p7182_p10 = pnand %p7181_p8, %p7175_p12 }
 0x562   : > { %7185 = shalt.err (!%p7182_p10)
}
 0x563   : > { %s7256_s14 = smov 16   ;;  %s7257_s22 = smov 1  }
 0x564   : > { %6808 = dma.vmem_to_hbm [thread:$0]  (%p9944_p4), %s9876_s24, 512, %s9874_s26, %s9881_s18, %s7256_s14, %s7256_s14, %s7257_s22  }
 0x565 PF: > { %p6830_p11 = scmp.ge.s32.totalorder %s7244_s20, 2  ;;  %s5163_s6 = sand.u32 1, %s7224_s15  }
 0x566   : > { %p9945_p3 = scmp.ne.s32.totalorder %s9937_s27, 0  ;;  %s5164_s9 = scalar_lea.sflag [#allocation9], %s5163_s6 }
 0x568   : > { %p6821_p5 = pnand %p6830_p11, %p9945_p3 }
 0x56a   : > { %7219 = dma.done.wait (!%p6821_p5), %s5164_s9, 512  }
 0x56b   : > { %7221 = vsyncadd (!%p6821_p5), %s5164_s9, 4294966784  ;;  %s19_s20 = sadd.s32 1, %s7244_s20   ;;  %s9946_s15 = smov %s7228_s16 }
 0x56c   : > { %p16_p6 = scmp.ge.s32.totalorder %s19_s20, 4   ;;  %s9947_s16 = smov %s7232_s17 }
 0x56d   : > { %s9948_s17 = smov %s7336_s28  ;;  %s9949_s18 = smov %s7240_s19 }
 0x56e   : > { %s9950_s19 = smov %s9952_s23  ;;  %18 = sbr.rel (!%p16_p6) target bundleno = 6 (0x6), region = 121 }
 0x575   :  { %5169 = vsyncpa [#allocation8], 1 }
 0x576   :  { %5171 = vsyncpa [#allocation8 + $0x1], 1 }
 0x577   :  { %5172 = vsyncpa [#allocation11], 1 }
 0x578   :  { %5173 = vsyncpa [#allocation9], 1 }
 0x579   :  { %5175 = vsyncpa [#allocation9 + $0x1], 1 }

</bundles_post_ra>
